<compile_context>
chip_gen: v7x
topology: tpu7x:2x2x1
jax: 0.10.0
libtpu: 0.0.40
codegen_flags: <defaults>
</compile_context>

<pallas_src>
import functools

import numpy as np
import jax
import jax.numpy as jnp
from jax.experimental import pallas as pl
from jax.experimental.pallas import tpu as pltpu

# ----------------------------- config (small) ------------------------------
HIDDEN = 64          # d_model
NHEAD = 4            # heads (head_dim = 16)
FFN = 128            # dim_feedforward
NUM_LAYERS = 2       # module default is 6; kept small for the demo
L_SENT = 8           # sentence/segment token length
L_VID = 16           # video token length
NUM_CLIPS = [3, 5]   # segments per video; total batch = sum = 8
LN_EPS = 1e-5        # torch.nn.LayerNorm default eps

# Packed per-layer bias/LN slab layout (rows of a (VEC_ROWS, VEC_W) array).
VEC_W = max(2 * HIDDEN, FFN)    # 128
VEC_ROWS = 16
(_R_BQ, _R_BKV, _R_B1, _R_BO, _R_B2,
 _R_LN1G, _R_LN1B, _R_LN2G, _R_LN2B) = range(9)
# Packed head slab layout (rows of an (8, HIDDEN) array).
(_H_LN1G, _H_LN1B, _H_B1, _H_LN2G, _H_LN2B, _H_B2, _H_MTOK) = range(7)


def _layer_norm(x, g, b, eps=LN_EPS):
    mu = jnp.mean(x, axis=-1, keepdims=True)
    var = jnp.mean(jnp.square(x - mu), axis=-1, keepdims=True)
    return (x - mu) * jax.lax.rsqrt(var + eps) * g + b


# --------------------------- fully fused kernel ----------------------------
def _fused_kernel(nhead, num_layers, B, Ls, Lv,
                  sent_ref, vid_ref, maskcol_ref, bias_ref, sel_ref,
                  wq_ref, wkv_ref, wo_ref, w1_ref, w2_ref, vecs_ref,
                  hw_ref, hvec_ref,
                  out_ref):
    D = sent_ref.shape[-1]
    ffn = w1_ref.shape[-1]
    hd = D // nhead
    scale = 1.0 / float(hd) ** 0.5

    hv = hvec_ref[...]                               # (8, D) packed head slab
    mtok = hv[_H_MTOK:_H_MTOK + 1, :]                # (1, D) masked_sent_token

    # _sequence_mask_sent: replace token local_idx[b] of each row with mtok.
    x = jnp.where(maskcol_ref[...] > 0.5, mtok, sent_ref[...])   # (B*Ls, D)
    vid = vid_ref[...]                                           # (B*Lv, D)
    bias = bias_ref[...][:, None, :]                             # (nhead*B,1,Lv)

    for l in range(num_layers):                      # unrolled (static)
        vl = vecs_ref[l]                             # (VEC_ROWS, VEC_W)
        bq = vl[_R_BQ:_R_BQ + 1, 0:D]
        bkv = vl[_R_BKV:_R_BKV + 1, 0:2 * D]
        b1 = vl[_R_B1:_R_B1 + 1, 0:ffn]
        bo = vl[_R_BO:_R_BO + 1, 0:D]
        b2 = vl[_R_B2:_R_B2 + 1, 0:D]
        ln1g = vl[_R_LN1G:_R_LN1G + 1, 0:D]
        ln1b = vl[_R_LN1B:_R_LN1B + 1, 0:D]
        ln2g = vl[_R_LN2G:_R_LN2G + 1, 0:D]
        ln2b = vl[_R_LN2B:_R_LN2B + 1, 0:D]

        # Whole-batch projections. K/V weights fused into one (D, 2D) matmul.
        q = jnp.dot(x, wq_ref[l], preferred_element_type=jnp.float32) + bq
        kv = jnp.dot(vid, wkv_ref[l], preferred_element_type=jnp.float32) + bkv
        k = kv[:, 0:D]
        v = kv[:, D:2 * D]

        # Head-major batched layout: (nhead*B, L, hd) with index h*B + b.
        qh = jnp.stack(
            [q[:, h * hd:(h + 1) * hd].reshape(B, Ls, hd) for h in range(nhead)],
            axis=0).reshape(nhead * B, Ls, hd)
        kh = jnp.stack(
            [k[:, h * hd:(h + 1) * hd].reshape(B, Lv, hd) for h in range(nhead)],
            axis=0).reshape(nhead * B, Lv, hd)
        vh = jnp.stack(
            [v[:, h * hd:(h + 1) * hd].reshape(B, Lv, hd) for h in range(nhead)],
            axis=0).reshape(nhead * B, Lv, hd)

        # One batched score matmul + ONE softmax over all (b, h).
        s = jnp.einsum('bqd,bkd->bqk', qh, kh,
                       preferred_element_type=jnp.float32) * scale + bias
        s = s - jnp.max(s, axis=-1, keepdims=True)
        p = jnp.exp(s)
        p = p * pl.reciprocal(jnp.sum(p, axis=-1, keepdims=True), approx=True)
        oh = jnp.einsum('bqk,bkd->bqd', p, vh,
                        preferred_element_type=jnp.float32)     # (nhead*B,Ls,hd)

        # Output projection: sum_h oh_h @ Wo[h*hd:(h+1)*hd, :] as one batched
        # einsum + reduce over heads (no in-kernel concatenate needed).
        oh_r = oh.reshape(nhead, B * Ls, hd)
        wo_r = wo_ref[l].reshape(nhead, hd, D)
        attn = jnp.sum(jnp.einsum('hnk,hkd->hnd', oh_r, wo_r,
                                  preferred_element_type=jnp.float32),
                       axis=0) + bo                              # (B*Ls, D)

        # Post-norm residual + FFN (relu) + post-norm residual.
        x = _layer_norm(x + attn, ln1g, ln1b)
        h1 = jnp.maximum(
            jnp.dot(x, w1_ref[l], preferred_element_type=jnp.float32) + b1, 0.0)
        y = jnp.dot(h1, w2_ref[l], preferred_element_type=jnp.float32) + b2
        x = _layer_norm(x + y, ln2g, ln2b)

    # recon_sent_tokens[masked_sent_loc]: one-hot row selection on the MXU.
    sel = jnp.dot(sel_ref[...], x, preferred_element_type=jnp.float32)  # (B, D)

    # F.normalize(p=2, dim=1)
    nrm2 = jnp.sum(sel * sel, axis=-1, keepdims=True)
    xn = sel * jax.lax.rsqrt(jnp.maximum(nrm2, 1e-24))

    # output_sent_proj: LN -> Linear -> ReLU -> LN -> Linear (dropout = id).
    hh = _layer_norm(xn, hv[_H_LN1G:_H_LN1G + 1, :], hv[_H_LN1B:_H_LN1B + 1, :])
    hh = jnp.maximum(
        jnp.dot(hh, hw_ref[0], preferred_element_type=jnp.float32)
        + hv[_H_B1:_H_B1 + 1, :], 0.0)
    hh = _layer_norm(hh, hv[_H_LN2G:_H_LN2G + 1, :], hv[_H_LN2B:_H_LN2B + 1, :])
    pj = (jnp.dot(hh, hw_ref[1], preferred_element_type=jnp.float32)
          + hv[_H_B2:_H_B2 + 1, :])

    # Lane-dense store: one full (B, 2*D) = (8, 128) tile, no masked vst.
    out_ref[...] = jnp.concatenate([xn, pj], axis=-1)


# ------------------------------- wrapper ------------------------------------
@jax.jit
def _forward_jit(params, batched_vid, batched_vid_mask, batched_sent,
                 mask_col, sel_mat):
    B, Ls, D = batched_sent.shape
    Lv = batched_vid.shape[1]
    num_layers = params["wq"].shape[0]

    # key_padding_mask = ~batched_vid_mask -> additive bias, expanded per head
    bias = jnp.where(batched_vid_mask, 0.0, -1e30).astype(jnp.float32)  # (B,Lv)
    bias_h = jnp.tile(bias, (NHEAD, 1))                       # (nhead*B, Lv)

    sent_flat = batched_sent.reshape(B * Ls, D).astype(jnp.float32)
    vid_flat = batched_vid.reshape(B * Lv, D).astype(jnp.float32)

    vmem = lambda: pl.BlockSpec(memory_space=pltpu.MemorySpace.VMEM)
    kernel = functools.partial(_fused_kernel, NHEAD, num_layers, B, Ls, Lv)
    out = pl.pallas_call(
        kernel,
        out_shape=jax.ShapeDtypeStruct((B, 2 * D), jnp.float32),
        in_specs=[vmem() for _ in range(13)],
        out_specs=vmem(),
    )(sent_flat, vid_flat, mask_col, bias_h, sel_mat,
      params["wq"], params["wkv"], params["wo"], params["w1"], params["w2"],
      params["vecs"], params["hw"], params["hvecs"])
    return out[:, 0:D], out[:, D:2 * D]


def seg_sen_recon_forward(params, batched_vid, batched_vid_mask,
                          batched_sent, batched_sent_mask, num_clips,
                          vid_position=None):
    del vid_position       # None in this configuration (pos embeddings unused)
    del batched_sent_mask  # query-side padding never affects selected rows
    B, Ls, _ = batched_sent.shape

    # _sequence_mask_sent glue (static given num_clips): segment i masks token i
    local = np.concatenate(
        [np.arange(n, dtype=np.int32) for n in num_clips])               # (B,)
    mask2d = np.arange(Ls, dtype=np.int32)[None, :] == local[:, None]    # (B,Ls)
    mask_col = jnp.asarray(mask2d.reshape(B * Ls, 1).astype(np.float32))
    flat_idx = np.arange(B, dtype=np.int32) * Ls + local
    sel_mat = jnp.asarray(
        (np.arange(B * Ls, dtype=np.int32)[None, :] == flat_idx[:, None]
         ).astype(np.float32))                                           # (B,B*Ls)

    return _forward_jit(params, batched_vid, batched_vid_mask, batched_sent,
                        mask_col, sel_mat)


# ----------------------------- parameter init ------------------------------
def init_params(key):
    keys = iter(jax.random.split(key, 64))

    def lin(in_d, out_d):
        w = 0.02 * jax.random.normal(next(keys), (in_d, out_d), jnp.float32)
        b = 0.02 * jax.random.normal(next(keys), (1, out_d), jnp.float32)
        return w, b

    def pad_row(v):
        return jnp.pad(v, ((0, 0), (0, VEC_W - v.shape[1])))

    ones = jnp.ones((1, HIDDEN), jnp.float32)
    zeros = jnp.zeros((1, HIDDEN), jnp.float32)

    wq_l, wkv_l, wo_l, w1_l, w2_l, vec_l = [], [], [], [], [], []
    for _ in range(NUM_LAYERS):
        wq, bq = lin(HIDDEN, HIDDEN)
        wk, bk = lin(HIDDEN, HIDDEN)
        wv, bv = lin(HIDDEN, HIDDEN)
        wo, bo = lin(HIDDEN, HIDDEN)
        w1, b1 = lin(HIDDEN, FFN)
        w2, b2 = lin(FFN, HIDDEN)
        wq_l.append(wq)
        wkv_l.append(jnp.concatenate([wk, wv], axis=1))   # fused K|V weight
        wo_l.append(wo)
        w1_l.append(w1)
        w2_l.append(w2)
        rows = [jnp.zeros((1, VEC_W), jnp.float32)] * VEC_ROWS
        rows[_R_BQ] = pad_row(bq)
        rows[_R_BKV] = pad_row(jnp.concatenate([bk, bv], axis=1))
        rows[_R_B1] = pad_row(b1)
        rows[_R_BO] = pad_row(bo)
        rows[_R_B2] = pad_row(b2)
        rows[_R_LN1G] = pad_row(ones)
        rows[_R_LN1B] = pad_row(zeros)
        rows[_R_LN2G] = pad_row(ones)
        rows[_R_LN2B] = pad_row(zeros)
        vec_l.append(jnp.concatenate(rows, axis=0))       # (VEC_ROWS, VEC_W)

    # output_sent_proj (2x LinearLayer) + masked_sent_token, packed
    hw1, hb1 = lin(HIDDEN, HIDDEN)
    hw2, hb2 = lin(HIDDEN, HIDDEN)
    # nn.Parameter(torch.zeros(hidden_dim)); init deterministically (nonzero)
    masked_token = 0.02 * jax.random.normal(next(keys), (1, HIDDEN), jnp.float32)
    hrows = [jnp.zeros((1, HIDDEN), jnp.float32)] * 8
    hrows[_H_LN1G] = ones
    hrows[_H_LN1B] = zeros
    hrows[_H_B1] = hb1
    hrows[_H_LN2G] = ones
    hrows[_H_LN2B] = zeros
    hrows[_H_B2] = hb2
    hrows[_H_MTOK] = masked_token

    return dict(
        wq=jnp.stack(wq_l), wkv=jnp.stack(wkv_l), wo=jnp.stack(wo_l),
        w1=jnp.stack(w1_l), w2=jnp.stack(w2_l), vecs=jnp.stack(vec_l),
        hw=jnp.stack([hw1, hw2]), hvecs=jnp.concatenate(hrows, axis=0))


if __name__ == "__main__":
    key = jax.random.PRNGKey(0)
    kp, kv_, ks = jax.random.split(key, 3)
    params = init_params(kp)

    B = sum(NUM_CLIPS)                                    # 8
    batched_vid = jax.random.normal(kv_, (B, L_VID, HIDDEN), jnp.float32)
    batched_sent = jax.random.normal(ks, (B, L_SENT, HIDDEN), jnp.float32)
    vid_lens = jnp.array([12, 16, 10, 16, 14, 16, 16, 9], jnp.int32)
    batched_vid_mask = jnp.arange(L_VID)[None, :] < vid_lens[:, None]   # (B,Lv)
    batched_sent_mask = jnp.ones((B, L_SENT), dtype=bool)

    recon_feat, recon_feat_proj = seg_sen_recon_forward(
        params, batched_vid, batched_vid_mask,
        batched_sent, batched_sent_mask,
        tuple(NUM_CLIPS), vid_position=None)

    jax.block_until_ready((recon_feat, recon_feat_proj))
    assert recon_feat.shape == (B, HIDDEN)
    assert recon_feat_proj.shape == (B, HIDDEN)
    assert bool(jnp.all(jnp.isfinite(recon_feat)))
    assert bool(jnp.all(jnp.isfinite(recon_feat_proj)))
    print("KERNEL_OK")
</pallas_src>

<mosaic_0001>
module attributes {stable_mosaic.version = 11 : i64} {
  func.func @_fused_kernel(%arg0: memref<64x64xf32, #tpu.memory_space<vmem>>, %arg1: memref<128x64xf32, #tpu.memory_space<vmem>>, %arg2: memref<64x1xf32, #tpu.memory_space<vmem>>, %arg3: memref<32x16xf32, #tpu.memory_space<vmem>>, %arg4: memref<8x64xf32, #tpu.memory_space<vmem>>, %arg5: memref<2x64x64xf32, #tpu.memory_space<vmem>>, %arg6: memref<2x64x128xf32, #tpu.memory_space<vmem>>, %arg7: memref<2x64x64xf32, #tpu.memory_space<vmem>>, %arg8: memref<2x64x128xf32, #tpu.memory_space<vmem>>, %arg9: memref<2x128x64xf32, #tpu.memory_space<vmem>>, %arg10: memref<2x16x128xf32, #tpu.memory_space<vmem>>, %arg11: memref<2x64x64xf32, #tpu.memory_space<vmem>>, %arg12: memref<8x64xf32, #tpu.memory_space<vmem>>, %arg13: memref<8x128xf32, #tpu.memory_space<vmem>>) attributes {dimension_semantics = [], scalar_prefetch = 0 : i64, scratch_operands = 0 : i64, tpu.core_type = #tpu.core_type<tc>} {
    %c0 = arith.constant 0 : index
    %c0_0 = arith.constant 0 : index
    %0 = vector.load %arg12[%c0, %c0_0] : memref<8x64xf32, #tpu.memory_space<vmem>>, vector<8x64xf32>
    %1 = vector.extract_strided_slice %0 {offsets = [6, 0], sizes = [1, 64], strides = [1, 1]} : vector<8x64xf32> to vector<1x64xf32>
    %c0_1 = arith.constant 0 : index
    %c0_2 = arith.constant 0 : index
    %2 = vector.load %arg2[%c0_1, %c0_2] : memref<64x1xf32, #tpu.memory_space<vmem>>, vector<64x1xf32>
    %cst = arith.constant 5.000000e-01 : f32
    %3 = vector.broadcast %cst : f32 to vector<64x1xf32>
    %4 = arith.cmpf ogt, %2, %3 : vector<64x1xf32>
    %c0_3 = arith.constant 0 : index
    %c0_4 = arith.constant 0 : index
    %5 = vector.load %arg0[%c0_3, %c0_4] : memref<64x64xf32, #tpu.memory_space<vmem>>, vector<64x64xf32>
    %6 = vector.shape_cast %4 : vector<64x1xi1> to vector<64x1xi1>
    %7 = vector.broadcast %6 : vector<64x1xi1> to vector<64x64xi1>
    %8 = vector.shape_cast %1 : vector<1x64xf32> to vector<1x64xf32>
    %9 = vector.broadcast %8 : vector<1x64xf32> to vector<64x64xf32>
    %10 = arith.select %7, %9, %5 : vector<64x64xi1>, vector<64x64xf32>
    %c0_5 = arith.constant 0 : index
    %c0_6 = arith.constant 0 : index
    %11 = vector.load %arg1[%c0_5, %c0_6] : memref<128x64xf32, #tpu.memory_space<vmem>>, vector<128x64xf32>
    %c0_7 = arith.constant 0 : index
    %c0_8 = arith.constant 0 : index
    %12 = vector.load %arg3[%c0_7, %c0_8] : memref<32x16xf32, #tpu.memory_space<vmem>>, vector<32x16xf32>
    %13 = vector.shape_cast %12 : vector<32x16xf32> to vector<32x1x16xf32>
    %c0_9 = arith.constant 0 : index
    %c0_10 = arith.constant 0 : index
    %c0_11 = arith.constant 0 : index
    %14 = vector.load %arg10[%c0_9, %c0_10, %c0_11] : memref<2x16x128xf32, #tpu.memory_space<vmem>>, vector<1x16x128xf32>
    %15 = vector.shape_cast %14 : vector<1x16x128xf32> to vector<16x128xf32>
    %16 = vector.extract_strided_slice %15 {offsets = [0, 0], sizes = [1, 64], strides = [1, 1]} : vector<16x128xf32> to vector<1x64xf32>
    %17 = vector.extract_strided_slice %15 {offsets = [1, 0], sizes = [1, 128], strides = [1, 1]} : vector<16x128xf32> to vector<1x128xf32>
    %18 = vector.extract_strided_slice %15 {offsets = [2, 0], sizes = [1, 128], strides = [1, 1]} : vector<16x128xf32> to vector<1x128xf32>
    %19 = vector.extract_strided_slice %15 {offsets = [3, 0], sizes = [1, 64], strides = [1, 1]} : vector<16x128xf32> to vector<1x64xf32>
    %20 = vector.extract_strided_slice %15 {offsets = [4, 0], sizes = [1, 64], strides = [1, 1]} : vector<16x128xf32> to vector<1x64xf32>
    %21 = vector.extract_strided_slice %15 {offsets = [5, 0], sizes = [1, 64], strides = [1, 1]} : vector<16x128xf32> to vector<1x64xf32>
    %22 = vector.extract_strided_slice %15 {offsets = [6, 0], sizes = [1, 64], strides = [1, 1]} : vector<16x128xf32> to vector<1x64xf32>
    %23 = vector.extract_strided_slice %15 {offsets = [7, 0], sizes = [1, 64], strides = [1, 1]} : vector<16x128xf32> to vector<1x64xf32>
    %24 = vector.extract_strided_slice %15 {offsets = [8, 0], sizes = [1, 64], strides = [1, 1]} : vector<16x128xf32> to vector<1x64xf32>
    %c0_12 = arith.constant 0 : index
    %c0_13 = arith.constant 0 : index
    %c0_14 = arith.constant 0 : index
    %25 = vector.load %arg5[%c0_12, %c0_13, %c0_14] : memref<2x64x64xf32, #tpu.memory_space<vmem>>, vector<1x64x64xf32>
    %26 = vector.shape_cast %25 : vector<1x64x64xf32> to vector<64x64xf32>
    %cst_15 = arith.constant dense<0.000000e+00> : vector<64x64xf32>
    %27 = tpu.matmul %10, %26, %cst_15 {dimension_numbers = #tpu.dot_dimension_numbers<[1], [0], [0], [1], [0, 0, 1, 1], [], []>} : vector<64x64xf32>, vector<64x64xf32>, vector<64x64xf32> -> vector<64x64xf32>
    %28 = vector.broadcast %16 : vector<1x64xf32> to vector<64x64xf32>
    %29 = arith.addf %27, %28 : vector<64x64xf32>
    %c0_16 = arith.constant 0 : index
    %c0_17 = arith.constant 0 : index
    %c0_18 = arith.constant 0 : index
    %30 = vector.load %arg6[%c0_16, %c0_17, %c0_18] : memref<2x64x128xf32, #tpu.memory_space<vmem>>, vector<1x64x128xf32>
    %31 = vector.shape_cast %30 : vector<1x64x128xf32> to vector<64x128xf32>
    %cst_19 = arith.constant dense<0.000000e+00> : vector<128x128xf32>
    %32 = tpu.matmul %11, %31, %cst_19 {dimension_numbers = #tpu.dot_dimension_numbers<[1], [0], [0], [1], [0, 0, 1, 1], [], []>} : vector<128x64xf32>, vector<64x128xf32>, vector<128x128xf32> -> vector<128x128xf32>
    %33 = vector.broadcast %17 : vector<1x128xf32> to vector<128x128xf32>
    %34 = arith.addf %32, %33 : vector<128x128xf32>
    %35 = vector.extract_strided_slice %34 {offsets = [0, 0], sizes = [128, 64], strides = [1, 1]} : vector<128x128xf32> to vector<128x64xf32>
    %36 = vector.extract_strided_slice %34 {offsets = [0, 64], sizes = [128, 64], strides = [1, 1]} : vector<128x128xf32> to vector<128x64xf32>
    %37 = vector.extract_strided_slice %29 {offsets = [0, 0], sizes = [64, 16], strides = [1, 1]} : vector<64x64xf32> to vector<64x16xf32>
    %38 = vector.shape_cast %37 : vector<64x16xf32> to vector<8x8x16xf32>
    %39 = vector.extract_strided_slice %29 {offsets = [0, 16], sizes = [64, 16], strides = [1, 1]} : vector<64x64xf32> to vector<64x16xf32>
    %40 = vector.shape_cast %39 : vector<64x16xf32> to vector<8x8x16xf32>
    %41 = vector.extract_strided_slice %29 {offsets = [0, 32], sizes = [64, 16], strides = [1, 1]} : vector<64x64xf32> to vector<64x16xf32>
    %42 = vector.shape_cast %41 : vector<64x16xf32> to vector<8x8x16xf32>
    %43 = vector.extract_strided_slice %29 {offsets = [0, 48], sizes = [64, 16], strides = [1, 1]} : vector<64x64xf32> to vector<64x16xf32>
    %44 = vector.shape_cast %43 : vector<64x16xf32> to vector<8x8x16xf32>
    %45 = vector.shape_cast %38 : vector<8x8x16xf32> to vector<1x8x8x16xf32>
    %46 = vector.shape_cast %40 : vector<8x8x16xf32> to vector<1x8x8x16xf32>
    %47 = vector.shape_cast %42 : vector<8x8x16xf32> to vector<1x8x8x16xf32>
    %48 = vector.shape_cast %44 : vector<8x8x16xf32> to vector<1x8x8x16xf32>
    %49 = tpu.concatenate %45, %46, %47, %48 in 0 : vector<1x8x8x16xf32>, vector<1x8x8x16xf32>, vector<1x8x8x16xf32>, vector<1x8x8x16xf32> -> vector<4x8x8x16xf32>
    %50 = vector.shape_cast %49 : vector<4x8x8x16xf32> to vector<32x8x16xf32>
    %51 = vector.extract_strided_slice %35 {offsets = [0, 0], sizes = [128, 16], strides = [1, 1]} : vector<128x64xf32> to vector<128x16xf32>
    %52 = vector.shape_cast %51 : vector<128x16xf32> to vector<8x16x16xf32>
    %53 = vector.extract_strided_slice %35 {offsets = [0, 16], sizes = [128, 16], strides = [1, 1]} : vector<128x64xf32> to vector<128x16xf32>
    %54 = vector.shape_cast %53 : vector<128x16xf32> to vector<8x16x16xf32>
    %55 = vector.extract_strided_slice %35 {offsets = [0, 32], sizes = [128, 16], strides = [1, 1]} : vector<128x64xf32> to vector<128x16xf32>
    %56 = vector.shape_cast %55 : vector<128x16xf32> to vector<8x16x16xf32>
    %57 = vector.extract_strided_slice %35 {offsets = [0, 48], sizes = [128, 16], strides = [1, 1]} : vector<128x64xf32> to vector<128x16xf32>
    %58 = vector.shape_cast %57 : vector<128x16xf32> to vector<8x16x16xf32>
    %59 = vector.shape_cast %52 : vector<8x16x16xf32> to vector<1x8x16x16xf32>
    %60 = vector.shape_cast %54 : vector<8x16x16xf32> to vector<1x8x16x16xf32>
    %61 = vector.shape_cast %56 : vector<8x16x16xf32> to vector<1x8x16x16xf32>
    %62 = vector.shape_cast %58 : vector<8x16x16xf32> to vector<1x8x16x16xf32>
    %63 = tpu.concatenate %59, %60, %61, %62 in 0 : vector<1x8x16x16xf32>, vector<1x8x16x16xf32>, vector<1x8x16x16xf32>, vector<1x8x16x16xf32> -> vector<4x8x16x16xf32>
    %64 = vector.shape_cast %63 : vector<4x8x16x16xf32> to vector<32x16x16xf32>
    %65 = vector.extract_strided_slice %36 {offsets = [0, 0], sizes = [128, 16], strides = [1, 1]} : vector<128x64xf32> to vector<128x16xf32>
    %66 = vector.shape_cast %65 : vector<128x16xf32> to vector<8x16x16xf32>
    %67 = vector.extract_strided_slice %36 {offsets = [0, 16], sizes = [128, 16], strides = [1, 1]} : vector<128x64xf32> to vector<128x16xf32>
    %68 = vector.shape_cast %67 : vector<128x16xf32> to vector<8x16x16xf32>
    %69 = vector.extract_strided_slice %36 {offsets = [0, 32], sizes = [128, 16], strides = [1, 1]} : vector<128x64xf32> to vector<128x16xf32>
    %70 = vector.shape_cast %69 : vector<128x16xf32> to vector<8x16x16xf32>
    %71 = vector.extract_strided_slice %36 {offsets = [0, 48], sizes = [128, 16], strides = [1, 1]} : vector<128x64xf32> to vector<128x16xf32>
    %72 = vector.shape_cast %71 : vector<128x16xf32> to vector<8x16x16xf32>
    %73 = vector.shape_cast %66 : vector<8x16x16xf32> to vector<1x8x16x16xf32>
    %74 = vector.shape_cast %68 : vector<8x16x16xf32> to vector<1x8x16x16xf32>
    %75 = vector.shape_cast %70 : vector<8x16x16xf32> to vector<1x8x16x16xf32>
    %76 = vector.shape_cast %72 : vector<8x16x16xf32> to vector<1x8x16x16xf32>
    %77 = tpu.concatenate %73, %74, %75, %76 in 0 : vector<1x8x16x16xf32>, vector<1x8x16x16xf32>, vector<1x8x16x16xf32>, vector<1x8x16x16xf32> -> vector<4x8x16x16xf32>
    %78 = vector.shape_cast %77 : vector<4x8x16x16xf32> to vector<32x16x16xf32>
    "tpu.trace_start"() <{level = 10 : i32, message = "bqd,bkd->bqk"}> : () -> ()
    %cst_20 = arith.constant dense<0.000000e+00> : vector<32x8x16xf32>
    %79 = tpu.matmul %50, %64, %cst_20 {dimension_numbers = #tpu.dot_dimension_numbers<[2], [2], [1], [1], [0, 0, 0, 1, 1, 1], [0], [0]>} : vector<32x8x16xf32>, vector<32x16x16xf32>, vector<32x8x16xf32> -> vector<32x8x16xf32>
    "tpu.trace_stop"() : () -> ()
    %cst_21 = arith.constant 2.500000e-01 : f32
    %80 = vector.broadcast %cst_21 : f32 to vector<32x8x16xf32>
    %81 = arith.mulf %79, %80 : vector<32x8x16xf32>
    %82 = vector.broadcast %13 : vector<32x1x16xf32> to vector<32x8x16xf32>
    %83 = arith.addf %81, %82 : vector<32x8x16xf32>
    %cst_22 = arith.constant dense<0xFF800000> : vector<32x8xf32>
    %84 = vector.multi_reduction <maximumf>, %83, %cst_22 [2] : vector<32x8x16xf32> to vector<32x8xf32>
    %85 = vector.shape_cast %84 : vector<32x8xf32> to vector<32x8x1xf32>
    %86 = vector.broadcast %85 : vector<32x8x1xf32> to vector<32x8x16xf32>
    %87 = arith.subf %83, %86 : vector<32x8x16xf32>
    %88 = math.exp %87 : vector<32x8x16xf32>
    %cst_23 = arith.constant dense<0.000000e+00> : vector<32x8xf32>
    %89 = vector.multi_reduction <add>, %88, %cst_23 [2] : vector<32x8x16xf32> to vector<32x8xf32>
    %90 = vector.shape_cast %89 : vector<32x8xf32> to vector<32x8x1xf32>
    %91 = tpu.reciprocal %90 {approx = true} : vector<32x8x1xf32> -> vector<32x8x1xf32>
    %92 = vector.broadcast %91 : vector<32x8x1xf32> to vector<32x8x16xf32>
    %93 = arith.mulf %88, %92 : vector<32x8x16xf32>
    "tpu.trace_start"() <{level = 10 : i32, message = "bqk,bkd->bqd"}> : () -> ()
    %cst_24 = arith.constant dense<0.000000e+00> : vector<32x8x16xf32>
    %94 = tpu.matmul %93, %78, %cst_24 {dimension_numbers = #tpu.dot_dimension_numbers<[2], [1], [1], [2], [0, 0, 0, 1, 1, 2], [0], [0]>} : vector<32x8x16xf32>, vector<32x16x16xf32>, vector<32x8x16xf32> -> vector<32x8x16xf32>
    "tpu.trace_stop"() : () -> ()
    %95 = vector.shape_cast %94 : vector<32x8x16xf32> to vector<4x64x16xf32>
    %c0_25 = arith.constant 0 : index
    %c0_26 = arith.constant 0 : index
    %c0_27 = arith.constant 0 : index
    %96 = vector.load %arg7[%c0_25, %c0_26, %c0_27] : memref<2x64x64xf32, #tpu.memory_space<vmem>>, vector<1x64x64xf32>
    %97 = vector.shape_cast %96 : vector<1x64x64xf32> to vector<64x64xf32>
    %98 = vector.shape_cast %97 : vector<64x64xf32> to vector<4x16x64xf32>
    "tpu.trace_start"() <{level = 10 : i32, message = "hnk,hkd->hnd"}> : () -> ()
    %cst_28 = arith.constant dense<0.000000e+00> : vector<4x64x64xf32>
    %99 = tpu.matmul %95, %98, %cst_28 {dimension_numbers = #tpu.dot_dimension_numbers<[2], [1], [1], [2], [0, 0, 0, 1, 1, 2], [0], [0]>} : vector<4x64x16xf32>, vector<4x16x64xf32>, vector<4x64x64xf32> -> vector<4x64x64xf32>
    "tpu.trace_stop"() : () -> ()
    %cst_29 = arith.constant dense<0.000000e+00> : vector<64x64xf32>
    %100 = vector.multi_reduction <add>, %99, %cst_29 [0] : vector<4x64x64xf32> to vector<64x64xf32>
    %101 = vector.broadcast %19 : vector<1x64xf32> to vector<64x64xf32>
    %102 = arith.addf %100, %101 : vector<64x64xf32>
    %103 = arith.addf %10, %102 : vector<64x64xf32>
    %cst_30 = arith.constant dense<0.000000e+00> : vector<64xf32>
    %104 = vector.multi_reduction <add>, %103, %cst_30 [1] : vector<64x64xf32> to vector<64xf32>
    %105 = vector.shape_cast %104 : vector<64xf32> to vector<64x1xf32>
    %cst_31 = arith.constant 6.400000e+01 : f32
    %106 = vector.broadcast %cst_31 : f32 to vector<64x1xf32>
    %107 = arith.divf %105, %106 : vector<64x1xf32>
    %108 = vector.broadcast %107 : vector<64x1xf32> to vector<64x64xf32>
    %109 = arith.subf %103, %108 : vector<64x64xf32>
    %110 = arith.mulf %109, %109 : vector<64x64xf32>
    %cst_32 = arith.constant dense<0.000000e+00> : vector<64xf32>
    %111 = vector.multi_reduction <add>, %110, %cst_32 [1] : vector<64x64xf32> to vector<64xf32>
    %112 = vector.shape_cast %111 : vector<64xf32> to vector<64x1xf32>
    %cst_33 = arith.constant 6.400000e+01 : f32
    %113 = vector.broadcast %cst_33 : f32 to vector<64x1xf32>
    %114 = arith.divf %112, %113 : vector<64x1xf32>
    %115 = vector.broadcast %107 : vector<64x1xf32> to vector<64x64xf32>
    %116 = arith.subf %103, %115 : vector<64x64xf32>
    %cst_34 = arith.constant 9.99999974E-6 : f32
    %117 = vector.broadcast %cst_34 : f32 to vector<64x1xf32>
    %118 = arith.addf %114, %117 : vector<64x1xf32>
    %119 = math.rsqrt %118 : vector<64x1xf32>
    %120 = vector.broadcast %119 : vector<64x1xf32> to vector<64x64xf32>
    %121 = arith.mulf %116, %120 : vector<64x64xf32>
    %122 = vector.broadcast %21 : vector<1x64xf32> to vector<64x64xf32>
    %123 = arith.mulf %121, %122 : vector<64x64xf32>
    %124 = vector.broadcast %22 : vector<1x64xf32> to vector<64x64xf32>
    %125 = arith.addf %123, %124 : vector<64x64xf32>
    %c0_35 = arith.constant 0 : index
    %c0_36 = arith.constant 0 : index
    %c0_37 = arith.constant 0 : index
    %126 = vector.load %arg8[%c0_35, %c0_36, %c0_37] : memref<2x64x128xf32, #tpu.memory_space<vmem>>, vector<1x64x128xf32>
    %127 = vector.shape_cast %126 : vector<1x64x128xf32> to vector<64x128xf32>
    %cst_38 = arith.constant dense<0.000000e+00> : vector<64x128xf32>
    %128 = tpu.matmul %125, %127, %cst_38 {dimension_numbers = #tpu.dot_dimension_numbers<[1], [0], [0], [1], [0, 0, 1, 1], [], []>} : vector<64x64xf32>, vector<64x128xf32>, vector<64x128xf32> -> vector<64x128xf32>
    %129 = vector.broadcast %18 : vector<1x128xf32> to vector<64x128xf32>
    %130 = arith.addf %128, %129 : vector<64x128xf32>
    %cst_39 = arith.constant 0.000000e+00 : f32
    %131 = vector.broadcast %cst_39 : f32 to vector<64x128xf32>
    %132 = arith.maximumf %130, %131 : vector<64x128xf32>
    %c0_40 = arith.constant 0 : index
    %c0_41 = arith.constant 0 : index
    %c0_42 = arith.constant 0 : index
    %133 = vector.load %arg9[%c0_40, %c0_41, %c0_42] : memref<2x128x64xf32, #tpu.memory_space<vmem>>, vector<1x128x64xf32>
    %134 = vector.shape_cast %133 : vector<1x128x64xf32> to vector<128x64xf32>
    %cst_43 = arith.constant dense<0.000000e+00> : vector<64x64xf32>
    %135 = tpu.matmul %132, %134, %cst_43 {dimension_numbers = #tpu.dot_dimension_numbers<[1], [0], [0], [1], [0, 0, 1, 1], [], []>} : vector<64x128xf32>, vector<128x64xf32>, vector<64x64xf32> -> vector<64x64xf32>
    %136 = vector.broadcast %20 : vector<1x64xf32> to vector<64x64xf32>
    %137 = arith.addf %135, %136 : vector<64x64xf32>
    %138 = arith.addf %125, %137 : vector<64x64xf32>
    %cst_44 = arith.constant dense<0.000000e+00> : vector<64xf32>
    %139 = vector.multi_reduction <add>, %138, %cst_44 [1] : vector<64x64xf32> to vector<64xf32>
    %140 = vector.shape_cast %139 : vector<64xf32> to vector<64x1xf32>
    %cst_45 = arith.constant 6.400000e+01 : f32
    %141 = vector.broadcast %cst_45 : f32 to vector<64x1xf32>
    %142 = arith.divf %140, %141 : vector<64x1xf32>
    %143 = vector.broadcast %142 : vector<64x1xf32> to vector<64x64xf32>
    %144 = arith.subf %138, %143 : vector<64x64xf32>
    %145 = arith.mulf %144, %144 : vector<64x64xf32>
    %cst_46 = arith.constant dense<0.000000e+00> : vector<64xf32>
    %146 = vector.multi_reduction <add>, %145, %cst_46 [1] : vector<64x64xf32> to vector<64xf32>
    %147 = vector.shape_cast %146 : vector<64xf32> to vector<64x1xf32>
    %cst_47 = arith.constant 6.400000e+01 : f32
    %148 = vector.broadcast %cst_47 : f32 to vector<64x1xf32>
    %149 = arith.divf %147, %148 : vector<64x1xf32>
    %150 = vector.broadcast %142 : vector<64x1xf32> to vector<64x64xf32>
    %151 = arith.subf %138, %150 : vector<64x64xf32>
    %cst_48 = arith.constant 9.99999974E-6 : f32
    %152 = vector.broadcast %cst_48 : f32 to vector<64x1xf32>
    %153 = arith.addf %149, %152 : vector<64x1xf32>
    %154 = math.rsqrt %153 : vector<64x1xf32>
    %155 = vector.broadcast %154 : vector<64x1xf32> to vector<64x64xf32>
    %156 = arith.mulf %151, %155 : vector<64x64xf32>
    %157 = vector.broadcast %23 : vector<1x64xf32> to vector<64x64xf32>
    %158 = arith.mulf %156, %157 : vector<64x64xf32>
    %159 = vector.broadcast %24 : vector<1x64xf32> to vector<64x64xf32>
    %160 = arith.addf %158, %159 : vector<64x64xf32>
    %c1 = arith.constant 1 : index
    %c0_49 = arith.constant 0 : index
    %c0_50 = arith.constant 0 : index
    %161 = vector.load %arg10[%c1, %c0_49, %c0_50] : memref<2x16x128xf32, #tpu.memory_space<vmem>>, vector<1x16x128xf32>
    %162 = vector.shape_cast %161 : vector<1x16x128xf32> to vector<16x128xf32>
    %163 = vector.extract_strided_slice %162 {offsets = [0, 0], sizes = [1, 64], strides = [1, 1]} : vector<16x128xf32> to vector<1x64xf32>
    %164 = vector.extract_strided_slice %162 {offsets = [1, 0], sizes = [1, 128], strides = [1, 1]} : vector<16x128xf32> to vector<1x128xf32>
    %165 = vector.extract_strided_slice %162 {offsets = [2, 0], sizes = [1, 128], strides = [1, 1]} : vector<16x128xf32> to vector<1x128xf32>
    %166 = vector.extract_strided_slice %162 {offsets = [3, 0], sizes = [1, 64], strides = [1, 1]} : vector<16x128xf32> to vector<1x64xf32>
    %167 = vector.extract_strided_slice %162 {offsets = [4, 0], sizes = [1, 64], strides = [1, 1]} : vector<16x128xf32> to vector<1x64xf32>
    %168 = vector.extract_strided_slice %162 {offsets = [5, 0], sizes = [1, 64], strides = [1, 1]} : vector<16x128xf32> to vector<1x64xf32>
    %169 = vector.extract_strided_slice %162 {offsets = [6, 0], sizes = [1, 64], strides = [1, 1]} : vector<16x128xf32> to vector<1x64xf32>
    %170 = vector.extract_strided_slice %162 {offsets = [7, 0], sizes = [1, 64], strides = [1, 1]} : vector<16x128xf32> to vector<1x64xf32>
    %171 = vector.extract_strided_slice %162 {offsets = [8, 0], sizes = [1, 64], strides = [1, 1]} : vector<16x128xf32> to vector<1x64xf32>
    %c1_51 = arith.constant 1 : index
    %c0_52 = arith.constant 0 : index
    %c0_53 = arith.constant 0 : index
    %172 = vector.load %arg5[%c1_51, %c0_52, %c0_53] : memref<2x64x64xf32, #tpu.memory_space<vmem>>, vector<1x64x64xf32>
    %173 = vector.shape_cast %172 : vector<1x64x64xf32> to vector<64x64xf32>
    %cst_54 = arith.constant dense<0.000000e+00> : vector<64x64xf32>
    %174 = tpu.matmul %160, %173, %cst_54 {dimension_numbers = #tpu.dot_dimension_numbers<[1], [0], [0], [1], [0, 0, 1, 1], [], []>} : vector<64x64xf32>, vector<64x64xf32>, vector<64x64xf32> -> vector<64x64xf32>
    %175 = vector.broadcast %163 : vector<1x64xf32> to vector<64x64xf32>
    %176 = arith.addf %174, %175 : vector<64x64xf32>
    %c1_55 = arith.constant 1 : index
    %c0_56 = arith.constant 0 : index
    %c0_57 = arith.constant 0 : index
    %177 = vector.load %arg6[%c1_55, %c0_56, %c0_57] : memref<2x64x128xf32, #tpu.memory_space<vmem>>, vector<1x64x128xf32>
    %178 = vector.shape_cast %177 : vector<1x64x128xf32> to vector<64x128xf32>
    %cst_58 = arith.constant dense<0.000000e+00> : vector<128x128xf32>
    %179 = tpu.matmul %11, %178, %cst_58 {dimension_numbers = #tpu.dot_dimension_numbers<[1], [0], [0], [1], [0, 0, 1, 1], [], []>} : vector<128x64xf32>, vector<64x128xf32>, vector<128x128xf32> -> vector<128x128xf32>
    %180 = vector.broadcast %164 : vector<1x128xf32> to vector<128x128xf32>
    %181 = arith.addf %179, %180 : vector<128x128xf32>
    %182 = vector.extract_strided_slice %181 {offsets = [0, 0], sizes = [128, 64], strides = [1, 1]} : vector<128x128xf32> to vector<128x64xf32>
    %183 = vector.extract_strided_slice %181 {offsets = [0, 64], sizes = [128, 64], strides = [1, 1]} : vector<128x128xf32> to vector<128x64xf32>
    %184 = vector.extract_strided_slice %176 {offsets = [0, 0], sizes = [64, 16], strides = [1, 1]} : vector<64x64xf32> to vector<64x16xf32>
    %185 = vector.shape_cast %184 : vector<64x16xf32> to vector<8x8x16xf32>
    %186 = vector.extract_strided_slice %176 {offsets = [0, 16], sizes = [64, 16], strides = [1, 1]} : vector<64x64xf32> to vector<64x16xf32>
    %187 = vector.shape_cast %186 : vector<64x16xf32> to vector<8x8x16xf32>
    %188 = vector.extract_strided_slice %176 {offsets = [0, 32], sizes = [64, 16], strides = [1, 1]} : vector<64x64xf32> to vector<64x16xf32>
    %189 = vector.shape_cast %188 : vector<64x16xf32> to vector<8x8x16xf32>
    %190 = vector.extract_strided_slice %176 {offsets = [0, 48], sizes = [64, 16], strides = [1, 1]} : vector<64x64xf32> to vector<64x16xf32>
    %191 = vector.shape_cast %190 : vector<64x16xf32> to vector<8x8x16xf32>
    %192 = vector.shape_cast %185 : vector<8x8x16xf32> to vector<1x8x8x16xf32>
    %193 = vector.shape_cast %187 : vector<8x8x16xf32> to vector<1x8x8x16xf32>
    %194 = vector.shape_cast %189 : vector<8x8x16xf32> to vector<1x8x8x16xf32>
    %195 = vector.shape_cast %191 : vector<8x8x16xf32> to vector<1x8x8x16xf32>
    %196 = tpu.concatenate %192, %193, %194, %195 in 0 : vector<1x8x8x16xf32>, vector<1x8x8x16xf32>, vector<1x8x8x16xf32>, vector<1x8x8x16xf32> -> vector<4x8x8x16xf32>
    %197 = vector.shape_cast %196 : vector<4x8x8x16xf32> to vector<32x8x16xf32>
    %198 = vector.extract_strided_slice %182 {offsets = [0, 0], sizes = [128, 16], strides = [1, 1]} : vector<128x64xf32> to vector<128x16xf32>
    %199 = vector.shape_cast %198 : vector<128x16xf32> to vector<8x16x16xf32>
    %200 = vector.extract_strided_slice %182 {offsets = [0, 16], sizes = [128, 16], strides = [1, 1]} : vector<128x64xf32> to vector<128x16xf32>
    %201 = vector.shape_cast %200 : vector<128x16xf32> to vector<8x16x16xf32>
    %202 = vector.extract_strided_slice %182 {offsets = [0, 32], sizes = [128, 16], strides = [1, 1]} : vector<128x64xf32> to vector<128x16xf32>
    %203 = vector.shape_cast %202 : vector<128x16xf32> to vector<8x16x16xf32>
    %204 = vector.extract_strided_slice %182 {offsets = [0, 48], sizes = [128, 16], strides = [1, 1]} : vector<128x64xf32> to vector<128x16xf32>
    %205 = vector.shape_cast %204 : vector<128x16xf32> to vector<8x16x16xf32>
    %206 = vector.shape_cast %199 : vector<8x16x16xf32> to vector<1x8x16x16xf32>
    %207 = vector.shape_cast %201 : vector<8x16x16xf32> to vector<1x8x16x16xf32>
    %208 = vector.shape_cast %203 : vector<8x16x16xf32> to vector<1x8x16x16xf32>
    %209 = vector.shape_cast %205 : vector<8x16x16xf32> to vector<1x8x16x16xf32>
    %210 = tpu.concatenate %206, %207, %208, %209 in 0 : vector<1x8x16x16xf32>, vector<1x8x16x16xf32>, vector<1x8x16x16xf32>, vector<1x8x16x16xf32> -> vector<4x8x16x16xf32>
    %211 = vector.shape_cast %210 : vector<4x8x16x16xf32> to vector<32x16x16xf32>
    %212 = vector.extract_strided_slice %183 {offsets = [0, 0], sizes = [128, 16], strides = [1, 1]} : vector<128x64xf32> to vector<128x16xf32>
    %213 = vector.shape_cast %212 : vector<128x16xf32> to vector<8x16x16xf32>
    %214 = vector.extract_strided_slice %183 {offsets = [0, 16], sizes = [128, 16], strides = [1, 1]} : vector<128x64xf32> to vector<128x16xf32>
    %215 = vector.shape_cast %214 : vector<128x16xf32> to vector<8x16x16xf32>
    %216 = vector.extract_strided_slice %183 {offsets = [0, 32], sizes = [128, 16], strides = [1, 1]} : vector<128x64xf32> to vector<128x16xf32>
    %217 = vector.shape_cast %216 : vector<128x16xf32> to vector<8x16x16xf32>
    %218 = vector.extract_strided_slice %183 {offsets = [0, 48], sizes = [128, 16], strides = [1, 1]} : vector<128x64xf32> to vector<128x16xf32>
    %219 = vector.shape_cast %218 : vector<128x16xf32> to vector<8x16x16xf32>
    %220 = vector.shape_cast %213 : vector<8x16x16xf32> to vector<1x8x16x16xf32>
    %221 = vector.shape_cast %215 : vector<8x16x16xf32> to vector<1x8x16x16xf32>
    %222 = vector.shape_cast %217 : vector<8x16x16xf32> to vector<1x8x16x16xf32>
    %223 = vector.shape_cast %219 : vector<8x16x16xf32> to vector<1x8x16x16xf32>
    %224 = tpu.concatenate %220, %221, %222, %223 in 0 : vector<1x8x16x16xf32>, vector<1x8x16x16xf32>, vector<1x8x16x16xf32>, vector<1x8x16x16xf32> -> vector<4x8x16x16xf32>
    %225 = vector.shape_cast %224 : vector<4x8x16x16xf32> to vector<32x16x16xf32>
    "tpu.trace_start"() <{level = 10 : i32, message = "bqd,bkd->bqk"}> : () -> ()
    %cst_59 = arith.constant dense<0.000000e+00> : vector<32x8x16xf32>
    %226 = tpu.matmul %197, %211, %cst_59 {dimension_numbers = #tpu.dot_dimension_numbers<[2], [2], [1], [1], [0, 0, 0, 1, 1, 1], [0], [0]>} : vector<32x8x16xf32>, vector<32x16x16xf32>, vector<32x8x16xf32> -> vector<32x8x16xf32>
    "tpu.trace_stop"() : () -> ()
    %cst_60 = arith.constant 2.500000e-01 : f32
    %227 = vector.broadcast %cst_60 : f32 to vector<32x8x16xf32>
    %228 = arith.mulf %226, %227 : vector<32x8x16xf32>
    %229 = vector.broadcast %13 : vector<32x1x16xf32> to vector<32x8x16xf32>
    %230 = arith.addf %228, %229 : vector<32x8x16xf32>
    %cst_61 = arith.constant dense<0xFF800000> : vector<32x8xf32>
    %231 = vector.multi_reduction <maximumf>, %230, %cst_61 [2] : vector<32x8x16xf32> to vector<32x8xf32>
    %232 = vector.shape_cast %231 : vector<32x8xf32> to vector<32x8x1xf32>
    %233 = vector.broadcast %232 : vector<32x8x1xf32> to vector<32x8x16xf32>
    %234 = arith.subf %230, %233 : vector<32x8x16xf32>
    %235 = math.exp %234 : vector<32x8x16xf32>
    %cst_62 = arith.constant dense<0.000000e+00> : vector<32x8xf32>
    %236 = vector.multi_reduction <add>, %235, %cst_62 [2] : vector<32x8x16xf32> to vector<32x8xf32>
    %237 = vector.shape_cast %236 : vector<32x8xf32> to vector<32x8x1xf32>
    %238 = tpu.reciprocal %237 {approx = true} : vector<32x8x1xf32> -> vector<32x8x1xf32>
    %239 = vector.broadcast %238 : vector<32x8x1xf32> to vector<32x8x16xf32>
    %240 = arith.mulf %235, %239 : vector<32x8x16xf32>
    "tpu.trace_start"() <{level = 10 : i32, message = "bqk,bkd->bqd"}> : () -> ()
    %cst_63 = arith.constant dense<0.000000e+00> : vector<32x8x16xf32>
    %241 = tpu.matmul %240, %225, %cst_63 {dimension_numbers = #tpu.dot_dimension_numbers<[2], [1], [1], [2], [0, 0, 0, 1, 1, 2], [0], [0]>} : vector<32x8x16xf32>, vector<32x16x16xf32>, vector<32x8x16xf32> -> vector<32x8x16xf32>
    "tpu.trace_stop"() : () -> ()
    %242 = vector.shape_cast %241 : vector<32x8x16xf32> to vector<4x64x16xf32>
    %c1_64 = arith.constant 1 : index
    %c0_65 = arith.constant 0 : index
    %c0_66 = arith.constant 0 : index
    %243 = vector.load %arg7[%c1_64, %c0_65, %c0_66] : memref<2x64x64xf32, #tpu.memory_space<vmem>>, vector<1x64x64xf32>
    %244 = vector.shape_cast %243 : vector<1x64x64xf32> to vector<64x64xf32>
    %245 = vector.shape_cast %244 : vector<64x64xf32> to vector<4x16x64xf32>
    "tpu.trace_start"() <{level = 10 : i32, message = "hnk,hkd->hnd"}> : () -> ()
    %cst_67 = arith.constant dense<0.000000e+00> : vector<4x64x64xf32>
    %246 = tpu.matmul %242, %245, %cst_67 {dimension_numbers = #tpu.dot_dimension_numbers<[2], [1], [1], [2], [0, 0, 0, 1, 1, 2], [0], [0]>} : vector<4x64x16xf32>, vector<4x16x64xf32>, vector<4x64x64xf32> -> vector<4x64x64xf32>
    "tpu.trace_stop"() : () -> ()
    %cst_68 = arith.constant dense<0.000000e+00> : vector<64x64xf32>
    %247 = vector.multi_reduction <add>, %246, %cst_68 [0] : vector<4x64x64xf32> to vector<64x64xf32>
    %248 = vector.broadcast %166 : vector<1x64xf32> to vector<64x64xf32>
    %249 = arith.addf %247, %248 : vector<64x64xf32>
    %250 = arith.addf %160, %249 : vector<64x64xf32>
    %cst_69 = arith.constant dense<0.000000e+00> : vector<64xf32>
    %251 = vector.multi_reduction <add>, %250, %cst_69 [1] : vector<64x64xf32> to vector<64xf32>
    %252 = vector.shape_cast %251 : vector<64xf32> to vector<64x1xf32>
    %cst_70 = arith.constant 6.400000e+01 : f32
    %253 = vector.broadcast %cst_70 : f32 to vector<64x1xf32>
    %254 = arith.divf %252, %253 : vector<64x1xf32>
    %255 = vector.broadcast %254 : vector<64x1xf32> to vector<64x64xf32>
    %256 = arith.subf %250, %255 : vector<64x64xf32>
    %257 = arith.mulf %256, %256 : vector<64x64xf32>
    %cst_71 = arith.constant dense<0.000000e+00> : vector<64xf32>
    %258 = vector.multi_reduction <add>, %257, %cst_71 [1] : vector<64x64xf32> to vector<64xf32>
    %259 = vector.shape_cast %258 : vector<64xf32> to vector<64x1xf32>
    %cst_72 = arith.constant 6.400000e+01 : f32
    %260 = vector.broadcast %cst_72 : f32 to vector<64x1xf32>
    %261 = arith.divf %259, %260 : vector<64x1xf32>
    %262 = vector.broadcast %254 : vector<64x1xf32> to vector<64x64xf32>
    %263 = arith.subf %250, %262 : vector<64x64xf32>
    %cst_73 = arith.constant 9.99999974E-6 : f32
    %264 = vector.broadcast %cst_73 : f32 to vector<64x1xf32>
    %265 = arith.addf %261, %264 : vector<64x1xf32>
    %266 = math.rsqrt %265 : vector<64x1xf32>
    %267 = vector.broadcast %266 : vector<64x1xf32> to vector<64x64xf32>
    %268 = arith.mulf %263, %267 : vector<64x64xf32>
    %269 = vector.broadcast %168 : vector<1x64xf32> to vector<64x64xf32>
    %270 = arith.mulf %268, %269 : vector<64x64xf32>
    %271 = vector.broadcast %169 : vector<1x64xf32> to vector<64x64xf32>
    %272 = arith.addf %270, %271 : vector<64x64xf32>
    %c1_74 = arith.constant 1 : index
    %c0_75 = arith.constant 0 : index
    %c0_76 = arith.constant 0 : index
    %273 = vector.load %arg8[%c1_74, %c0_75, %c0_76] : memref<2x64x128xf32, #tpu.memory_space<vmem>>, vector<1x64x128xf32>
    %274 = vector.shape_cast %273 : vector<1x64x128xf32> to vector<64x128xf32>
    %cst_77 = arith.constant dense<0.000000e+00> : vector<64x128xf32>
    %275 = tpu.matmul %272, %274, %cst_77 {dimension_numbers = #tpu.dot_dimension_numbers<[1], [0], [0], [1], [0, 0, 1, 1], [], []>} : vector<64x64xf32>, vector<64x128xf32>, vector<64x128xf32> -> vector<64x128xf32>
    %276 = vector.broadcast %165 : vector<1x128xf32> to vector<64x128xf32>
    %277 = arith.addf %275, %276 : vector<64x128xf32>
    %cst_78 = arith.constant 0.000000e+00 : f32
    %278 = vector.broadcast %cst_78 : f32 to vector<64x128xf32>
    %279 = arith.maximumf %277, %278 : vector<64x128xf32>
    %c1_79 = arith.constant 1 : index
    %c0_80 = arith.constant 0 : index
    %c0_81 = arith.constant 0 : index
    %280 = vector.load %arg9[%c1_79, %c0_80, %c0_81] : memref<2x128x64xf32, #tpu.memory_space<vmem>>, vector<1x128x64xf32>
    %281 = vector.shape_cast %280 : vector<1x128x64xf32> to vector<128x64xf32>
    %cst_82 = arith.constant dense<0.000000e+00> : vector<64x64xf32>
    %282 = tpu.matmul %279, %281, %cst_82 {dimension_numbers = #tpu.dot_dimension_numbers<[1], [0], [0], [1], [0, 0, 1, 1], [], []>} : vector<64x128xf32>, vector<128x64xf32>, vector<64x64xf32> -> vector<64x64xf32>
    %283 = vector.broadcast %167 : vector<1x64xf32> to vector<64x64xf32>
    %284 = arith.addf %282, %283 : vector<64x64xf32>
    %285 = arith.addf %272, %284 : vector<64x64xf32>
    %cst_83 = arith.constant dense<0.000000e+00> : vector<64xf32>
    %286 = vector.multi_reduction <add>, %285, %cst_83 [1] : vector<64x64xf32> to vector<64xf32>
    %287 = vector.shape_cast %286 : vector<64xf32> to vector<64x1xf32>
    %cst_84 = arith.constant 6.400000e+01 : f32
    %288 = vector.broadcast %cst_84 : f32 to vector<64x1xf32>
    %289 = arith.divf %287, %288 : vector<64x1xf32>
    %290 = vector.broadcast %289 : vector<64x1xf32> to vector<64x64xf32>
    %291 = arith.subf %285, %290 : vector<64x64xf32>
    %292 = arith.mulf %291, %291 : vector<64x64xf32>
    %cst_85 = arith.constant dense<0.000000e+00> : vector<64xf32>
    %293 = vector.multi_reduction <add>, %292, %cst_85 [1] : vector<64x64xf32> to vector<64xf32>
    %294 = vector.shape_cast %293 : vector<64xf32> to vector<64x1xf32>
    %cst_86 = arith.constant 6.400000e+01 : f32
    %295 = vector.broadcast %cst_86 : f32 to vector<64x1xf32>
    %296 = arith.divf %294, %295 : vector<64x1xf32>
    %297 = vector.broadcast %289 : vector<64x1xf32> to vector<64x64xf32>
    %298 = arith.subf %285, %297 : vector<64x64xf32>
    %cst_87 = arith.constant 9.99999974E-6 : f32
    %299 = vector.broadcast %cst_87 : f32 to vector<64x1xf32>
    %300 = arith.addf %296, %299 : vector<64x1xf32>
    %301 = math.rsqrt %300 : vector<64x1xf32>
    %302 = vector.broadcast %301 : vector<64x1xf32> to vector<64x64xf32>
    %303 = arith.mulf %298, %302 : vector<64x64xf32>
    %304 = vector.broadcast %170 : vector<1x64xf32> to vector<64x64xf32>
    %305 = arith.mulf %303, %304 : vector<64x64xf32>
    %306 = vector.broadcast %171 : vector<1x64xf32> to vector<64x64xf32>
    %307 = arith.addf %305, %306 : vector<64x64xf32>
    %c0_88 = arith.constant 0 : index
    %c0_89 = arith.constant 0 : index
    %308 = vector.load %arg4[%c0_88, %c0_89] : memref<8x64xf32, #tpu.memory_space<vmem>>, vector<8x64xf32>
    %cst_90 = arith.constant dense<0.000000e+00> : vector<8x64xf32>
    %309 = tpu.matmul %308, %307, %cst_90 {dimension_numbers = #tpu.dot_dimension_numbers<[1], [0], [0], [1], [0, 0, 1, 1], [], []>} : vector<8x64xf32>, vector<64x64xf32>, vector<8x64xf32> -> vector<8x64xf32>
    %310 = arith.mulf %309, %309 : vector<8x64xf32>
    %cst_91 = arith.constant dense<0.000000e+00> : vector<8xf32>
    %311 = vector.multi_reduction <add>, %310, %cst_91 [1] : vector<8x64xf32> to vector<8xf32>
    %312 = vector.shape_cast %311 : vector<8xf32> to vector<8x1xf32>
    %cst_92 = arith.constant 1.000000e-24 : f32
    %313 = vector.broadcast %cst_92 : f32 to vector<8x1xf32>
    %314 = arith.maximumf %312, %313 : vector<8x1xf32>
    %315 = math.rsqrt %314 : vector<8x1xf32>
    %316 = vector.broadcast %315 : vector<8x1xf32> to vector<8x64xf32>
    %317 = arith.mulf %309, %316 : vector<8x64xf32>
    %318 = vector.extract_strided_slice %0 {offsets = [0, 0], sizes = [1, 64], strides = [1, 1]} : vector<8x64xf32> to vector<1x64xf32>
    %319 = vector.extract_strided_slice %0 {offsets = [1, 0], sizes = [1, 64], strides = [1, 1]} : vector<8x64xf32> to vector<1x64xf32>
    %cst_93 = arith.constant dense<0.000000e+00> : vector<8xf32>
    %320 = vector.multi_reduction <add>, %317, %cst_93 [1] : vector<8x64xf32> to vector<8xf32>
    %321 = vector.shape_cast %320 : vector<8xf32> to vector<8x1xf32>
    %cst_94 = arith.constant 6.400000e+01 : f32
    %322 = vector.broadcast %cst_94 : f32 to vector<8x1xf32>
    %323 = arith.divf %321, %322 : vector<8x1xf32>
    %324 = vector.broadcast %323 : vector<8x1xf32> to vector<8x64xf32>
    %325 = arith.subf %317, %324 : vector<8x64xf32>
    %326 = arith.mulf %325, %325 : vector<8x64xf32>
    %cst_95 = arith.constant dense<0.000000e+00> : vector<8xf32>
    %327 = vector.multi_reduction <add>, %326, %cst_95 [1] : vector<8x64xf32> to vector<8xf32>
    %328 = vector.shape_cast %327 : vector<8xf32> to vector<8x1xf32>
    %cst_96 = arith.constant 6.400000e+01 : f32
    %329 = vector.broadcast %cst_96 : f32 to vector<8x1xf32>
    %330 = arith.divf %328, %329 : vector<8x1xf32>
    %331 = vector.broadcast %323 : vector<8x1xf32> to vector<8x64xf32>
    %332 = arith.subf %317, %331 : vector<8x64xf32>
    %cst_97 = arith.constant 9.99999974E-6 : f32
    %333 = vector.broadcast %cst_97 : f32 to vector<8x1xf32>
    %334 = arith.addf %330, %333 : vector<8x1xf32>
    %335 = math.rsqrt %334 : vector<8x1xf32>
    %336 = vector.broadcast %335 : vector<8x1xf32> to vector<8x64xf32>
    %337 = arith.mulf %332, %336 : vector<8x64xf32>
    %338 = vector.broadcast %318 : vector<1x64xf32> to vector<8x64xf32>
    %339 = arith.mulf %337, %338 : vector<8x64xf32>
    %340 = vector.broadcast %319 : vector<1x64xf32> to vector<8x64xf32>
    %341 = arith.addf %339, %340 : vector<8x64xf32>
    %c0_98 = arith.constant 0 : index
    %c0_99 = arith.constant 0 : index
    %c0_100 = arith.constant 0 : index
    %342 = vector.load %arg11[%c0_98, %c0_99, %c0_100] : memref<2x64x64xf32, #tpu.memory_space<vmem>>, vector<1x64x64xf32>
    %343 = vector.shape_cast %342 : vector<1x64x64xf32> to vector<64x64xf32>
    %cst_101 = arith.constant dense<0.000000e+00> : vector<8x64xf32>
    %344 = tpu.matmul %341, %343, %cst_101 {dimension_numbers = #tpu.dot_dimension_numbers<[1], [0], [0], [1], [0, 0, 1, 1], [], []>} : vector<8x64xf32>, vector<64x64xf32>, vector<8x64xf32> -> vector<8x64xf32>
    %345 = vector.extract_strided_slice %0 {offsets = [2, 0], sizes = [1, 64], strides = [1, 1]} : vector<8x64xf32> to vector<1x64xf32>
    %346 = vector.broadcast %345 : vector<1x64xf32> to vector<8x64xf32>
    %347 = arith.addf %344, %346 : vector<8x64xf32>
    %cst_102 = arith.constant 0.000000e+00 : f32
    %348 = vector.broadcast %cst_102 : f32 to vector<8x64xf32>
    %349 = arith.maximumf %347, %348 : vector<8x64xf32>
    %350 = vector.extract_strided_slice %0 {offsets = [3, 0], sizes = [1, 64], strides = [1, 1]} : vector<8x64xf32> to vector<1x64xf32>
    %351 = vector.extract_strided_slice %0 {offsets = [4, 0], sizes = [1, 64], strides = [1, 1]} : vector<8x64xf32> to vector<1x64xf32>
    %cst_103 = arith.constant dense<0.000000e+00> : vector<8xf32>
    %352 = vector.multi_reduction <add>, %349, %cst_103 [1] : vector<8x64xf32> to vector<8xf32>
    %353 = vector.shape_cast %352 : vector<8xf32> to vector<8x1xf32>
    %cst_104 = arith.constant 6.400000e+01 : f32
    %354 = vector.broadcast %cst_104 : f32 to vector<8x1xf32>
    %355 = arith.divf %353, %354 : vector<8x1xf32>
    %356 = vector.broadcast %355 : vector<8x1xf32> to vector<8x64xf32>
    %357 = arith.subf %349, %356 : vector<8x64xf32>
    %358 = arith.mulf %357, %357 : vector<8x64xf32>
    %cst_105 = arith.constant dense<0.000000e+00> : vector<8xf32>
    %359 = vector.multi_reduction <add>, %358, %cst_105 [1] : vector<8x64xf32> to vector<8xf32>
    %360 = vector.shape_cast %359 : vector<8xf32> to vector<8x1xf32>
    %cst_106 = arith.constant 6.400000e+01 : f32
    %361 = vector.broadcast %cst_106 : f32 to vector<8x1xf32>
    %362 = arith.divf %360, %361 : vector<8x1xf32>
    %363 = vector.broadcast %355 : vector<8x1xf32> to vector<8x64xf32>
    %364 = arith.subf %349, %363 : vector<8x64xf32>
    %cst_107 = arith.constant 9.99999974E-6 : f32
    %365 = vector.broadcast %cst_107 : f32 to vector<8x1xf32>
    %366 = arith.addf %362, %365 : vector<8x1xf32>
    %367 = math.rsqrt %366 : vector<8x1xf32>
    %368 = vector.broadcast %367 : vector<8x1xf32> to vector<8x64xf32>
    %369 = arith.mulf %364, %368 : vector<8x64xf32>
    %370 = vector.broadcast %350 : vector<1x64xf32> to vector<8x64xf32>
    %371 = arith.mulf %369, %370 : vector<8x64xf32>
    %372 = vector.broadcast %351 : vector<1x64xf32> to vector<8x64xf32>
    %373 = arith.addf %371, %372 : vector<8x64xf32>
    %c1_108 = arith.constant 1 : index
    %c0_109 = arith.constant 0 : index
    %c0_110 = arith.constant 0 : index
    %374 = vector.load %arg11[%c1_108, %c0_109, %c0_110] : memref<2x64x64xf32, #tpu.memory_space<vmem>>, vector<1x64x64xf32>
    %375 = vector.shape_cast %374 : vector<1x64x64xf32> to vector<64x64xf32>
    %cst_111 = arith.constant dense<0.000000e+00> : vector<8x64xf32>
    %376 = tpu.matmul %373, %375, %cst_111 {dimension_numbers = #tpu.dot_dimension_numbers<[1], [0], [0], [1], [0, 0, 1, 1], [], []>} : vector<8x64xf32>, vector<64x64xf32>, vector<8x64xf32> -> vector<8x64xf32>
    %377 = vector.extract_strided_slice %0 {offsets = [5, 0], sizes = [1, 64], strides = [1, 1]} : vector<8x64xf32> to vector<1x64xf32>
    %378 = vector.broadcast %377 : vector<1x64xf32> to vector<8x64xf32>
    %379 = arith.addf %376, %378 : vector<8x64xf32>
    %380 = tpu.concatenate %317, %379 in 1 : vector<8x64xf32>, vector<8x64xf32> -> vector<8x128xf32>
    %c0_112 = arith.constant 0 : index
    %c0_113 = arith.constant 0 : index
    %381 = vector.load %arg13[%c0_112, %c0_113] : memref<8x128xf32, #tpu.memory_space<vmem>>, vector<8x128xf32>
    tpu.vector_store %arg13[%c0_112, %c0_113], %380 {strides = array<i32>} : memref<8x128xf32, #tpu.memory_space<vmem>>, vector<8x128xf32>,
    return
  }
}

</mosaic_0001>

<bundles_post_ra>
// kernel: _forward_jit.1
= control target key start
LH: loop header
LB: loop body
LE: loop exit
PB: predicated region body
PF: predicated region fallthrough
CT: control target
= control target key end

     0   :  { %18 = vsyncpa [#allocation3], 0  ;;  %s22525_s0 = inlined_call_operand.hbm [shape: f32[64,64], index: 0, kind: input, shape index: {}]   ;;  %s22526_s1 = inlined_call_operand.vmem [shape: f32[128,64], index: 1, kind: input, shape index: {}]   ;;  %s22527_s2 = inlined_call_operand.vmem [shape: f32[64,1], index: 2, kind: input, shape index: {}]   ;;  %s22528_s3 = inlined_call_operand.vmem [shape: f32[32,16], index: 3, kind: input, shape index: {}]   ;;  %s22529_s4 = inlined_call_operand.vmem [shape: f32[8,64], index: 4, kind: input, shape index: {}]   ;;  %s22530_s5 = inlined_call_operand.vmem [shape: f32[2,64,64], index: 5, kind: input, shape index: {}]   ;;  %s22531_s6 = inlined_call_operand.vmem [shape: f32[2,64,128], index: 6, kind: input, shape index: {}]   ;;  %s22532_s7 = inlined_call_operand.hbm [shape: f32[2,64,64], index: 7, kind: input, shape index: {}]   ;;  %s22533_s8 = inlined_call_operand.hbm [shape: f32[2,64,128], index: 8, kind: input, shape index: {}]   ;;  %s22534_s9 = inlined_call_operand.vmem [shape: f32[2,128,64], index: 9, kind: input, shape index: {}]   ;;  %s22535_s10 = inlined_call_operand.hbm [shape: f32[2,16,128], index: 10, kind: input, shape index: {}]   ;;  %s22536_s11 = inlined_call_operand.hbm [shape: f32[2,64,64], index: 11, kind: input, shape index: {}]   ;;  %s22537_s12 = inlined_call_operand.hbm [shape: f32[8,64], index: 12, kind: input, shape index: {}]   ;;  %s22538_s13 = inlined_call_operand.vmem [shape: f32[8,128], index: 13, kind: output, shape index: {}]  }
   0x1   :  { %19 = vsyncpa [#allocation5], 0 }
   0x2   :  { %20 = vsyncpa [#allocation8], 0 }
   0x3   :  { %21 = vsyncpa [#allocation11], 0  ;;  %s19090_s25 = smov [#allocation4]   ;;  %s19091_s27 = smov [#allocation7]  }
   0x4   :  { %s51_s26 = sshll.u32 %s19090_s25, 4  ;;  %s77_s28 = sshll.u32 %s19091_s27, 4  ;;  %s52_s26 = int_to_ptr.vmem [resolvable:$true] %s51_s26  ;;  %s19177_s28 = int_to_ptr.vmem [resolvable:$true] %s77_s28 }
   0x5   :  { %s18950_s14 = scalar_lea.hbm %s22532_s7, 2048 }
   0x6   :  { %p18951_p0 = scmp.ne.s32.totalorder %s22532_s7, %s18950_s14  ;;  %p18954_p1 = scmp.lt.u32.totalorder %s18950_s14, %s22532_s7 }
   0x8   :  { %p18956_p2 = pnand %p18954_p1, %p18951_p0 }
   0xa   :  { %18959 = shalt.err (!%p18956_p2)
}
   0xb   :  { %s18960_s19 = scalar_lea.vmem %s52_s26, 2048  ;;  %p18965_p4 = scmp.lt.s32.totalorder %s52_s26, %s52_s26 }
   0xc   :  { %p18961_p3 = scmp.ne.s32.totalorder %s52_s26, %s18960_s19  ;;  %p18966_p5 = scmp.lt.s32.totalorder %s18960_s19, %s18960_s19 }
   0xe   :  { %p18967_p6 = por %p18966_p5, %p18965_p4 }
  0x10   :  { %p18968_p7 = pnand %p18967_p6, %p18961_p3 }
  0x12   :  { %18971 = shalt.err (!%p18968_p7)
}
  0x13   :  { %s19092_s20 = smov 128   ;;  %s19093_s21 = smov 8  }
  0x14   :  { %57 = dma.hbm_to_vmem [thread:$0]  %s22532_s7, 2048, %s52_s26, [#allocation5], %s19092_s20, %s19092_s20, %s19093_s21  }
  0x15   :  { %s18972_s27 = scalar_lea.hbm %s22535_s10, 512 }
  0x16   :  { %p18973_p8 = scmp.ne.s32.totalorder %s22535_s10, %s18972_s27  ;;  %p18976_p9 = scmp.lt.u32.totalorder %s18972_s27, %s22535_s10 }
  0x18   :  { %p18978_p10 = pnand %p18976_p9, %p18973_p8 }
  0x1a   :  { %18981 = shalt.err (!%p18978_p10)
}
  0x1b   :  { %s18982_s16 = scalar_lea.vmem %s19177_s28, 512  ;;  %p18987_p12 = scmp.lt.s32.totalorder %s19177_s28, %s19177_s28 }
  0x1c   :  { %p18983_p11 = scmp.ne.s32.totalorder %s19177_s28, %s18982_s16  ;;  %p18988_p13 = scmp.lt.s32.totalorder %s18982_s16, %s18982_s16 }
  0x1e   :  { %p18989_p0 = por %p18988_p13, %p18987_p12 }
  0x20   :  { %p18990_p1 = pnand %p18989_p0, %p18983_p11 }
  0x22   :  { %18993 = shalt.err (!%p18990_p1)
}
  0x23   :  { %83 = dma.hbm_to_vmem [thread:$0]  %s22535_s10, 512, %s19177_s28, [#allocation8], %s19092_s20, %s19092_s20, %s19093_s21  }
  0x24   :  { %s19094_s17 = smov [#allocation2]   ;;  %s19095_s19 = smov [#allocation6]  }
  0x25   :  { %s27_s18 = sshll.u32 %s19094_s17, 4  ;;  %s63_s22 = sshll.u32 %s19095_s19, 4  ;;  %s28_s18 = int_to_ptr.vmem [resolvable:$true] %s27_s18  ;;  %s19214_s22 = int_to_ptr.vmem [resolvable:$true] %s63_s22 }
  0x26   :  { %s18994_s25 = scalar_lea.hbm %s22525_s0, 1024 }
  0x27   :  { %p18995_p2 = scmp.ne.s32.totalorder %s22525_s0, %s18994_s25  ;;  %p18998_p3 = scmp.lt.u32.totalorder %s18994_s25, %s22525_s0 }
  0x29   :  { %p19000_p4 = pnand %p18998_p3, %p18995_p2 }
  0x2b   :  { %19003 = shalt.err (!%p19000_p4)
}
  0x2c   :  { %s19004_s10 = scalar_lea.vmem %s28_s18, 1024  ;;  %p19009_p6 = scmp.lt.s32.totalorder %s28_s18, %s28_s18 }
  0x2d   :  { %p19005_p5 = scmp.ne.s32.totalorder %s28_s18, %s19004_s10  ;;  %p19010_p7 = scmp.lt.s32.totalorder %s19004_s10, %s19004_s10 }
  0x2f   :  { %p19011_p8 = por %p19010_p7, %p19009_p6 }
  0x31   :  { %p19012_p9 = pnand %p19011_p8, %p19005_p5 }
  0x33   :  { %19015 = shalt.err (!%p19012_p9)
}
  0x34   :  { %33 = dma.hbm_to_vmem [thread:$0]  %s22525_s0, 1024, %s28_s18, [#allocation3], %s19092_s20, %s19092_s20, %s19093_s21  }
  0x35   :  { %s19016_s26 = scalar_lea.hbm %s22533_s8, 2048 }
  0x36   :  { %p19017_p10 = scmp.ne.s32.totalorder %s22533_s8, %s19016_s26  ;;  %p19020_p11 = scmp.lt.u32.totalorder %s19016_s26, %s22533_s8 }
  0x38   :  { %p19022_p12 = pnand %p19020_p11, %p19017_p10 }
  0x3a   :  { %19025 = shalt.err (!%p19022_p12)
}
  0x3b   :  { %s19026_s25 = scalar_lea.vmem %s19214_s22, 2048  ;;  %p19031_p0 = scmp.lt.s32.totalorder %s19214_s22, %s19214_s22 }
  0x3c   :  { %p19027_p13 = scmp.ne.s32.totalorder %s19214_s22, %s19026_s25  ;;  %p19032_p1 = scmp.lt.s32.totalorder %s19026_s25, %s19026_s25 }
  0x3e   :  { %p19033_p2 = por %p19032_p1, %p19031_p0 }
  0x40   :  { %p19034_p3 = pnand %p19033_p2, %p19027_p13 }
  0x42   :  { %19037 = shalt.err (!%p19034_p3)
}
  0x43   :  { %69 = dma.hbm_to_vmem [thread:$0]  %s22533_s8, 2048, %s19214_s22, [#allocation5], %s19092_s20, %s19092_s20, %s19093_s21  }
  0x44   :  { %s19096_s27 = smov [#allocation9]   ;;  %s19097_s30 = smov [#allocation10]  }
  0x45   :  { %s89_s29 = sshll.u32 %s19096_s27, 4  ;;  %s102_s14 = sshll.u32 %s19097_s30, 4  ;;  %s90_s29 = int_to_ptr.vmem [resolvable:$true] %s89_s29  ;;  %s103_s14 = int_to_ptr.vmem [resolvable:$true] %s102_s14 }
  0x46   :  { %s19038_s15 = scalar_lea.hbm %s22536_s11, 2048 }
  0x47   :  { %p19039_p4 = scmp.ne.s32.totalorder %s22536_s11, %s19038_s15  ;;  %p19042_p5 = scmp.lt.u32.totalorder %s19038_s15, %s22536_s11 }
  0x49   :  { %p19044_p6 = pnand %p19042_p5, %p19039_p4 }
  0x4b   :  { %19047 = shalt.err (!%p19044_p6)
}
  0x4c   :  { %s19048_s8 = scalar_lea.vmem %s90_s29, 2048  ;;  %p19053_p8 = scmp.lt.s32.totalorder %s90_s29, %s90_s29 }
  0x4d   :  { %p19049_p7 = scmp.ne.s32.totalorder %s90_s29, %s19048_s8  ;;  %p19054_p9 = scmp.lt.s32.totalorder %s19048_s8, %s19048_s8 }
  0x4f   :  { %p19055_p10 = por %p19054_p9, %p19053_p8 }
  0x51   :  { %p19056_p11 = pnand %p19055_p10, %p19049_p7 }
  0x53   :  { %19059 = shalt.err (!%p19056_p11)
}
  0x54   :  { %95 = dma.hbm_to_vmem [thread:$0]  %s22536_s11, 2048, %s90_s29, [#allocation8], %s19092_s20, %s19092_s20, %s19093_s21  }
  0x55   :  { %s19060_s25 = scalar_lea.hbm %s22537_s12, 128 }
  0x56   :  { %p19061_p12 = scmp.ne.s32.totalorder %s22537_s12, %s19060_s25  ;;  %p19064_p13 = scmp.lt.u32.totalorder %s19060_s25, %s22537_s12 }
  0x58   :  { %p19066_p0 = pnand %p19064_p13, %p19061_p12 }
  0x5a   :  { %19069 = shalt.err (!%p19066_p0)
}
  0x5b   :  { %s19070_s10 = scalar_lea.vmem %s103_s14, 128  ;;  %p19075_p2 = scmp.lt.s32.totalorder %s103_s14, %s103_s14 }
  0x5c   :  { %p19071_p1 = scmp.ne.s32.totalorder %s103_s14, %s19070_s10  ;;  %p19076_p3 = scmp.lt.s32.totalorder %s19070_s10, %s19070_s10 }
  0x5e   :  { %p19077_p4 = por %p19076_p3, %p19075_p2 }
  0x60   :  { %p19078_p5 = pnand %p19077_p4, %p19071_p1 }
  0x62   :  { %19081 = shalt.err (!%p19078_p5)
}
  0x63   :  { %105 = dma.hbm_to_vmem [thread:$0]  %s22537_s12, 128, %s103_s14, [#allocation11]  }
  0x64   :  { %19082 = dma.done.wait [#allocation3], 1024  }
  0x65   :  { %19083 = vsyncadd [#allocation3], 4294966272 }
  0x66   :  { %19084 = dma.done.wait [#allocation5], 4096  }
  0x67   :  { %19085 = vsyncadd [#allocation5], 4294963200 }
  0x68   :  { %19086 = dma.done.wait [#allocation8], 2560  }
  0x69   :  { %19087 = vsyncadd [#allocation8], 4294964736 }
  0x6a   :  { %19088 = dma.done.wait [#allocation11], 128  }
  0x6b   :  { %19089 = vsyncadd [#allocation11], 4294967168  ;;  %v19098_v0 = vmov 0   ;;  %v127_v1 = vld [vmem:[%s22527_s2 + $0x10] sm:$0xff]  ;;  %v125_v2 = vld [vmem:[%s22527_s2] sm:$0xff]  ;;  %vm435_vm6 = vcmask 523264   ;;  %v189_v58 = vlaneseq }
  0x6c   :  { %18040 = vset.pattern.permute.xlu1 %v19098_v0  ;;  %18039 = vset.pattern.permute.xlu0 %v19098_v0  ;;  %v128_v3 = vld [vmem:[%s22527_s2 + $0x18] sm:$0xff]  ;;  %vm135_vm0 = vcmp.gt.f32.partialorder %v127_v1, 0.5  ;;  %vm133_vm1 = vcmp.gt.f32.partialorder %v125_v2, 0.5  ;;  %v126_v4 = vld [vmem:[%s22527_s2 + $0x8] sm:$0xff]  ;;  %v129_v8 = vld [vmem:[%s22527_s2 + $0x20] sm:$0xff]  ;;  %v22539_v57 = vmov 0.0|0.0  }
  0x6d   :  { %vm136_vm2 = vcmp.gt.f32.partialorder %v128_v3, 0.5  ;;  %v151_v5 = vsel %vm135_vm0, 1, %v19098_v0  ;;  %v149_v6 = vsel %vm133_vm1, 1, %v19098_v0  ;;  %vm134_vm3 = vcmp.gt.f32.partialorder %v126_v4, 0.5  ;;  %v130_v7 = vld [vmem:[%s22527_s2 + $0x28] sm:$0xff]  ;;  %v565_v9 = vld [vmem:[%s22531_s6] sm:$0xff] }
  0x6e   :  { %164 = vperm.xlu1 %18040, %v151_v5   ;;  %158 = vperm.xlu0 %18039, %v149_v6   ;;  %v566_v10 = vld [vmem:[%s22531_s6 + $0x8] sm:$0xff]  ;;  %v152_v11 = vsel %vm136_vm2, 1, %v19098_v0  ;;  %v150_v12 = vsel %vm134_vm3, 1, %v19098_v0  ;;  %v567_v13 = vld [vmem:[%s22531_s6 + $0x10] sm:$0xff]  ;;  %v568_v14 = vld [vmem:[%s22531_s6 + $0x18] sm:$0xff]  ;;  %vm138_vm4 = vcmp.gt.f32.partialorder %v130_v7, 0.5 }
  0x6f   :  { %vm137_vm5 = vcmp.gt.f32.partialorder %v129_v8, 0.5  ;;  %v17362_v15 = vpack.c.bf16 %v566_v10, %v565_v9  ;;  %v132_v16 = vld [vmem:[%s22527_s2 + $0x38] sm:$0xff]  ;;  %v131_v17 = vld [vmem:[%s22527_s2 + $0x30] sm:$0xff]  ;;  %v17366_v18 = vpack.c.bf16 %v568_v14, %v567_v13  ;;  %v201_v19 = vld [vmem:[%s22526_s1] sm:$0xff]  ;;  %v154_v22 = vsel %vm138_vm4, 1, %v19098_v0  ;;  %s19102_s26 = smov 112  }
  0x70   :  { %v569_v20 = vld [vmem:[%s22531_s6 + $0x20] sm:$0xff]  ;;  %v570_v21 = vld [vmem:[%s22531_s6 + $0x28] sm:$0xff]  ;;  %v153_v23 = vsel %vm137_vm5, 1, %v19098_v0  ;;  %16029 = vmatprep.mubr.msk.f32.mxu1 %vm435_vm6, %v201_v19  ;;  %vm140_vm7 = vcmp.gt.f32.partialorder %v132_v16, 0.5  ;;  %vm139_vm8 = vcmp.gt.f32.partialorder %v131_v17, 0.5  ;;  %v425_v26 = vld [vmem:[%s22530_s5 + $0x10] sm:$0xff] }
  0x71   :  { %17363 = vmatprep.subr.bf16.mxu1 %v17362_v15  ;;  %v423_v24 = vld [vmem:[%s22530_s5] sm:$0xff]  ;;  %v424_v25 = vld [vmem:[%s22530_s5 + $0x8] sm:$0xff]  ;;  %v17370_v27 = vpack.c.bf16 %v570_v21, %v569_v20  ;;  %v571_v28 = vld [vmem:[%s22531_s6 + $0x30] sm:$0xff]  ;;  %v156_v35 = vsel %vm140_vm7, 1, %v19098_v0  ;;  %v155_v36 = vsel %vm139_vm8, 1, %v19098_v0  ;;  %v19418_v59 = vshrl.u32 %v189_v58, 7 }
  0x72   :  { %167 = vperm.xlu1 %18040, %v152_v11   ;;  %161 = vperm.xlu0 %18039, %v150_v12   ;;  %v17346_v29 = vpack.c.bf16 %v424_v25, %v423_v24  ;;  %v426_v30 = vld [vmem:[%s22530_s5 + $0x18] sm:$0xff]  ;;  %v427_v33 = vld [vmem:[%s22530_s5 + $0x20] sm:$0xff]  ;;  %v428_v34 = vld [vmem:[%s22530_s5 + $0x28] sm:$0xff]  ;;  %vm19100_vm1 = vmmov 0   ;;  %vm938_vm2 = vcmask 130048   ;;  %s19103_s17 = smov 96  }
  0x73   :  { %17365 = vmatpush3.bf16.msra.mxu1 %v17362_v15  ;;  %v572_v31 = vld [vmem:[%s22531_s6 + $0x38] sm:$0xff]  ;;  %v17350_v32 = vpack.c.bf16 %v426_v30, %v425_v26  ;;  %v17354_v38 = vpack.c.bf16 %v428_v34, %v427_v33  ;;  %v429_v39 = vld [vmem:[%s22530_s5 + $0x30] sm:$0xff]  ;;  %v202_v42 = vld [vmem:[%s22526_s1 + $0x8] sm:$0xff]  ;;  %22633 = vst [vmem:[#allocation16_spill] sm:$0xff] %v19418_v59  ;;  %v19421_v60 = vsub.s32 6, %v19418_v59  ;;  %v19461_v24 = vsub.s32 1, %v19418_v59 }
  0x74   :  { %17367 = vmatprep.subr.bf16.mxu1 %v17366_v18  ;;  %17347 = vmatprep.subr.bf16.mxu0 %v17346_v29  ;;  %v17374_v37 = vpack.c.bf16 %v572_v31, %v571_v28  ;;  %v430_v40 = vld [vmem:[%s22530_s5 + $0x38] sm:$0xff]  ;;  %v203_v43 = vld [vmem:[%s22526_s1 + $0x10] sm:$0xff]  ;;  %v205_v45 = vld [vmem:[%s22526_s1 + $0x20] sm:$0xff]  ;;  %v22644_v31 = vmov 0  ;;  %s19104_s8 = smov 80   ;;  %s19105_s22 = smov 64  }
  0x75   :  { %17349 = vmatpush3.bf16.msra.mxu0 %v17346_v29  ;;  %v17358_v41 = vpack.c.bf16 %v430_v40, %v429_v39  ;;  %v204_v44 = vld [vmem:[%s22526_s1 + $0x18] sm:$0xff]  ;;  %v206_v46 = vld [vmem:[%s22526_s1 + $0x28] sm:$0xff]  ;;  %v207_v47 = vld [vmem:[%s22526_s1 + $0x30] sm:$0xff]  ;;  %22634 = vst [vmem:[#allocation17_spill] sm:$0xff] %v19421_v60 }
  0x76   :  { %173 = vperm.xlu1 %18040, %v154_v22   ;;  %170 = vperm.xlu0 %18039, %v153_v23   ;;  %v208_v48 = vld [vmem:[%s22526_s1 + $0x38] sm:$0xff]  ;;  %v209_v49 = vld [vmem:[%s22526_s1 + $0x40] sm:$0xff]  ;;  %v210_v50 = vld [vmem:[%s22526_s1 + $0x48] sm:$0xff]  ;;  %v22541_v23 = vmov 0.0   ;;  %22643 = vst [vmem:[#allocation26_spill] sm:$0xff] %v19461_v24 }
  0x77   :  { %17369 = vmatpush3.bf16.msra.mxu1 %v17366_v18  ;;  %17351 = vmatprep.subr.bf16.mxu0 %v17350_v32  ;;  %v211_v51 = vld [vmem:[%s22526_s1 + $0x50] sm:$0xff]  ;;  %v212_v52 = vld [vmem:[%s22526_s1 + $0x58] sm:$0xff]  ;;  %v213_v53 = vld [vmem:[%s22526_s1 + $0x60] sm:$0xff] }
  0x78   :  { %17371 = vmatprep.subr.bf16.mxu1 %v17370_v27  ;;  %v214_v54 = vld [vmem:[%s22526_s1 + $0x68] sm:$0xff]  ;;  %v215_v55 = vld [vmem:[%s22526_s1 + $0x70] sm:$0xff]  ;;  %v216_v56 = vld [vmem:[%s22526_s1 + $0x78] sm:$0xff] }
  0x79   :  { %17353 = vmatpush3.bf16.msra.mxu0 %v17350_v32  ;;  %v124_v61 = vld [vmem:[#allocation10] sm:$0xff]  ;;  %v143_v3 = vld [vmem:[#allocation2 + $0x10] sm:$0xff]  ;;  %v142_v4 = vld [vmem:[#allocation2 + $0x8] sm:$0xff] }
  0x7a   :  { %179 = vperm.xlu1 %18040, %v156_v35   ;;  %176 = vperm.xlu0 %18039, %v155_v36   ;;  %v192_v62 = vrot.slane %v124_v61, %v19421_v60  ;;  %v141_v63 = vld [vmem:[#allocation2] sm:$0xff]  ;;  %v144_v8 = vld [vmem:[#allocation2 + $0x18] sm:$0xff]  ;;  %v146_v15 = vld [vmem:[#allocation2 + $0x28] sm:$0xff] }
  0x7b   :  { %17373 = vmatpush3.bf16.msra.mxu1 %v17370_v27  ;;  %17355 = vmatprep.subr.bf16.mxu0 %v17354_v38  ;;  %v145_v10 = vld [vmem:[#allocation2 + $0x20] sm:$0xff]  ;;  %v147_v16 = vld [vmem:[#allocation2 + $0x30] sm:$0xff]  ;;  %v148_v21 = vld [vmem:[#allocation2 + $0x38] sm:$0xff] }
  0x7c   :  { %17375 = vmatprep.subr.bf16.mxu1 %v17374_v37  ;;  %v421_v25 = vld [vmem:[#allocation7] sm:$0xff]  ;;  %vm19466_vm3 = vmpackc.low %vm938_vm2, %vm938_vm2 }
  0x7d   :  { %17357 = vmatpush3.bf16.msra.mxu0 %v17354_v38  ;;  %v576_v26 = vrot.slane %v421_v25, %v19461_v24  ;;  %v22645_v31 = vsel %vm19466_vm3, 4294967295, %v22644_v31 }
  0x7e   :  { %17359 = vmatprep.subr.bf16.mxu0 %v17358_v41  ;;  %22646 = vst [vmem:[#allocation27_spill] sm:$0xff] %v22645_v31 }
  0x7f   :  { %17377 = vmatpush3.bf16.msra.mxu1 %v17374_v37 }
  0x80   :  { %17390 = vmatprep.subr.bf16.mxu1 %v22539_v57 }
  0x81   :  { %17361 = vmatpush3.bf16.msra.mxu0 %v17358_v41 }
  0x82   :  { %16030 = vmatmul.mubr.msk.f32.vlgmr.msra.gmra.mrb[0].mxu1 %vm435_vm6, %v202_v42  ;;  %17378 = vmatprep.subr.bf16.mxu0 %v22539_v57 }
  0x83   :  { %16032 = vmatprep.mubr.msk.f32.mxu1 %vm435_vm6, %v203_v43 }
  0x86   :  { %16033 = vmatmul.mubr.msk.f32.gmra.mrb[2].mxu1 %vm435_vm6, %v204_v44 }
  0x87   :  { %16035 = vmatprep.mubr.msk.f32.mxu1 %vm435_vm6, %v205_v45 }
  0x8a   :  { %16036 = vmatmul.mubr.msk.f32.gmra.mrb[4].mxu1 %vm435_vm6, %v206_v46 }
  0x8b   :  { %16038 = vmatprep.mubr.msk.f32.mxu1 %vm435_vm6, %v207_v47 }
  0x8e   :  { %16039 = vmatmul.mubr.msk.f32.gmra.mrb[6].mxu1 %vm435_vm6, %v208_v48 }
  0x8f   :  { %16041 = vmatprep.mubr.msk.f32.mxu1 %vm435_vm6, %v209_v49 }
  0x92   :  { %16042 = vmatmul.mubr.msk.f32.gmra.mrb[8].mxu1 %vm435_vm6, %v210_v50 }
  0x93   :  { %16044 = vmatprep.mubr.msk.f32.mxu1 %vm435_vm6, %v211_v51 }
  0x96   :  { %16045 = vmatmul.mubr.msk.f32.gmra.mrb[10].mxu1 %vm435_vm6, %v212_v52 }
  0x97   :  { %16047 = vmatprep.mubr.msk.f32.mxu1 %vm435_vm6, %v213_v53 }
  0x9a   :  { %16048 = vmatmul.mubr.msk.f32.gmra.mrb[12].mxu1 %vm435_vm6, %v214_v54 }
  0x9b   :  { %16050 = vmatprep.mubr.msk.f32.mxu1 %vm435_vm6, %v215_v55 }
  0x9e   :  { %16051 = vmatmul.mubr.msk.f32.gmra.mrb[14].mxu1 %vm435_vm6, %v216_v56 }
  0x9f   :  { %16078 = vmatprep.mubr.msk.f32.mxu1 %vm19100_vm1, %v22541_v23 }
  0xed   :  { %v165_v0 = vpop.permute.xlu1 %164  ;;  %v159_v1 = vpop.permute.xlu0 %158 }
  0xee   :  { %vm181_vm9 = vcmp.eq.s32.totalorder %v159_v1, 1  ;;  %vm183_vm10 = vcmp.eq.s32.totalorder %v165_v0, 1 }
  0xef   :  { %v19424_v2 = vsel %vm181_vm9, %v192_v62, %v141_v63  ;;  %v19428_v7 = vsel %vm183_vm10, %v192_v62, %v143_v3 }
  0xf0   :  { %22635 = vst [vmem:[#allocation18_spill] sm:$0xff] %v19424_v2  ;;  %16001 = vmatprep.mubr.msk.f32.mxu0 %vm435_vm6, %v19424_v2  ;;  %22636 = vst [vmem:[#allocation19_spill] sm:$0xff] %v19428_v7 }
  0xf1   :  { %v168_v5 = vpop.permute.xlu1 %167  ;;  %v162_v6 = vpop.permute.xlu0 %161 }
  0xf2   :  { %vm184_vm11 = vcmp.eq.s32.totalorder %v168_v5, 1  ;;  %vm182_vm12 = vcmp.eq.s32.totalorder %v162_v6, 1 }
  0xf3   :  { %v19430_v9 = vsel %vm182_vm12, %v192_v62, %v142_v4  ;;  %v19436_v13 = vsel %vm184_vm11, %v192_v62, %v144_v8 }
  0xf4   :  { %22637 = vst [vmem:[#allocation20_spill] sm:$0xff] %v19430_v9  ;;  %16002 = vmatmul.mubr.msk.f32.vlgmr.msra.gmra.mrb[0].mxu0 %vm435_vm6, %v19430_v9  ;;  %22638 = vst [vmem:[#allocation21_spill] sm:$0xff] %v19436_v13 }
  0xf5   :  { %v174_v11 = vpop.permute.xlu1 %173  ;;  %v171_v12 = vpop.permute.xlu0 %170  ;;  %16004 = vmatprep.mubr.msk.f32.mxu0 %vm435_vm6, %v19428_v7 }
  0xf6   :  { %vm185_vm13 = vcmp.eq.s32.totalorder %v171_v12, 1  ;;  %vm186_vm14 = vcmp.eq.s32.totalorder %v174_v11, 1 }
  0xf7   :  { %v19438_v14 = vsel %vm185_vm13, %v192_v62, %v145_v10  ;;  %v19444_v19 = vsel %vm186_vm14, %v192_v62, %v146_v15 }
  0xf8   :  { %22639 = vst [vmem:[#allocation22_spill] sm:$0xff] %v19438_v14  ;;  %16005 = vmatmul.mubr.msk.f32.gmra.mrb[2].mxu0 %vm435_vm6, %v19436_v13  ;;  %22640 = vst [vmem:[#allocation23_spill] sm:$0xff] %v19444_v19 }
  0xf9   :  { %v180_v17 = vpop.permute.xlu1 %179  ;;  %v177_v18 = vpop.permute.xlu0 %176  ;;  %16007 = vmatprep.mubr.msk.f32.mxu0 %vm435_vm6, %v19438_v14 }
  0xfa   :  { %vm187_vm15 = vcmp.eq.s32.totalorder %v177_v18, 1  ;;  %vm188_vm0 = vcmp.eq.s32.totalorder %v180_v17, 1 }
  0xfb   :  { %v19446_v20 = vsel %vm187_vm15, %v192_v62, %v147_v16  ;;  %v19452_v22 = vsel %vm188_vm0, %v192_v62, %v148_v21 }
  0xfc   :  { %22641 = vst [vmem:[#allocation24_spill] sm:$0xff] %v19446_v20  ;;  %16008 = vmatmul.mubr.msk.f32.gmra.mrb[4].mxu0 %vm435_vm6, %v19444_v19  ;;  %22642 = vst [vmem:[#allocation25_spill] sm:$0xff] %v19452_v22 }
  0xfd   :  { %16010 = vmatprep.mubr.msk.f32.mxu0 %vm435_vm6, %v19446_v20 }
 0x100   :  { %16011 = vmatmul.mubr.msk.f32.gmra.mrb[6].mxu0 %vm435_vm6, %v19452_v22 }
 0x101   :  { %16057 = vmatprep.mubr.msk.f32.mxu0 %vm19100_vm1, %v22541_v23 }
 0x155   :  { %v16031_v27 = vpop.f32.mrb[0].mxu1 }
 0x156   :  { %v697_v28 = vadd.f32 %v16031_v27, %v576_v26  ;;  %v691_v29 = vpop.f32.mrb[1].mxu1  ;;  %v19525_v27 = vsub.s32 0, %v19418_v59 }
 0x157   :  { %v692_v30 = vadd.f32 %v691_v29, %v576_v26 }
 0x158   :  { %22647 = vst [vmem:[#allocation28_spill] sm:$0xff] %v19525_v27 }
 0x159   :  { %v16034_v32 = vpop.f32.mrb[2].mxu1  ;;  %v19470_v33 = vpack.i.bf16 %v697_v28, %v692_v30  ;;  %v17379_v34 = vpack.c.bf16 %v697_v28, %v692_v30  ;;  %v19528_v28 = vrot.slane %v421_v25, %v19525_v27 }
 0x15a   :  { %v707_v35 = vadd.f32 %v16034_v32, %v576_v26  ;;  %v701_v36 = vpop.f32.mrb[3].mxu1 }
 0x15b   :  { %v702_v37 = vadd.f32 %v701_v36, %v576_v26  ;;  %18042 = vrot.lane.b32.xlu0 %v19470_v33, %s19102_s26  ;;  %17381 = vmatpush3.bf16.xpose.msk.msra.mxu0 %vm19466_vm3, %v17379_v34 }
 0x15c   :  { %17382 = vmatprep.subr.bf16.mxu0 %v22539_v57 }
 0x15d   :  { %v16037_v38 = vpop.f32.mrb[4].mxu1  ;;  %v19477_v39 = vpack.i.bf16 %v707_v35, %v702_v37  ;;  %v17383_v40 = vpack.c.bf16 %v707_v35, %v702_v37 }
 0x15e   :  { %v19479_v41 = vadd.f32 %v16037_v38, %v576_v26  ;;  %v711_v42 = vpop.f32.mrb[5].mxu1 }
 0x15f   :  { %v19481_v43 = vadd.f32 %v711_v42, %v576_v26  ;;  %18047 = vrot.lane.b32.xlu1 %v19477_v39, %s19102_s26 }
 0x161   :  { %v16040_v44 = vpop.f32.mrb[6].mxu1  ;;  %v19487_v45 = vpack.i.bf16 %v19479_v41, %v19481_v43  ;;  %v17387_v46 = vpack.c.bf16 %v19479_v41, %v19481_v43 }
 0x162   :  { %v727_v47 = vadd.f32 %v16040_v44, %v576_v26  ;;  %v721_v48 = vpop.f32.mrb[7].mxu1 }
 0x163   :  { %v722_v49 = vadd.f32 %v721_v48, %v576_v26  ;;  %18052 = vrot.lane.b32.xlu0 %v19487_v45, %s19102_s26 }
 0x165   :  { %v17391_v50 = vpack.c.bf16 %v727_v47, %v722_v49  ;;  %v19493_v51 = vpack.i.bf16 %v727_v47, %v722_v49  ;;  %v16043_v52 = vpop.f32.mrb[8].mxu1 }
 0x166   :  { %v19495_v53 = vadd.f32 %v16043_v52, %v576_v26  ;;  %v731_v54 = vpop.f32.mrb[9].mxu1 }
 0x167   :  { %17393 = vmatpush3.bf16.xpose.msk.msra.mxu1 %vm19466_vm3, %v17391_v50  ;;  %18057 = vrot.lane.b32.xlu1 %v19493_v51, %s19102_s26  ;;  %v19501_v55 = vadd.f32 %v731_v54, %v576_v26 }
 0x168   :  { %17398 = vmatprep.subr.bf16.mxu1 %v22539_v57 }
 0x169   :  { %v16046_v56 = vpop.f32.mrb[10].mxu1  ;;  %v19506_v58 = vpack.i.bf16 %v19495_v53, %v19501_v55  ;;  %v17395_v61 = vpack.c.bf16 %v19495_v53, %v19501_v55 }
 0x16a   :  { %v747_v62 = vadd.f32 %v16046_v56, %v576_v26  ;;  %v741_v63 = vpop.f32.mrb[11].mxu1 }
 0x16b   :  { %v742_v0 = vadd.f32 %v741_v63, %v576_v26 }
 0x16d   :  { %v16049_v1 = vpop.f32.mrb[12].mxu1  ;;  %v19510_v3 = vpack.i.bf16 %v747_v62, %v742_v0  ;;  %v17399_v4 = vpack.c.bf16 %v747_v62, %v742_v0 }
 0x16e   :  { %v19512_v5 = vadd.f32 %v16049_v1, %v576_v26  ;;  %v751_v6 = vpop.f32.mrb[13].mxu1 }
 0x16f   :  { %v19514_v8 = vadd.f32 %v751_v6, %v576_v26 }
 0x171   :  { %v16052_v10 = vpop.f32.mrb[14].mxu1  ;;  %v19518_v11 = vpack.i.bf16 %v19512_v5, %v19514_v8  ;;  %v17403_v12 = vpack.c.bf16 %v19512_v5, %v19514_v8 }
 0x172   :  { %v767_v15 = vadd.f32 %v16052_v10, %v576_v26  ;;  %v761_v16 = vpop.f32.mrb[15].mxu1 }
 0x173   :  { %v762_v17 = vadd.f32 %v761_v16, %v576_v26 }
 0x175   :  { %v19522_v18 = vpack.i.bf16 %v767_v15, %v762_v17  ;;  %v17407_v21 = vpack.c.bf16 %v767_v15, %v762_v17 }
 0x1c7   :  { %v16003_v29 = vpop.f32.mrb[0].mxu0 }
 0x1c8   :  { %v19531_v30 = vadd.f32 %v16003_v29, %v19528_v28  ;;  %v526_v32 = vpop.f32.mrb[1].mxu0 }
 0x1c9   :  { %v19534_v34 = vadd.f32 %v526_v32, %v19528_v28 }
 0x1ca   :  { %780 = vrot.lane.b32.xlu1 %v19531_v30, %s19102_s26 }
 0x1cb   :  { %v16006_v26 = vpop.f32.mrb[2].mxu0  ;;  %778 = vrot.lane.b32.xlu0 %v19534_v34, %s19102_s26  ;;  %16058 = vmatmul.mubr.msk.f32.vlgmr.msra.gmra.mrb[8].mxu0 %vm938_vm2, %v19534_v34 }
 0x1cc   :  { %v19543_v25 = vadd.f32 %v16006_v26, %v19528_v28  ;;  %17385 = vmatpush3.bf16.xpose.msk.msra.mxu0 %vm19466_vm3, %v17383_v40  ;;  %v536_v35 = vpop.f32.mrb[3].mxu0  ;;  %16064 = vmatprep.mubr.msk.f32.mxu0 %vm19100_vm1, %v22541_v23 }
 0x1cd   :  { %17386 = vmatprep.subr.bf16.mxu0 %v22539_v57  ;;  %v19554_v36 = vpop.permute.xlu0 %18042  ;;  %v19566_v44 = vadd.f32 %v536_v35, %v19528_v28 }
 0x1ce   :  { %18067 = vrot.lane.b32.xlu1 %v19510_v3, %s19102_s26  ;;  %16079 = vmatmul.mubr.msk.f32.vlgmr.msra.gmra.mrb[16].mxu1 %vm938_vm2, %v19543_v25  ;;  %v18045_v38 = vunpack.i.h.bf16 %v19554_v36  ;;  %v18044_v40 = vunpack.i.l.bf16 %v19554_v36 }
 0x1cf   :  { %17401 = vmatpush3.bf16.xpose.msk.msra.mxu1 %vm19466_vm3, %v17399_v4  ;;  %v16009_v37 = vpop.f32.mrb[4].mxu0  ;;  %18062 = vrot.lane.b32.xlu0 %v19506_v58, %s19102_s26 }
 0x1d0   :  { %v546_v42 = vpop.f32.mrb[5].mxu0  ;;  %16092 = vmatprep.mubr.msk.f32.mxu1 %vm19100_vm1, %v22541_v23  ;;  %17406 = vmatprep.subr.bf16.mxu1 %v22539_v57  ;;  %v19579_v52 = vadd.f32 %v16009_v37, %v19528_v28  ;;  %v17411_v55 = vpack.c.bf16 %v18045_v38, %v18044_v40 }
 0x1d1   :  { %v19570_v47 = vpop.permute.xlu1 %18047  ;;  %v547_v41 = vadd.f32 %v546_v42, %v19528_v28 }
 0x1d2   :  { %784 = vrot.lane.b32.xlu1 %v19543_v25, %s19102_s26  ;;  %v18050_v49 = vunpack.i.h.bf16 %v19570_v47  ;;  %v18049_v50 = vunpack.i.l.bf16 %v19570_v47 }
 0x1d3   :  { %16065 = vmatmul.mubr.msk.f32.vlgmr.msra.gmra.mrb[10].mxu0 %vm938_vm2, %v19531_v30  ;;  %v16012_v48 = vpop.f32.mrb[6].mxu0  ;;  %782 = vrot.lane.b32.xlu0 %v19566_v44, %s19102_s26 }
 0x1d4   :  { %17389 = vmatpush3.bf16.xpose.msk.msra.mxu0 %vm19466_vm3, %v17387_v46  ;;  %v556_v54 = vpop.f32.mrb[7].mxu0  ;;  %16071 = vmatprep.mubr.msk.f32.mxu0 %vm19100_vm1, %v22541_v23  ;;  %v17415_v46 = vpack.c.bf16 %v18050_v49, %v18049_v50  ;;  %v562_v63 = vadd.f32 %v16012_v48, %v19528_v28 }
 0x1d5   :  { %17394 = vmatprep.subr.bf16.mxu0 %v22539_v57  ;;  %v557_v53 = vadd.f32 %v556_v54, %v19528_v28 }
 0x1d6   :  { %16093 = vmatmul.mubr.msk.f32.vlgmr.msra.gmra.mrb[18].mxu1 %vm938_vm2, %v19579_v52  ;;  %18077 = vrot.lane.b32.xlu1 %v19522_v18, %s19102_s26 }
 0x1d7   :  { %17409 = vmatpush3.bf16.xpose.msk.msra.mxu1 %vm19466_vm3, %v17407_v21  ;;  %18072 = vrot.lane.b32.xlu0 %v19518_v11, %s19102_s26 }
 0x1d8   :  { %16106 = vmatprep.mubr.msk.f32.mxu1 %vm19100_vm1, %v22541_v23  ;;  %17414 = vmatprep.subr.bf16.mxu1 %v22539_v57 }
 0x1d9   :  { %v19603_v43 = vpop.permute.xlu1 %18057 }
 0x1da   :  { %788 = vrot.lane.b32.xlu1 %v19579_v52, %s19102_s26  ;;  %v18060_v56 = vunpack.i.h.bf16 %v19603_v43  ;;  %v18059_v62 = vunpack.i.l.bf16 %v19603_v43 }
 0x1db   :  { %16072 = vmatmul.mubr.msk.f32.vlgmr.msra.gmra.mrb[12].mxu0 %vm938_vm2, %v19566_v44  ;;  %786 = vrot.lane.b32.xlu0 %v547_v41, %s19102_s26 }
 0x1dc   :  { %17397 = vmatpush3.bf16.xpose.msk.msra.mxu0 %vm19466_vm3, %v17395_v61  ;;  %16085 = vmatprep.mubr.msk.f32.mxu0 %vm19100_vm1, %v22541_v23  ;;  %v18053_v61 = vpop.permute.xlu0 %18052 }
 0x1dd   :  { %17402 = vmatprep.subr.bf16.mxu0 %v22539_v57  ;;  %v18055_v0 = vunpack.i.h.bf16 %v18053_v61  ;;  %v18054_v1 = vunpack.i.l.bf16 %v18053_v61 }
 0x1de   :  { %16107 = vmatmul.mubr.msk.f32.vlgmr.msra.gmra.mrb[20].mxu1 %vm938_vm2, %v562_v63  ;;  %18087 = vrot.lane.b32.xlu1 %v19477_v39, %s19103_s17 }
 0x1df   :  { %18082 = vrot.lane.b32.xlu0 %v19470_v33, %s19103_s17  ;;  %17417 = vmatpush3.bf16.xpose.msk.msra.mxu1 %vm19466_vm3, %v17415_v46 }
 0x1e0   :  { %16120 = vmatprep.mubr.msk.f32.mxu1 %vm19100_vm1, %v22541_v23  ;;  %17422 = vmatprep.subr.bf16.mxu1 %v22539_v57 }
 0x1e2   :  { %792 = vrot.lane.b32.xlu1 %v562_v63, %s19102_s26 }
 0x1e3   :  { %16086 = vmatmul.mubr.msk.f32.vlgmr.msra.gmra.mrb[14].mxu0 %vm938_vm2, %v547_v41  ;;  %790 = vrot.lane.b32.xlu0 %v557_v53, %s19102_s26 }
 0x1e4   :  { %17405 = vmatpush3.bf16.xpose.msk.msra.mxu0 %vm19466_vm3, %v17403_v12  ;;  %16099 = vmatprep.mubr.msk.f32.mxu0 %vm19100_vm1, %v22541_v23 }
 0x1e5   :  { %17410 = vmatprep.subr.bf16.mxu0 %v22539_v57 }
 0x1e6   :  { %18097 = vrot.lane.b32.xlu1 %v19493_v51, %s19103_s17 }
 0x1e7   :  { %18092 = vrot.lane.b32.xlu0 %v19487_v45, %s19103_s17 }
 0x1ea   :  { %796 = vrot.lane.b32.xlu1 %v19531_v30, %s19103_s17 }
 0x1eb   :  { %16100 = vmatmul.mubr.msk.f32.vlgmr.msra.gmra.mrb[16].mxu0 %vm938_vm2, %v557_v53  ;;  %794 = vrot.lane.b32.xlu0 %v19534_v34, %s19103_s17 }
 0x1ec   :  { %17413 = vmatpush3.bf16.xpose.msk.msra.mxu0 %vm19466_vm3, %v17411_v55  ;;  %16113 = vmatprep.mubr.msk.f32.mxu0 %vm19100_vm1, %v22541_v23 }
 0x1ed   :  { %17418 = vmatprep.subr.bf16.mxu0 %v22539_v57 }
 0x1ee   :  { %18107 = vrot.lane.b32.xlu1 %v19510_v3, %s19103_s17 }
 0x1ef   :  { %18102 = vrot.lane.b32.xlu0 %v19506_v58, %s19103_s17 }
 0x1f2   :  { %800 = vrot.lane.b32.xlu1 %v19543_v25, %s19103_s17 }
 0x1f3   :  { %798 = vrot.lane.b32.xlu0 %v19566_v44, %s19103_s17 }
 0x1f6   :  { %18117 = vrot.lane.b32.xlu1 %v19522_v18, %s19103_s17 }
 0x1f7   :  { %18112 = vrot.lane.b32.xlu0 %v19518_v11, %s19103_s17 }
 0x1fa   :  { %804 = vrot.lane.b32.xlu1 %v19579_v52, %s19103_s17 }
 0x1fb   :  { %802 = vrot.lane.b32.xlu0 %v547_v41, %s19103_s17 }
 0x1fe   :  { %18127 = vrot.lane.b32.xlu1 %v19477_v39, %s19104_s8 }
 0x1ff   :  { %18122 = vrot.lane.b32.xlu0 %v19470_v33, %s19104_s8 }
 0x202   :  { %808 = vrot.lane.b32.xlu1 %v562_v63, %s19103_s17 }
 0x203   :  { %806 = vrot.lane.b32.xlu0 %v557_v53, %s19103_s17 }
 0x206   :  { %18137 = vrot.lane.b32.xlu1 %v19493_v51, %s19104_s8 }
 0x207   :  { %18132 = vrot.lane.b32.xlu0 %v19487_v45, %s19104_s8 }
 0x20a   :  { %812 = vrot.lane.b32.xlu1 %v19531_v30, %s19104_s8 }
 0x20b   :  { %810 = vrot.lane.b32.xlu0 %v19534_v34, %s19104_s8 }
 0x20e   :  { %18147 = vrot.lane.b32.xlu1 %v19510_v3, %s19104_s8 }
 0x20f   :  { %18142 = vrot.lane.b32.xlu0 %v19506_v58, %s19104_s8 }
 0x212   :  { %816 = vrot.lane.b32.xlu1 %v19543_v25, %s19104_s8 }
 0x213   :  { %814 = vrot.lane.b32.xlu0 %v19566_v44, %s19104_s8 }
 0x216   :  { %18157 = vrot.lane.b32.xlu1 %v19522_v18, %s19104_s8 }
 0x217   :  { %18152 = vrot.lane.b32.xlu0 %v19518_v11, %s19104_s8 }
 0x21a   :  { %820 = vrot.lane.b32.xlu1 %v19579_v52, %s19104_s8 }
 0x21b   :  { %818 = vrot.lane.b32.xlu0 %v547_v41, %s19104_s8 }
 0x21e   :  { %824 = vrot.lane.b32.xlu1 %v562_v63, %s19104_s8 }
 0x21f   :  { %822 = vrot.lane.b32.xlu0 %v557_v53, %s19104_s8 }
 0x222   :  { %18162 = vrot.lane.b32.xlu1 %v19470_v33, %s19105_s22  ;;  %v17423_v33 = vpack.c.bf16 %v18060_v56, %v18059_v62 }
 0x223   :  { %18167 = vrot.lane.b32.xlu0 %v19477_v39, %s19105_s22 }
 0x226   :  { %18172 = vrot.lane.b32.xlu1 %v19487_v45, %s19105_s22  ;;  %v17419_v45 = vpack.c.bf16 %v18055_v0, %v18054_v1 }
 0x227   :  { %18177 = vrot.lane.b32.xlu0 %v19493_v51, %s19105_s22 }
 0x22a   :  { %18182 = vrot.lane.b32.xlu1 %v19506_v58, %s19105_s22 }
 0x22b   :  { %18187 = vrot.lane.b32.xlu0 %v19510_v3, %s19105_s22 }
 0x22e   :  { %18192 = vrot.lane.b32.xlu1 %v19518_v11, %s19105_s22 }
 0x22f   :  { %18197 = vrot.lane.b32.xlu0 %v19522_v18, %s19105_s22 }
 0x232   :  { %18202 = vrot.lane.b32.xlu1 %v19554_v36, %s19105_s22 }
 0x233   :  { %18207 = vrot.lane.b32.xlu0 %v19570_v47, %s19105_s22 }
 0x236   :  { %18212 = vrot.lane.b32.xlu1 %v18053_v61, %s19105_s22 }
 0x23c   :  { %v781_v39 = vpop.permute.xlu1 %780 }
 0x23d   :  { %16121 = vmatmul.mubr.msk.f32.vlgmr.msra.gmra.mrb[22].mxu1 %vm938_vm2, %v781_v39  ;;  %v779_v51 = vpop.permute.xlu0 %778 }
 0x23e   :  { %17425 = vmatpush3.bf16.xpose.msk.msra.mxu1 %vm19466_vm3, %v17423_v33  ;;  %16114 = vmatmul.mubr.msk.f32.vlgmr.msra.gmra.mrb[18].mxu0 %vm938_vm2, %v779_v51 }
 0x23f   :  { %17421 = vmatpush3.bf16.xpose.msk.msra.mxu0 %vm19466_vm3, %v17419_v45  ;;  %16134 = vmatprep.mubr.msk.f32.mxu1 %vm19100_vm1, %v22541_v23 }
 0x240   :  { %v19734_v58 = vpop.permute.xlu1 %18067  ;;  %17430 = vmatprep.subr.bf16.mxu1 %v22539_v57  ;;  %16127 = vmatprep.mubr.msk.f32.mxu0 %vm19100_vm1, %v22541_v23 }
 0x241   :  { %v18070_v3 = vunpack.i.h.bf16 %v19734_v58  ;;  %v18069_v4 = vunpack.i.l.bf16 %v19734_v58  ;;  %v19741_v5 = vpop.permute.xlu0 %18062  ;;  %17426 = vmatprep.subr.bf16.mxu0 %v22539_v57 }
 0x242   :  { %v18065_v6 = vunpack.i.h.bf16 %v19741_v5  ;;  %v18064_v8 = vunpack.i.l.bf16 %v19741_v5 }
 0x243   :  { %v17431_v10 = vpack.c.bf16 %v18070_v3, %v18069_v4 }
 0x244   :  { %v17427_v11 = vpack.c.bf16 %v18065_v6, %v18064_v8  ;;  %v785_v12 = vpop.permute.xlu1 %784 }
 0x245   :  { %16135 = vmatmul.mubr.msk.f32.vlgmr.msra.gmra.mrb[24].mxu1 %vm938_vm2, %v785_v12  ;;  %v783_v15 = vpop.permute.xlu0 %782 }
 0x246   :  { %17433 = vmatpush3.bf16.xpose.msk.msra.mxu1 %vm19466_vm3, %v17431_v10  ;;  %16128 = vmatmul.mubr.msk.f32.vlgmr.msra.gmra.mrb[20].mxu0 %vm938_vm2, %v783_v15 }
 0x247   :  { %17429 = vmatpush3.bf16.xpose.msk.msra.mxu0 %vm19466_vm3, %v17427_v11  ;;  %16148 = vmatprep.mubr.msk.f32.mxu1 %vm19100_vm1, %v22541_v23 }
 0x248   :  { %v19754_v16 = vpop.permute.xlu1 %18077  ;;  %17438 = vmatprep.subr.bf16.mxu1 %v22539_v57  ;;  %16141 = vmatprep.mubr.msk.f32.mxu0 %vm19100_vm1, %v22541_v23 }
 0x249   :  { %v18080_v17 = vunpack.i.h.bf16 %v19754_v16  ;;  %v18079_v18 = vunpack.i.l.bf16 %v19754_v16  ;;  %v19761_v21 = vpop.permute.xlu0 %18072  ;;  %17434 = vmatprep.subr.bf16.mxu0 %v22539_v57 }
 0x24a   :  { %v18075_v28 = vunpack.i.h.bf16 %v19761_v21  ;;  %v18074_v29 = vunpack.i.l.bf16 %v19761_v21 }
 0x24b   :  { %v17439_v30 = vpack.c.bf16 %v18080_v17, %v18079_v18 }
 0x24c   :  { %v17435_v32 = vpack.c.bf16 %v18075_v28, %v18074_v29  ;;  %v789_v34 = vpop.permute.xlu1 %788 }
 0x24d   :  { %16149 = vmatmul.mubr.msk.f32.vlgmr.msra.gmra.mrb[26].mxu1 %vm938_vm2, %v789_v34  ;;  %v787_v26 = vpop.permute.xlu0 %786 }
 0x24e   :  { %17441 = vmatpush3.bf16.xpose.msk.msra.mxu1 %vm19466_vm3, %v17439_v30  ;;  %16142 = vmatmul.mubr.msk.f32.vlgmr.msra.gmra.mrb[22].mxu0 %vm938_vm2, %v787_v26 }
 0x24f   :  { %17437 = vmatpush3.bf16.xpose.msk.msra.mxu0 %vm19466_vm3, %v17435_v32  ;;  %16162 = vmatprep.mubr.msk.f32.mxu1 %vm19100_vm1, %v22541_v23 }
 0x250   :  { %v18088_v25 = vpop.permute.xlu1 %18087  ;;  %17446 = vmatprep.subr.bf16.mxu1 %v22539_v57  ;;  %16155 = vmatprep.mubr.msk.f32.mxu0 %vm19100_vm1, %v22541_v23 }
 0x251   :  { %v18090_v35 = vunpack.i.h.bf16 %v18088_v25  ;;  %v18089_v36 = vunpack.i.l.bf16 %v18088_v25  ;;  %v18083_v37 = vpop.permute.xlu0 %18082  ;;  %17442 = vmatprep.subr.bf16.mxu0 %v22539_v57  ;;  %18222 = vrot.lane.b32.xlu0 %v18088_v25, %s19105_s22 }
 0x252   :  { %v18085_v38 = vunpack.i.h.bf16 %v18083_v37  ;;  %v18084_v40 = vunpack.i.l.bf16 %v18083_v37  ;;  %18217 = vrot.lane.b32.xlu1 %v18083_v37, %s19105_s22 }
 0x253   :  { %v17447_v42 = vpack.c.bf16 %v18090_v35, %v18089_v36 }
 0x254   :  { %v17443_v44 = vpack.c.bf16 %v18085_v38, %v18084_v40  ;;  %v793_v47 = vpop.permute.xlu1 %792 }
 0x255   :  { %16163 = vmatmul.mubr.msk.f32.vlgmr.msra.gmra.mrb[28].mxu1 %vm938_vm2, %v793_v47  ;;  %v791_v48 = vpop.permute.xlu0 %790 }
 0x256   :  { %17449 = vmatpush3.bf16.xpose.msk.msra.mxu1 %vm19466_vm3, %v17447_v42  ;;  %16156 = vmatmul.mubr.msk.f32.vlgmr.msra.gmra.mrb[24].mxu0 %vm938_vm2, %v791_v48 }
 0x257   :  { %16176 = vmatprep.mubr.msk.f32.mxu1 %vm19100_vm1, %v22541_v23  ;;  %17445 = vmatpush3.bf16.xpose.msk.msra.mxu0 %vm19466_vm3, %v17443_v44 }
 0x258   :  { %v19788_v49 = vpop.permute.xlu1 %18097  ;;  %17454 = vmatprep.subr.bf16.mxu1 %v22539_v57  ;;  %16169 = vmatprep.mubr.msk.f32.mxu0 %vm19100_vm1, %v22541_v23 }
 0x259   :  { %v18100_v50 = vunpack.i.h.bf16 %v19788_v49  ;;  %v18099_v52 = vunpack.i.l.bf16 %v19788_v49  ;;  %v18093_v54 = vpop.permute.xlu0 %18092  ;;  %17450 = vmatprep.subr.bf16.mxu0 %v22539_v57 }
 0x25a   :  { %v18095_v41 = vunpack.i.h.bf16 %v18093_v54  ;;  %v18094_v46 = vunpack.i.l.bf16 %v18093_v54  ;;  %18227 = vrot.lane.b32.xlu1 %v18093_v54, %s19105_s22 }
 0x25b   :  { %v17455_v56 = vpack.c.bf16 %v18100_v50, %v18099_v52 }
 0x25c   :  { %v17451_v62 = vpack.c.bf16 %v18095_v41, %v18094_v46  ;;  %v797_v63 = vpop.permute.xlu1 %796 }
 0x25d   :  { %16177 = vmatmul.mubr.msk.f32.vlgmr.msra.gmra.mrb[30].mxu1 %vm938_vm2, %v797_v63  ;;  %v795_v53 = vpop.permute.xlu0 %794 }
 0x25e   :  { %17457 = vmatpush3.bf16.xpose.msk.msra.mxu1 %vm19466_vm3, %v17455_v56  ;;  %16170 = vmatmul.mubr.msk.f32.vlgmr.msra.gmra.mrb[26].mxu0 %vm938_vm2, %v795_v53 }
 0x25f   :  { %16190 = vmatprep.mubr.msk.f32.mxu1 %vm19100_vm1, %v22541_v23  ;;  %17453 = vmatpush3.bf16.xpose.msk.msra.mxu0 %vm19466_vm3, %v17451_v62 }
 0x260   :  { %v19805_v55 = vpop.permute.xlu1 %18107  ;;  %17462 = vmatprep.subr.bf16.mxu1 %v22539_v57  ;;  %16183 = vmatprep.mubr.msk.f32.mxu0 %vm19100_vm1, %v22541_v23 }
 0x261   :  { %v18110_v61 = vunpack.i.h.bf16 %v19805_v55  ;;  %v18109_v0 = vunpack.i.l.bf16 %v19805_v55  ;;  %v19810_v1 = vpop.permute.xlu0 %18102  ;;  %17458 = vmatprep.subr.bf16.mxu0 %v22539_v57 }
 0x262   :  { %v18105_v33 = vunpack.i.h.bf16 %v19810_v1  ;;  %v18104_v39 = vunpack.i.l.bf16 %v19810_v1 }
 0x263   :  { %v17463_v45 = vpack.c.bf16 %v18110_v61, %v18109_v0 }
 0x264   :  { %v17459_v51 = vpack.c.bf16 %v18105_v33, %v18104_v39  ;;  %v801_v3 = vpop.permute.xlu1 %800 }
 0x265   :  { %16191 = vmatmul.mubr.msk.f32.vlgmr.msra.gmra.mrb[32].mxu1 %vm938_vm2, %v801_v3  ;;  %v799_v4 = vpop.permute.xlu0 %798 }
 0x266   :  { %17465 = vmatpush3.bf16.xpose.msk.msra.mxu1 %vm19466_vm3, %v17463_v45  ;;  %16204 = vmatprep.mubr.msk.f32.mxu1 %vm19100_vm1, %v22541_v23 }
 0x267   :  { %16184 = vmatmul.mubr.msk.f32.vlgmr.msra.gmra.mrb[28].mxu0 %vm938_vm2, %v799_v4  ;;  %17470 = vmatprep.subr.bf16.mxu1 %v22539_v57 }
 0x268   :  { %17461 = vmatpush3.bf16.xpose.msk.msra.mxu0 %vm19466_vm3, %v17459_v51  ;;  %v19826_v6 = vpop.permute.xlu1 %18117  ;;  %16197 = vmatprep.mubr.msk.f32.mxu0 %vm19100_vm1, %v22541_v23 }
 0x269   :  { %v18120_v8 = vunpack.i.h.bf16 %v19826_v6  ;;  %v18119_v10 = vunpack.i.l.bf16 %v19826_v6  ;;  %v19832_v11 = vpop.permute.xlu0 %18112  ;;  %17466 = vmatprep.subr.bf16.mxu0 %v22539_v57 }
 0x26a   :  { %v18115_v12 = vunpack.i.h.bf16 %v19832_v11  ;;  %v18114_v15 = vunpack.i.l.bf16 %v19832_v11 }
 0x26b   :  { %v17471_v17 = vpack.c.bf16 %v18120_v8, %v18119_v10 }
 0x26c   :  { %v17467_v18 = vpack.c.bf16 %v18115_v12, %v18114_v15  ;;  %v805_v28 = vpop.permute.xlu1 %804 }
 0x26d   :  { %16205 = vmatmul.mubr.msk.f32.vlgmr.msra.gmra.mrb[34].mxu1 %vm938_vm2, %v805_v28  ;;  %v803_v29 = vpop.permute.xlu0 %802 }
 0x26e   :  { %17473 = vmatpush3.bf16.xpose.msk.msra.mxu1 %vm19466_vm3, %v17471_v17  ;;  %16218 = vmatprep.mubr.msk.f32.mxu1 %vm19100_vm1, %v22541_v23 }
 0x26f   :  { %16198 = vmatmul.mubr.msk.f32.vlgmr.msra.gmra.mrb[30].mxu0 %vm938_vm2, %v803_v29  ;;  %17478 = vmatprep.subr.bf16.mxu1 %v22539_v57 }
 0x270   :  { %17469 = vmatpush3.bf16.xpose.msk.msra.mxu0 %vm19466_vm3, %v17467_v18  ;;  %v18128_v30 = vpop.permute.xlu1 %18127  ;;  %16211 = vmatprep.mubr.msk.f32.mxu0 %vm19100_vm1, %v22541_v23 }
 0x271   :  { %v18130_v32 = vunpack.i.h.bf16 %v18128_v30  ;;  %v18129_v34 = vunpack.i.l.bf16 %v18128_v30  ;;  %v18123_v26 = vpop.permute.xlu0 %18122  ;;  %17474 = vmatprep.subr.bf16.mxu0 %v22539_v57  ;;  %18237 = vrot.lane.b32.xlu1 %v18128_v30, %s19105_s22 }
 0x272   :  { %v18125_v25 = vunpack.i.h.bf16 %v18123_v26  ;;  %v18124_v35 = vunpack.i.l.bf16 %v18123_v26  ;;  %18232 = vrot.lane.b32.xlu0 %v18123_v26, %s19105_s22 }
 0x273   :  { %v17479_v36 = vpack.c.bf16 %v18130_v32, %v18129_v34 }
 0x274   :  { %v17475_v37 = vpack.c.bf16 %v18125_v25, %v18124_v35  ;;  %v809_v38 = vpop.permute.xlu1 %808  ;;  %v217_v35 = vld [vmem:[%s22528_s3] sm:$0xff] }
 0x275   :  { %16219 = vmatmul.mubr.msk.f32.vlgmr.msra.gmra.mrb[36].mxu1 %vm938_vm2, %v809_v38  ;;  %v807_v40 = vpop.permute.xlu0 %806 }
 0x276   :  { %17481 = vmatpush3.bf16.xpose.msk.msra.mxu1 %vm19466_vm3, %v17479_v36  ;;  %16232 = vmatprep.mubr.msk.f32.mxu1 %vm19100_vm1, %v22541_v23 }
 0x277   :  { %16212 = vmatmul.mubr.msk.f32.vlgmr.msra.gmra.mrb[32].mxu0 %vm938_vm2, %v807_v40  ;;  %17486 = vmatprep.subr.bf16.mxu1 %v22539_v57  ;;  %v225_v40 = vcombine.high %v217_v35, %v217_v35 }
 0x278   :  { %17477 = vmatpush3.bf16.xpose.msk.msra.mxu0 %vm19466_vm3, %v17475_v37  ;;  %v18138_v42 = vpop.permute.xlu1 %18137  ;;  %16225 = vmatprep.mubr.msk.f32.mxu0 %vm19100_vm1, %v22541_v23 }
 0x279   :  { %v18140_v44 = vunpack.i.h.bf16 %v18138_v42  ;;  %v18139_v47 = vunpack.i.l.bf16 %v18138_v42  ;;  %v18133_v48 = vpop.permute.xlu0 %18132  ;;  %17482 = vmatprep.subr.bf16.mxu0 %v22539_v57  ;;  %18257 = vrot.lane.b32.xlu1 %v18138_v42, %s19105_s22 }
 0x27a   :  { %v18135_v50 = vunpack.i.h.bf16 %v18133_v48  ;;  %v18134_v52 = vunpack.i.l.bf16 %v18133_v48  ;;  %18242 = vrot.lane.b32.xlu0 %v18133_v48, %s19105_s22 }
 0x27b   :  { %v17487_v54 = vpack.c.bf16 %v18140_v44, %v18139_v47 }
 0x27c   :  { %v17483_v41 = vpack.c.bf16 %v18135_v50, %v18134_v52  ;;  %v813_v46 = vpop.permute.xlu1 %812 }
 0x27d   :  { %16233 = vmatmul.mubr.msk.f32.vlgmr.msra.gmra.mrb[38].mxu1 %vm938_vm2, %v813_v46  ;;  %v811_v56 = vpop.permute.xlu0 %810  ;;  %18262 = vrot.lane.b32.xlu1 %v19741_v5, %s19105_s22 }
 0x27e   :  { %17489 = vmatpush3.bf16.xpose.msk.msra.mxu1 %vm19466_vm3, %v17487_v54  ;;  %16246 = vmatprep.mubr.msk.f32.mxu1 %vm19100_vm1, %v22541_v23 }
 0x27f   :  { %16226 = vmatmul.mubr.msk.f32.vlgmr.msra.gmra.mrb[34].mxu0 %vm938_vm2, %v811_v56  ;;  %17494 = vmatprep.subr.bf16.mxu1 %v22539_v57 }
 0x280   :  { %17485 = vmatpush3.bf16.xpose.msk.msra.mxu0 %vm19466_vm3, %v17483_v41  ;;  %v19873_v62 = vpop.permute.xlu1 %18147  ;;  %16239 = vmatprep.mubr.msk.f32.mxu0 %vm19100_vm1, %v22541_v23 }
 0x281   :  { %v18150_v63 = vunpack.i.h.bf16 %v19873_v62  ;;  %v18149_v53 = vunpack.i.l.bf16 %v19873_v62  ;;  %v19878_v61 = vpop.permute.xlu0 %18142  ;;  %18247 = vrot.lane.b32.xlu0 %v19603_v43, %s19105_s22  ;;  %17490 = vmatprep.subr.bf16.mxu0 %v22539_v57 }
 0x282   :  { %v18145_v0 = vunpack.i.h.bf16 %v19878_v61  ;;  %v18144_v33 = vunpack.i.l.bf16 %v19878_v61  ;;  %18267 = vrot.lane.b32.xlu1 %v19810_v1, %s19105_s22 }
 0x283   :  { %v17495_v39 = vpack.c.bf16 %v18150_v63, %v18149_v53 }
 0x284   :  { %v17491_v45 = vpack.c.bf16 %v18145_v0, %v18144_v33  ;;  %v817_v51 = vpop.permute.xlu1 %816 }
 0x285   :  { %16247 = vmatmul.mubr.msk.f32.vlgmr.msra.gmra.mrb[40].mxu1 %vm938_vm2, %v817_v51  ;;  %v815_v3 = vpop.permute.xlu0 %814  ;;  %18252 = vrot.lane.b32.xlu0 %v19788_v49, %s19105_s22 }
 0x286   :  { %17497 = vmatpush3.bf16.xpose.msk.msra.mxu1 %vm19466_vm3, %v17495_v39  ;;  %16260 = vmatprep.mubr.msk.f32.mxu1 %vm19100_vm1, %v22541_v23 }
 0x287   :  { %16240 = vmatmul.mubr.msk.f32.vlgmr.msra.gmra.mrb[36].mxu0 %vm938_vm2, %v815_v3  ;;  %17502 = vmatprep.subr.bf16.mxu1 %v22539_v57 }
 0x288   :  { %17493 = vmatpush3.bf16.xpose.msk.msra.mxu0 %vm19466_vm3, %v17491_v45  ;;  %v19901_v43 = vpop.permute.xlu1 %18157  ;;  %18282 = vrot.lane.b32.xlu1 %v19761_v21, %s19105_s22  ;;  %v19106_v21 = vmov 1966171168  }
 0x289   :  { %v18160_v5 = vunpack.i.h.bf16 %v19901_v43  ;;  %v18159_v1 = vunpack.i.l.bf16 %v19901_v43  ;;  %v19906_v4 = vpop.permute.xlu0 %18152  ;;  %16253 = vmatprep.mubr.msk.f32.mxu0 %vm19100_vm1, %v22541_v23  ;;  %18272 = vrot.lane.b32.xlu0 %v19734_v58, %s19105_s22  ;;  %v227_v18 = vunpack.c.l.s4 %v19106_v21 }
 0x28a   :  { %v18155_v49 = vunpack.i.h.bf16 %v19906_v4  ;;  %v18154_v8 = vunpack.i.l.bf16 %v19906_v4  ;;  %17498 = vmatprep.subr.bf16.mxu0 %v22539_v57 }
 0x28b   :  { %v17503_v10 = vpack.c.bf16 %v18160_v5, %v18159_v1 }
 0x28c   :  { %v17499_v12 = vpack.c.bf16 %v18155_v49, %v18154_v8  ;;  %v821_v15 = vpop.permute.xlu1 %820  ;;  %18287 = vrot.lane.b32.xlu1 %v19832_v11, %s19105_s22 }
 0x28d   :  { %16261 = vmatmul.mubr.msk.f32.vlgmr.msra.gmra.mrb[42].mxu1 %vm938_vm2, %v821_v15  ;;  %v819_v17 = vpop.permute.xlu0 %818  ;;  %18277 = vrot.lane.b32.xlu0 %v19805_v55, %s19105_s22  ;;  %v228_v55 = vunpack.c.0.s8 %v227_v18 }
 0x28e   :  { %17505 = vmatpush3.bf16.xpose.msk.msra.mxu1 %vm19466_vm3, %v17503_v10  ;;  %16274 = vmatprep.mubr.msk.f32.mxu1 %vm19100_vm1, %v22541_v23 }
 0x28f   :  { %16254 = vmatmul.mubr.msk.f32.vlgmr.msra.gmra.mrb[38].mxu0 %vm938_vm2, %v819_v17  ;;  %17509 = vmatprep.subr.bf16.mxu1 %v22539_v57 }
 0x290   :  { %17501 = vmatpush3.bf16.xpose.msk.msra.mxu0 %vm19466_vm3, %v17499_v12  ;;  %v825_v58 = vpop.permute.xlu1 %824  ;;  %16267 = vmatprep.mubr.msk.f32.mxu0 %vm19100_vm1, %v22541_v23 }
 0x291   :  { %v823_v11 = vpop.permute.xlu0 %822  ;;  %18297 = vrot.lane.b32.xlu1 %v19826_v6, %s19105_s22  ;;  %17506 = vmatprep.subr.bf16.mxu0 %v22539_v57  ;;  %v19941_v6 = vsub.s32 %v228_v55, %v19418_v59 }
 0x292   :  { %18292 = vrot.lane.b32.xlu0 %v19754_v16, %s19105_s22 }
 0x293   :  { %v232_v36 = vrot.slane %v217_v35, %v19941_v6  ;;  %v239_v50 = vrot.slane %v225_v40, %v19941_v6 }
 0x294   :  { %v18163_v28 = vpop.permute.xlu1 %18162 }
 0x295   :  { %v18165_v29 = vunpack.i.h.bf16 %v18163_v28  ;;  %v18164_v30 = vunpack.i.l.bf16 %v18163_v28  ;;  %16275 = vmatmul.mubr.msk.f32.vlgmr.msra.gmra.mrb[44].mxu1 %vm938_vm2, %v825_v58  ;;  %v18168_v32 = vpop.permute.xlu0 %18167  ;;  %v240_v42 = vcombine.high %v232_v36, %v232_v36  ;;  %v248_v52 = vrot.slane %v232_v36, %v19941_v6 }
 0x296   :  { %v18170_v34 = vunpack.i.h.bf16 %v18168_v32  ;;  %v18169_v26 = vunpack.i.l.bf16 %v18168_v32  ;;  %16288 = vmatprep.mubr.msk.f32.mxu1 %vm19100_vm1, %v22541_v23  ;;  %v241_v56 = vcombine.high %v239_v50, %v239_v50 }
 0x297   :  { %v17507_v25 = vpack.c.bf16 %v18165_v29, %v18164_v30  ;;  %16268 = vmatmul.mubr.msk.f32.vlgmr.msra.gmra.mrb[40].mxu0 %vm938_vm2, %v823_v11  ;;  %v262_v48 = vrot.slane %v240_v42, %v19941_v6  ;;  %v19956_v53 = vrot.slane %v248_v52, %v19525_v27  ;;  %v270_v12 = vcombine.high %v248_v52, %v248_v52 }
 0x298   :  { %v17510_v16 = vpack.c.bf16 %v18170_v34, %v18169_v26  ;;  %16281 = vmatprep.mubr.msk.f32.mxu0 %vm19100_vm1, %v22541_v23  ;;  %v269_v45 = vrot.slane %v241_v56, %v19941_v6  ;;  %v255_v11 = vrot.slane %v239_v50, %v19941_v6 }
 0x299   :  { %17508 = vmatpush3.bf16.msra.mxu0 %v17507_v25  ;;  %v272_v46 = vcombine.high %v262_v48, %v262_v48  ;;  %22648 = vst [vmem:[#allocation29_spill] sm:$0xff] %v19956_v53  ;;  %v19966_v1 = vrot.slane %v262_v48, %v19525_v27  ;;  %v19981_v28 = vrot.slane %v270_v12, %v19525_v27 }
 0x29a   :  { %17511 = vmatpush3.bf16.msra.mxu1 %v17510_v16  ;;  %17512 = vmatprep.subr.bf16.mxu0 %v22539_v57  ;;  %v19969_v10 = vrot.slane %v269_v45, %v19525_v27  ;;  %v273_v29 = vcombine.high %v269_v45, %v269_v45  ;;  %v19991_v25 = vrot.slane %v255_v11, %v19525_v27  ;;  %v20021_v45 = vpop.permute.xlu1 %18172 }
 0x29b   :  { %17515 = vmatprep.subr.bf16.mxu1 %v22539_v57  ;;  %v19959_v39 = vrot.slane %v272_v46, %v19525_v27  ;;  %22650 = vst [vmem:[#allocation31_spill] sm:$0xff] %v19966_v1  ;;  %22652 = vst [vmem:[#allocation33_spill] sm:$0xff] %v19981_v28 }
 0x29c   :  { %22651 = vst [vmem:[#allocation32_spill] sm:$0xff] %v19969_v10  ;;  %22653 = vst [vmem:[#allocation34_spill] sm:$0xff] %v19991_v25  ;;  %v19999_v42 = vrot.slane %v273_v29, %v19525_v27 }
 0x29d   :  { %22649 = vst [vmem:[#allocation30_spill] sm:$0xff] %v19959_v39 }
 0x29e   :  { %v1011_v37 = vpop.f32.mrb[8].mxu0  ;;  %22654 = vst [vmem:[#allocation35_spill] sm:$0xff] %v19999_v42 }
 0x29f   :  { %v16059_v38 = vpop.f32.mrb[9].mxu0  ;;  %v3371_v63 = vmul.f32 0.25, %v1011_v37 }
 0x2a1   :  { %v1239_v44 = vpop.f32.mrb[16].mxu1  ;;  %v19963_v5 = vadd.f32 %v19956_v53, %v3371_v63 }
 0x2a2   :  { %v16080_v47 = vpop.f32.mrb[17].mxu1  ;;  %v3374_v51 = vmul.f32 0.25, %v1239_v44 }
 0x2a3   :  { %v3595_v17 = vsel %vm938_vm2, %v19963_v5, -inf  ;;  %v271_v47 = vcombine.high %v255_v11, %v255_v11 }
 0x2a4   :  { %v19974_v21 = vadd.f32 %v19959_v39, %v3374_v51  ;;  %v20023_v51 = vpop.permute.xlu0 %18177 }
 0x2a6   :  { %v1087_v54 = vpop.f32.mrb[10].mxu0  ;;  %v3604_v32 = vsel %vm938_vm2, %v19974_v21, -inf }
 0x2a7   :  { %v16066_v41 = vpop.f32.mrb[11].mxu0  ;;  %v3372_v3 = vmul.f32 0.25, %v1087_v54  ;;  %v20012_v54 = vrot.slane %v271_v47, %v19525_v27 }
 0x2a8   :  { %v20031_v12 = vpop.permute.xlu0 %18187 }
 0x2a9   :  { %v1391_v0 = vpop.f32.mrb[18].mxu1  ;;  %v19977_v18 = vadd.f32 %v19966_v1, %v3372_v3  ;;  %22655 = vst [vmem:[#allocation36_spill] sm:$0xff] %v20012_v54  ;;  %v218_v3 = vld [vmem:[%s22528_s3 + $0x8] sm:$0xff] }
 0x2aa   :  { %v16094_v33 = vpop.f32.mrb[19].mxu1  ;;  %v3376_v15 = vmul.f32 0.25, %v1391_v0 }
 0x2ab   :  { %v3598_v34 = vsel %vm938_vm2, %v19977_v18, -inf }
 0x2ac   :  { %v19988_v26 = vadd.f32 %v19969_v10, %v3376_v15 }
 0x2ae   :  { %v1163_v49 = vpop.f32.mrb[12].mxu0  ;;  %v3610_v38 = vsel %vm938_vm2, %v19988_v26, -inf }
 0x2af   :  { %v16073_v8 = vpop.f32.mrb[13].mxu0  ;;  %v3373_v30 = vmul.f32 0.25, %v1163_v49  ;;  %v20028_v49 = vpop.permute.xlu1 %18182 }
 0x2b0   :  { %v281_v8 = vrot.slane %v218_v3, %v19941_v6 }
 0x2b1   :  { %v1543_v58 = vpop.f32.mrb[20].mxu1  ;;  %3596 = vmax.xlane.f32.xlu0 %v3595_v17  ;;  %v19996_v40 = vadd.f32 %v19981_v28, %v3373_v30 }
 0x2b2   :  { %v16108_v55 = vpop.f32.mrb[21].mxu1  ;;  %v3378_v37 = vmul.f32 0.25, %v1543_v58  ;;  %v289_v17 = vcombine.high %v281_v8, %v281_v8  ;;  %v297_v29 = vrot.slane %v281_v8, %v19941_v6 }
 0x2b3   :  { %v3601_v50 = vsel %vm938_vm2, %v19996_v40, -inf  ;;  %v20033_v15 = vpop.permute.xlu1 %18192  ;;  %v20038_v55 = vpop.permute.xlu0 %18197 }
 0x2b4   :  { %v20009_v52 = vadd.f32 %v19999_v42, %v3378_v37  ;;  %v311_v11 = vrot.slane %v289_v17, %v19941_v6  ;;  %v319_v8 = vcombine.high %v297_v29, %v297_v29 }
 0x2b5   :  { %3605 = vmax.xlane.f32.xlu0 %v3604_v32  ;;  %3599 = vmax.xlane.f32.xlu1 %v3598_v34  ;;  %v274_v34 = vcombine.high %v218_v3, %v218_v3 }
 0x2b6   :  { %v1315_v16 = vpop.f32.mrb[14].mxu0  ;;  %v3616_v63 = vsel %vm938_vm2, %v20009_v52, -inf  ;;  %v20044_v32 = vrot.slane %v311_v11, %v19525_v27 }
 0x2b7   :  { %v3375_v35 = vmul.f32 0.25, %v1315_v16  ;;  %v16087_v36 = vpop.f32.mrb[15].mxu0  ;;  %v20035_v58 = vpop.permute.xlu1 %18202 }
 0x2b8   :  { %22656 = vst [vmem:[#allocation37_spill] sm:$0xff] %v20044_v32  ;;  %v20046_v16 = vpop.permute.xlu0 %18207  ;;  %v20049_v36 = vrot.slane %v297_v29, %v19525_v27 }
 0x2b9   :  { %3611 = vmax.xlane.f32.xlu0 %v3610_v38  ;;  %v20002_v44 = vadd.f32 %v19991_v25, %v3375_v35 }
 0x2ba   :  { %22657 = vst [vmem:[#allocation38_spill] sm:$0xff] %v20049_v36 }
 0x2bb   :  { %v3607_v48 = vsel %vm938_vm2, %v20002_v44, -inf  ;;  %v20041_v30 = vpop.permute.xlu1 %18212 }
 0x2bc   :  { %3608 = vmax.xlane.f32.xlu1 %v3607_v48 }
 0x2bd   :  { %3602 = vmax.xlane.f32.xlu0 %v3601_v50 }
 0x2be   :  { %v1467_v41 = vpop.f32.mrb[16].mxu0 }
 0x2bf   :  { %v3377_v46 = vmul.f32 0.25, %v1467_v41  ;;  %v16101_v56 = vpop.f32.mrb[17].mxu0 }
 0x2c0   :  { %v321_v56 = vcombine.high %v311_v11, %v311_v11 }
 0x2c1   :  { %3617 = vmax.xlane.f32.xlu0 %v3616_v63  ;;  %v20017_v0 = vadd.f32 %v20012_v54, %v3377_v46  ;;  %v288_v63 = vrot.slane %v274_v34, %v19941_v6 }
 0x2c2   :  { %v20069_v11 = vrot.slane %v321_v56, %v19525_v27 }
 0x2c3   :  { %v3613_v33 = vsel %vm938_vm2, %v20017_v0, -inf  ;;  %v290_v34 = vcombine.high %v288_v63, %v288_v63 }
 0x2c4   :  { %3614 = vmax.xlane.f32.xlu1 %v3613_v33  ;;  %v20051_v41 = vpop.permute.xlu1 %18217  ;;  %v20057_v33 = vpop.permute.xlu0 %18222  ;;  %22661 = vst [vmem:[#allocation42_spill] sm:$0xff] %v20069_v11 }
 0x2c5   :  { %22658 = vst [vmem:[#allocation39_spill] sm:$0xff] %v20051_v41  ;;  %22659 = vst [vmem:[#allocation40_spill] sm:$0xff] %v20057_v33 }
 0x310   :  { %v1695_v35 = vpop.f32.mrb[22].mxu1 }
 0x311   :  { %v3380_v37 = vmul.f32 0.25, %v1695_v35  ;;  %v1619_v38 = vpop.f32.mrb[18].mxu0  ;;  %v16122_v47 = vpop.f32.mrb[23].mxu1 }
 0x312   :  { %v3379_v48 = vmul.f32 0.25, %v1619_v38  ;;  %v16115_v50 = vpop.f32.mrb[19].mxu0  ;;  %v20066_v38 = vpop.permute.xlu1 %18227 }
 0x313   :  { %v20054_v46 = vadd.f32 %v20044_v32, %v3380_v37  ;;  %22660 = vst [vmem:[#allocation41_spill] sm:$0xff] %v20066_v38  ;;  %v20071_v37 = vpop.permute.xlu0 %18232 }
 0x314   :  { %v20060_v3 = vadd.f32 %v20049_v36, %v3379_v48  ;;  %22662 = vst [vmem:[#allocation43_spill] sm:$0xff] %v20071_v37  ;;  %v20074_v48 = vrot.slane %v319_v8, %v19525_v27  ;;  %v304_v8 = vrot.slane %v288_v63, %v19941_v6  ;;  %v219_v63 = vld [vmem:[%s22528_s3 + $0x10] sm:$0xff] }
 0x315   :  { %v3622_v17 = vsel %vm938_vm2, %v20054_v46, -inf  ;;  %v330_v1 = vrot.slane %v219_v63, %v19941_v6 }
 0x316   :  { %3623 = vmax.xlane.f32.xlu0 %v3622_v17  ;;  %v3619_v35 = vsel %vm938_vm2, %v20060_v3, -inf  ;;  %22663 = vst [vmem:[#allocation44_spill] sm:$0xff] %v20074_v48  ;;  %v20080_v36 = vpop.permute.xlu1 %18237  ;;  %v320_v53 = vcombine.high %v304_v8, %v304_v8 }
 0x317   :  { %3620 = vmax.xlane.f32.xlu1 %v3619_v35  ;;  %v318_v35 = vrot.slane %v290_v34, %v19941_v6  ;;  %22664 = vst [vmem:[#allocation45_spill] sm:$0xff] %v20080_v36  ;;  %v20082_v56 = vpop.permute.xlu0 %18242 }
 0x318   :  { %v1847_v47 = vpop.f32.mrb[24].mxu1  ;;  %22665 = vst [vmem:[#allocation46_spill] sm:$0xff] %v20082_v56 }
 0x319   :  { %v3382_v29 = vmul.f32 0.25, %v1847_v47  ;;  %v1771_v50 = vpop.f32.mrb[20].mxu0  ;;  %v16136_v57 = vpop.f32.mrb[25].mxu1  ;;  %v322_v10 = vcombine.high %v318_v35, %v318_v35 }
 0x31a   :  { %v3381_v17 = vmul.f32 0.25, %v1771_v50  ;;  %v16129_v23 = vpop.f32.mrb[21].mxu0  ;;  %v20095_v34 = vpop.permute.xlu1 %18257  ;;  %v20098_v50 = vrot.slane %v304_v8, %v19525_v27 }
 0x31b   :  { %v20077_v32 = vadd.f32 %v20069_v11, %v3382_v29  ;;  %v20093_v23 = vrot.slane %v318_v35, %v19525_v27  ;;  %22667 = vst [vmem:[#allocation48_spill] sm:$0xff] %v20095_v34  ;;  %v338_v35 = vcombine.high %v330_v1, %v330_v1 }
 0x31c   :  { %v20085_v42 = vadd.f32 %v20074_v48, %v3381_v17  ;;  %22668 = vst [vmem:[#allocation49_spill] sm:$0xff] %v20098_v50  ;;  %v20103_v48 = vpop.permute.xlu0 %18247 }
 0x31d   :  { %v3628_v47 = vsel %vm938_vm2, %v20077_v32, -inf  ;;  %22666 = vst [vmem:[#allocation47_spill] sm:$0xff] %v20093_v23 }
 0x31e   :  { %3629 = vmax.xlane.f32.xlu0 %v3628_v47  ;;  %v3625_v57 = vsel %vm938_vm2, %v20085_v42, -inf }
 0x31f   :  { %3626 = vmax.xlane.f32.xlu1 %v3625_v57 }
 0x320   :  { %v1999_v29 = vpop.f32.mrb[26].mxu1 }
 0x321   :  { %v3384_v17 = vmul.f32 0.25, %v1999_v29  ;;  %v1923_v11 = vpop.f32.mrb[22].mxu0  ;;  %v16150_v47 = vpop.f32.mrb[27].mxu1 }
 0x322   :  { %v3383_v54 = vmul.f32 0.25, %v1923_v11  ;;  %v16143_v57 = vpop.f32.mrb[23].mxu0  ;;  %v20116_v47 = vpop.permute.xlu1 %18262  ;;  %v20119_v11 = vrot.slane %v322_v10, %v19525_v27 }
 0x323   :  { %v20106_v25 = vadd.f32 %v20093_v23, %v3384_v17  ;;  %v20121_v17 = vpop.permute.xlu0 %18252  ;;  %v20124_v23 = vrot.slane %v320_v53, %v19525_v27  ;;  %v346_v53 = vrot.slane %v330_v1, %v19941_v6 }
 0x324   :  { %v20110_v39 = vadd.f32 %v20098_v50, %v3383_v54  ;;  %22669 = vst [vmem:[#allocation50_spill] sm:$0xff] %v20119_v11  ;;  %22670 = vst [vmem:[#allocation51_spill] sm:$0xff] %v20121_v17 }
 0x325   :  { %v3634_v28 = vsel %vm938_vm2, %v20106_v25, -inf  ;;  %22671 = vst [vmem:[#allocation52_spill] sm:$0xff] %v20124_v23 }
 0x326   :  { %3635 = vmax.xlane.f32.xlu0 %v3634_v28  ;;  %v3631_v29 = vsel %vm938_vm2, %v20110_v39, -inf  ;;  %v20130_v60 = vpop.permute.xlu1 %18267 }
 0x327   :  { %3632 = vmax.xlane.f32.xlu1 %v3631_v29  ;;  %v360_v29 = vrot.slane %v338_v35, %v19941_v6  ;;  %22672 = vst [vmem:[#allocation53_spill] sm:$0xff] %v20130_v60  ;;  %v20138_v22 = vpop.permute.xlu0 %18272  ;;  %v323_v35 = vcombine.high %v219_v63, %v219_v63 }
 0x328   :  { %v2151_v57 = vpop.f32.mrb[28].mxu1 }
 0x329   :  { %v3386_v54 = vmul.f32 0.25, %v2151_v57  ;;  %v16164_v50 = vpop.f32.mrb[29].mxu1  ;;  %v2075_v8 = vpop.f32.mrb[24].mxu0  ;;  %v370_v14 = vcombine.high %v360_v29, %v360_v29  ;;  %v337_v13 = vrot.slane %v323_v35, %v19941_v6 }
 0x32a   :  { %v3385_v31 = vmul.f32 0.25, %v2075_v8  ;;  %v16157_v24 = vpop.f32.mrb[25].mxu0  ;;  %v20148_v20 = vpop.permute.xlu1 %18282 }
 0x32b   :  { %v20127_v28 = vadd.f32 %v20119_v11, %v3386_v54  ;;  %v20143_v24 = vrot.slane %v360_v29, %v19525_v27  ;;  %v20154_v7 = vpop.permute.xlu0 %18277 }
 0x32c   :  { %v20133_v10 = vadd.f32 %v20124_v23, %v3385_v31  ;;  %v20146_v31 = vrot.slane %v346_v53, %v19525_v27  ;;  %22675 = vst [vmem:[#allocation56_spill] sm:$0xff] %v20154_v7 }
 0x32d   :  { %v3640_v57 = vsel %vm938_vm2, %v20127_v28, -inf  ;;  %22673 = vst [vmem:[#allocation54_spill] sm:$0xff] %v20143_v24 }
 0x32e   :  { %3641 = vmax.xlane.f32.xlu0 %v3640_v57  ;;  %v3637_v50 = vsel %vm938_vm2, %v20133_v10, -inf  ;;  %22674 = vst [vmem:[#allocation55_spill] sm:$0xff] %v20146_v31  ;;  %v20166_v29 = vpop.permute.xlu1 %18287 }
 0x32f   :  { %3638 = vmax.xlane.f32.xlu1 %v3637_v50  ;;  %22677 = vst [vmem:[#allocation58_spill] sm:$0xff] %v20166_v29 }
 0x330   :  { %v2303_v54 = vpop.f32.mrb[30].mxu1 }
 0x331   :  { %v3388_v8 = vmul.f32 0.25, %v2303_v54  ;;  %v16178_v11 = vpop.f32.mrb[31].mxu1  ;;  %v2227_v23 = vpop.f32.mrb[26].mxu0 }
 0x332   :  { %v3387_v57 = vmul.f32 0.25, %v2227_v23  ;;  %v16171_v19 = vpop.f32.mrb[27].mxu0  ;;  %v368_v11 = vcombine.high %v346_v53, %v346_v53 }
 0x333   :  { %v20151_v1 = vadd.f32 %v20143_v24, %v3388_v8  ;;  %v20164_v8 = vrot.slane %v370_v14, %v19525_v27  ;;  %v339_v19 = vcombine.high %v337_v13, %v337_v13 }
 0x334   :  { %v20157_v63 = vadd.f32 %v20146_v31, %v3387_v57  ;;  %v20169_v57 = vrot.slane %v368_v11, %v19525_v27  ;;  %v20171_v31 = vpop.permute.xlu0 %18292 }
 0x335   :  { %v3646_v50 = vsel %vm938_vm2, %v20151_v1, -inf  ;;  %22676 = vst [vmem:[#allocation57_spill] sm:$0xff] %v20164_v8  ;;  %v20177_v14 = vrot.slane %v339_v19, %v19941_v6 }
 0x336   :  { %3647 = vmax.xlane.f32.xlu0 %v3646_v50  ;;  %v3643_v54 = vsel %vm938_vm2, %v20157_v63, -inf  ;;  %22678 = vst [vmem:[#allocation59_spill] sm:$0xff] %v20169_v57 }
 0x337   :  { %3644 = vmax.xlane.f32.xlu1 %v3643_v54 }
 0x338   :  { %v2455_v23 = vpop.f32.mrb[32].mxu1 }
 0x339   :  { %v3390_v35 = vmul.f32 0.25, %v2455_v23  ;;  %v16192_v24 = vpop.f32.mrb[33].mxu1 }
 0x33a   :  { %v2379_v53 = vpop.f32.mrb[28].mxu0  ;;  %v20184_v24 = vpop.permute.xlu1 %18297 }
 0x33b   :  { %v20174_v50 = vadd.f32 %v20164_v8, %v3390_v35  ;;  %v3389_v2 = vmul.f32 0.25, %v2379_v53  ;;  %v16185_v9 = vpop.f32.mrb[29].mxu0  ;;  %22679 = vst [vmem:[#allocation60_spill] sm:$0xff] %v20184_v24 }
 0x33c   :  { %v20191_v9 = vrot.slane %v20177_v14, %v19525_v27 }
 0x33d   :  { %v20180_v54 = vadd.f32 %v20169_v57, %v3389_v2  ;;  %v3652_v23 = vsel %vm938_vm2, %v20174_v50, -inf }
 0x33e   :  { %v3597_v11 = vpop.xlane.xlu0 %3596  ;;  %3653 = vmax.xlane.f32.xlu0 %v3652_v23  ;;  %22680 = vst [vmem:[#allocation61_spill] sm:$0xff] %v20191_v9 }
 0x33f   :  { %v3691_v59 = vsub.f32 %v19963_v5, %v3597_v11  ;;  %v3649_v35 = vsel %vm938_vm2, %v20180_v54, -inf }
 0x340   :  { %3650 = vmax.xlane.f32.xlu1 %v3649_v35  ;;  %v2607_v19 = vpop.f32.mrb[34].mxu1 }
 0x341   :  { %v3723_v2 = vmul.f32 1.442695, %v3691_v59  ;;  %v3392_v53 = vmul.f32 0.25, %v2607_v19  ;;  %v16206_v8 = vpop.f32.mrb[35].mxu1  ;;  %v353_v59 = vrot.slane %v337_v13, %v19941_v6 }
 0x342   :  { %v2531_v57 = vpop.f32.mrb[30].mxu0  ;;  %v3606_v34 = vpop.xlane.xlu0 %3605 }
 0x343   :  { %18605 = vpow2.f32 %v3723_v2  ;;  %v20194_v23 = vadd.f32 %v20191_v9, %v3392_v53  ;;  %v3694_v5 = vsub.f32 %v19974_v21, %v3606_v34  ;;  %v3600_v11 = vpop.xlane.xlu1 %3599  ;;  %v16199_v56 = vpop.f32.mrb[31].mxu0 }
 0x344   :  { %v3692_v36 = vsub.f32 %v19977_v18, %v3600_v11  ;;  %v3391_v56 = vmul.f32 0.25, %v2531_v57  ;;  %v20203_v18 = vrot.slane %v353_v59, %v19525_v27 }
 0x345   :  { %v3729_v37 = vmul.f32 1.442695, %v3694_v5  ;;  %v3658_v35 = vsel %vm938_vm2, %v20194_v23, -inf  ;;  %v369_v5 = vcombine.high %v353_v59, %v353_v59 }
 0x346   :  { %v3725_v19 = vmul.f32 1.442695, %v3692_v36  ;;  %v3612_v8 = vpop.xlane.xlu0 %3611  ;;  %3659 = vmax.xlane.f32.xlu0 %v3658_v35  ;;  %22681 = vst [vmem:[#allocation62_spill] sm:$0xff] %v20203_v18  ;;  %v20213_v57 = vadd.f32 %v20203_v18, %v3391_v56 }
 0x347   :  { %18607 = vpow2.f32 %v3729_v37  ;;  %v3696_v2 = vsub.f32 %v19988_v26, %v3612_v8  ;;  %v220_v26 = vld [vmem:[%s22528_s3 + $0x18] sm:$0xff]  ;;  %v20216_v59 = vrot.slane %v369_v5, %v19525_v27 }
 0x348   :  { %v2759_v53 = vpop.f32.mrb[36].mxu1  ;;  %18609 = vpow2.f32 %v3725_v19 }
 0x349   :  { %v3733_v9 = vmul.f32 1.442695, %v3696_v2  ;;  %v3609_v21 = vpop.xlane.xlu1 %3608  ;;  %v16220_v34 = vpop.f32.mrb[37].mxu1  ;;  %22682 = vst [vmem:[#allocation63_spill] sm:$0xff] %v20216_v59  ;;  %v3394_v24 = vmul.f32 0.25, %v2759_v53 }
 0x34a   :  { %v2683_v11 = vpop.f32.mrb[32].mxu0  ;;  %v3603_v29 = vpop.xlane.xlu0 %3602  ;;  %v3695_v35 = vsub.f32 %v20002_v44, %v3609_v21 }
 0x34b   :  { %v3693_v13 = vsub.f32 %v19996_v40, %v3603_v29  ;;  %v16213_v36 = vpop.f32.mrb[33].mxu0  ;;  %18611 = vpow2.f32 %v3733_v9  ;;  %v3393_v8 = vmul.f32 0.25, %v2683_v11  ;;  %v379_v29 = vrot.slane %v220_v26, %v19941_v6 }
 0x34c   :  { %v371_v9 = vcombine.high %v20177_v14, %v20177_v14  ;;  %v3731_v21 = vmul.f32 1.442695, %v3695_v35 }
 0x34d   :  { %v20210_v37 = vpop.eup %18605  ;;  %v3727_v19 = vmul.f32 1.442695, %v3693_v13  ;;  %v395_v5 = vrot.slane %v379_v29, %v19941_v6  ;;  %v20228_v36 = vadd.f32 %v20216_v59, %v3393_v8  ;;  %v387_v8 = vcombine.high %v379_v29, %v379_v29 }
 0x34e   :  { %v3618_v2 = vpop.xlane.xlu0 %3617  ;;  %v3787_v40 = vsel %vm938_vm2, %v20210_v37, 0.0 }
 0x34f   :  { %18613 = vpow2.f32 %v3727_v19  ;;  %v3698_v44 = vsub.f32 %v20009_v52, %v3618_v2  ;;  %3788 = vadd.xlane.f32.xlu1 %v3787_v40  ;;  %v3655_v2 = vsel %vm938_vm2, %v20213_v57, -inf  ;;  %v20237_v40 = vrot.slane %v371_v9, %v19525_v27 }
 0x350   :  { %v2911_v34 = vpop.f32.mrb[38].mxu1  ;;  %18615 = vpow2.f32 %v3731_v21  ;;  %v20241_v59 = vrot.slane %v395_v5, %v19525_v27  ;;  %v417_v53 = vcombine.high %v395_v5, %v395_v5 }
 0x351   :  { %v20224_v56 = vpop.eup %18607  ;;  %v3737_v11 = vmul.f32 1.442695, %v3698_v44  ;;  %v16234_v13 = vpop.f32.mrb[39].mxu1  ;;  %22683 = vst [vmem:[#allocation64_spill] sm:$0xff] %v20237_v40  ;;  %v372_v44 = vcombine.high %v220_v26, %v220_v26 }
 0x352   :  { %v3615_v19 = vpop.xlane.xlu1 %3614  ;;  %v2835_v18 = vpop.f32.mrb[34].mxu0  ;;  %v3796_v52 = vsel %vm938_vm2, %v20224_v56, 0.0  ;;  %22684 = vst [vmem:[#allocation65_spill] sm:$0xff] %v20241_v59 }
 0x353   :  { %v20234_v14 = vpop.eup %18609  ;;  %v16227_v35 = vpop.f32.mrb[35].mxu0  ;;  %3797 = vadd.xlane.f32.xlu0 %v3796_v52  ;;  %3656 = vmax.xlane.f32.xlu1 %v3655_v2  ;;  %18617 = vpow2.f32 %v3737_v11  ;;  %v3697_v13 = vsub.f32 %v20017_v0, %v3615_v19  ;;  %v3395_v60 = vmul.f32 0.25, %v2835_v18  ;;  %v3661_v52 = vsel %vm938_vm2, %v20228_v36, -inf }
 0x354   :  { %v3790_v7 = vsel %vm938_vm2, %v20234_v14, 0.0  ;;  %v386_v29 = vrot.slane %v372_v44, %v19941_v6  ;;  %v409_v0 = vrot.slane %v387_v8, %v19941_v6  ;;  %v20254_v11 = vadd.f32 %v20237_v40, %v3394_v24 }
 0x355   :  { %v20247_v2 = vpop.eup %18611  ;;  %v3735_v21 = vmul.f32 1.442695, %v3697_v13  ;;  %v20257_v19 = vadd.f32 %v20241_v59, %v3395_v60  ;;  %v20267_v13 = vrot.slane %v417_v53, %v19525_v27 }
 0x356   :  { %v388_v8 = vcombine.high %v386_v29, %v386_v29  ;;  %v20264_v5 = vrot.slane %v409_v0, %v19525_v27  ;;  %v419_v24 = vcombine.high %v409_v0, %v409_v0  ;;  %v3664_v40 = vsel %vm938_vm2, %v20254_v11, -inf }
 0x357   :  { %3791 = vadd.xlane.f32.xlu0 %v3790_v7  ;;  %3662 = vmax.xlane.f32.xlu1 %v3661_v52  ;;  %v3802_v7 = vsel %vm938_vm2, %v20247_v2, 0.0  ;;  %18619 = vpow2.f32 %v3735_v21  ;;  %22686 = vst [vmem:[#allocation67_spill] sm:$0xff] %v20267_v13 }
 0x358   :  { %v3063_v26 = vpop.f32.mrb[40].mxu1  ;;  %22685 = vst [vmem:[#allocation66_spill] sm:$0xff] %v20264_v5  ;;  %v416_v21 = vrot.slane %v388_v8, %v19941_v6  ;;  %v20279_v53 = vrot.slane %v419_v24, %v19525_v27 }
 0x359   :  { %v20250_v9 = vpop.eup %18613  ;;  %v16248_v18 = vpop.f32.mrb[41].mxu1 }
 0x35a   :  { %v2987_v35 = vpop.f32.mrb[36].mxu0  ;;  %v3793_v44 = vsel %vm938_vm2, %v20250_v9, 0.0  ;;  %v20269_v60 = vpop.eup %18615  ;;  %v3396_v18 = vmul.f32 0.25, %v2911_v34  ;;  %22687 = vst [vmem:[#allocation68_spill] sm:$0xff] %v20279_v53  ;;  %v402_v34 = vrot.slane %v386_v29, %v19941_v6  ;;  %v20293_v24 = vrot.slane %v416_v21, %v19525_v27 }
 0x35b   :  { %v16241_v52 = vpop.f32.mrb[37].mxu0  ;;  %3803 = vadd.xlane.f32.xlu0 %v3802_v7  ;;  %3794 = vadd.xlane.f32.xlu1 %v3793_v44  ;;  %v3397_v59 = vmul.f32 0.25, %v2987_v35  ;;  %v3667_v7 = vsel %vm938_vm2, %v20257_v19, -inf  ;;  %v3799_v8 = vsel %vm938_vm2, %v20269_v60, 0.0 }
 0x35c   :  { %v3398_v52 = vmul.f32 0.25, %v3063_v26  ;;  %v20283_v38 = vadd.f32 %v20264_v5, %v3396_v18  ;;  %22688 = vst [vmem:[#allocation69_spill] sm:$0xff] %v20293_v24  ;;  %v20299_v29 = vrot.slane %v402_v34, %v19525_v27  ;;  %v418_v18 = vcombine.high %v402_v34, %v402_v34 }
 0x35d   :  { %v20275_v44 = vpop.eup %18617  ;;  %v20286_v17 = vadd.f32 %v20267_v13, %v3397_v59  ;;  %v420_v59 = vcombine.high %v416_v21, %v416_v21 }
 0x35e   :  { %v20296_v6 = vadd.f32 %v20279_v53, %v3398_v52  ;;  %v3670_v13 = vsel %vm938_vm2, %v20283_v38, -inf  ;;  %v20311_v53 = vrot.slane %v418_v18, %v19525_v27 }
 0x35f   :  { %3665 = vmax.xlane.f32.xlu0 %v3664_v40  ;;  %3668 = vmax.xlane.f32.xlu1 %v3667_v7  ;;  %v3808_v40 = vsel %vm938_vm2, %v20275_v44, 0.0  ;;  %v20308_v52 = vrot.slane %v420_v59, %v19525_v27 }
 0x360   :  { %v3215_v0 = vpop.f32.mrb[42].mxu1  ;;  %22690 = vst [vmem:[#allocation71_spill] sm:$0xff] %v20311_v53 }
 0x361   :  { %v16262_v35 = vpop.f32.mrb[43].mxu1  ;;  %v3400_v7 = vmul.f32 0.25, %v3215_v0  ;;  %22689 = vst [vmem:[#allocation70_spill] sm:$0xff] %v20308_v52 }
 0x362   :  { %v3139_v41 = vpop.f32.mrb[38].mxu0 }
 0x363   :  { %v16255_v26 = vpop.f32.mrb[39].mxu0  ;;  %3809 = vadd.xlane.f32.xlu0 %v3808_v40  ;;  %3800 = vadd.xlane.f32.xlu1 %v3799_v8  ;;  %v3399_v35 = vmul.f32 0.25, %v3139_v41  ;;  %v3673_v40 = vsel %vm938_vm2, %v20286_v17, -inf  ;;  %v20305_v8 = vpop.eup %18619  ;;  %v3676_v41 = vsel %vm938_vm2, %v20296_v6, -inf  ;;  %v20316_v0 = vadd.f32 %v20293_v24, %v3400_v7 }
 0x365   :  { %v20319_v34 = vadd.f32 %v20299_v29, %v3399_v35  ;;  %v3682_v7 = vsel %vm938_vm2, %v20316_v0, -inf }
 0x367   :  { %3671 = vmax.xlane.f32.xlu0 %v3670_v13  ;;  %3674 = vmax.xlane.f32.xlu1 %v3673_v40  ;;  %v3805_v40 = vsel %vm938_vm2, %v20305_v8, 0.0  ;;  %v3679_v35 = vsel %vm938_vm2, %v20319_v34, -inf }
 0x368   :  { %v3367_v26 = vpop.f32.mrb[44].mxu1 }
 0x369   :  { %v16276_v21 = vpop.f32.mrb[45].mxu1  ;;  %v3402_v5 = vmul.f32 0.25, %v3367_v26 }
 0x36a   :  { %v3291_v13 = vpop.f32.mrb[40].mxu0 }
 0x36b   :  { %v3401_v59 = vmul.f32 0.25, %v3291_v13  ;;  %v16269_v33 = vpop.f32.mrb[41].mxu0  ;;  %3677 = vmax.xlane.f32.xlu0 %v3676_v41  ;;  %3806 = vadd.xlane.f32.xlu1 %v3805_v40  ;;  %v20324_v18 = vadd.f32 %v20308_v52, %v3402_v5 }
 0x36d   :  { %v20327_v21 = vadd.f32 %v20311_v53, %v3401_v59  ;;  %v3688_v26 = vsel %vm938_vm2, %v20324_v18, -inf }
 0x36f   :  { %3683 = vmax.xlane.f32.xlu0 %v3682_v7  ;;  %3680 = vmax.xlane.f32.xlu1 %v3679_v35  ;;  %v3685_v33 = vsel %vm938_vm2, %v20327_v21, -inf }
 0x373   :  { %3689 = vmax.xlane.f32.xlu0 %v3688_v26  ;;  %3686 = vmax.xlane.f32.xlu1 %v3685_v33 }
 0x384   :  { %18307 = vrot.lane.b32.xlu1 %v19873_v62, %s19105_s22 }
 0x389   :  { %18302 = vrot.lane.b32.xlu0 %v19878_v61, %s19105_s22 }
 0x3a3   :  { %v3624_v5 = vpop.xlane.xlu0 %3623 }
 0x3a4   :  { %v3700_v41 = vsub.f32 %v20054_v46, %v3624_v5  ;;  %v3621_v13 = vpop.xlane.xlu1 %3620 }
 0x3a5   :  { %v3699_v40 = vsub.f32 %v20060_v3, %v3621_v13 }
 0x3a6   :  { %v3741_v59 = vmul.f32 1.442695, %v3700_v41 }
 0x3a7   :  { %v3739_v7 = vmul.f32 1.442695, %v3699_v40 }
 0x3a8   :  { %18621 = vpow2.f32 %v3741_v59 }
 0x3a9   :  { %18623 = vpow2.f32 %v3739_v7 }
 0x3ab   :  { %v3630_v35 = vpop.xlane.xlu0 %3629 }
 0x3ac   :  { %v3702_v26 = vsub.f32 %v20077_v32, %v3630_v35  ;;  %v3627_v33 = vpop.xlane.xlu1 %3626 }
 0x3ad   :  { %v3701_v52 = vsub.f32 %v20085_v42, %v3627_v33 }
 0x3ae   :  { %v3745_v62 = vmul.f32 1.442695, %v3702_v26 }
 0x3af   :  { %v3743_v24 = vmul.f32 1.442695, %v3701_v52 }
 0x3b0   :  { %18625 = vpow2.f32 %v3745_v62 }
 0x3b1   :  { %18627 = vpow2.f32 %v3743_v24 }
 0x3b2   :  { %v20345_v61 = vpop.eup %18621 }
 0x3b3   :  { %v20347_v46 = vpop.eup %18623  ;;  %v3636_v5 = vpop.xlane.xlu0 %3635  ;;  %v3814_v3 = vsel %vm938_vm2, %v20345_v61, 0.0 }
 0x3b4   :  { %v3704_v41 = vsub.f32 %v20106_v25, %v3636_v5  ;;  %3815 = vadd.xlane.f32.xlu0 %v3814_v3  ;;  %v3633_v13 = vpop.xlane.xlu1 %3632  ;;  %v3811_v32 = vsel %vm938_vm2, %v20347_v46, 0.0 }
 0x3b5   :  { %v3703_v42 = vsub.f32 %v20110_v39, %v3633_v13  ;;  %3812 = vadd.xlane.f32.xlu1 %v3811_v32 }
 0x3b6   :  { %v3749_v52 = vmul.f32 1.442695, %v3704_v41 }
 0x3b7   :  { %v3747_v24 = vmul.f32 1.442695, %v3703_v42 }
 0x3b8   :  { %18629 = vpow2.f32 %v3749_v52 }
 0x3b9   :  { %18631 = vpow2.f32 %v3747_v24 }
 0x3ba   :  { %v20355_v40 = vpop.eup %18625 }
 0x3bb   :  { %v20357_v59 = vpop.eup %18627  ;;  %v3642_v7 = vpop.xlane.xlu0 %3641  ;;  %v3820_v25 = vsel %vm938_vm2, %v20355_v40, 0.0 }
 0x3bc   :  { %v3706_v35 = vsub.f32 %v20127_v28, %v3642_v7  ;;  %3821 = vadd.xlane.f32.xlu0 %v3820_v25  ;;  %v3817_v26 = vsel %vm938_vm2, %v20357_v59, 0.0  ;;  %v3639_v39 = vpop.xlane.xlu1 %3638 }
 0x3bd   :  { %3818 = vadd.xlane.f32.xlu1 %v3817_v26  ;;  %v3705_v62 = vsub.f32 %v20133_v10, %v3639_v39 }
 0x3be   :  { %v3753_v33 = vmul.f32 1.442695, %v3706_v35 }
 0x3bf   :  { %v3751_v5 = vmul.f32 1.442695, %v3705_v62 }
 0x3c0   :  { %18633 = vpow2.f32 %v3753_v33 }
 0x3c1   :  { %18635 = vpow2.f32 %v3751_v5 }
 0x3c2   :  { %v20365_v3 = vpop.eup %18629 }
 0x3c3   :  { %v20367_v41 = vpop.eup %18631  ;;  %v3648_v13 = vpop.xlane.xlu0 %3647  ;;  %v3826_v28 = vsel %vm938_vm2, %v20365_v3, 0.0 }
 0x3c4   :  { %v3708_v32 = vsub.f32 %v20151_v1, %v3648_v13  ;;  %3827 = vadd.xlane.f32.xlu0 %v3826_v28  ;;  %v3823_v42 = vsel %vm938_vm2, %v20367_v41, 0.0  ;;  %v3645_v52 = vpop.xlane.xlu1 %3644 }
 0x3c5   :  { %3824 = vadd.xlane.f32.xlu1 %v3823_v42  ;;  %v3707_v24 = vsub.f32 %v20157_v63, %v3645_v52 }
 0x3c6   :  { %v3757_v10 = vmul.f32 1.442695, %v3708_v32 }
 0x3c7   :  { %v3755_v7 = vmul.f32 1.442695, %v3707_v24 }
 0x3c8   :  { %18637 = vpow2.f32 %v3757_v10 }
 0x3c9   :  { %18639 = vpow2.f32 %v3755_v7 }
 0x3ca   :  { %v20375_v25 = vpop.eup %18633 }
 0x3cb   :  { %v3654_v35 = vpop.xlane.xlu0 %3653  ;;  %v3832_v26 = vsel %vm938_vm2, %v20375_v25, 0.0  ;;  %v20379_v39 = vpop.eup %18635 }
 0x3cc   :  { %v3710_v1 = vsub.f32 %v20174_v50, %v3654_v35  ;;  %3833 = vadd.xlane.f32.xlu0 %v3832_v26  ;;  %v3829_v62 = vsel %vm938_vm2, %v20379_v39, 0.0 }
 0x3cd   :  { %v3651_v33 = vpop.xlane.xlu1 %3650  ;;  %3830 = vadd.xlane.f32.xlu1 %v3829_v62 }
 0x3ce   :  { %v3761_v5 = vmul.f32 1.442695, %v3710_v1  ;;  %v3709_v63 = vsub.f32 %v20180_v54, %v3651_v33 }
 0x3d0   :  { %18641 = vpow2.f32 %v3761_v5  ;;  %v3759_v13 = vmul.f32 1.442695, %v3709_v63 }
 0x3d2   :  { %v20385_v28 = vpop.eup %18637  ;;  %18643 = vpow2.f32 %v3759_v13 }
 0x3d3   :  { %v3660_v32 = vpop.xlane.xlu0 %3659  ;;  %v3838_v42 = vsel %vm938_vm2, %v20385_v28, 0.0  ;;  %v20389_v52 = vpop.eup %18639 }
 0x3d4   :  { %v3712_v50 = vsub.f32 %v20194_v23, %v3660_v32  ;;  %3839 = vadd.xlane.f32.xlu0 %v3838_v42  ;;  %v3835_v10 = vsel %vm938_vm2, %v20389_v52, 0.0 }
 0x3d5   :  { %3836 = vadd.xlane.f32.xlu1 %v3835_v10  ;;  %v18174_v10 = vunpack.i.l.bf16 %v20021_v45 }
 0x3d6   :  { %v3765_v24 = vmul.f32 1.442695, %v3712_v50  ;;  %v18175_v50 = vunpack.i.h.bf16 %v20021_v45 }
 0x3d8   :  { %18645 = vpow2.f32 %v3765_v24 }
 0x3da   :  { %v20394_v54 = vpop.eup %18641 }
 0x3db   :  { %v3844_v7 = vsel %vm938_vm2, %v20394_v54, 0.0 }
 0x3dc   :  { %v20398_v35 = vpop.eup %18643  ;;  %3845 = vadd.xlane.f32.xlu0 %v3844_v7  ;;  %v3789_v26 = vpop.xlane.xlu1 %3788 }
 0x3dd   :  { %18647 = vrcp.f32 %v3789_v26  ;;  %v3841_v23 = vsel %vm938_vm2, %v20398_v35, 0.0 }
 0x3de   :  { %3842 = vadd.xlane.f32.xlu1 %v3841_v23 }
 0x3e0   :  { %v3798_v1 = vpop.xlane.xlu0 %3797  ;;  %v3657_v33 = vpop.xlane.xlu1 %3656 }
 0x3e1   :  { %v3711_v62 = vsub.f32 %v20213_v57, %v3657_v33 }
 0x3e2   :  { %v20403_v5 = vpop.eup %18645 }
 0x3e3   :  { %v3763_v63 = vmul.f32 1.442695, %v3711_v62  ;;  %v3850_v13 = vsel %vm938_vm2, %v20403_v5, 0.0  ;;  %v17513_v62 = vpack.c.bf16 %v18175_v50, %v18174_v10 }
 0x3e4   :  { %3851 = vadd.xlane.f32.xlu0 %v3850_v13  ;;  %v3792_v32 = vpop.xlane.xlu0 %3791  ;;  %v3663_v42 = vpop.xlane.xlu1 %3662  ;;  %v22691_v13 = vmov 0.0  }
 0x3e5   :  { %18649 = vpow2.f32 %v3763_v63  ;;  %v3713_v24 = vsub.f32 %v20228_v36, %v3663_v42  ;;  %v22692_v63 = vmov 0.0|0.0   ;;  %v18179_v42 = vunpack.i.l.bf16 %v20023_v51 }
 0x3e6   :  { %18651 = vrcp.f32 %v3792_v32 }
 0x3e7   :  { %v18648_v7 = vpop.eup %18647  ;;  %v3767_v26 = vmul.f32 1.442695, %v3713_v24  ;;  %18653 = vrcp.f32 %v3798_v1 }
 0x3e8   :  { %v3804_v57 = vpop.xlane.xlu0 %3803  ;;  %v3795_v23 = vpop.xlane.xlu1 %3794  ;;  %v3915_v33 = vmul.f32 %v18648_v7, %v20210_v37  ;;  %v18180_v37 = vunpack.i.h.bf16 %v20023_v51  ;;  %v18189_v51 = vunpack.i.l.bf16 %v20031_v12 }
 0x3e9   :  { %18655 = vpow2.f32 %v3767_v26 }
 0x3ea   :  { %16282 = vmatmul.mubr.msk.f32.vlgmr.msra.gmra.mrb[42].mxu0 %vm938_vm2, %v3915_v33  ;;  %18657 = vrcp.f32 %v3795_v23 }
 0x3eb   :  { %17514 = vmatpush3.bf16.msra.mxu0 %v17513_v62  ;;  %16295 = vmatprep.mubr.msk.f32.mxu0 %vm19100_vm1, %v22691_v13  ;;  %18659 = vrcp.f32 %v3804_v57  ;;  %v18190_v62 = vunpack.i.h.bf16 %v20031_v12 }
 0x3ec   :  { %v3666_v45 = vpop.xlane.xlu0 %3665  ;;  %v3669_v36 = vpop.xlane.xlu1 %3668  ;;  %17518 = vmatprep.subr.bf16.mxu0 %v22692_v63 }
 0x3ed   :  { %v3714_v1 = vsub.f32 %v20254_v11, %v3666_v45  ;;  %v3715_v32 = vsub.f32 %v20257_v19, %v3669_v36  ;;  %v17516_v19 = vpack.c.bf16 %v18180_v37, %v18179_v42  ;;  %v18185_v36 = vunpack.i.h.bf16 %v20028_v49 }
 0x3ef   :  { %v20419_v50 = vpop.eup %18649  ;;  %v3769_v10 = vmul.f32 1.442695, %v3714_v1  ;;  %v3771_v24 = vmul.f32 1.442695, %v3715_v32  ;;  %v18184_v1 = vunpack.i.l.bf16 %v20028_v49 }
 0x3f0   :  { %v18652_v7 = vpop.eup %18651  ;;  %v3810_v26 = vpop.xlane.xlu0 %3809  ;;  %v3847_v57 = vsel %vm938_vm2, %v20419_v50, 0.0 }
 0x3f1   :  { %v3801_v23 = vpop.xlane.xlu1 %3800  ;;  %18661 = vpow2.f32 %v3769_v10  ;;  %3848 = vadd.xlane.f32.xlu1 %v3847_v57  ;;  %v3916_v11 = vmul.f32 %v18652_v7, %v20234_v14  ;;  %v18654_v33 = vpop.eup %18653  ;;  %v17522_v7 = vpack.c.bf16 %v18190_v62, %v18189_v51  ;;  %v18210_v62 = vunpack.i.h.bf16 %v20046_v16 }
 0x3f2   :  { %18663 = vpow2.f32 %v3771_v24  ;;  %v3918_v49 = vmul.f32 %v18654_v33, %v20224_v56  ;;  %v18209_v51 = vunpack.i.l.bf16 %v20046_v16 }
 0x3f3   :  { %v20426_v45 = vpop.eup %18655  ;;  %18665 = vrcp.f32 %v3810_v26  ;;  %16289 = vmatmul.mubr.msk.f32.vlgmr.msra.gmra.mrb[46].mxu1 %vm938_vm2, %v3916_v11  ;;  %v18200_v26 = vunpack.i.h.bf16 %v20038_v55  ;;  %v17519_v11 = vpack.c.bf16 %v18185_v36, %v18184_v1 }
 0x3f4   :  { %18667 = vrcp.f32 %v3801_v23  ;;  %17517 = vmatpush3.bf16.msra.mxu1 %v17516_v19  ;;  %v3672_v32 = vpop.xlane.xlu0 %3671  ;;  %16302 = vmatprep.mubr.msk.f32.mxu1 %vm19100_vm1, %v22691_v13  ;;  %v3853_v12 = vsel %vm938_vm2, %v20426_v45, 0.0  ;;  %v18658_v37 = vpop.eup %18657  ;;  %v18199_v23 = vunpack.i.l.bf16 %v20038_v55 }
 0x3f5   :  { %v3675_v14 = vpop.xlane.xlu1 %3674  ;;  %v3716_v42 = vsub.f32 %v20283_v38, %v3672_v32  ;;  %17521 = vmatprep.subr.bf16.mxu1 %v22692_v63  ;;  %3854 = vadd.xlane.f32.xlu1 %v3853_v12  ;;  %v18660_v24 = vpop.eup %18659  ;;  %v3917_v57 = vmul.f32 %v18658_v37, %v20250_v9 }
 0x3f6   :  { %v3717_v10 = vsub.f32 %v20286_v17, %v3675_v14  ;;  %v3920_v55 = vmul.f32 %v18660_v24, %v20247_v2  ;;  %v17528_v9 = vpack.c.bf16 %v18200_v26, %v18199_v23 }
 0x3f7   :  { %v3773_v19 = vmul.f32 1.442695, %v3716_v42  ;;  %16303 = vmatmul.mubr.msk.f32.vlgmr.msra.gmra.mrb[48].mxu1 %vm938_vm2, %v3918_v49  ;;  %16296 = vmatmul.mubr.msk.f32.vlgmr.msra.gmra.mrb[44].mxu0 %vm938_vm2, %v3917_v57  ;;  %v17534_v49 = vpack.c.bf16 %v18210_v62, %v18209_v51 }
 0x3f8   :  { %v3775_v53 = vmul.f32 1.442695, %v3717_v10  ;;  %17523 = vmatpush3.bf16.msra.mxu1 %v17522_v7  ;;  %v3678_v38 = vpop.xlane.xlu0 %3677  ;;  %17520 = vmatpush3.bf16.msra.mxu0 %v17519_v11 }
 0x3f9   :  { %v3807_v17 = vpop.xlane.xlu1 %3806  ;;  %18669 = vpow2.f32 %v3773_v19  ;;  %v3718_v56 = vsub.f32 %v20296_v6, %v3678_v38  ;;  %16316 = vmatprep.mubr.msk.f32.mxu1 %vm19100_vm1, %v22691_v13  ;;  %17527 = vmatprep.subr.bf16.mxu1 %v22692_v63  ;;  %v18194_v6 = vunpack.i.l.bf16 %v20033_v15  ;;  %v18204_v19 = vunpack.i.l.bf16 %v20035_v58 }
 0x3fa   :  { %18671 = vpow2.f32 %v3775_v53  ;;  %16309 = vmatprep.mubr.msk.f32.mxu0 %vm19100_vm1, %v22691_v13  ;;  %17524 = vmatprep.subr.bf16.mxu0 %v22692_v63  ;;  %v18195_v53 = vunpack.i.h.bf16 %v20033_v15 }
 0x3fb   :  { %v20451_v33 = vpop.eup %18661  ;;  %v3777_v36 = vmul.f32 1.442695, %v3718_v56  ;;  %18673 = vrcp.f32 %v3807_v17  ;;  %16317 = vmatmul.mubr.msk.f32.vlgmr.msra.gmra.mrb[50].mxu1 %vm938_vm2, %v3920_v55 }
 0x3fc   :  { %v20457_v2 = vpop.eup %18663  ;;  %17529 = vmatpush3.bf16.msra.mxu1 %v17528_v9  ;;  %v3684_v1 = vpop.xlane.xlu0 %3683  ;;  %16330 = vmatprep.mubr.msk.f32.mxu1 %vm19100_vm1, %v22691_v13  ;;  %v3856_v16 = vsel %vm938_vm2, %v20451_v33, 0.0  ;;  %v17525_v23 = vpack.c.bf16 %v18195_v53, %v18194_v6 }
 0x3fd   :  { %v3681_v32 = vpop.xlane.xlu1 %3680  ;;  %v18666_v14 = vpop.eup %18665  ;;  %18675 = vpow2.f32 %v3777_v36  ;;  %v3720_v12 = vsub.f32 %v20316_v0, %v3684_v1  ;;  %17533 = vmatprep.subr.bf16.mxu1 %v22692_v63  ;;  %3857 = vadd.xlane.f32.xlu0 %v3856_v16  ;;  %v3859_v15 = vsel %vm938_vm2, %v20457_v2, 0.0 }
 0x3fe   :  { %v3719_v37 = vsub.f32 %v20319_v34, %v3681_v32  ;;  %v18668_v42 = vpop.eup %18667  ;;  %3860 = vadd.xlane.f32.xlu1 %v3859_v15  ;;  %v3922_v10 = vmul.f32 %v18666_v14, %v20275_v44 }
 0x3ff   :  { %v3781_v24 = vmul.f32 1.442695, %v3720_v12  ;;  %v3919_v26 = vmul.f32 %v18668_v42, %v20269_v60  ;;  %v18205_v60 = vunpack.i.h.bf16 %v20035_v58 }
 0x400   :  { %v3779_v7 = vmul.f32 1.442695, %v3719_v37  ;;  %16331 = vmatmul.mubr.msk.f32.vlgmr.msra.gmra.mrb[52].mxu1 %vm938_vm2, %v3922_v10  ;;  %v3690_v0 = vpop.xlane.xlu0 %3689 }
 0x401   :  { %v3687_v34 = vpop.xlane.xlu1 %3686  ;;  %18677 = vpow2.f32 %v3781_v24  ;;  %16310 = vmatmul.mubr.msk.f32.vlgmr.msra.gmra.mrb[46].mxu0 %vm938_vm2, %v3919_v26  ;;  %17535 = vmatpush3.bf16.msra.mxu1 %v17534_v49  ;;  %v3722_v57 = vsub.f32 %v20324_v18, %v3690_v0  ;;  %v17531_v62 = vpack.c.bf16 %v18205_v60, %v18204_v19  ;;  %v18250_v49 = vunpack.i.h.bf16 %v20103_v48 }
 0x402   :  { %v3721_v11 = vsub.f32 %v20327_v21, %v3687_v34  ;;  %18679 = vpow2.f32 %v3779_v7  ;;  %17526 = vmatpush3.bf16.msra.mxu0 %v17525_v23  ;;  %16323 = vmatprep.mubr.msk.f32.mxu0 %vm19100_vm1, %v22691_v13  ;;  %v18249_v24 = vunpack.i.l.bf16 %v20103_v48  ;;  %v18214_v26 = vunpack.i.l.bf16 %v20041_v30 }
 0x403   :  { %v20478_v44 = vpop.eup %18669  ;;  %v3785_v38 = vmul.f32 1.442695, %v3722_v57  ;;  %17530 = vmatprep.subr.bf16.mxu0 %v22692_v63  ;;  %16344 = vmatprep.mubr.msk.f32.mxu1 %vm19100_vm1, %v22691_v13  ;;  %v18274_v60 = vunpack.i.l.bf16 %v20138_v22  ;;  %v18264_v19 = vunpack.i.l.bf16 %v20116_v47 }
 0x404   :  { %v3783_v17 = vmul.f32 1.442695, %v3721_v11  ;;  %v20485_v18 = vpop.eup %18671  ;;  %v3862_v21 = vsel %vm938_vm2, %v20478_v44, 0.0  ;;  %17539 = vmatprep.subr.bf16.mxu1 %v22692_v63  ;;  %v20521_v12 = vpop.permute.xlu0 %18302  ;;  %v17540_v34 = vpack.c.bf16 %v18250_v49, %v18249_v24  ;;  %v22694_v24 = vld [vmem:[#allocation39_spill] sm:$0xff] }
 0x405   :  { %v18674_v56 = vpop.eup %18673  ;;  %18681 = vpow2.f32 %v3785_v38  ;;  %3863 = vadd.xlane.f32.xlu0 %v3862_v21  ;;  %v3865_v58 = vsel %vm938_vm2, %v20485_v18, 0.0  ;;  %v20523_v37 = vpop.permute.xlu1 %18307 }
 0x406   :  { %18683 = vpow2.f32 %v3783_v17  ;;  %v3921_v55 = vmul.f32 %v18674_v56, %v20305_v8  ;;  %3866 = vadd.xlane.f32.xlu1 %v3865_v58 }
 0x407   :  { %v20493_v9 = vpop.eup %18675 }
 0x408   :  { %16324 = vmatmul.mubr.msk.f32.vlgmr.msra.gmra.mrb[48].mxu0 %vm938_vm2, %v3921_v55  ;;  %v3868_v51 = vsel %vm938_vm2, %v20493_v9, 0.0 }
 0x409   :  { %17532 = vmatpush3.bf16.msra.mxu0 %v17531_v62  ;;  %3869 = vadd.xlane.f32.xlu0 %v3868_v51  ;;  %v18294_v62 = vunpack.i.l.bf16 %v20171_v31 }
 0x40a   :  { %16337 = vmatprep.mubr.msk.f32.mxu0 %vm19100_vm1, %v22691_v13  ;;  %17536 = vmatprep.subr.bf16.mxu0 %v22692_v63 }
 0x40b   :  { %v20501_v36 = vpop.eup %18677 }
 0x40c   :  { %v20503_v53 = vpop.eup %18679  ;;  %v3874_v8 = vsel %vm938_vm2, %v20501_v36, 0.0 }
 0x40d   :  { %3875 = vadd.xlane.f32.xlu0 %v3874_v8  ;;  %v3871_v6 = vsel %vm938_vm2, %v20503_v53, 0.0 }
 0x40e   :  { %3872 = vadd.xlane.f32.xlu1 %v3871_v6 }
 0x40f   :  { %v20509_v1 = vpop.eup %18681 }
 0x410   :  { %v20511_v32 = vpop.eup %18683  ;;  %v3880_v16 = vsel %vm938_vm2, %v20509_v1, 0.0 }
 0x411   :  { %3881 = vadd.xlane.f32.xlu0 %v3880_v16  ;;  %v3877_v14 = vsel %vm938_vm2, %v20511_v32, 0.0 }
 0x412   :  { %3878 = vadd.xlane.f32.xlu1 %v3877_v14 }
 0x423   :  { %18317 = vrot.lane.b32.xlu1 %v19901_v43, %s19105_s22  ;;  %v18215_v43 = vunpack.i.h.bf16 %v20041_v30  ;;  %v18275_v30 = vunpack.i.h.bf16 %v20138_v22 }
 0x425   :  { %v17537_v11 = vpack.c.bf16 %v18215_v43, %v18214_v26  ;;  %v17546_v56 = vpack.c.bf16 %v18275_v30, %v18274_v60  ;;  %v18219_v43 = vunpack.i.l.bf16 %v22694_v24  ;;  %v22696_v60 = vld [vmem:[#allocation41_spill] sm:$0xff] }
 0x427   :  { %18312 = vrot.lane.b32.xlu0 %v19906_v4, %s19105_s22 }
 0x441   :  { %v3816_v15 = vpop.xlane.xlu0 %3815 }
 0x442   :  { %18685 = vrcp.f32 %v3816_v15  ;;  %v3813_v42 = vpop.xlane.xlu1 %3812 }
 0x443   :  { %18687 = vrcp.f32 %v3813_v42 }
 0x449   :  { %v3822_v10 = vpop.xlane.xlu0 %3821 }
 0x44a   :  { %18689 = vrcp.f32 %v3822_v10  ;;  %v3819_v7 = vpop.xlane.xlu1 %3818 }
 0x44b   :  { %18691 = vrcp.f32 %v3819_v7  ;;  %v18220_v7 = vunpack.i.h.bf16 %v22694_v24 }
 0x44c   :  { %v18686_v4 = vpop.eup %18685 }
 0x44d   :  { %v18688_v23 = vpop.eup %18687  ;;  %v3924_v0 = vmul.f32 %v18686_v4, %v20345_v61 }
 0x44e   :  { %v3923_v57 = vmul.f32 %v18688_v23, %v20347_v46  ;;  %v18265_v46 = vunpack.i.h.bf16 %v20116_v47  ;;  %v18295_v47 = vunpack.i.h.bf16 %v20171_v31 }
 0x44f   :  { %16345 = vmatmul.mubr.msk.f32.vlgmr.msra.gmra.mrb[54].mxu1 %vm938_vm2, %v3924_v0 }
 0x450   :  { %17541 = vmatpush3.bf16.msra.mxu1 %v17540_v34  ;;  %16338 = vmatmul.mubr.msk.f32.vlgmr.msra.gmra.mrb[50].mxu0 %vm938_vm2, %v3923_v57  ;;  %v17543_v58 = vpack.c.bf16 %v18265_v46, %v18264_v19  ;;  %v17552_v14 = vpack.c.bf16 %v18295_v47, %v18294_v62  ;;  %v17555_v34 = vpack.c.bf16 %v18220_v7, %v18219_v43  ;;  %v18229_v46 = vunpack.i.l.bf16 %v22696_v60  ;;  %v22698_v47 = vld [vmem:[#allocation53_spill] sm:$0xff]  ;;  %v22701_v43 = vld [vmem:[#allocation43_spill] sm:$0xff] }
 0x451   :  { %17538 = vmatpush3.bf16.msra.mxu0 %v17537_v11  ;;  %v3828_v48 = vpop.xlane.xlu0 %3827  ;;  %16358 = vmatprep.mubr.msk.f32.mxu1 %vm19100_vm1, %v22691_v13  ;;  %v22695_v11 = vld [vmem:[#allocation51_spill] sm:$0xff]  ;;  %v18270_v62 = vunpack.i.h.bf16 %v22698_v47 }
 0x452   :  { %18693 = vrcp.f32 %v3828_v48  ;;  %v3825_v61 = vpop.xlane.xlu1 %3824  ;;  %17545 = vmatprep.subr.bf16.mxu1 %v22692_v63  ;;  %16351 = vmatprep.mubr.msk.f32.mxu0 %vm19100_vm1, %v22691_v13  ;;  %v18255_v48 = vunpack.i.h.bf16 %v22695_v11 }
 0x453   :  { %18695 = vrcp.f32 %v3825_v61  ;;  %17542 = vmatprep.subr.bf16.mxu0 %v22692_v63  ;;  %v18230_v61 = vunpack.i.h.bf16 %v22696_v60 }
 0x454   :  { %v18690_v38 = vpop.eup %18689 }
 0x455   :  { %v18692_v17 = vpop.eup %18691  ;;  %v3926_v21 = vmul.f32 %v18690_v38, %v20355_v40  ;;  %v18285_v40 = vunpack.i.h.bf16 %v20148_v20 }
 0x456   :  { %v3925_v22 = vmul.f32 %v18692_v17, %v20357_v59  ;;  %v18284_v59 = vunpack.i.l.bf16 %v20148_v20  ;;  %v22693_v20 = vld [vmem:[#allocation40_spill] sm:$0xff] }
 0x457   :  { %16359 = vmatmul.mubr.msk.f32.vlgmr.msra.gmra.mrb[56].mxu1 %vm938_vm2, %v3926_v21  ;;  %v18225_v10 = vunpack.i.h.bf16 %v22693_v20  ;;  %v18224_v49 = vunpack.i.l.bf16 %v22693_v20 }
 0x458   :  { %17547 = vmatpush3.bf16.msra.mxu1 %v17546_v56  ;;  %16352 = vmatmul.mubr.msk.f32.vlgmr.msra.gmra.mrb[52].mxu0 %vm938_vm2, %v3925_v22  ;;  %v17549_v15 = vpack.c.bf16 %v18285_v40, %v18284_v59  ;;  %v17561_v56 = vpack.c.bf16 %v18230_v61, %v18229_v46  ;;  %v18269_v40 = vunpack.i.l.bf16 %v22698_v47  ;;  %v18305_v47 = vunpack.i.h.bf16 %v20521_v12 }
 0x459   :  { %17544 = vmatpush3.bf16.msra.mxu0 %v17543_v58  ;;  %v3834_v55 = vpop.xlane.xlu0 %3833  ;;  %16372 = vmatprep.mubr.msk.f32.mxu1 %vm19100_vm1, %v22691_v13  ;;  %v17558_v23 = vpack.c.bf16 %v18225_v10, %v18224_v49  ;;  %v22697_v58 = vld [vmem:[#allocation56_spill] sm:$0xff]  ;;  %v22700_v49 = vld [vmem:[#allocation58_spill] sm:$0xff] }
 0x45a   :  { %18697 = vrcp.f32 %v3834_v55  ;;  %17551 = vmatprep.subr.bf16.mxu1 %v22692_v63  ;;  %16365 = vmatprep.mubr.msk.f32.mxu0 %vm19100_vm1, %v22691_v13  ;;  %v3831_v51 = vpop.xlane.xlu1 %3830  ;;  %v18280_v55 = vunpack.i.h.bf16 %v22697_v58 }
 0x45b   :  { %17548 = vmatprep.subr.bf16.mxu0 %v22692_v63  ;;  %18699 = vrcp.f32 %v3831_v51 }
 0x45c   :  { %v18694_v8 = vpop.eup %18693 }
 0x45d   :  { %v18696_v6 = vpop.eup %18695  ;;  %v3928_v16 = vmul.f32 %v18694_v8, %v20365_v3 }
 0x45e   :  { %v3927_v31 = vmul.f32 %v18696_v6, %v20367_v41 }
 0x45f   :  { %16373 = vmatmul.mubr.msk.f32.vlgmr.msra.gmra.mrb[58].mxu1 %vm938_vm2, %v3928_v16  ;;  %v17567_v16 = vpack.c.bf16 %v18270_v62, %v18269_v40  ;;  %v18304_v62 = vunpack.i.l.bf16 %v20521_v12 }
 0x460   :  { %17553 = vmatpush3.bf16.msra.mxu1 %v17552_v14  ;;  %16366 = vmatmul.mubr.msk.f32.vlgmr.msra.gmra.mrb[54].mxu0 %vm938_vm2, %v3927_v31  ;;  %v22699_v14 = vld [vmem:[#allocation60_spill] sm:$0xff] }
 0x461   :  { %17550 = vmatpush3.bf16.msra.mxu0 %v17549_v15  ;;  %v3840_v42 = vpop.xlane.xlu0 %3839  ;;  %16386 = vmatprep.mubr.msk.f32.mxu1 %vm19100_vm1, %v22691_v13  ;;  %v18300_v31 = vunpack.i.h.bf16 %v22699_v14  ;;  %v18299_v15 = vunpack.i.l.bf16 %v22699_v14 }
 0x462   :  { %18701 = vrcp.f32 %v3840_v42  ;;  %17557 = vmatprep.subr.bf16.mxu1 %v22692_v63  ;;  %16379 = vmatprep.mubr.msk.f32.mxu0 %vm19100_vm1, %v22691_v13  ;;  %v3837_v3 = vpop.xlane.xlu1 %3836 }
 0x463   :  { %17554 = vmatprep.subr.bf16.mxu0 %v22692_v63  ;;  %18703 = vrcp.f32 %v3837_v3  ;;  %v17576_v42 = vpack.c.bf16 %v18300_v31, %v18299_v15  ;;  %v18290_v3 = vunpack.i.h.bf16 %v22700_v49 }
 0x464   :  { %v18698_v41 = vpop.eup %18697 }
 0x465   :  { %v3930_v26 = vmul.f32 %v18698_v41, %v20375_v25  ;;  %v18700_v4 = vpop.eup %18699  ;;  %v18254_v25 = vunpack.i.l.bf16 %v22695_v11  ;;  %v18289_v41 = vunpack.i.l.bf16 %v22700_v49  ;;  %v6475_v49 = vld [vmem:[#allocation4] sm:$0xff] }
 0x466   :  { %v3929_v0 = vmul.f32 %v18700_v4, %v20379_v39  ;;  %v18234_v4 = vunpack.i.l.bf16 %v22701_v43 }
 0x467   :  { %16387 = vmatmul.mubr.msk.f32.vlgmr.msra.gmra.mrb[60].mxu1 %vm938_vm2, %v3930_v26  ;;  %v17564_v17 = vpack.c.bf16 %v18255_v48, %v18254_v25  ;;  %v18235_v26 = vunpack.i.h.bf16 %v22701_v43  ;;  %v22702_v48 = vld [vmem:[#allocation45_spill] sm:$0xff] }
 0x468   :  { %17559 = vmatpush3.bf16.msra.mxu1 %v17558_v23  ;;  %16400 = vmatprep.mubr.msk.f32.mxu1 %vm19100_vm1, %v22691_v13  ;;  %v17573_v23 = vpack.c.bf16 %v18290_v3, %v18289_v41  ;;  %v18240_v25 = vunpack.i.h.bf16 %v22702_v48  ;;  %v6476_v3 = vld [vmem:[#allocation4 + $0x8] sm:$0xff] }
 0x469   :  { %16380 = vmatmul.mubr.msk.f32.vlgmr.msra.gmra.mrb[56].mxu0 %vm938_vm2, %v3929_v0  ;;  %v3846_v57 = vpop.xlane.xlu0 %3845  ;;  %17563 = vmatprep.subr.bf16.mxu1 %v22692_v63 }
 0x46a   :  { %17556 = vmatpush3.bf16.msra.mxu0 %v17555_v34  ;;  %18705 = vrcp.f32 %v3846_v57  ;;  %16393 = vmatprep.mubr.msk.f32.mxu0 %vm19100_vm1, %v22691_v13 }
 0x46b   :  { %v3843_v39 = vpop.xlane.xlu1 %3842  ;;  %17560 = vmatprep.subr.bf16.mxu0 %v22692_v63 }
 0x46c   :  { %v18702_v30 = vpop.eup %18701  ;;  %18707 = vrcp.f32 %v3843_v39  ;;  %v18239_v39 = vunpack.i.l.bf16 %v22702_v48  ;;  %v6479_v48 = vld [vmem:[#allocation4 + $0x20] sm:$0xff] }
 0x46d   :  { %v3932_v19 = vmul.f32 %v18702_v30, %v20385_v28  ;;  %v18704_v38 = vpop.eup %18703  ;;  %v18279_v28 = vunpack.i.l.bf16 %v22697_v58  ;;  %v22703_v30 = vld [vmem:[#allocation46_spill] sm:$0xff] }
 0x46e   :  { %v3931_v21 = vmul.f32 %v18704_v38, %v20389_v52  ;;  %v18245_v60 = vunpack.i.h.bf16 %v22703_v30  ;;  %v18244_v61 = vunpack.i.l.bf16 %v22703_v30 }
 0x46f   :  { %16401 = vmatmul.mubr.msk.f32.vlgmr.msra.gmra.mrb[62].mxu1 %vm938_vm2, %v3932_v19  ;;  %v17570_v8 = vpack.c.bf16 %v18280_v55, %v18279_v28  ;;  %v22704_v55 = vld [vmem:[#allocation48_spill] sm:$0xff] }
 0x470   :  { %17565 = vmatpush3.bf16.msra.mxu1 %v17564_v17  ;;  %16414 = vmatprep.mubr.msk.f32.mxu1 %vm19100_vm1, %v22691_v13  ;;  %v18260_v28 = vunpack.i.h.bf16 %v22704_v55 }
 0x471   :  { %16394 = vmatmul.mubr.msk.f32.vlgmr.msra.gmra.mrb[58].mxu0 %vm938_vm2, %v3931_v21  ;;  %v3852_v22 = vpop.xlane.xlu0 %3851  ;;  %17569 = vmatprep.subr.bf16.mxu1 %v22692_v63  ;;  %v17582_v21 = vpack.c.bf16 %v18240_v25, %v18239_v39  ;;  %v6480_v25 = vld [vmem:[#allocation4 + $0x28] sm:$0xff] }
 0x472   :  { %17562 = vmatpush3.bf16.msra.mxu0 %v17561_v56  ;;  %18709 = vrcp.f32 %v3852_v22  ;;  %16407 = vmatprep.mubr.msk.f32.mxu0 %vm19100_vm1, %v22691_v13  ;;  %v17585_v22 = vpack.c.bf16 %v18245_v60, %v18244_v61 }
 0x473   :  { %17566 = vmatprep.subr.bf16.mxu0 %v22692_v63 }
 0x474   :  { %v18706_v52 = vpop.eup %18705 }
 0x475   :  { %v3934_v59 = vmul.f32 %v18706_v52, %v20394_v54  ;;  %v18259_v52 = vunpack.i.l.bf16 %v22704_v55  ;;  %v6481_v55 = vld [vmem:[#allocation4 + $0x30] sm:$0xff] }
 0x476   :  { %v18708_v51 = vpop.eup %18707 }
 0x477   :  { %16415 = vmatmul.mubr.msk.f32.vlgmr.msra.gmra.mrb[64].mxu1 %vm938_vm2, %v3934_v59  ;;  %v3933_v6 = vmul.f32 %v18708_v51, %v20398_v35 }
 0x478   :  { %17571 = vmatpush3.bf16.msra.mxu1 %v17570_v8  ;;  %16428 = vmatprep.mubr.msk.f32.mxu1 %vm19100_vm1, %v22691_v13  ;;  %v17588_v8 = vpack.c.bf16 %v18260_v28, %v18259_v52  ;;  %v6482_v28 = vld [vmem:[#allocation4 + $0x38] sm:$0xff] }
 0x479   :  { %16408 = vmatmul.mubr.msk.f32.vlgmr.msra.gmra.mrb[60].mxu0 %vm938_vm2, %v3933_v6  ;;  %17575 = vmatprep.subr.bf16.mxu1 %v22692_v63  ;;  %v18310_v6 = vunpack.i.h.bf16 %v20523_v37  ;;  %v17614_v52 = vpack.c.bf16 %v6482_v28, %v6481_v55 }
 0x47a   :  { %17568 = vmatpush3.bf16.msra.mxu0 %v17567_v16  ;;  %16421 = vmatprep.mubr.msk.f32.mxu0 %vm19100_vm1, %v22691_v13  ;;  %v18309_v16 = vunpack.i.l.bf16 %v20523_v37 }
 0x47b   :  { %17572 = vmatprep.subr.bf16.mxu0 %v22692_v63 }
 0x47c   :  { %v18710_v54 = vpop.eup %18709  ;;  %v17594_v37 = vpack.c.bf16 %v18310_v6, %v18309_v16 }
 0x47d   :  { %v3936_v35 = vmul.f32 %v18710_v54, %v20403_v5  ;;  %v17591_v54 = vpack.c.bf16 %v18305_v47, %v18304_v62 }
 0x47e   :  { %v3849_v20 = vpop.xlane.xlu1 %3848 }
 0x47f   :  { %18711 = vrcp.f32 %v3849_v20  ;;  %16429 = vmatmul.mubr.msk.f32.vlgmr.msra.gmra.mrb[66].mxu1 %vm938_vm2, %v3936_v35 }
 0x480   :  { %17577 = vmatpush3.bf16.msra.mxu1 %v17576_v42  ;;  %16442 = vmatprep.mubr.msk.f32.mxu1 %vm19100_vm1, %v22691_v13 }
 0x481   :  { %17581 = vmatprep.subr.bf16.mxu1 %v22692_v63 }
 0x482   :  { %v3855_v10 = vpop.xlane.xlu1 %3854 }
 0x483   :  { %18713 = vrcp.f32 %v3855_v10 }
 0x489   :  { %v18712_v24 = vpop.eup %18711 }
 0x48a   :  { %v3858_v7 = vpop.xlane.xlu0 %3857  ;;  %v3935_v5 = vmul.f32 %v18712_v24, %v20419_v50  ;;  %v17579_v50 = vpack.c.bf16 %v18235_v26, %v18234_v4  ;;  %v6478_v24 = vld [vmem:[#allocation4 + $0x18] sm:$0xff] }
 0x48b   :  { %18715 = vrcp.f32 %v3858_v7  ;;  %v3861_v0 = vpop.xlane.xlu1 %3860 }
 0x48c   :  { %18717 = vrcp.f32 %v3861_v0  ;;  %16422 = vmatmul.mubr.msk.f32.vlgmr.msra.gmra.mrb[62].mxu0 %vm938_vm2, %v3935_v5 }
 0x48d   :  { %v18714_v34 = vpop.eup %18713  ;;  %17574 = vmatpush3.bf16.msra.mxu0 %v17573_v23  ;;  %16435 = vmatprep.mubr.msk.f32.mxu0 %vm19100_vm1, %v22691_v13  ;;  %v17602_v23 = vpack.c.bf16 %v6476_v3, %v6475_v49 }
 0x48e   :  { %17578 = vmatprep.subr.bf16.mxu0 %v22692_v63  ;;  %v3937_v57 = vmul.f32 %v18714_v34, %v20426_v45 }
 0x490   :  { %16436 = vmatmul.mubr.msk.f32.vlgmr.msra.gmra.mrb[64].mxu0 %vm938_vm2, %v3937_v57 }
 0x491   :  { %17580 = vmatpush3.bf16.msra.mxu0 %v17579_v50  ;;  %16449 = vmatprep.mubr.msk.f32.mxu0 %vm19100_vm1, %v22691_v13 }
 0x492   :  { %v3864_v11 = vpop.xlane.xlu0 %3863  ;;  %17584 = vmatprep.subr.bf16.mxu0 %v22692_v63 }
 0x493   :  { %18719 = vrcp.f32 %v3864_v11  ;;  %v3867_v45 = vpop.xlane.xlu1 %3866 }
 0x494   :  { %18721 = vrcp.f32 %v3867_v45 }
 0x495   :  { %v18716_v46 = vpop.eup %18715 }
 0x496   :  { %v18718_v19 = vpop.eup %18717  ;;  %v3870_v38 = vpop.xlane.xlu0 %3869  ;;  %v3938_v17 = vmul.f32 %v18716_v46, %v20451_v33 }
 0x497   :  { %18723 = vrcp.f32 %v3870_v38  ;;  %v3939_v56 = vmul.f32 %v18718_v19, %v20457_v2 }
 0x498   :  { %16443 = vmatmul.mubr.msk.f32.vlgmr.msra.gmra.mrb[68].mxu1 %vm938_vm2, %v3938_v17 }
 0x499   :  { %16450 = vmatmul.mubr.msk.f32.vlgmr.msra.gmra.mrb[66].mxu0 %vm938_vm2, %v3939_v56  ;;  %17583 = vmatpush3.bf16.msra.mxu1 %v17582_v21 }
 0x49a   :  { %17586 = vmatpush3.bf16.msra.mxu0 %v17585_v22  ;;  %v3876_v58 = vpop.xlane.xlu0 %3875  ;;  %16456 = vmatprep.mubr.msk.f32.mxu1 %vm19100_vm1, %v22691_v13 }
 0x49b   :  { %18725 = vrcp.f32 %v3876_v58  ;;  %v3873_v33 = vpop.xlane.xlu1 %3872  ;;  %16463 = vmatprep.mubr.msk.f32.mxu0 %vm19100_vm1, %v22691_v13  ;;  %17587 = vmatprep.subr.bf16.mxu1 %v22692_v63 }
 0x49c   :  { %18727 = vrcp.f32 %v3873_v33  ;;  %17590 = vmatprep.subr.bf16.mxu0 %v22692_v63 }
 0x49d   :  { %v18720_v2 = vpop.eup %18719 }
 0x49e   :  { %v3882_v40 = vpop.xlane.xlu0 %3881  ;;  %v3940_v59 = vmul.f32 %v18720_v2, %v20478_v44  ;;  %v18722_v51 = vpop.eup %18721 }
 0x49f   :  { %18729 = vrcp.f32 %v3882_v40  ;;  %v3879_v14 = vpop.xlane.xlu1 %3878  ;;  %v3941_v31 = vmul.f32 %v18722_v51, %v20485_v18 }
 0x4a0   :  { %18731 = vrcp.f32 %v3879_v14  ;;  %16457 = vmatmul.mubr.msk.f32.vlgmr.msra.gmra.mrb[70].mxu1 %vm938_vm2, %v3940_v59 }
 0x4a1   :  { %v18724_v15 = vpop.eup %18723  ;;  %17589 = vmatpush3.bf16.msra.mxu1 %v17588_v8  ;;  %16470 = vmatprep.mubr.msk.f32.mxu1 %vm19100_vm1, %v22691_v13 }
 0x4a2   :  { %16464 = vmatmul.mubr.msk.f32.vlgmr.msra.gmra.mrb[68].mxu0 %vm938_vm2, %v3941_v31  ;;  %v18313_v44 = vpop.permute.xlu0 %18312  ;;  %17593 = vmatprep.subr.bf16.mxu1 %v22692_v63  ;;  %v3942_v12 = vmul.f32 %v18724_v15, %v20493_v9  ;;  %v6477_v9 = vld [vmem:[#allocation4 + $0x10] sm:$0xff] }
 0x4a3   :  { %17592 = vmatpush3.bf16.msra.mxu0 %v17591_v54  ;;  %v18315_v35 = vunpack.i.h.bf16 %v18313_v44  ;;  %v18314_v42 = vunpack.i.l.bf16 %v18313_v44  ;;  %v18318_v20 = vpop.permute.xlu1 %18317  ;;  %16477 = vmatprep.mubr.msk.f32.mxu0 %vm19100_vm1, %v22691_v13  ;;  %v17606_v0 = vpack.c.bf16 %v6478_v24, %v6477_v9 }
 0x4a4   :  { %v18320_v18 = vunpack.i.h.bf16 %v18318_v20  ;;  %v18319_v10 = vunpack.i.l.bf16 %v18318_v20  ;;  %16471 = vmatmul.mubr.msk.f32.vlgmr.msra.gmra.mrb[72].mxu1 %vm938_vm2, %v3942_v12  ;;  %17596 = vmatprep.subr.bf16.mxu0 %v22692_v63 }
 0x4a5   :  { %v18726_v41 = vpop.eup %18725  ;;  %17595 = vmatpush3.bf16.msra.mxu1 %v17594_v37  ;;  %16484 = vmatprep.mubr.msk.f32.mxu1 %vm19100_vm1, %v22691_v13  ;;  %v17597_v5 = vpack.c.bf16 %v18315_v35, %v18314_v42 }
 0x4a6   :  { %v18728_v7 = vpop.eup %18727  ;;  %v17600_v43 = vpack.c.bf16 %v18320_v18, %v18319_v10  ;;  %17599 = vmatprep.subr.bf16.mxu1 %v22692_v63  ;;  %v3944_v26 = vmul.f32 %v18726_v41, %v20501_v36 }
 0x4a7   :  { %v3943_v4 = vmul.f32 %v18728_v7, %v20503_v53 }
 0x4a8   :  { %16485 = vmatmul.mubr.msk.f32.vlgmr.msra.gmra.mrb[74].mxu1 %vm938_vm2, %v3944_v26 }
 0x4a9   :  { %v18730_v34 = vpop.eup %18729  ;;  %16478 = vmatmul.mubr.msk.f32.vlgmr.msra.gmra.mrb[70].mxu0 %vm938_vm2, %v3943_v4  ;;  %17601 = vmatpush3.bf16.msra.mxu1 %v17600_v43 }
 0x4aa   :  { %v18732_v57 = vpop.eup %18731  ;;  %17598 = vmatpush3.bf16.msra.mxu0 %v17597_v5  ;;  %16491 = vmatprep.mubr.msk.f32.mxu0 %vm19100_vm1, %v22691_v13  ;;  %v3946_v50 = vmul.f32 %v18730_v34, %v20509_v1  ;;  %v17610_v1 = vpack.c.bf16 %v6480_v25, %v6479_v48 }
 0x4ab   :  { %16498 = vmatprep.mubr.msk.f32.mxu1 %vm19100_vm1, %v22691_v13  ;;  %v3945_v36 = vmul.f32 %v18732_v57, %v20511_v32  ;;  %17603 = vmatprep.subr.bf16.mxu0 %v17602_v23 }
 0x4ac   :  { %16499 = vmatmul.mubr.msk.f32.vlgmr.msra.gmra.mrb[76].mxu1 %vm938_vm2, %v3946_v50  ;;  %17607 = vmatprep.subr.bf16.mxu1 %v17606_v0 }
 0x4ad   :  { %16492 = vmatmul.mubr.msk.f32.vlgmr.msra.gmra.mrb[72].mxu0 %vm938_vm2, %v3945_v36  ;;  %17609 = vmatpush3.bf16.msra.mxu1 %v17606_v0 }
 0x4ae   :  { %17605 = vmatpush3.bf16.msra.mxu0 %v17602_v23  ;;  %17615 = vmatprep.subr.bf16.mxu1 %v17614_v52 }
 0x4af   :  { %17611 = vmatprep.subr.bf16.mxu0 %v17610_v1 }
 0x4bd   :  { %v4022_v53 = vpop.f32.mrb[42].mxu0 }
 0x4be   :  { %v16283_v11 = vpop.f32.mrb[43].mxu0  ;;  %16505 = vmatprep.mubr.msk.f32.mxu0 %vm938_vm2, %v4022_v53 }
 0x4c6   :  { %v4101_v39 = vpop.f32.mrb[46].mxu1 }
 0x4c7   :  { %v16290_v30 = vpop.f32.mrb[47].mxu1  ;;  %16506 = vmatmul.mubr.msk.f32.vlgmr.msra.gmra.mrb[74].mxu0 %vm938_vm2, %v4101_v39 }
 0x4c8   :  { %17613 = vmatpush3.bf16.msra.mxu0 %v17610_v1 }
 0x4ca   :  { %v4259_v32 = vpop.f32.mrb[48].mxu1  ;;  %v4180_v60 = vpop.f32.mrb[44].mxu0 }
 0x4cb   :  { %v16304_v61 = vpop.f32.mrb[49].mxu1  ;;  %v16297_v45 = vpop.f32.mrb[45].mxu0  ;;  %16508 = vmatprep.mubr.msk.f32.mxu0 %vm938_vm2, %v4180_v60 }
 0x4cc   :  { %16509 = vmatmul.mubr.msk.f32.gmra.mrb[76].mxu0 %vm938_vm2, %v4259_v32 }
 0x4ce   :  { %v4417_v46 = vpop.f32.mrb[50].mxu1 }
 0x4cf   :  { %v16318_v19 = vpop.f32.mrb[51].mxu1 }
 0x4d3   :  { %v4575_v38 = vpop.f32.mrb[52].mxu1 }
 0x4d4   :  { %v4338_v17 = vpop.f32.mrb[46].mxu0  ;;  %v16332_v21 = vpop.f32.mrb[53].mxu1 }
 0x4d5   :  { %v16311_v56 = vpop.f32.mrb[47].mxu0  ;;  %16511 = vmatprep.mubr.msk.f32.mxu0 %vm938_vm2, %v4338_v17 }
 0x4d6   :  { %16512 = vmatmul.mubr.msk.f32.gmra.mrb[78].mxu0 %vm938_vm2, %v4417_v46 }
 0x4db   :  { %v4496_v22 = vpop.f32.mrb[48].mxu0 }
 0x4dc   :  { %v16325_v58 = vpop.f32.mrb[49].mxu0  ;;  %16514 = vmatprep.mubr.msk.f32.mxu0 %vm938_vm2, %v4496_v22 }
 0x4dd   :  { %16515 = vmatmul.mubr.msk.f32.gmra.mrb[80].mxu0 %vm938_vm2, %v4575_v38 }
 0x522   :  { %v4733_v33 = vpop.f32.mrb[54].mxu1 }
 0x523   :  { %v4654_v2 = vpop.f32.mrb[50].mxu0  ;;  %v16346_v47 = vpop.f32.mrb[55].mxu1 }
 0x524   :  { %v16339_v62 = vpop.f32.mrb[51].mxu0  ;;  %16521 = vmatprep.mubr.msk.f32.mxu1 %vm938_vm2, %v4654_v2 }
 0x525   :  { %16522 = vmatmul.mubr.msk.f32.vlgmr.msra.gmra.mrb[78].mxu1 %vm938_vm2, %v4733_v33 }
 0x526   :  { %17617 = vmatpush3.bf16.msra.mxu1 %v17614_v52 }
 0x52a   :  { %v4891_v40 = vpop.f32.mrb[56].mxu1 }
 0x52b   :  { %v4812_v59 = vpop.f32.mrb[52].mxu0  ;;  %v16360_v51 = vpop.f32.mrb[57].mxu1 }
 0x52c   :  { %v16353_v8 = vpop.f32.mrb[53].mxu0  ;;  %16524 = vmatprep.mubr.msk.f32.mxu1 %vm938_vm2, %v4812_v59 }
 0x52d   :  { %16525 = vmatmul.mubr.msk.f32.gmra.mrb[80].mxu1 %vm938_vm2, %v4891_v40 }
 0x532   :  { %v5049_v6 = vpop.f32.mrb[58].mxu1 }
 0x533   :  { %v4970_v16 = vpop.f32.mrb[54].mxu0  ;;  %v16374_v14 = vpop.f32.mrb[59].mxu1 }
 0x534   :  { %v16367_v31 = vpop.f32.mrb[55].mxu0  ;;  %16527 = vmatprep.mubr.msk.f32.mxu1 %vm938_vm2, %v4970_v16 }
 0x535   :  { %16528 = vmatmul.mubr.msk.f32.gmra.mrb[82].mxu1 %vm938_vm2, %v5049_v6 }
 0x53a   :  { %v5207_v15 = vpop.f32.mrb[60].mxu1 }
 0x53b   :  { %v16388_v54 = vpop.f32.mrb[61].mxu1 }
 0x53c   :  { %v5128_v44 = vpop.f32.mrb[56].mxu0 }
 0x53d   :  { %v16381_v12 = vpop.f32.mrb[57].mxu0  ;;  %16530 = vmatprep.mubr.msk.f32.mxu1 %vm938_vm2, %v5128_v44 }
 0x53e   :  { %16531 = vmatmul.mubr.msk.f32.gmra.mrb[84].mxu1 %vm938_vm2, %v5207_v15 }
 0x542   :  { %v5365_v37 = vpop.f32.mrb[62].mxu1 }
 0x543   :  { %v16402_v35 = vpop.f32.mrb[63].mxu1 }
 0x544   :  { %v5286_v42 = vpop.f32.mrb[58].mxu0 }
 0x545   :  { %v16395_v20 = vpop.f32.mrb[59].mxu0  ;;  %16537 = vmatprep.mubr.msk.f32.mxu0 %vm938_vm2, %v5286_v42 }
 0x546   :  { %16538 = vmatmul.mubr.msk.f32.vlgmr.msra.gmra.mrb[82].mxu0 %vm938_vm2, %v5365_v37 }
 0x54a   :  { %v5523_v18 = vpop.f32.mrb[64].mxu1 }
 0x54b   :  { %v16416_v10 = vpop.f32.mrb[65].mxu1 }
 0x54c   :  { %v5444_v49 = vpop.f32.mrb[60].mxu0 }
 0x54d   :  { %v16409_v3 = vpop.f32.mrb[61].mxu0  ;;  %16540 = vmatprep.mubr.msk.f32.mxu0 %vm938_vm2, %v5444_v49 }
 0x54e   :  { %16541 = vmatmul.mubr.msk.f32.gmra.mrb[84].mxu0 %vm938_vm2, %v5523_v18 }
 0x552   :  { %v5681_v41 = vpop.f32.mrb[66].mxu1 }
 0x553   :  { %v16430_v9 = vpop.f32.mrb[67].mxu1 }
 0x55f   :  { %v5602_v24 = vpop.f32.mrb[62].mxu0 }
 0x560   :  { %v16423_v7 = vpop.f32.mrb[63].mxu0  ;;  %16543 = vmatprep.mubr.msk.f32.mxu0 %vm938_vm2, %v5602_v24 }
 0x561   :  { %16544 = vmatmul.mubr.msk.f32.gmra.mrb[86].mxu0 %vm938_vm2, %v5681_v41 }
 0x563   :  { %v5760_v5 = vpop.f32.mrb[64].mxu0 }
 0x564   :  { %v16437_v43 = vpop.f32.mrb[65].mxu0  ;;  %16546 = vmatprep.mubr.msk.f32.mxu0 %vm938_vm2, %v5760_v5 }
 0x56b   :  { %v5839_v26 = vpop.f32.mrb[68].mxu1 }
 0x56c   :  { %v5918_v4 = vpop.f32.mrb[66].mxu0  ;;  %v16444_v23 = vpop.f32.mrb[69].mxu1  ;;  %16547 = vmatmul.mubr.msk.f32.gmra.mrb[88].mxu0 %vm938_vm2, %v5839_v26 }
 0x56d   :  { %v16451_v0 = vpop.f32.mrb[67].mxu0  ;;  %16553 = vmatprep.mubr.msk.f32.mxu1 %vm938_vm2, %v5918_v4 }
 0x573   :  { %v5997_v34 = vpop.f32.mrb[70].mxu1 }
 0x574   :  { %v16458_v57 = vpop.f32.mrb[71].mxu1  ;;  %16554 = vmatmul.mubr.msk.f32.vlgmr.msra.gmra.mrb[86].mxu1 %vm938_vm2, %v5997_v34 }
 0x575   :  { %v6076_v50 = vpop.f32.mrb[68].mxu0 }
 0x576   :  { %v16465_v36 = vpop.f32.mrb[69].mxu0  ;;  %16556 = vmatprep.mubr.msk.f32.mxu1 %vm938_vm2, %v6076_v50 }
 0x577   :  { %v6155_v53 = vpop.f32.mrb[72].mxu1 }
 0x578   :  { %v16472_v11 = vpop.f32.mrb[73].mxu1  ;;  %16557 = vmatmul.mubr.msk.f32.gmra.mrb[88].mxu1 %vm938_vm2, %v6155_v53 }
 0x57b   :  { %v6313_v48 = vpop.f32.mrb[74].mxu1 }
 0x57c   :  { %v6234_v25 = vpop.f32.mrb[70].mxu0  ;;  %v16486_v1 = vpop.f32.mrb[75].mxu1 }
 0x57d   :  { %v16479_v39 = vpop.f32.mrb[71].mxu0  ;;  %16559 = vmatprep.mubr.msk.f32.mxu1 %vm938_vm2, %v6234_v25 }
 0x57e   :  { %16560 = vmatmul.mubr.msk.f32.gmra.mrb[90].mxu1 %vm938_vm2, %v6313_v48 }
 0x57f   :  { %v6471_v30 = vpop.f32.mrb[76].mxu1 }
 0x580   :  { %v6392_v32 = vpop.f32.mrb[72].mxu0  ;;  %v16500_v60 = vpop.f32.mrb[77].mxu1 }
 0x581   :  { %v16493_v61 = vpop.f32.mrb[73].mxu0  ;;  %16562 = vmatprep.mubr.msk.f32.mxu1 %vm938_vm2, %v6392_v32 }
 0x582   :  { %16563 = vmatmul.mubr.msk.f32.gmra.mrb[92].mxu1 %vm938_vm2, %v6471_v30 }
 0x59a   :  { %v16507_v45 = vpop.f32.mrb[74].mxu0 }
 0x59b   :  { %v6573_v46 = vpop.f32.mrb[75].mxu0  ;;  %v7006_v55 = vsel %vm435_vm6, %v16507_v45, 0.0 }
 0x59c   :  { %v6999_v33 = vsel %vm435_vm6, %v6573_v46, 0.0 }
 0x59f   :  { %v16510_v19 = vpop.f32.mrb[76].mxu0 }
 0x5a0   :  { %v6583_v38 = vpop.f32.mrb[77].mxu0  ;;  %v7020_v59 = vsel %vm435_vm6, %v16510_v19, 0.0 }
 0x5a1   :  { %v7013_v6 = vsel %vm435_vm6, %v6583_v38, 0.0 }
 0x5a9   :  { %v16513_v17 = vpop.f32.mrb[78].mxu0 }
 0x5aa   :  { %v6593_v21 = vpop.f32.mrb[79].mxu0  ;;  %v7034_v54 = vsel %vm435_vm6, %v16513_v17, 0.0  ;;  %v22705_v17 = vld [vmem:[#allocation16_spill] sm:$0xff] }
 0x5ab   :  { %v7027_v37 = vsel %vm435_vm6, %v6593_v21, 0.0  ;;  %v20734_v21 = vsub.s32 3, %v22705_v17 }
 0x5ad   :  { %22706 = vst [vmem:[#allocation40_spill] sm:$0xff] %v20734_v21 }
 0x5b0   :  { %v16516_v56 = vpop.f32.mrb[80].mxu0 }
 0x5b1   :  { %v6603_v22 = vpop.f32.mrb[81].mxu0  ;;  %v7048_v10 = vsel %vm435_vm6, %v16516_v56, 0.0 }
 0x5b2   :  { %v7041_v41 = vsel %vm435_vm6, %v6603_v22, 0.0  ;;  %v20736_v22 = vld [vmem:[#allocation7] sm:$0xff] }
 0x5f8   :  { %v16523_v58 = vpop.f32.mrb[78].mxu1 }
 0x5f9   :  { %v7007_v28 = vsel %vm435_vm6, %v16523_v58, 0.0  ;;  %v6702_v52 = vpop.f32.mrb[79].mxu1  ;;  %v7058_v58 = vrot.slane %v20736_v22, %v20734_v21 }
 0x5fa   :  { %v7008_v2 = vadd.f32 %v7007_v28, %v7006_v55  ;;  %v7000_v47 = vsel %vm435_vm6, %v6702_v52, 0.0 }
 0x5fb   :  { %v7001_v62 = vadd.f32 %v7000_v47, %v6999_v33 }
 0x600   :  { %v16526_v40 = vpop.f32.mrb[80].mxu1 }
 0x601   :  { %v7021_v51 = vsel %vm435_vm6, %v16526_v40, 0.0  ;;  %v6712_v8 = vpop.f32.mrb[81].mxu1 }
 0x602   :  { %v7022_v16 = vadd.f32 %v7021_v51, %v7020_v59  ;;  %v7014_v14 = vsel %vm435_vm6, %v6712_v8, 0.0 }
 0x603   :  { %v7015_v31 = vadd.f32 %v7014_v14, %v7013_v6 }
 0x608   :  { %v16529_v15 = vpop.f32.mrb[82].mxu1 }
 0x609   :  { %v7035_v44 = vsel %vm435_vm6, %v16529_v15, 0.0  ;;  %v6722_v12 = vpop.f32.mrb[83].mxu1  ;;  %v22708_v15 = vld [vmem:[#allocation18_spill] sm:$0xff] }
 0x60a   :  { %v7036_v35 = vadd.f32 %v7035_v44, %v7034_v54  ;;  %v7028_v42 = vsel %vm435_vm6, %v6722_v12, 0.0 }
 0x60b   :  { %v7029_v20 = vadd.f32 %v7028_v42, %v7027_v37 }
 0x611   :  { %v16532_v18 = vpop.f32.mrb[84].mxu1 }
 0x612   :  { %v7049_v49 = vsel %vm435_vm6, %v16532_v18, 0.0  ;;  %v6732_v3 = vpop.f32.mrb[85].mxu1 }
 0x613   :  { %v7050_v9 = vadd.f32 %v7049_v49, %v7048_v10  ;;  %v7042_v24 = vsel %vm435_vm6, %v6732_v3, 0.0  ;;  %v22709_v10 = vld [vmem:[#allocation19_spill] sm:$0xff] }
 0x614   :  { %v7043_v7 = vadd.f32 %v7042_v24, %v7041_v41 }
 0x619   :  { %v16539_v5 = vpop.f32.mrb[82].mxu0 }
 0x61a   :  { %v7009_v43 = vsel %vm435_vm6, %v16539_v5, 0.0  ;;  %v6831_v26 = vpop.f32.mrb[83].mxu0 }
 0x61b   :  { %v7010_v4 = vadd.f32 %v7009_v43, %v7008_v2  ;;  %v7002_v23 = vsel %vm435_vm6, %v6831_v26, 0.0 }
 0x61c   :  { %v7003_v0 = vadd.f32 %v7002_v23, %v7001_v62 }
 0x621   :  { %v16542_v34 = vpop.f32.mrb[84].mxu0 }
 0x622   :  { %v7023_v57 = vsel %vm435_vm6, %v16542_v34, 0.0  ;;  %v6841_v50 = vpop.f32.mrb[85].mxu0 }
 0x623   :  { %v7024_v36 = vadd.f32 %v7023_v57, %v7022_v16  ;;  %v7016_v53 = vsel %vm435_vm6, %v6841_v50, 0.0  ;;  %v22707_v16 = vld [vmem:[#allocation20_spill] sm:$0xff] }
 0x624   :  { %v7017_v11 = vadd.f32 %v7016_v53, %v7015_v31  ;;  %v22711_v53 = vld [vmem:[#allocation22_spill] sm:$0xff] }
 0x634   :  { %v16545_v48 = vpop.f32.mrb[86].mxu0 }
 0x635   :  { %v7037_v25 = vsel %vm435_vm6, %v16545_v48, 0.0  ;;  %v6851_v1 = vpop.f32.mrb[87].mxu0  ;;  %v22712_v48 = vld [vmem:[#allocation23_spill] sm:$0xff] }
 0x636   :  { %v7038_v39 = vadd.f32 %v7037_v25, %v7036_v35  ;;  %v7030_v30 = vsel %vm435_vm6, %v6851_v1, 0.0 }
 0x637   :  { %v7031_v32 = vadd.f32 %v7030_v30, %v7029_v20 }
 0x63f   :  { %v16548_v60 = vpop.f32.mrb[88].mxu0 }
 0x640   :  { %v7051_v61 = vsel %vm435_vm6, %v16548_v60, 0.0  ;;  %v6861_v45 = vpop.f32.mrb[89].mxu0  ;;  %v22713_v60 = vld [vmem:[#allocation24_spill] sm:$0xff] }
 0x641   :  { %v7052_v46 = vadd.f32 %v7051_v61, %v7050_v9  ;;  %v7044_v19 = vsel %vm435_vm6, %v6861_v45, 0.0  ;;  %v22714_v45 = vld [vmem:[#allocation25_spill] sm:$0xff] }
 0x642   :  { %v7045_v38 = vadd.f32 %v7044_v19, %v7043_v7  ;;  %v22710_v7 = vld [vmem:[#allocation21_spill] sm:$0xff] }
 0x647   :  { %v16555_v56 = vpop.f32.mrb[86].mxu1 }
 0x648   :  { %v7011_v55 = vsel %vm435_vm6, %v16555_v56, 0.0  ;;  %v6960_v28 = vpop.f32.mrb[87].mxu1 }
 0x649   :  { %v7012_v52 = vadd.f32 %v7011_v55, %v7010_v4  ;;  %v7004_v33 = vsel %vm435_vm6, %v6960_v28, 0.0 }
 0x64a   :  { %v7005_v2 = vadd.f32 %v7004_v33, %v7003_v0 }
 0x64b   :  { %v7060_v47 = vadd.f32 %v7058_v58, %v7012_v52  ;;  %v16558_v62 = vpop.f32.mrb[88].mxu1 }
 0x64c   :  { %v7059_v40 = vadd.f32 %v7058_v58, %v7005_v2  ;;  %v7025_v59 = vsel %vm435_vm6, %v16558_v62, 0.0  ;;  %v6970_v51 = vpop.f32.mrb[89].mxu1 }
 0x64d   :  { %v7026_v8 = vadd.f32 %v7025_v59, %v7024_v36  ;;  %v7018_v6 = vsel %vm435_vm6, %v6970_v51, 0.0  ;;  %v7068_v14 = vadd.f32 %v7060_v47, %v22707_v16 }
 0x64e   :  { %v7019_v31 = vadd.f32 %v7018_v6, %v7017_v11  ;;  %v7067_v54 = vadd.f32 %v7059_v40, %v22708_v15 }
 0x64f   :  { %v7078_v44 = vsel %vm435_vm6, %v7068_v14, 0.0  ;;  %v7062_v12 = vadd.f32 %v7058_v58, %v7026_v8 }
 0x650   :  { %v7061_v37 = vadd.f32 %v7058_v58, %v7019_v31  ;;  %7079 = vadd.xlane.f32.xlu1 %v7078_v44  ;;  %v7075_v35 = vsel %vm435_vm6, %v7067_v54, 0.0 }
 0x651   :  { %v16561_v42 = vpop.f32.mrb[90].mxu1  ;;  %7076 = vadd.xlane.f32.xlu0 %v7075_v35  ;;  %v7070_v5 = vadd.f32 %v7062_v12, %v22710_v7 }
 0x652   :  { %v7039_v20 = vsel %vm435_vm6, %v16561_v42, 0.0  ;;  %v6980_v18 = vpop.f32.mrb[91].mxu1  ;;  %v7069_v49 = vadd.f32 %v7061_v37, %v22709_v10 }
 0x653   :  { %v7040_v3 = vadd.f32 %v7039_v20, %v7038_v39  ;;  %v7032_v41 = vsel %vm435_vm6, %v6980_v18, 0.0  ;;  %v7084_v36 = vsel %vm435_vm6, %v7070_v5, 0.0 }
 0x654   :  { %v7033_v9 = vadd.f32 %v7032_v41, %v7031_v32  ;;  %v7081_v24 = vsel %vm435_vm6, %v7069_v49, 0.0 }
 0x655   :  { %v7064_v43 = vadd.f32 %v7058_v58, %v7040_v3  ;;  %v16564_v26 = vpop.f32.mrb[92].mxu1  ;;  %7082 = vadd.xlane.f32.xlu0 %v7081_v24 }
 0x656   :  { %v7063_v4 = vadd.f32 %v7058_v58, %v7033_v9  ;;  %v7053_v23 = vsel %vm435_vm6, %v16564_v26, 0.0  ;;  %v6990_v0 = vpop.f32.mrb[93].mxu1 }
 0x657   :  { %v7054_v34 = vadd.f32 %v7053_v23, %v7052_v46  ;;  %v7046_v57 = vsel %vm435_vm6, %v6990_v0, 0.0  ;;  %v7072_v25 = vadd.f32 %v7064_v43, %v22712_v48 }
 0x658   :  { %v7047_v50 = vadd.f32 %v7046_v57, %v7045_v38  ;;  %v7071_v11 = vadd.f32 %v7063_v4, %v22711_v53  ;;  %v7204_v57 = vld [vmem:[#allocation6] sm:$0xff]  ;;  %v7206_v53 = vld [vmem:[#allocation6 + $0x10] sm:$0xff] }
 0x659   :  { %v7066_v1 = vadd.f32 %v7058_v58, %v7054_v34  ;;  %7085 = vadd.xlane.f32.xlu0 %v7084_v36  ;;  %v7090_v32 = vsel %vm435_vm6, %v7072_v25, 0.0 }
 0x65a   :  { %v7065_v39 = vadd.f32 %v7058_v58, %v7047_v50  ;;  %v7087_v30 = vsel %vm435_vm6, %v7071_v11, 0.0  ;;  %v7205_v50 = vld [vmem:[#allocation6 + $0x8] sm:$0xff] }
 0x65b   :  { %7088 = vadd.xlane.f32.xlu1 %v7087_v30  ;;  %v7074_v46 = vadd.f32 %v7066_v1, %v22714_v45  ;;  %v17618_v36 = vpack.c.bf16 %v7205_v50, %v7204_v57  ;;  %v7209_v1 = vld [vmem:[#allocation6 + $0x28] sm:$0xff]  ;;  %v7210_v30 = vld [vmem:[#allocation6 + $0x30] sm:$0xff] }
 0x65c   :  { %v7073_v61 = vadd.f32 %v7065_v39, %v22713_v60  ;;  %v7354_v45 = vld [vmem:[%s22534_s9 + $0x8] sm:$0xff] }
 0x65d   :  { %7091 = vadd.xlane.f32.xlu0 %v7090_v32  ;;  %v7096_v38 = vsel %vm435_vm6, %v7074_v46, 0.0  ;;  %17619 = vmatprep.subr.bf16.mxu0 %v17618_v36  ;;  %v7211_v32 = vld [vmem:[#allocation6 + $0x38] sm:$0xff] }
 0x65e   :  { %v7093_v19 = vsel %vm435_vm6, %v7073_v61, 0.0  ;;  %17621 = vmatpush3.bf16.msra.mxu0 %v17618_v36  ;;  %v17630_v60 = vpack.c.bf16 %v7211_v32, %v7210_v30 }
 0x65f   :  { %7094 = vadd.xlane.f32.xlu1 %v7093_v19 }
 0x661   :  { %7097 = vadd.xlane.f32.xlu0 %v7096_v38  ;;  %v7356_v38 = vld [vmem:[%s22534_s9 + $0x18] sm:$0xff] }
 0x6dd   :  { %v7080_v56 = vpop.xlane.xlu1 %7079 }
 0x6de   :  { %v7101_v55 = vmul.f32 0.015625, %v7080_v56  ;;  %v7077_v28 = vpop.xlane.xlu0 %7076 }
 0x6df   :  { %v7100_v58 = vmul.f32 0.015625, %v7077_v28  ;;  %v7358_v28 = vld [vmem:[%s22534_s9 + $0x28] sm:$0xff] }
 0x6e0   :  { %v20764_v52 = vsub.f32 %v7068_v14, %v7101_v55  ;;  %v7357_v55 = vld [vmem:[%s22534_s9 + $0x20] sm:$0xff] }
 0x6e1   :  { %v20766_v33 = vsub.f32 %v7067_v54, %v7100_v58  ;;  %v17642_v58 = vpack.c.bf16 %v7358_v28, %v7357_v55 }
 0x6e2   :  { %v7083_v2 = vpop.xlane.xlu0 %7082  ;;  %v7117_v47 = vmul.f32 %v20764_v52, %v20764_v52 }
 0x6e3   :  { %v7102_v62 = vmul.f32 0.015625, %v7083_v2  ;;  %v7116_v40 = vmul.f32 %v20766_v33, %v20766_v33  ;;  %v7359_v2 = vld [vmem:[%s22534_s9 + $0x30] sm:$0xff] }
 0x6e4   :  { %v7127_v59 = vsel %vm435_vm6, %v7117_v47, 0.0  ;;  %v7360_v47 = vld [vmem:[%s22534_s9 + $0x38] sm:$0xff] }
 0x6e5   :  { %v20773_v51 = vsub.f32 %v7069_v49, %v7102_v62  ;;  %7128 = vadd.xlane.f32.xlu0 %v7127_v59  ;;  %v7124_v8 = vsel %vm435_vm6, %v7116_v40, 0.0  ;;  %v17646_v62 = vpack.c.bf16 %v7360_v47, %v7359_v2  ;;  %v7361_v40 = vld [vmem:[%s22534_s9 + $0x40] sm:$0xff]  ;;  %v7362_v59 = vld [vmem:[%s22534_s9 + $0x48] sm:$0xff] }
 0x6e6   :  { %v7086_v6 = vpop.xlane.xlu0 %7085  ;;  %7125 = vadd.xlane.f32.xlu1 %v7124_v8  ;;  %v17650_v8 = vpack.c.bf16 %v7362_v59, %v7361_v40 }
 0x6e7   :  { %v7103_v16 = vmul.f32 0.015625, %v7086_v6  ;;  %v7118_v14 = vmul.f32 %v20773_v51, %v20773_v51  ;;  %v7363_v6 = vld [vmem:[%s22534_s9 + $0x50] sm:$0xff] }
 0x6e8   :  { %v7089_v31 = vpop.xlane.xlu1 %7088 }
 0x6e9   :  { %v20778_v15 = vsub.f32 %v7070_v5, %v7103_v16  ;;  %v7104_v54 = vmul.f32 0.015625, %v7089_v31  ;;  %v7130_v44 = vsel %vm435_vm6, %v7118_v14, 0.0  ;;  %v7364_v16 = vld [vmem:[%s22534_s9 + $0x58] sm:$0xff]  ;;  %v7365_v31 = vld [vmem:[%s22534_s9 + $0x60] sm:$0xff] }
 0x6ea   :  { %v7092_v12 = vpop.xlane.xlu0 %7091  ;;  %7131 = vadd.xlane.f32.xlu1 %v7130_v44  ;;  %v17654_v14 = vpack.c.bf16 %v7364_v16, %v7363_v6 }
 0x6eb   :  { %v20781_v37 = vsub.f32 %v7071_v11, %v7104_v54  ;;  %v7105_v35 = vmul.f32 0.015625, %v7092_v12  ;;  %v7119_v42 = vmul.f32 %v20778_v15, %v20778_v15  ;;  %v7207_v11 = vld [vmem:[#allocation6 + $0x18] sm:$0xff]  ;;  %v7366_v54 = vld [vmem:[%s22534_s9 + $0x68] sm:$0xff] }
 0x6ec   :  { %v7095_v20 = vpop.xlane.xlu1 %7094  ;;  %v17622_v48 = vpack.c.bf16 %v7207_v11, %v7206_v53  ;;  %v17658_v44 = vpack.c.bf16 %v7366_v54, %v7365_v31 }
 0x6ed   :  { %v20785_v18 = vsub.f32 %v7072_v25, %v7105_v35  ;;  %v7106_v10 = vmul.f32 0.015625, %v7095_v20  ;;  %v7133_v49 = vsel %vm435_vm6, %v7119_v42, 0.0  ;;  %v7120_v3 = vmul.f32 %v20781_v37, %v20781_v37  ;;  %v7208_v25 = vld [vmem:[#allocation6 + $0x20] sm:$0xff] }
 0x6ee   :  { %7134 = vadd.xlane.f32.xlu0 %v7133_v49  ;;  %v7098_v41 = vpop.xlane.xlu0 %7097  ;;  %17623 = vmatprep.subr.bf16.mxu0 %v17622_v48  ;;  %v17626_v39 = vpack.c.bf16 %v7209_v1, %v7208_v25 }
 0x6ef   :  { %v20790_v9 = vsub.f32 %v7073_v61, %v7106_v10  ;;  %v7107_v24 = vmul.f32 0.015625, %v7098_v41  ;;  %v7136_v7 = vsel %vm435_vm6, %v7120_v3, 0.0  ;;  %v7121_v5 = vmul.f32 %v20785_v18, %v20785_v18  ;;  %17625 = vmatpush3.bf16.msra.mxu0 %v17622_v48  ;;  %v7353_v61 = vld [vmem:[%s22534_s9] sm:$0xff] }
 0x6f0   :  { %7137 = vadd.xlane.f32.xlu1 %v7136_v7  ;;  %17627 = vmatprep.subr.bf16.mxu0 %v17626_v39  ;;  %v17634_v19 = vpack.c.bf16 %v7354_v45, %v7353_v61 }
 0x6f1   :  { %v20795_v43 = vsub.f32 %v7074_v46, %v7107_v24  ;;  %v7139_v26 = vsel %vm435_vm6, %v7121_v5, 0.0  ;;  %v7122_v4 = vmul.f32 %v20790_v9, %v20790_v9  ;;  %v7355_v46 = vld [vmem:[%s22534_s9 + $0x10] sm:$0xff]  ;;  %v20847_v5 = vsub.s32 5, %v22705_v17 }
 0x6f2   :  { %7140 = vadd.xlane.f32.xlu0 %v7139_v26  ;;  %v17638_v56 = vpack.c.bf16 %v7356_v38, %v7355_v46  ;;  %17635 = vmatprep.subr.bf16.mxu1 %v17634_v19 }
 0x6f3   :  { %v7142_v23 = vsel %vm435_vm6, %v7122_v4, 0.0  ;;  %v7123_v0 = vmul.f32 %v20795_v43, %v20795_v43  ;;  %17629 = vmatpush3.bf16.msra.mxu0 %v17626_v39  ;;  %17637 = vmatpush3.bf16.msra.mxu1 %v17634_v19  ;;  %22715 = vst [vmem:[#allocation39_spill] sm:$0xff] %v20847_v5  ;;  %v7183_v57 = vrot.slane %v20736_v22, %v20847_v5 }
 0x6f4   :  { %7143 = vadd.xlane.f32.xlu1 %v7142_v23  ;;  %17631 = vmatprep.subr.bf16.mxu0 %v17630_v60 }
 0x6f5   :  { %v7145_v34 = vsel %vm435_vm6, %v7123_v0, 0.0  ;;  %17639 = vmatprep.subr.bf16.mxu1 %v17638_v56 }
 0x6f6   :  { %7146 = vadd.xlane.f32.xlu0 %v7145_v34 }
 0x6f7   :  { %17633 = vmatpush3.bf16.msra.mxu0 %v17630_v60  ;;  %17641 = vmatpush3.bf16.msra.mxu1 %v17638_v56  ;;  %v22716_v60 = vld [vmem:[#allocation17_spill] sm:$0xff] }
 0x6f8   :  { %17643 = vmatprep.subr.bf16.mxu1 %v17642_v58  ;;  %v7195_v61 = vrot.slane %v20736_v22, %v22716_v60 }
 0x6fb   :  { %17645 = vmatpush3.bf16.msra.mxu1 %v17642_v58 }
 0x6fc   :  { %17647 = vmatprep.subr.bf16.mxu1 %v17646_v62 }
 0x6ff   :  { %17649 = vmatpush3.bf16.msra.mxu1 %v17646_v62 }
 0x700   :  { %17651 = vmatprep.subr.bf16.mxu1 %v17650_v8 }
 0x703   :  { %17653 = vmatpush3.bf16.msra.mxu1 %v17650_v8 }
 0x704   :  { %17655 = vmatprep.subr.bf16.mxu1 %v17654_v14 }
 0x707   :  { %17657 = vmatpush3.bf16.msra.mxu1 %v17654_v14 }
 0x708   :  { %17659 = vmatprep.subr.bf16.mxu1 %v17658_v44 }
 0x70b   :  { %17661 = vmatpush3.bf16.msra.mxu1 %v17658_v44 }
 0x772   :  { %v7129_v12 = vpop.xlane.xlu0 %7128 }
 0x773   :  { %v7149_v35 = vmul.f32 0.015625, %v7129_v12  ;;  %v7126_v42 = vpop.xlane.xlu1 %7125 }
 0x774   :  { %v7148_v20 = vmul.f32 0.015625, %v7126_v42 }
 0x775   :  { %v7157_v10 = vadd.f32 1e-05, %v7149_v35 }
 0x776   :  { %v7156_v49 = vadd.f32 1e-05, %v7148_v20 }
 0x777   :  { %18733 = vrsqrt.f32 %v7157_v10  ;;  %v7132_v3 = vpop.xlane.xlu1 %7131 }
 0x778   :  { %18735 = vrsqrt.f32 %v7156_v49  ;;  %v7150_v41 = vmul.f32 0.015625, %v7132_v3  ;;  %v20901_v3 = vsub.s32 2, %v22705_v17 }
 0x77a   :  { %v7158_v24 = vadd.f32 1e-05, %v7150_v41  ;;  %22717 = vst [vmem:[#allocation51_spill] sm:$0xff] %v20901_v3  ;;  %v7215_v41 = vrot.slane %v20736_v22, %v20901_v3 }
 0x77b   :  { %v7135_v7 = vpop.xlane.xlu0 %7134 }
 0x77c   :  { %18737 = vrsqrt.f32 %v7158_v24  ;;  %v7151_v26 = vmul.f32 0.015625, %v7135_v7 }
 0x77d   :  { %v7138_v4 = vpop.xlane.xlu1 %7137 }
 0x77e   :  { %v7159_v23 = vadd.f32 1e-05, %v7151_v26  ;;  %v7152_v0 = vmul.f32 0.015625, %v7138_v4 }
 0x77f   :  { %v7141_v34 = vpop.xlane.xlu0 %7140 }
 0x780   :  { %18739 = vrsqrt.f32 %v7159_v23  ;;  %v7160_v50 = vadd.f32 1e-05, %v7152_v0  ;;  %v7153_v36 = vmul.f32 0.015625, %v7141_v34 }
 0x781   :  { %v18734_v53 = vpop.eup %18733  ;;  %v7144_v11 = vpop.xlane.xlu1 %7143 }
 0x782   :  { %v18736_v48 = vpop.eup %18735  ;;  %v7173_v25 = vmul.f32 %v18734_v53, %v20764_v52  ;;  %18741 = vrsqrt.f32 %v7160_v50  ;;  %v7161_v1 = vadd.f32 1e-05, %v7153_v36  ;;  %v7154_v39 = vmul.f32 0.015625, %v7144_v11 }
 0x783   :  { %v7147_v30 = vpop.xlane.xlu0 %7146  ;;  %v7172_v32 = vmul.f32 %v18736_v48, %v20766_v33 }
 0x784   :  { %v7185_v45 = vmul.f32 %v7183_v57, %v7173_v25  ;;  %18743 = vrsqrt.f32 %v7161_v1  ;;  %v7162_v46 = vadd.f32 1e-05, %v7154_v39  ;;  %v7155_v19 = vmul.f32 0.015625, %v7147_v30 }
 0x785   :  { %v7184_v38 = vmul.f32 %v7183_v57, %v7172_v32 }
 0x786   :  { %v18738_v56 = vpop.eup %18737  ;;  %18745 = vrsqrt.f32 %v7162_v46  ;;  %v7163_v55 = vadd.f32 1e-05, %v7155_v19  ;;  %v20858_v58 = vadd.f32 %v7195_v61, %v7185_v45 }
 0x787   :  { %v20855_v28 = vadd.f32 %v7195_v61, %v7184_v38  ;;  %v7174_v52 = vmul.f32 %v18738_v56, %v20773_v51 }
 0x788   :  { %18747 = vrsqrt.f32 %v7163_v55  ;;  %v20908_v55 = vsub.s32 4, %v22705_v17 }
 0x789   :  { %16581 = vmatprep.mubr.msk.f32.mxu0 %vm435_vm6, %v20855_v28  ;;  %v7186_v33 = vmul.f32 %v7183_v57, %v7174_v52 }
 0x78a   :  { %v18740_v2 = vpop.eup %18739  ;;  %16582 = vmatmul.mubr.msk.f32.vlgmr.msra.gmra.mrb[90].mxu0 %vm435_vm6, %v20858_v58  ;;  %22718 = vst [vmem:[#allocation41_spill] sm:$0xff] %v20908_v55  ;;  %v7372_v52 = vrot.slane %v20736_v22, %v20908_v55 }
 0x78b   :  { %v20864_v47 = vadd.f32 %v7195_v61, %v7186_v33  ;;  %v7175_v62 = vmul.f32 %v18740_v2, %v20778_v15 }
 0x78c   :  { %v18742_v40 = vpop.eup %18741 }
 0x78d   :  { %16584 = vmatprep.mubr.msk.f32.mxu0 %vm435_vm6, %v20864_v47  ;;  %v7187_v51 = vmul.f32 %v7183_v57, %v7175_v62  ;;  %v7176_v59 = vmul.f32 %v18742_v40, %v20781_v37 }
 0x78e   :  { %v18744_v8 = vpop.eup %18743 }
 0x78f   :  { %v20870_v6 = vadd.f32 %v7195_v61, %v7187_v51  ;;  %v7188_v16 = vmul.f32 %v7183_v57, %v7176_v59  ;;  %v7177_v14 = vmul.f32 %v18744_v8, %v20785_v18 }
 0x790   :  { %v18746_v31 = vpop.eup %18745 }
 0x791   :  { %16585 = vmatmul.mubr.msk.f32.gmra.mrb[92].mxu0 %vm435_vm6, %v20870_v6  ;;  %v20875_v54 = vadd.f32 %v7195_v61, %v7188_v16  ;;  %v7189_v15 = vmul.f32 %v7183_v57, %v7177_v14  ;;  %v7178_v44 = vmul.f32 %v18746_v31, %v20790_v9  ;;  %v7367_v9 = vld [vmem:[%s22534_s9 + $0x70] sm:$0xff] }
 0x792   :  { %v18748_v12 = vpop.eup %18747 }
 0x793   :  { %16587 = vmatprep.mubr.msk.f32.mxu0 %vm435_vm6, %v20875_v54  ;;  %v20880_v37 = vadd.f32 %v7195_v61, %v7189_v15  ;;  %v7190_v35 = vmul.f32 %v7183_v57, %v7178_v44  ;;  %v7179_v42 = vmul.f32 %v18748_v12, %v20795_v43  ;;  %v7368_v43 = vld [vmem:[%s22534_s9 + $0x78] sm:$0xff] }
 0x794   :  { %v17662_v49 = vpack.c.bf16 %v7368_v43, %v7367_v9 }
 0x795   :  { %16588 = vmatmul.mubr.msk.f32.gmra.mrb[94].mxu0 %vm435_vm6, %v20880_v37  ;;  %v20885_v18 = vadd.f32 %v7195_v61, %v7190_v35  ;;  %v7191_v20 = vmul.f32 %v7183_v57, %v7179_v42 }
 0x796   :  { %17663 = vmatprep.subr.bf16.mxu1 %v17662_v49 }
 0x797   :  { %16590 = vmatprep.mubr.msk.f32.mxu0 %vm435_vm6, %v20885_v18  ;;  %v20889_v10 = vadd.f32 %v7195_v61, %v7191_v20  ;;  %17665 = vmatpush3.bf16.msra.mxu1 %v17662_v49 }
 0x798   :  { %17698 = vmatprep.subr.bf16.mxu1 %v22692_v63 }
 0x799   :  { %16591 = vmatmul.mubr.msk.f32.gmra.mrb[96].mxu0 %vm435_vm6, %v20889_v10 }
 0x85d   :  { %v16583_v24 = vpop.f32.mrb[90].mxu0 }
 0x85e   :  { %v7312_v7 = vadd.f32 %v16583_v24, %v7215_v41  ;;  %v7306_v26 = vpop.f32.mrb[91].mxu0 }
 0x85f   :  { %v7307_v4 = vadd.f32 %v7306_v26, %v7215_v41 }
 0x860   :  { %v7346_v0 = vmax.f32 %v7312_v7, 0.0 }
 0x861   :  { %v7345_v23 = vmax.f32 %v7307_v4, 0.0 }
 0x863   :  { %16625 = vmatprep.mubr.f32.mxu1 %v7345_v23 }
 0x864   :  { %v16586_v34 = vpop.f32.mrb[92].mxu0  ;;  %16626 = vmatmul.mubr.f32.vlgmr.msra.gmra.mrb[94].mxu1 %v7346_v0 }
 0x865   :  { %v7322_v57 = vadd.f32 %v16586_v34, %v7215_v41  ;;  %v7316_v50 = vpop.f32.mrb[93].mxu0 }
 0x866   :  { %v7317_v36 = vadd.f32 %v7316_v50, %v7215_v41 }
 0x867   :  { %v7348_v48 = vmax.f32 %v7322_v57, 0.0 }
 0x868   :  { %v7347_v53 = vmax.f32 %v7317_v36, 0.0  ;;  %v16589_v11 = vpop.f32.mrb[94].mxu0 }
 0x869   :  { %v7332_v25 = vadd.f32 %v16589_v11, %v7215_v41  ;;  %v7326_v1 = vpop.f32.mrb[95].mxu0 }
 0x86a   :  { %v7327_v39 = vadd.f32 %v7326_v1, %v7215_v41  ;;  %16628 = vmatprep.mubr.f32.mxu1 %v7347_v53 }
 0x86b   :  { %16629 = vmatmul.mubr.f32.gmra.mrb[96].mxu1 %v7348_v48  ;;  %v7350_v61 = vmax.f32 %v7332_v25, 0.0 }
 0x86c   :  { %v7349_v30 = vmax.f32 %v7327_v39, 0.0  ;;  %v16592_v32 = vpop.f32.mrb[96].mxu0 }
 0x86d   :  { %v7342_v45 = vadd.f32 %v16592_v32, %v7215_v41  ;;  %v7336_v46 = vpop.f32.mrb[97].mxu0 }
 0x86e   :  { %v7337_v19 = vadd.f32 %v7336_v46, %v7215_v41  ;;  %16631 = vmatprep.mubr.f32.mxu1 %v7349_v30 }
 0x86f   :  { %16632 = vmatmul.mubr.f32.gmra.mrb[98].mxu1 %v7350_v61  ;;  %v7352_v56 = vmax.f32 %v7342_v45, 0.0 }
 0x870   :  { %v7351_v38 = vmax.f32 %v7337_v19, 0.0 }
 0x872   :  { %16634 = vmatprep.mubr.f32.mxu1 %v7351_v38 }
 0x873   :  { %16635 = vmatmul.mubr.f32.gmra.mrb[100].mxu1 %v7352_v56 }
 0x874   :  { %16709 = vmatprep.mubr.msk.f32.mxu1 %vm19100_vm1, %v22691_v13 }
 0x937   :  { %v16627_v33 = vpop.f32.mrb[94].mxu1 }
 0x938   :  { %v7445_v2 = vadd.f32 %v16627_v33, %v7372_v52  ;;  %v7439_v62 = vpop.f32.mrb[95].mxu1 }
 0x939   :  { %v7440_v40 = vadd.f32 %v7439_v62, %v7372_v52 }
 0x93a   :  { %v7479_v51 = vadd.f32 %v7445_v2, %v20858_v58 }
 0x93b   :  { %v7478_v59 = vadd.f32 %v7440_v40, %v20855_v28 }
 0x93c   :  { %v7489_v8 = vsel %vm435_vm6, %v7479_v51, 0.0 }
 0x93d   :  { %7490 = vadd.xlane.f32.xlu0 %v7489_v8  ;;  %v7486_v16 = vsel %vm435_vm6, %v7478_v59, 0.0 }
 0x93e   :  { %7487 = vadd.xlane.f32.xlu1 %v7486_v16  ;;  %v16630_v14 = vpop.f32.mrb[96].mxu1 }
 0x93f   :  { %v7455_v31 = vadd.f32 %v16630_v14, %v7372_v52  ;;  %v7449_v15 = vpop.f32.mrb[97].mxu1 }
 0x940   :  { %v7450_v44 = vadd.f32 %v7449_v15, %v7372_v52 }
 0x941   :  { %v7481_v12 = vadd.f32 %v7455_v31, %v20870_v6 }
 0x942   :  { %v7480_v35 = vadd.f32 %v7450_v44, %v20864_v47  ;;  %v16633_v42 = vpop.f32.mrb[98].mxu1 }
 0x943   :  { %v7465_v20 = vadd.f32 %v16633_v42, %v7372_v52  ;;  %v7459_v9 = vpop.f32.mrb[99].mxu1  ;;  %v7495_v58 = vsel %vm435_vm6, %v7481_v12, 0.0 }
 0x944   :  { %v7460_v28 = vadd.f32 %v7459_v9, %v7372_v52  ;;  %7496 = vadd.xlane.f32.xlu0 %v7495_v58  ;;  %v7492_v43 = vsel %vm435_vm6, %v7480_v35, 0.0 }
 0x945   :  { %v7483_v49 = vadd.f32 %v7465_v20, %v20880_v37  ;;  %7493 = vadd.xlane.f32.xlu1 %v7492_v43  ;;  %v15107_v43 = vld [vmem:[%s22530_s5 + $0x40] sm:$0xff] }
 0x946   :  { %v7482_v41 = vadd.f32 %v7460_v28, %v20875_v54  ;;  %v16636_v24 = vpop.f32.mrb[100].mxu1 }
 0x947   :  { %v7475_v7 = vadd.f32 %v16636_v24, %v7372_v52  ;;  %v7469_v26 = vpop.f32.mrb[101].mxu1  ;;  %v7501_v6 = vsel %vm435_vm6, %v7483_v49, 0.0  ;;  %v15109_v24 = vld [vmem:[%s22530_s5 + $0x50] sm:$0xff] }
 0x948   :  { %v7470_v47 = vadd.f32 %v7469_v26, %v7372_v52  ;;  %7502 = vadd.xlane.f32.xlu0 %v7501_v6  ;;  %v7498_v4 = vsel %vm435_vm6, %v7482_v41, 0.0  ;;  %v15111_v6 = vld [vmem:[%s22530_s5 + $0x60] sm:$0xff] }
 0x949   :  { %v7485_v23 = vadd.f32 %v7475_v7, %v20889_v10  ;;  %7499 = vadd.xlane.f32.xlu1 %v7498_v4  ;;  %v15110_v7 = vld [vmem:[%s22530_s5 + $0x58] sm:$0xff] }
 0x94a   :  { %v7484_v0 = vadd.f32 %v7470_v47, %v20885_v18  ;;  %v17670_v26 = vpack.c.bf16 %v15110_v7, %v15109_v24  ;;  %v15112_v47 = vld [vmem:[%s22530_s5 + $0x68] sm:$0xff]  ;;  %v15125_v24 = vld [vmem:[%s22531_s6 + $0x50] sm:$0xff] }
 0x94b   :  { %v7507_v34 = vsel %vm435_vm6, %v7485_v23, 0.0  ;;  %v17674_v4 = vpack.c.bf16 %v15112_v47, %v15111_v6 }
 0x94c   :  { %7508 = vadd.xlane.f32.xlu0 %v7507_v34  ;;  %v7504_v37 = vsel %vm435_vm6, %v7484_v0, 0.0 }
 0x94d   :  { %7505 = vadd.xlane.f32.xlu1 %v7504_v37  ;;  %v15123_v37 = vld [vmem:[%s22531_s6 + $0x40] sm:$0xff] }
 0x9ca   :  { %v7491_v54 = vpop.xlane.xlu0 %7490 }
 0x9cb   :  { %v7511_v57 = vmul.f32 0.015625, %v7491_v54  ;;  %v7488_v50 = vpop.xlane.xlu1 %7487  ;;  %v15124_v54 = vld [vmem:[%s22531_s6 + $0x48] sm:$0xff] }
 0x9cc   :  { %v7510_v36 = vmul.f32 0.015625, %v7488_v50 }
 0x9cd   :  { %v20928_v53 = vsub.f32 %v7479_v51, %v7511_v57  ;;  %v17682_v57 = vpack.c.bf16 %v15124_v54, %v15123_v37 }
 0x9ce   :  { %v20930_v11 = vsub.f32 %v7478_v59, %v7510_v36 }
 0x9cf   :  { %v7527_v10 = vmul.f32 %v20928_v53, %v20928_v53 }
 0x9d0   :  { %v7526_v18 = vmul.f32 %v20930_v11, %v20930_v11 }
 0x9d1   :  { %v7497_v48 = vpop.xlane.xlu0 %7496  ;;  %v7537_v25 = vsel %vm435_vm6, %v7527_v10, 0.0 }
 0x9d2   :  { %v7513_v1 = vmul.f32 0.015625, %v7497_v48  ;;  %7538 = vadd.xlane.f32.xlu0 %v7537_v25  ;;  %v7494_v39 = vpop.xlane.xlu1 %7493  ;;  %v7534_v30 = vsel %vm435_vm6, %v7526_v18, 0.0 }
 0x9d3   :  { %v7512_v32 = vmul.f32 0.015625, %v7494_v39  ;;  %7535 = vadd.xlane.f32.xlu1 %v7534_v30 }
 0x9d4   :  { %v20938_v61 = vsub.f32 %v7481_v12, %v7513_v1 }
 0x9d5   :  { %v20940_v45 = vsub.f32 %v7480_v35, %v7512_v32  ;;  %v7503_v46 = vpop.xlane.xlu0 %7502 }
 0x9d6   :  { %v7515_v19 = vmul.f32 0.015625, %v7503_v46  ;;  %v7500_v38 = vpop.xlane.xlu1 %7499  ;;  %v7529_v56 = vmul.f32 %v20938_v61, %v20938_v61  ;;  %v22602_v46 = vsub.s32 7, %v22705_v17 }
 0x9d7   :  { %v7514_v52 = vmul.f32 0.015625, %v7500_v38  ;;  %v7528_v33 = vmul.f32 %v20940_v45, %v20940_v45 }
 0x9d8   :  { %v20946_v2 = vsub.f32 %v7483_v49, %v7515_v19  ;;  %v7543_v62 = vsel %vm435_vm6, %v7529_v56, 0.0  ;;  %v15108_v49 = vld [vmem:[%s22530_s5 + $0x48] sm:$0xff] }
 0x9d9   :  { %v20949_v40 = vsub.f32 %v7482_v41, %v7514_v52  ;;  %7544 = vadd.xlane.f32.xlu0 %v7543_v62  ;;  %v7509_v51 = vpop.xlane.xlu0 %7508  ;;  %v7540_v59 = vsel %vm435_vm6, %v7528_v33, 0.0  ;;  %v17666_v41 = vpack.c.bf16 %v15108_v49, %v15107_v43 }
 0x9da   :  { %v7517_v8 = vmul.f32 0.015625, %v7509_v51  ;;  %7541 = vadd.xlane.f32.xlu1 %v7540_v59  ;;  %v7506_v16 = vpop.xlane.xlu1 %7505  ;;  %v7531_v14 = vmul.f32 %v20946_v2, %v20946_v2  ;;  %v21002_v51 = vrot.slane %v20736_v22, %v22602_v46 }
 0x9db   :  { %v7516_v31 = vmul.f32 0.015625, %v7506_v16  ;;  %v7530_v15 = vmul.f32 %v20949_v40, %v20949_v40  ;;  %17667 = vmatprep.subr.bf16.mxu0 %v17666_v41 }
 0x9dc   :  { %v20956_v44 = vsub.f32 %v7485_v23, %v7517_v8  ;;  %v7549_v12 = vsel %vm435_vm6, %v7531_v14, 0.0  ;;  %17669 = vmatpush3.bf16.msra.mxu0 %v17666_v41  ;;  %v15113_v23 = vld [vmem:[%s22530_s5 + $0x70] sm:$0xff]  ;;  %v422_v8 = vld [vmem:[#allocation7 + $0x8] sm:$0xff] }
 0x9dd   :  { %v20959_v35 = vsub.f32 %v7484_v0, %v7516_v31  ;;  %7550 = vadd.xlane.f32.xlu0 %v7549_v12  ;;  %v7546_v42 = vsel %vm435_vm6, %v7530_v15, 0.0  ;;  %17671 = vmatprep.subr.bf16.mxu0 %v17670_v26  ;;  %v15114_v0 = vld [vmem:[%s22530_s5 + $0x78] sm:$0xff] }
 0x9de   :  { %7547 = vadd.xlane.f32.xlu1 %v7546_v42  ;;  %v7533_v20 = vmul.f32 %v20956_v44, %v20956_v44  ;;  %v17678_v34 = vpack.c.bf16 %v15114_v0, %v15113_v23  ;;  %v15127_v23 = vld [vmem:[%s22531_s6 + $0x60] sm:$0xff]  ;;  %v15128_v0 = vld [vmem:[%s22531_s6 + $0x68] sm:$0xff] }
 0x9df   :  { %v7532_v9 = vmul.f32 %v20959_v35, %v20959_v35 }
 0x9e0   :  { %v7555_v58 = vsel %vm435_vm6, %v7533_v20, 0.0  ;;  %17673 = vmatpush3.bf16.msra.mxu0 %v17670_v26 }
 0x9e1   :  { %7556 = vadd.xlane.f32.xlu0 %v7555_v58  ;;  %v7552_v28 = vsel %vm435_vm6, %v7532_v9, 0.0  ;;  %17675 = vmatprep.subr.bf16.mxu0 %v17674_v4 }
 0x9e2   :  { %7553 = vadd.xlane.f32.xlu1 %v7552_v28  ;;  %v7605_v28 = vrot.slane %v422_v8, %v19525_v27  ;;  %v18935_v8 = vld [vmem:[%s22526_s1 + $0x18] sm:$0xff] }
 0x9e4   :  { %17677 = vmatpush3.bf16.msra.mxu0 %v17674_v4 }
 0x9e5   :  { %17679 = vmatprep.subr.bf16.mxu0 %v17678_v34 }
 0x9e8   :  { %17681 = vmatpush3.bf16.msra.mxu0 %v17678_v34 }
 0x9e9   :  { %17683 = vmatprep.subr.bf16.mxu0 %v17682_v57 }
 0xa5f   :  { %v7539_v50 = vpop.xlane.xlu0 %7538 }
 0xa60   :  { %v7559_v36 = vmul.f32 0.015625, %v7539_v50  ;;  %v7536_v10 = vpop.xlane.xlu1 %7535 }
 0xa61   :  { %v7558_v18 = vmul.f32 0.015625, %v7536_v10 }
 0xa62   :  { %v7567_v48 = vadd.f32 1e-05, %v7559_v36 }
 0xa63   :  { %v7566_v25 = vadd.f32 1e-05, %v7558_v18  ;;  %v15129_v18 = vld [vmem:[%s22531_s6 + $0x70] sm:$0xff] }
 0xa64   :  { %18749 = vrsqrt.f32 %v7567_v48  ;;  %v15130_v48 = vld [vmem:[%s22531_s6 + $0x78] sm:$0xff] }
 0xa65   :  { %18751 = vrsqrt.f32 %v7566_v25 }
 0xa66   :  { %v7545_v1 = vpop.xlane.xlu0 %7544 }
 0xa67   :  { %v7561_v39 = vmul.f32 0.015625, %v7545_v1  ;;  %v7542_v30 = vpop.xlane.xlu1 %7541 }
 0xa68   :  { %v7560_v32 = vmul.f32 0.015625, %v7542_v30  ;;  %v17694_v30 = vpack.c.bf16 %v15130_v48, %v15129_v18 }
 0xa69   :  { %v7569_v19 = vadd.f32 1e-05, %v7561_v39 }
 0xa6a   :  { %v7568_v38 = vadd.f32 1e-05, %v7560_v32  ;;  %v7551_v56 = vpop.xlane.xlu0 %7550 }
 0xa6b   :  { %18753 = vrsqrt.f32 %v7569_v19  ;;  %v7563_v52 = vmul.f32 0.015625, %v7551_v56  ;;  %v7548_v33 = vpop.xlane.xlu1 %7547 }
 0xa6c   :  { %18755 = vrsqrt.f32 %v7568_v38  ;;  %v7562_v62 = vmul.f32 0.015625, %v7548_v33 }
 0xa6d   :  { %v7571_v59 = vadd.f32 1e-05, %v7563_v52 }
 0xa6e   :  { %v18750_v16 = vpop.eup %18749  ;;  %v7570_v14 = vadd.f32 1e-05, %v7562_v62  ;;  %v7557_v31 = vpop.xlane.xlu0 %7556 }
 0xa6f   :  { %v18752_v15 = vpop.eup %18751  ;;  %v7583_v12 = vmul.f32 %v18750_v16, %v20928_v53  ;;  %18757 = vrsqrt.f32 %v7571_v59  ;;  %v7565_v42 = vmul.f32 0.015625, %v7557_v31  ;;  %v7554_v20 = vpop.xlane.xlu1 %7553  ;;  %v15126_v53 = vld [vmem:[%s22531_s6 + $0x58] sm:$0xff]  ;;  %v18934_v59 = vld [vmem:[%s22526_s1 + $0x10] sm:$0xff]  ;;  %v18936_v16 = vld [vmem:[%s22526_s1 + $0x20] sm:$0xff] }
 0xa70   :  { %18759 = vrsqrt.f32 %v7570_v14  ;;  %v7564_v9 = vmul.f32 0.015625, %v7554_v20  ;;  %v7582_v58 = vmul.f32 %v18752_v15, %v20930_v11  ;;  %v17686_v6 = vpack.c.bf16 %v15126_v53, %v15125_v24  ;;  %v18937_v14 = vld [vmem:[%s22526_s1 + $0x28] sm:$0xff]  ;;  %v18938_v31 = vld [vmem:[%s22526_s1 + $0x30] sm:$0xff]  ;;  %v18939_v15 = vld [vmem:[%s22526_s1 + $0x38] sm:$0xff] }
 0xa71   :  { %v7595_v22 = vmul.f32 %v21002_v51, %v7583_v12  ;;  %v7573_v43 = vadd.f32 1e-05, %v7565_v42  ;;  %v18940_v12 = vld [vmem:[%s22526_s1 + $0x40] sm:$0xff]  ;;  %v18941_v42 = vld [vmem:[%s22526_s1 + $0x48] sm:$0xff]  ;;  %v18942_v20 = vld [vmem:[%s22526_s1 + $0x50] sm:$0xff] }
 0xa72   :  { %v7572_v49 = vadd.f32 1e-05, %v7564_v9  ;;  %v7594_v41 = vmul.f32 %v21002_v51, %v7582_v58  ;;  %v18943_v9 = vld [vmem:[%s22526_s1 + $0x58] sm:$0xff]  ;;  %v18944_v58 = vld [vmem:[%s22526_s1 + $0x60] sm:$0xff] }
 0xa73   :  { %18761 = vrsqrt.f32 %v7573_v43  ;;  %v21017_v26 = vadd.f32 %v7605_v28, %v7595_v22  ;;  %v18946_v22 = vld [vmem:[%s22526_s1 + $0x70] sm:$0xff]  ;;  %v18947_v43 = vld [vmem:[%s22526_s1 + $0x78] sm:$0xff] }
 0xa74   :  { %18763 = vrsqrt.f32 %v7572_v49  ;;  %v21015_v7 = vadd.f32 %v7605_v28, %v7594_v41 }
 0xa75   :  { %v18754_v11 = vpop.eup %18753  ;;  %22720 = vst [vmem:[#allocation53_spill] sm:$0xff] %v21017_v26 }
 0xa76   :  { %22719 = vst [vmem:[#allocation56_spill] sm:$0xff] %v21015_v7  ;;  %v18756_v47 = vpop.eup %18755  ;;  %16653 = vmatprep.mubr.msk.f32.mxu0 %vm435_vm6, %v21015_v7  ;;  %v7585_v4 = vmul.f32 %v18754_v11, %v20938_v61  ;;  %v17690_v61 = vpack.c.bf16 %v15128_v0, %v15127_v23  ;;  %v22727_v23 = vld [vmem:[#allocation26_spill] sm:$0xff] }
 0xa77   :  { %16654 = vmatmul.mubr.msk.f32.vlgmr.msra.gmra.mrb[98].mxu0 %vm435_vm6, %v21017_v26  ;;  %v7584_v34 = vmul.f32 %v18756_v47, %v20940_v45  ;;  %v7615_v47 = vld [vmem:[#allocation7 + $0x10] sm:$0xff] }
 0xa78   :  { %17685 = vmatpush3.bf16.msra.mxu0 %v17682_v57  ;;  %v7597_v37 = vmul.f32 %v21002_v51, %v7585_v4  ;;  %v21147_v0 = vrot.slane %v7615_v47, %v22727_v23 }
 0xa79   :  { %v18758_v54 = vpop.eup %18757  ;;  %v7596_v50 = vmul.f32 %v21002_v51, %v7584_v34  ;;  %17687 = vmatprep.subr.bf16.mxu0 %v17686_v6 }
 0xa7a   :  { %v18760_v36 = vpop.eup %18759  ;;  %v7587_v10 = vmul.f32 %v18758_v54, %v20946_v2  ;;  %v21043_v25 = vadd.f32 %v7605_v28, %v7597_v37 }
 0xa7b   :  { %v21040_v45 = vadd.f32 %v7605_v28, %v7596_v50  ;;  %v7586_v57 = vmul.f32 %v18760_v36, %v20949_v40 }
 0xa7c   :  { %22722 = vst [vmem:[#allocation58_spill] sm:$0xff] %v21043_v25  ;;  %17689 = vmatpush3.bf16.msra.mxu0 %v17686_v6  ;;  %v7599_v1 = vmul.f32 %v21002_v51, %v7587_v10 }
 0xa7d   :  { %22721 = vst [vmem:[#allocation60_spill] sm:$0xff] %v21040_v45  ;;  %v18762_v39 = vpop.eup %18761  ;;  %16656 = vmatprep.mubr.msk.f32.mxu0 %vm435_vm6, %v21040_v45  ;;  %v7598_v2 = vmul.f32 %v21002_v51, %v7586_v57  ;;  %17691 = vmatprep.subr.bf16.mxu0 %v17690_v61 }
 0xa7e   :  { %v18764_v32 = vpop.eup %18763  ;;  %16657 = vmatmul.mubr.msk.f32.gmra.mrb[100].mxu0 %vm435_vm6, %v21043_v25  ;;  %v7589_v19 = vmul.f32 %v18762_v39, %v20956_v44  ;;  %v21055_v56 = vadd.f32 %v7605_v28, %v7599_v1 }
 0xa7f   :  { %v21052_v40 = vadd.f32 %v7605_v28, %v7598_v2  ;;  %v7588_v38 = vmul.f32 %v18764_v32, %v20959_v35  ;;  %v18932_v35 = vld [vmem:[%s22526_s1] sm:$0xff]  ;;  %v21162_v2 = vrot.slane %v7615_v47, %v19525_v27 }
 0xa80   :  { %22724 = vst [vmem:[#allocation45_spill] sm:$0xff] %v21055_v56  ;;  %17693 = vmatpush3.bf16.msra.mxu0 %v17690_v61  ;;  %v7601_v52 = vmul.f32 %v21002_v51, %v7589_v19 }
 0xa81   :  { %22723 = vst [vmem:[#allocation43_spill] sm:$0xff] %v21052_v40  ;;  %16659 = vmatprep.mubr.msk.f32.mxu0 %vm435_vm6, %v21052_v40  ;;  %v7600_v33 = vmul.f32 %v21002_v51, %v7588_v38  ;;  %17695 = vmatprep.subr.bf16.mxu0 %v17694_v30  ;;  %v18933_v51 = vld [vmem:[%s22526_s1 + $0x8] sm:$0xff] }
 0xa82   :  { %16660 = vmatmul.mubr.msk.f32.gmra.mrb[102].mxu0 %vm435_vm6, %v21055_v56  ;;  %v21065_v44 = vadd.f32 %v7605_v28, %v7601_v52 }
 0xa83   :  { %v21063_v62 = vadd.f32 %v7605_v28, %v7600_v33  ;;  %v18945_v28 = vld [vmem:[%s22526_s1 + $0x68] sm:$0xff] }
 0xa84   :  { %22726 = vst [vmem:[#allocation48_spill] sm:$0xff] %v21065_v44  ;;  %17697 = vmatpush3.bf16.msra.mxu0 %v17694_v30 }
 0xa85   :  { %22725 = vst [vmem:[#allocation46_spill] sm:$0xff] %v21063_v62  ;;  %16662 = vmatprep.mubr.msk.f32.mxu0 %vm435_vm6, %v21063_v62  ;;  %17714 = vmatprep.subr.bf16.mxu0 %v22692_v63 }
 0xa86   :  { %16663 = vmatmul.mubr.msk.f32.gmra.mrb[104].mxu0 %vm435_vm6, %v21065_v44 }
 0xa87   :  { %16681 = vmatprep.mubr.msk.f32.mxu0 %vm435_vm6, %v18932_v35 }
 0xa8a   :  { %16682 = vmatmul.mubr.msk.f32.vlgmr.msra.gmra.mrb[106].mxu0 %vm435_vm6, %v18933_v51 }
 0xa8b   :  { %16684 = vmatprep.mubr.msk.f32.mxu0 %vm435_vm6, %v18934_v59 }
 0xa8e   :  { %16685 = vmatmul.mubr.msk.f32.gmra.mrb[108].mxu0 %vm435_vm6, %v18935_v8 }
 0xa8f   :  { %16687 = vmatprep.mubr.msk.f32.mxu0 %vm435_vm6, %v18936_v16 }
 0xa92   :  { %16688 = vmatmul.mubr.msk.f32.gmra.mrb[110].mxu0 %vm435_vm6, %v18937_v14 }
 0xa93   :  { %16690 = vmatprep.mubr.msk.f32.mxu0 %vm435_vm6, %v18938_v31 }
 0xa96   :  { %16691 = vmatmul.mubr.msk.f32.gmra.mrb[112].mxu0 %vm435_vm6, %v18939_v15 }
 0xa97   :  { %16693 = vmatprep.mubr.msk.f32.mxu0 %vm435_vm6, %v18940_v12 }
 0xa9a   :  { %16694 = vmatmul.mubr.msk.f32.gmra.mrb[114].mxu0 %vm435_vm6, %v18941_v42 }
 0xa9b   :  { %16696 = vmatprep.mubr.msk.f32.mxu0 %vm435_vm6, %v18942_v20 }
 0xa9e   :  { %16697 = vmatmul.mubr.msk.f32.gmra.mrb[116].mxu0 %vm435_vm6, %v18943_v9 }
 0xa9f   :  { %16699 = vmatprep.mubr.msk.f32.mxu0 %vm435_vm6, %v18944_v58 }
 0xaa2   :  { %16700 = vmatmul.mubr.msk.f32.gmra.mrb[118].mxu0 %vm435_vm6, %v18945_v28 }
 0xaa3   :  { %16702 = vmatprep.mubr.msk.f32.mxu0 %vm435_vm6, %v18946_v22 }
 0xaa6   :  { %16703 = vmatmul.mubr.msk.f32.gmra.mrb[120].mxu0 %vm435_vm6, %v18947_v43 }
 0xaa7   :  { %16737 = vmatprep.mubr.msk.f32.mxu0 %vm19100_vm1, %v22691_v13 }
 0xb4a   :  { %v16655_v49 = vpop.f32.mrb[98].mxu0 }
 0xb4b   :  { %v7720_v41 = vpop.f32.mrb[99].mxu0  ;;  %v21196_v28 = vadd.f32 %v16655_v49, %v21162_v2 }
 0xb4c   :  { %v21172_v35 = vadd.f32 %v7720_v41, %v21162_v2 }
 0xb51   :  { %v21138_v24 = vpop.f32.mrb[100].mxu0 }
 0xb52   :  { %v7730_v53 = vpop.f32.mrb[101].mxu0 }
 0xb55   :  { %v21140_v11 = vpop.f32.mrb[102].mxu0 }
 0xb56   :  { %v21142_v6 = vpop.f32.mrb[103].mxu0 }
 0xb59   :  { %v21144_v4 = vpop.f32.mrb[104].mxu0 }
 0xb5a   :  { %v21149_v34 = vpop.f32.mrb[105].mxu0 }
 0xb5d   :  { %v16683_v37 = vpop.f32.mrb[106].mxu0 }
 0xb5e   :  { %v7844_v54 = vadd.f32 %v16683_v37, %v21147_v0  ;;  %v7838_v50 = vpop.f32.mrb[107].mxu0 }
 0xb5f   :  { %v7839_v61 = vadd.f32 %v7838_v50, %v21147_v0  ;;  %v21207_v50 = vadd.f32 %v7730_v53, %v21162_v2 }
 0xb61   :  { %v16686_v36 = vpop.f32.mrb[108].mxu0  ;;  %v21153_v10 = vpack.i.bf16 %v7844_v54, %v7839_v61  ;;  %v17699_v18 = vpack.c.bf16 %v7844_v54, %v7839_v61 }
 0xb62   :  { %v7854_v48 = vadd.f32 %v16686_v36, %v21147_v0  ;;  %v7848_v57 = vpop.f32.mrb[109].mxu0 }
 0xb63   :  { %v7849_v1 = vadd.f32 %v7848_v57, %v21147_v0  ;;  %18322 = vrot.lane.b32.xlu1 %v21153_v10, %s19102_s26  ;;  %17701 = vmatpush3.bf16.xpose.msk.msra.mxu1 %vm19466_vm3, %v17699_v18  ;;  %v21225_v57 = vadd.f32 %v21142_v6, %v21162_v2  ;;  %v7736_v6 = vadd.f32 %v21138_v24, %v21162_v2 }
 0xb64   :  { %17702 = vmatprep.subr.bf16.mxu1 %v22692_v63 }
 0xb65   :  { %v16689_v30 = vpop.f32.mrb[110].mxu0  ;;  %v21165_v32 = vpack.i.bf16 %v7854_v48, %v7849_v1  ;;  %v17703_v19 = vpack.c.bf16 %v7854_v48, %v7849_v1 }
 0xb66   :  { %v7864_v38 = vadd.f32 %v16689_v30, %v21147_v0  ;;  %v7858_v52 = vpop.f32.mrb[111].mxu0 }
 0xb67   :  { %v7859_v33 = vadd.f32 %v7858_v52, %v21147_v0  ;;  %18327 = vrot.lane.b32.xlu0 %v21165_v32, %s19102_s26 }
 0xb69   :  { %v16692_v51 = vpop.f32.mrb[112].mxu0  ;;  %v21174_v59 = vpack.i.bf16 %v7864_v38, %v7859_v33  ;;  %v17707_v8 = vpack.c.bf16 %v7864_v38, %v7859_v33 }
 0xb6a   :  { %v7874_v16 = vadd.f32 %v16692_v51, %v21147_v0  ;;  %v7868_v14 = vpop.f32.mrb[113].mxu0  ;;  %16710 = vmatmul.mubr.msk.f32.vlgmr.msra.gmra.mrb[102].mxu1 %vm938_vm2, %v21172_v35 }
 0xb6b   :  { %v7869_v31 = vadd.f32 %v7868_v14, %v21147_v0  ;;  %7925 = vrot.lane.b32.xlu0 %v21172_v35, %s19102_s26  ;;  %18332 = vrot.lane.b32.xlu1 %v21174_v59, %s19102_s26 }
 0xb6c   :  { %17705 = vmatpush3.bf16.xpose.msk.msra.mxu1 %vm19466_vm3, %v17703_v19  ;;  %16716 = vmatprep.mubr.msk.f32.mxu1 %vm19100_vm1, %v22691_v13 }
 0xb6d   :  { %v16695_v15 = vpop.f32.mrb[114].mxu0  ;;  %v21188_v12 = vpack.i.bf16 %v7874_v16, %v7869_v31  ;;  %17706 = vmatprep.subr.bf16.mxu1 %v22692_v63  ;;  %v17711_v42 = vpack.c.bf16 %v7874_v16, %v7869_v31 }
 0xb6e   :  { %v7884_v20 = vadd.f32 %v16695_v15, %v21147_v0  ;;  %v7878_v9 = vpop.f32.mrb[115].mxu0 }
 0xb6f   :  { %v7879_v58 = vadd.f32 %v7878_v9, %v21147_v0  ;;  %18337 = vrot.lane.b32.xlu1 %v21188_v12, %s19102_s26 }
 0xb71   :  { %v16698_v22 = vpop.f32.mrb[116].mxu0  ;;  %v17715_v43 = vpack.c.bf16 %v7884_v20, %v7879_v58  ;;  %v21198_v41 = vpack.i.bf16 %v7884_v20, %v7879_v58 }
 0xb72   :  { %v7894_v47 = vadd.f32 %v16698_v22, %v21147_v0  ;;  %v7888_v37 = vpop.f32.mrb[117].mxu0 }
 0xb73   :  { %v7889_v54 = vadd.f32 %v7888_v37, %v21147_v0  ;;  %16717 = vmatmul.mubr.msk.f32.vlgmr.msra.gmra.mrb[104].mxu1 %vm938_vm2, %v21196_v28  ;;  %17717 = vmatpush3.bf16.xpose.msk.msra.mxu0 %vm19466_vm3, %v17715_v43 }
 0xb74   :  { %18342 = vrot.lane.b32.xlu0 %v21198_v41, %s19102_s26  ;;  %7927 = vrot.lane.b32.xlu1 %v21196_v28, %s19102_s26 }
 0xb75   :  { %17709 = vmatpush3.bf16.xpose.msk.msra.mxu1 %vm19466_vm3, %v17707_v8  ;;  %v16701_v49 = vpop.f32.mrb[118].mxu0  ;;  %v21215_v61 = vpack.i.bf16 %v7894_v47, %v7889_v54  ;;  %16723 = vmatprep.mubr.msk.f32.mxu1 %vm19100_vm1, %v22691_v13  ;;  %v17719_v36 = vpack.c.bf16 %v7894_v47, %v7889_v54  ;;  %v7746_v8 = vadd.f32 %v21140_v11, %v21162_v2 }
 0xb76   :  { %v7904_v18 = vadd.f32 %v16701_v49, %v21147_v0  ;;  %v7898_v53 = vpop.f32.mrb[119].mxu0  ;;  %17710 = vmatprep.subr.bf16.mxu1 %v22692_v63  ;;  %17722 = vmatprep.subr.bf16.mxu0 %v22692_v63  ;;  %v7756_v11 = vadd.f32 %v21144_v4, %v21162_v2 }
 0xb77   :  { %v7899_v48 = vadd.f32 %v7898_v53, %v21147_v0 }
 0xb78   :  { %7929 = vrot.lane.b32.xlu0 %v21207_v50, %s19102_s26  ;;  %18347 = vrot.lane.b32.xlu1 %v21215_v61, %s19102_s26 }
 0xb79   :  { %v16704_v1 = vpop.f32.mrb[120].mxu0  ;;  %v17723_v30 = vpack.c.bf16 %v7904_v18, %v7899_v48  ;;  %v21231_v19 = vpack.i.bf16 %v7904_v18, %v7899_v48 }
 0xb7a   :  { %v7914_v38 = vadd.f32 %v16704_v1, %v21147_v0  ;;  %v7908_v52 = vpop.f32.mrb[121].mxu0  ;;  %16738 = vmatmul.mubr.msk.f32.vlgmr.msra.gmra.mrb[122].mxu0 %vm938_vm2, %v21225_v57 }
 0xb7b   :  { %v7909_v33 = vadd.f32 %v7908_v52, %v21147_v0  ;;  %17725 = vmatpush3.bf16.xpose.msk.msra.mxu0 %vm19466_vm3, %v17723_v30  ;;  %16751 = vmatprep.mubr.msk.f32.mxu0 %vm19100_vm1, %v22691_v13  ;;  %v7751_v0 = vadd.f32 %v21149_v34, %v21162_v2 }
 0xb7c   :  { %16724 = vmatmul.mubr.msk.f32.vlgmr.msra.gmra.mrb[106].mxu1 %vm938_vm2, %v21207_v50  ;;  %18352 = vrot.lane.b32.xlu0 %v21231_v19, %s19102_s26 }
 0xb7d   :  { %7931 = vrot.lane.b32.xlu1 %v7736_v6, %s19102_s26  ;;  %17713 = vmatpush3.bf16.xpose.msk.msra.mxu1 %vm19466_vm3, %v17711_v42  ;;  %v18356_v24 = vpack.i.bf16 %v7914_v38, %v7909_v33  ;;  %v17727_v51 = vpack.c.bf16 %v7914_v38, %v7909_v33 }
 0xb7e   :  { %16730 = vmatprep.mubr.msk.f32.mxu1 %vm19100_vm1, %v22691_v13  ;;  %17718 = vmatprep.subr.bf16.mxu1 %v22692_v63 }
 0xb7f   :  { %17730 = vmatprep.subr.bf16.mxu0 %v22692_v63 }
 0xb80   :  { %7933 = vrot.lane.b32.xlu0 %v21225_v57, %s19102_s26 }
 0xb81   :  { %18357 = vrot.lane.b32.xlu1 %v18356_v24, %s19102_s26 }
 0xb82   :  { %16752 = vmatmul.mubr.msk.f32.vlgmr.msra.gmra.mrb[124].mxu0 %vm938_vm2, %v7751_v0 }
 0xb83   :  { %16765 = vmatprep.mubr.msk.f32.mxu0 %vm19100_vm1, %v22691_v13 }
 0xb84   :  { %16731 = vmatmul.mubr.msk.f32.vlgmr.msra.gmra.mrb[108].mxu1 %vm938_vm2, %v7736_v6  ;;  %18362 = vrot.lane.b32.xlu0 %v21153_v10, %s19103_s17 }
 0xb85   :  { %7935 = vrot.lane.b32.xlu1 %v7746_v8, %s19102_s26  ;;  %17721 = vmatpush3.bf16.xpose.msk.msra.mxu1 %vm19466_vm3, %v17719_v36 }
 0xb86   :  { %16744 = vmatprep.mubr.msk.f32.mxu1 %vm19100_vm1, %v22691_v13  ;;  %17726 = vmatprep.subr.bf16.mxu1 %v22692_v63 }
 0xb88   :  { %7937 = vrot.lane.b32.xlu0 %v7751_v0, %s19102_s26 }
 0xb89   :  { %18367 = vrot.lane.b32.xlu1 %v21165_v32, %s19103_s17 }
 0xb8c   :  { %16745 = vmatmul.mubr.msk.f32.vlgmr.msra.gmra.mrb[110].mxu1 %vm938_vm2, %v7746_v8  ;;  %18372 = vrot.lane.b32.xlu0 %v21174_v59, %s19103_s17 }
 0xb8d   :  { %7939 = vrot.lane.b32.xlu1 %v7756_v11, %s19102_s26  ;;  %17729 = vmatpush3.bf16.xpose.msk.msra.mxu1 %vm19466_vm3, %v17727_v51 }
 0xb8e   :  { %16758 = vmatprep.mubr.msk.f32.mxu1 %vm19100_vm1, %v22691_v13  ;;  %17734 = vmatprep.subr.bf16.mxu1 %v22692_v63 }
 0xb90   :  { %7941 = vrot.lane.b32.xlu0 %v21172_v35, %s19103_s17 }
 0xb91   :  { %18377 = vrot.lane.b32.xlu1 %v21188_v12, %s19103_s17 }
 0xb94   :  { %16759 = vmatmul.mubr.msk.f32.vlgmr.msra.gmra.mrb[112].mxu1 %vm938_vm2, %v7756_v11  ;;  %18382 = vrot.lane.b32.xlu0 %v21198_v41, %s19103_s17 }
 0xb95   :  { %7943 = vrot.lane.b32.xlu1 %v21196_v28, %s19103_s17  ;;  %16772 = vmatprep.mubr.msk.f32.mxu1 %vm19100_vm1, %v22691_v13 }
 0xb98   :  { %7945 = vrot.lane.b32.xlu0 %v21207_v50, %s19103_s17 }
 0xb99   :  { %18387 = vrot.lane.b32.xlu1 %v21215_v61, %s19103_s17 }
 0xb9c   :  { %18392 = vrot.lane.b32.xlu0 %v21231_v19, %s19103_s17 }
 0xb9d   :  { %7947 = vrot.lane.b32.xlu1 %v7736_v6, %s19103_s17 }
 0xba0   :  { %7949 = vrot.lane.b32.xlu0 %v21225_v57, %s19103_s17 }
 0xba1   :  { %18397 = vrot.lane.b32.xlu1 %v18356_v24, %s19103_s17 }
 0xba4   :  { %18402 = vrot.lane.b32.xlu0 %v21153_v10, %s19104_s8 }
 0xba5   :  { %7951 = vrot.lane.b32.xlu1 %v7746_v8, %s19103_s17 }
 0xba8   :  { %7953 = vrot.lane.b32.xlu0 %v7751_v0, %s19103_s17 }
 0xba9   :  { %18407 = vrot.lane.b32.xlu1 %v21165_v32, %s19104_s8 }
 0xbac   :  { %18412 = vrot.lane.b32.xlu0 %v21174_v59, %s19104_s8 }
 0xbad   :  { %7955 = vrot.lane.b32.xlu1 %v7756_v11, %s19103_s17 }
 0xbb0   :  { %7957 = vrot.lane.b32.xlu0 %v21172_v35, %s19104_s8 }
 0xbb1   :  { %18417 = vrot.lane.b32.xlu1 %v21188_v12, %s19104_s8 }
 0xbb4   :  { %18422 = vrot.lane.b32.xlu0 %v21198_v41, %s19104_s8 }
 0xbb5   :  { %7959 = vrot.lane.b32.xlu1 %v21196_v28, %s19104_s8 }
 0xbb8   :  { %7961 = vrot.lane.b32.xlu0 %v21207_v50, %s19104_s8 }
 0xbb9   :  { %18427 = vrot.lane.b32.xlu1 %v21215_v61, %s19104_s8 }
 0xbbc   :  { %18432 = vrot.lane.b32.xlu0 %v21231_v19, %s19104_s8 }
 0xbbd   :  { %7963 = vrot.lane.b32.xlu1 %v7736_v6, %s19104_s8 }
 0xbc0   :  { %7965 = vrot.lane.b32.xlu0 %v21225_v57, %s19104_s8 }
 0xbc1   :  { %18437 = vrot.lane.b32.xlu1 %v18356_v24, %s19104_s8 }
 0xbc4   :  { %7969 = vrot.lane.b32.xlu0 %v7751_v0, %s19104_s8 }
 0xbc5   :  { %7967 = vrot.lane.b32.xlu1 %v7746_v8, %s19104_s8 }
 0xbc8   :  { %18447 = vrot.lane.b32.xlu0 %v21165_v32, %s19105_s22 }
 0xbc9   :  { %7971 = vrot.lane.b32.xlu1 %v7756_v11, %s19104_s8 }
 0xbcc   :  { %18457 = vrot.lane.b32.xlu0 %v21188_v12, %s19105_s22 }
 0xbcd   :  { %18442 = vrot.lane.b32.xlu1 %v21153_v10, %s19105_s22 }
 0xbd0   :  { %18467 = vrot.lane.b32.xlu0 %v21215_v61, %s19105_s22 }
 0xbd1   :  { %18452 = vrot.lane.b32.xlu1 %v21174_v59, %s19105_s22 }
 0xbd4   :  { %18477 = vrot.lane.b32.xlu0 %v18356_v24, %s19105_s22 }
 0xbd5   :  { %18462 = vrot.lane.b32.xlu1 %v21198_v41, %s19105_s22  ;;  %v18323_v4 = vpop.permute.xlu1 %18322 }
 0xbd6   :  { %v18325_v34 = vunpack.i.h.bf16 %v18323_v4  ;;  %v18324_v2 = vunpack.i.l.bf16 %v18323_v4 }
 0xbd8   :  { %v17731_v32 = vpack.c.bf16 %v18325_v34, %v18324_v2 }
 0xbd9   :  { %18472 = vrot.lane.b32.xlu1 %v21231_v19, %s19105_s22  ;;  %v21353_v35 = vpop.permute.xlu0 %18327 }
 0xbda   :  { %v18330_v10 = vunpack.i.h.bf16 %v21353_v35  ;;  %v18329_v16 = vunpack.i.l.bf16 %v21353_v35  ;;  %17733 = vmatpush3.bf16.xpose.msk.msra.mxu0 %vm19466_vm3, %v17731_v32 }
 0xbdb   :  { %17738 = vmatprep.subr.bf16.mxu0 %v22692_v63 }
 0xbdc   :  { %v17735_v59 = vpack.c.bf16 %v18330_v10, %v18329_v16 }
 0xbdd   :  { %18482 = vrot.lane.b32.xlu1 %v18323_v4, %s19105_s22  ;;  %v21361_v14 = vpop.permute.xlu1 %18332  ;;  %v7926_v12 = vpop.permute.xlu0 %7925 }
 0xbde   :  { %v18335_v31 = vunpack.i.h.bf16 %v21361_v14  ;;  %v18334_v15 = vunpack.i.l.bf16 %v21361_v14  ;;  %17737 = vmatpush3.bf16.xpose.msk.msra.mxu1 %vm19466_vm3, %v17735_v59 }
 0xbdf   :  { %17742 = vmatprep.subr.bf16.mxu1 %v22692_v63 }
 0xbe0   :  { %v17739_v42 = vpack.c.bf16 %v18335_v31, %v18334_v15 }
 0xbe1   :  { %v21368_v20 = vpop.permute.xlu1 %18337  ;;  %16766 = vmatmul.mubr.msk.f32.vlgmr.msra.gmra.mrb[126].mxu0 %vm938_vm2, %v7926_v12 }
 0xbe2   :  { %v18340_v9 = vunpack.i.h.bf16 %v21368_v20  ;;  %v18339_v58 = vunpack.i.l.bf16 %v21368_v20  ;;  %17741 = vmatpush3.bf16.xpose.msk.msra.mxu0 %vm19466_vm3, %v17739_v42  ;;  %16779 = vmatprep.mubr.msk.f32.mxu0 %vm19100_vm1, %v22691_v13 }
 0xbe3   :  { %17746 = vmatprep.subr.bf16.mxu0 %v22692_v63 }
 0xbe4   :  { %v17743_v28 = vpack.c.bf16 %v18340_v9, %v18339_v58 }
 0xbe6   :  { %v21378_v22 = vpop.permute.xlu0 %18342  ;;  %v7928_v43 = vpop.permute.xlu1 %7927 }
 0xbe7   :  { %v18345_v41 = vunpack.i.h.bf16 %v21378_v22  ;;  %v18344_v47 = vunpack.i.l.bf16 %v21378_v22  ;;  %16773 = vmatmul.mubr.msk.f32.vlgmr.msra.gmra.mrb[114].mxu1 %vm938_vm2, %v7928_v43 }
 0xbe8   :  { %17745 = vmatpush3.bf16.xpose.msk.msra.mxu1 %vm19466_vm3, %v17743_v28  ;;  %16786 = vmatprep.mubr.msk.f32.mxu1 %vm19100_vm1, %v22691_v13 }
 0xbe9   :  { %v17747_v37 = vpack.c.bf16 %v18345_v41, %v18344_v47  ;;  %17750 = vmatprep.subr.bf16.mxu1 %v22692_v63 }
 0xbea   :  { %v7930_v54 = vpop.permute.xlu0 %7929  ;;  %v21388_v50 = vpop.permute.xlu1 %18347 }
 0xbeb   :  { %v18350_v49 = vunpack.i.h.bf16 %v21388_v50  ;;  %v18349_v61 = vunpack.i.l.bf16 %v21388_v50  ;;  %16780 = vmatmul.mubr.msk.f32.vlgmr.msra.gmra.mrb[128].mxu0 %vm938_vm2, %v7930_v54 }
 0xbec   :  { %17749 = vmatpush3.bf16.xpose.msk.msra.mxu0 %vm19466_vm3, %v17747_v37  ;;  %16793 = vmatprep.mubr.msk.f32.mxu0 %vm19100_vm1, %v22691_v13 }
 0xbed   :  { %v17751_v36 = vpack.c.bf16 %v18350_v49, %v18349_v61  ;;  %17754 = vmatprep.subr.bf16.mxu0 %v22692_v63 }
 0xbee   :  { %v21398_v18 = vpop.permute.xlu0 %18352 }
 0xbef   :  { %v18355_v53 = vunpack.i.h.bf16 %v21398_v18  ;;  %v18354_v48 = vunpack.i.l.bf16 %v21398_v18  ;;  %v7932_v57 = vpop.permute.xlu1 %7931 }
 0xbf0   :  { %16787 = vmatmul.mubr.msk.f32.vlgmr.msra.gmra.mrb[116].mxu1 %vm938_vm2, %v7932_v57 }
 0xbf1   :  { %v17755_v1 = vpack.c.bf16 %v18355_v53, %v18354_v48  ;;  %17753 = vmatpush3.bf16.xpose.msk.msra.mxu1 %vm19466_vm3, %v17751_v36  ;;  %16800 = vmatprep.mubr.msk.f32.mxu1 %vm19100_vm1, %v22691_v13 }
 0xbf2   :  { %v7934_v30 = vpop.permute.xlu0 %7933  ;;  %17758 = vmatprep.subr.bf16.mxu1 %v22692_v63 }
 0xbf3   :  { %v21408_v19 = vpop.permute.xlu1 %18357  ;;  %16794 = vmatmul.mubr.msk.f32.vlgmr.msra.gmra.mrb[130].mxu0 %vm938_vm2, %v7934_v30 }
 0xbf4   :  { %v18360_v38 = vunpack.i.h.bf16 %v21408_v19  ;;  %v18359_v52 = vunpack.i.l.bf16 %v21408_v19  ;;  %17757 = vmatpush3.bf16.xpose.msk.msra.mxu0 %vm19466_vm3, %v17755_v1  ;;  %16807 = vmatprep.mubr.msk.f32.mxu0 %vm19100_vm1, %v22691_v13 }
 0xbf5   :  { %17762 = vmatprep.subr.bf16.mxu0 %v22692_v63 }
 0xbf6   :  { %v17759_v6 = vpack.c.bf16 %v18360_v38, %v18359_v52  ;;  %v18363_v33 = vpop.permute.xlu0 %18362 }
 0xbf7   :  { %v18365_v24 = vunpack.i.h.bf16 %v18363_v33  ;;  %v18364_v51 = vunpack.i.l.bf16 %v18363_v33  ;;  %v7936_v0 = vpop.permute.xlu1 %7935  ;;  %18487 = vrot.lane.b32.xlu1 %v18363_v33, %s19105_s22 }
 0xbf8   :  { %16801 = vmatmul.mubr.msk.f32.vlgmr.msra.gmra.mrb[118].mxu1 %vm938_vm2, %v7936_v0 }
 0xbf9   :  { %v17763_v8 = vpack.c.bf16 %v18365_v24, %v18364_v51  ;;  %17761 = vmatpush3.bf16.xpose.msk.msra.mxu1 %vm19466_vm3, %v17759_v6  ;;  %16814 = vmatprep.mubr.msk.f32.mxu1 %vm19100_vm1, %v22691_v13 }
 0xbfa   :  { %v7938_v11 = vpop.permute.xlu0 %7937  ;;  %17766 = vmatprep.subr.bf16.mxu1 %v22692_v63 }
 0xbfb   :  { %v21424_v4 = vpop.permute.xlu1 %18367  ;;  %16808 = vmatmul.mubr.msk.f32.vlgmr.msra.gmra.mrb[132].mxu0 %vm938_vm2, %v7938_v11 }
 0xbfc   :  { %v18370_v34 = vunpack.i.h.bf16 %v21424_v4  ;;  %v18369_v2 = vunpack.i.l.bf16 %v21424_v4  ;;  %17765 = vmatpush3.bf16.xpose.msk.msra.mxu0 %vm19466_vm3, %v17763_v8  ;;  %16821 = vmatprep.mubr.msk.f32.mxu0 %vm19100_vm1, %v22691_v13 }
 0xbfd   :  { %17770 = vmatprep.subr.bf16.mxu0 %v22692_v63 }
 0xbfe   :  { %v17767_v32 = vpack.c.bf16 %v18370_v34, %v18369_v2  ;;  %v21435_v10 = vpop.permute.xlu0 %18372 }
 0xbff   :  { %v7940_v16 = vpop.permute.xlu1 %7939  ;;  %v18375_v59 = vunpack.i.h.bf16 %v21435_v10  ;;  %v18374_v31 = vunpack.i.l.bf16 %v21435_v10 }
 0xc00   :  { %16815 = vmatmul.mubr.msk.f32.vlgmr.msra.gmra.mrb[120].mxu1 %vm938_vm2, %v7940_v16 }
 0xc01   :  { %v17771_v15 = vpack.c.bf16 %v18375_v59, %v18374_v31  ;;  %17769 = vmatpush3.bf16.xpose.msk.msra.mxu1 %vm19466_vm3, %v17767_v32  ;;  %16828 = vmatprep.mubr.msk.f32.mxu1 %vm19100_vm1, %v22691_v13 }
 0xc02   :  { %v7942_v12 = vpop.permute.xlu0 %7941  ;;  %17774 = vmatprep.subr.bf16.mxu1 %v22692_v63 }
 0xc03   :  { %v21445_v42 = vpop.permute.xlu1 %18377  ;;  %16822 = vmatmul.mubr.msk.f32.vlgmr.msra.gmra.mrb[134].mxu0 %vm938_vm2, %v7942_v12 }
 0xc04   :  { %v18380_v9 = vunpack.i.h.bf16 %v21445_v42  ;;  %v18379_v58 = vunpack.i.l.bf16 %v21445_v42  ;;  %17773 = vmatpush3.bf16.xpose.msk.msra.mxu0 %vm19466_vm3, %v17771_v15  ;;  %16835 = vmatprep.mubr.msk.f32.mxu0 %vm19100_vm1, %v22691_v13 }
 0xc05   :  { %17778 = vmatprep.subr.bf16.mxu0 %v22692_v63 }
 0xc06   :  { %v17775_v28 = vpack.c.bf16 %v18380_v9, %v18379_v58  ;;  %v21455_v43 = vpop.permute.xlu0 %18382 }
 0xc07   :  { %v7944_v41 = vpop.permute.xlu1 %7943  ;;  %v18385_v47 = vunpack.i.h.bf16 %v21455_v43  ;;  %v18384_v37 = vunpack.i.l.bf16 %v21455_v43 }
 0xc08   :  { %16829 = vmatmul.mubr.msk.f32.vlgmr.msra.gmra.mrb[122].mxu1 %vm938_vm2, %v7944_v41 }
 0xc09   :  { %v17779_v54 = vpack.c.bf16 %v18385_v47, %v18384_v37  ;;  %17777 = vmatpush3.bf16.xpose.msk.msra.mxu1 %vm19466_vm3, %v17775_v28  ;;  %16842 = vmatprep.mubr.msk.f32.mxu1 %vm19100_vm1, %v22691_v13 }
 0xc0a   :  { %v7946_v49 = vpop.permute.xlu0 %7945  ;;  %17782 = vmatprep.subr.bf16.mxu1 %v22692_v63 }
 0xc0b   :  { %v21465_v61 = vpop.permute.xlu1 %18387  ;;  %16836 = vmatmul.mubr.msk.f32.vlgmr.msra.gmra.mrb[136].mxu0 %vm938_vm2, %v7946_v49 }
 0xc0c   :  { %v18390_v36 = vunpack.i.h.bf16 %v21465_v61  ;;  %v18389_v53 = vunpack.i.l.bf16 %v21465_v61  ;;  %17781 = vmatpush3.bf16.xpose.msk.msra.mxu0 %vm19466_vm3, %v17779_v54  ;;  %16849 = vmatprep.mubr.msk.f32.mxu0 %vm19100_vm1, %v22691_v13 }
 0xc0d   :  { %17786 = vmatprep.subr.bf16.mxu0 %v22692_v63 }
 0xc0e   :  { %v17783_v48 = vpack.c.bf16 %v18390_v36, %v18389_v53  ;;  %v21475_v57 = vpop.permute.xlu0 %18392 }
 0xc0f   :  { %v7948_v1 = vpop.permute.xlu1 %7947  ;;  %v18395_v30 = vunpack.i.h.bf16 %v21475_v57  ;;  %v18394_v38 = vunpack.i.l.bf16 %v21475_v57 }
 0xc10   :  { %16843 = vmatmul.mubr.msk.f32.vlgmr.msra.gmra.mrb[124].mxu1 %vm938_vm2, %v7948_v1 }
 0xc11   :  { %v17787_v52 = vpack.c.bf16 %v18395_v30, %v18394_v38  ;;  %17785 = vmatpush3.bf16.xpose.msk.msra.mxu1 %vm19466_vm3, %v17783_v48  ;;  %16856 = vmatprep.mubr.msk.f32.mxu1 %vm19100_vm1, %v22691_v13 }
 0xc12   :  { %v7950_v6 = vpop.permute.xlu0 %7949  ;;  %17790 = vmatprep.subr.bf16.mxu1 %v22692_v63 }
 0xc13   :  { %v21485_v33 = vpop.permute.xlu1 %18397  ;;  %16850 = vmatmul.mubr.msk.f32.vlgmr.msra.gmra.mrb[138].mxu0 %vm938_vm2, %v7950_v6 }
 0xc14   :  { %v18400_v24 = vunpack.i.h.bf16 %v21485_v33  ;;  %v18399_v51 = vunpack.i.l.bf16 %v21485_v33  ;;  %17789 = vmatpush3.bf16.xpose.msk.msra.mxu0 %vm19466_vm3, %v17787_v52  ;;  %16863 = vmatprep.mubr.msk.f32.mxu0 %vm19100_vm1, %v22691_v13 }
 0xc15   :  { %17794 = vmatprep.subr.bf16.mxu0 %v22692_v63 }
 0xc16   :  { %v17791_v0 = vpack.c.bf16 %v18400_v24, %v18399_v51  ;;  %v18403_v8 = vpop.permute.xlu0 %18402 }
 0xc17   :  { %v7952_v11 = vpop.permute.xlu1 %7951  ;;  %v18405_v34 = vunpack.i.h.bf16 %v18403_v8  ;;  %v18404_v2 = vunpack.i.l.bf16 %v18403_v8  ;;  %18492 = vrot.lane.b32.xlu0 %v18403_v8, %s19105_s22 }
 0xc18   :  { %16857 = vmatmul.mubr.msk.f32.vlgmr.msra.gmra.mrb[126].mxu1 %vm938_vm2, %v7952_v11 }
 0xc19   :  { %v17795_v32 = vpack.c.bf16 %v18405_v34, %v18404_v2  ;;  %17793 = vmatpush3.bf16.xpose.msk.msra.mxu1 %vm19466_vm3, %v17791_v0  ;;  %16870 = vmatprep.mubr.msk.f32.mxu1 %vm19100_vm1, %v22691_v13 }
 0xc1a   :  { %v7954_v16 = vpop.permute.xlu0 %7953  ;;  %17798 = vmatprep.subr.bf16.mxu1 %v22692_v63 }
 0xc1b   :  { %v18408_v59 = vpop.permute.xlu1 %18407  ;;  %16864 = vmatmul.mubr.msk.f32.vlgmr.msra.gmra.mrb[140].mxu0 %vm938_vm2, %v7954_v16  ;;  %18497 = vrot.lane.b32.xlu0 %v21353_v35, %s19105_s22 }
 0xc1c   :  { %v18410_v31 = vunpack.i.h.bf16 %v18408_v59  ;;  %v18409_v15 = vunpack.i.l.bf16 %v18408_v59  ;;  %17797 = vmatpush3.bf16.xpose.msk.msra.mxu0 %vm19466_vm3, %v17795_v32  ;;  %16877 = vmatprep.mubr.msk.f32.mxu0 %vm19100_vm1, %v22691_v13 }
 0xc1d   :  { %17802 = vmatprep.subr.bf16.mxu0 %v22692_v63  ;;  %18507 = vrot.lane.b32.xlu1 %v18408_v59, %s19105_s22 }
 0xc1e   :  { %v17799_v12 = vpack.c.bf16 %v18410_v31, %v18409_v15  ;;  %v18413_v9 = vpop.permute.xlu0 %18412 }
 0xc1f   :  { %v7956_v58 = vpop.permute.xlu1 %7955  ;;  %v18415_v28 = vunpack.i.h.bf16 %v18413_v9  ;;  %v18414_v41 = vunpack.i.l.bf16 %v18413_v9  ;;  %18502 = vrot.lane.b32.xlu0 %v21424_v4, %s19105_s22 }
 0xc20   :  { %16871 = vmatmul.mubr.msk.f32.vlgmr.msra.gmra.mrb[128].mxu1 %vm938_vm2, %v7956_v58 }
 0xc21   :  { %v17803_v47 = vpack.c.bf16 %v18415_v28, %v18414_v41  ;;  %17801 = vmatpush3.bf16.xpose.msk.msra.mxu1 %vm19466_vm3, %v17799_v12  ;;  %16884 = vmatprep.mubr.msk.f32.mxu1 %vm19100_vm1, %v22691_v13 }
 0xc22   :  { %v7958_v37 = vpop.permute.xlu0 %7957  ;;  %17806 = vmatprep.subr.bf16.mxu1 %v22692_v63  ;;  %18512 = vrot.lane.b32.xlu1 %v21361_v14, %s19105_s22 }
 0xc23   :  { %v18418_v54 = vpop.permute.xlu1 %18417  ;;  %16878 = vmatmul.mubr.msk.f32.vlgmr.msra.gmra.mrb[142].mxu0 %vm938_vm2, %v7958_v37  ;;  %18522 = vrot.lane.b32.xlu0 %v18413_v9, %s19105_s22 }
 0xc24   :  { %v18420_v35 = vunpack.i.h.bf16 %v18418_v54  ;;  %v18419_v49 = vunpack.i.l.bf16 %v18418_v54  ;;  %17805 = vmatpush3.bf16.xpose.msk.msra.mxu0 %vm19466_vm3, %v17803_v47  ;;  %16891 = vmatprep.mubr.msk.f32.mxu0 %vm19100_vm1, %v22691_v13 }
 0xc25   :  { %17810 = vmatprep.subr.bf16.mxu0 %v22692_v63 }
 0xc26   :  { %v17807_v36 = vpack.c.bf16 %v18420_v35, %v18419_v49  ;;  %v21527_v53 = vpop.permute.xlu0 %18422  ;;  %18517 = vrot.lane.b32.xlu1 %v21435_v10, %s19105_s22  ;;  %v22729_v35 = vld [vmem:[#allocation29_spill] sm:$0xff] }
 0xc27   :  { %v7960_v48 = vpop.permute.xlu1 %7959  ;;  %v18425_v4 = vunpack.i.h.bf16 %v21527_v53  ;;  %v18424_v1 = vunpack.i.l.bf16 %v21527_v53  ;;  %18527 = vrot.lane.b32.xlu0 %v21368_v20, %s19105_s22 }
 0xc28   :  { %16885 = vmatmul.mubr.msk.f32.vlgmr.msra.gmra.mrb[130].mxu1 %vm938_vm2, %v7960_v48 }
 0xc29   :  { %v17811_v14 = vpack.c.bf16 %v18425_v4, %v18424_v1  ;;  %17809 = vmatpush3.bf16.xpose.msk.msra.mxu1 %vm19466_vm3, %v17807_v36  ;;  %16898 = vmatprep.mubr.msk.f32.mxu1 %vm19100_vm1, %v22691_v13 }
 0xc2a   :  { %v7962_v30 = vpop.permute.xlu0 %7961  ;;  %17814 = vmatprep.subr.bf16.mxu1 %v22692_v63  ;;  %18537 = vrot.lane.b32.xlu1 %v18418_v54, %s19105_s22 }
 0xc2b   :  { %v21540_v38 = vpop.permute.xlu1 %18427  ;;  %16892 = vmatmul.mubr.msk.f32.vlgmr.msra.gmra.mrb[144].mxu0 %vm938_vm2, %v7962_v30  ;;  %18532 = vrot.lane.b32.xlu0 %v21445_v42, %s19105_s22 }
 0xc2c   :  { %v18430_v52 = vunpack.i.h.bf16 %v21540_v38  ;;  %v18429_v10 = vunpack.i.l.bf16 %v21540_v38  ;;  %17813 = vmatpush3.bf16.xpose.msk.msra.mxu0 %vm19466_vm3, %v17811_v14  ;;  %16905 = vmatprep.mubr.msk.f32.mxu0 %vm19100_vm1, %v22691_v13  ;;  %v22730_v14 = vld [vmem:[#allocation33_spill] sm:$0xff] }
 0xc2d   :  { %17818 = vmatprep.subr.bf16.mxu0 %v22692_v63 }
 0xc2e   :  { %v17815_v6 = vpack.c.bf16 %v18430_v52, %v18429_v10  ;;  %v21553_v24 = vpop.permute.xlu0 %18432  ;;  %18542 = vrot.lane.b32.xlu1 %v21378_v22, %s19105_s22 }
 0xc2f   :  { %v7964_v20 = vpop.permute.xlu1 %7963  ;;  %v18435_v51 = vunpack.i.h.bf16 %v21553_v24  ;;  %v18434_v0 = vunpack.i.l.bf16 %v21553_v24  ;;  %18552 = vrot.lane.b32.xlu0 %v21388_v50, %s19105_s22 }
 0xc30   :  { %16899 = vmatmul.mubr.msk.f32.vlgmr.msra.gmra.mrb[132].mxu1 %vm938_vm2, %v7964_v20  ;;  %v22731_v20 = vld [vmem:[#allocation30_spill] sm:$0xff] }
 0xc31   :  { %v17819_v8 = vpack.c.bf16 %v18435_v51, %v18434_v0  ;;  %17817 = vmatpush3.bf16.xpose.msk.msra.mxu1 %vm19466_vm3, %v17815_v6  ;;  %16912 = vmatprep.mubr.msk.f32.mxu1 %vm19100_vm1, %v22691_v13 }
 0xc32   :  { %v7966_v11 = vpop.permute.xlu0 %7965  ;;  %17822 = vmatprep.subr.bf16.mxu1 %v22692_v63  ;;  %18547 = vrot.lane.b32.xlu1 %v21455_v43, %s19105_s22 }
 0xc33   :  { %v21567_v34 = vpop.permute.xlu1 %18437  ;;  %16906 = vmatmul.mubr.msk.f32.vlgmr.msra.gmra.mrb[146].mxu0 %vm938_vm2, %v7966_v11  ;;  %18557 = vrot.lane.b32.xlu0 %v21465_v61, %s19105_s22 }
 0xc34   :  { %v18440_v42 = vunpack.i.h.bf16 %v21567_v34  ;;  %v18439_v22 = vunpack.i.l.bf16 %v21567_v34  ;;  %17821 = vmatpush3.bf16.xpose.msk.msra.mxu0 %vm19466_vm3, %v17819_v8  ;;  %16919 = vmatprep.mubr.msk.f32.mxu0 %vm19100_vm1, %v22691_v13  ;;  %v22732_v8 = vld [vmem:[#allocation31_spill] sm:$0xff] }
 0xc35   :  { %17826 = vmatprep.subr.bf16.mxu0 %v22692_v63 }
 0xc36   :  { %v17823_v2 = vpack.c.bf16 %v18440_v42, %v18439_v22  ;;  %v7970_v32 = vpop.permute.xlu0 %7969  ;;  %18562 = vrot.lane.b32.xlu1 %v21398_v18, %s19105_s22 }
 0xc37   :  { %v7968_v50 = vpop.permute.xlu1 %7967  ;;  %18572 = vrot.lane.b32.xlu0 %v21408_v19, %s19105_s22 }
 0xc38   :  { %16913 = vmatmul.mubr.msk.f32.vlgmr.msra.gmra.mrb[134].mxu1 %vm938_vm2, %v7968_v50 }
 0xc39   :  { %17825 = vmatpush3.bf16.xpose.msk.msra.mxu1 %vm19466_vm3, %v17823_v2  ;;  %16926 = vmatprep.mubr.msk.f32.mxu1 %vm19100_vm1, %v22691_v13 }
 0xc3a   :  { %v18448_v43 = vpop.permute.xlu0 %18447  ;;  %17829 = vmatprep.subr.bf16.mxu1 %v22692_v63  ;;  %18567 = vrot.lane.b32.xlu1 %v21475_v57, %s19105_s22 }
 0xc3b   :  { %v7972_v16 = vpop.permute.xlu1 %7971  ;;  %v18450_v59 = vunpack.i.h.bf16 %v18448_v43  ;;  %v18449_v31 = vunpack.i.l.bf16 %v18448_v43  ;;  %16920 = vmatmul.mubr.msk.f32.vlgmr.msra.gmra.mrb[148].mxu0 %vm938_vm2, %v7970_v32  ;;  %v22733_v43 = vld [vmem:[#allocation32_spill] sm:$0xff] }
 0xc3c   :  { %16933 = vmatprep.mubr.msk.f32.mxu0 %vm19100_vm1, %v22691_v13 }
 0xc3d   :  { %v17830_v39 = vpack.c.bf16 %v18450_v59, %v18449_v31  ;;  %v8157_v18 = vpop.f32.mrb[102].mxu1  ;;  %v22734_v59 = vld [vmem:[#allocation34_spill] sm:$0xff] }
 0xc3e   :  { %v16711_v61 = vpop.f32.mrb[103].mxu1  ;;  %18577 = vrot.lane.b32.xlu1 %v21485_v33, %s19105_s22  ;;  %v10517_v54 = vmul.f32 0.25, %v8157_v18 }
 0xc3f   :  { %v18443_v15 = vpop.permute.xlu1 %18442 }
 0xc40   :  { %v18445_v12 = vunpack.i.h.bf16 %v18443_v15  ;;  %v18444_v9 = vunpack.i.l.bf16 %v18443_v15  ;;  %16927 = vmatmul.mubr.msk.f32.vlgmr.msra.gmra.mrb[136].mxu1 %vm938_vm2, %v7972_v16  ;;  %v21606_v49 = vadd.f32 %v10517_v54, %v22729_v35  ;;  %v22735_v15 = vld [vmem:[#allocation36_spill] sm:$0xff]  ;;  %v21647_v35 = vpop.permute.xlu0 %18457 }
 0xc41   :  { %17831 = vmatpush3.bf16.msra.mxu1 %v17830_v39  ;;  %16940 = vmatprep.mubr.msk.f32.mxu1 %vm19100_vm1, %v22691_v13 }
 0xc42   :  { %v17827_v19 = vpack.c.bf16 %v18445_v12, %v18444_v9  ;;  %17835 = vmatprep.subr.bf16.mxu1 %v22692_v63  ;;  %v10581_v10 = vsel %vm938_vm2, %v21606_v49, -inf }
 0xc43   :  { %v21645_v54 = vpop.permute.xlu1 %18452 }
 0xc44   :  { %17828 = vmatpush3.bf16.msra.mxu0 %v17827_v19 }
 0xc45   :  { %17832 = vmatprep.subr.bf16.mxu0 %v22692_v63 }
 0xc46   :  { %v8233_v57 = vpop.f32.mrb[104].mxu1 }
 0xc47   :  { %v16718_v58 = vpop.f32.mrb[105].mxu1  ;;  %v10518_v6 = vmul.f32 0.25, %v8233_v57 }
 0xc49   :  { %v21619_v11 = vadd.f32 %v10518_v6, %v22732_v8 }
 0xc4b   :  { %v10584_v18 = vsel %vm938_vm2, %v21619_v11, -inf }
 0xc4d   :  { %v8461_v28 = vpop.f32.mrb[122].mxu0 }
 0xc4e   :  { %v16739_v41 = vpop.f32.mrb[123].mxu0  ;;  %v10521_v42 = vmul.f32 0.25, %v8461_v28  ;;  %v22736_v28 = vld [vmem:[#allocation35_spill] sm:$0xff] }
 0xc4f   :  { %v8309_v47 = vpop.f32.mrb[106].mxu1 }
 0xc50   :  { %v16725_v37 = vpop.f32.mrb[107].mxu1  ;;  %v10519_v33 = vmul.f32 0.25, %v8309_v47  ;;  %v21627_v31 = vadd.f32 %v10521_v42, %v22734_v59  ;;  %v22740_v59 = vld [vmem:[#allocation37_spill] sm:$0xff] }
 0xc52   :  { %v21609_v30 = vadd.f32 %v10519_v33, %v22730_v14  ;;  %v10593_v19 = vsel %vm938_vm2, %v21627_v31, -inf  ;;  %v21649_v33 = vpop.permute.xlu1 %18462 }
 0xc54   :  { %v10587_v0 = vsel %vm938_vm2, %v21609_v30, -inf }
 0xc55   :  { %v8613_v36 = vpop.f32.mrb[124].mxu0 }
 0xc56   :  { %v16753_v48 = vpop.f32.mrb[125].mxu0  ;;  %10582 = vmax.xlane.f32.xlu0 %v10581_v10  ;;  %v10523_v39 = vmul.f32 0.25, %v8613_v36  ;;  %v21651_v36 = vpop.permute.xlu0 %18467 }
 0xc57   :  { %v8385_v4 = vpop.f32.mrb[108].mxu1  ;;  %v21653_v48 = vpop.permute.xlu1 %18472 }
 0xc58   :  { %v16732_v1 = vpop.f32.mrb[109].mxu1  ;;  %v10520_v52 = vmul.f32 0.25, %v8385_v4  ;;  %v21634_v12 = vadd.f32 %v10523_v39, %v22735_v15 }
 0xc5a   :  { %v21614_v51 = vadd.f32 %v10520_v52, %v22731_v20  ;;  %10588 = vmax.xlane.f32.xlu0 %v10587_v0  ;;  %v10599_v47 = vsel %vm938_vm2, %v21634_v12, -inf  ;;  %v21655_v4 = vpop.permute.xlu0 %18477  ;;  %v22738_v20 = vld [vmem:[#allocation38_spill] sm:$0xff] }
 0xc5b   :  { %v21659_v14 = vpop.permute.xlu1 %18482 }
 0xc5c   :  { %v10590_v50 = vsel %vm938_vm2, %v21614_v51, -inf }
 0xc5e   :  { %10591 = vmax.xlane.f32.xlu0 %v10590_v50 }
 0xc5f   :  { %v8537_v22 = vpop.f32.mrb[110].mxu1 }
 0xc60   :  { %v10522_v2 = vmul.f32 0.25, %v8537_v22  ;;  %v16746_v32 = vpop.f32.mrb[111].mxu1 }
 0xc62   :  { %v21624_v16 = vadd.f32 %v10522_v2, %v22733_v43  ;;  %10585 = vmax.xlane.f32.xlu1 %v10584_v18 }
 0xc64   :  { %v10596_v61 = vsel %vm938_vm2, %v21624_v16, -inf }
 0xc65   :  { %10597 = vmax.xlane.f32.xlu0 %v10596_v61 }
 0xc66   :  { %10594 = vmax.xlane.f32.xlu1 %v10593_v19 }
 0xc67   :  { %v8689_v9 = vpop.f32.mrb[112].mxu1 }
 0xc68   :  { %v10524_v57 = vmul.f32 0.25, %v8689_v9  ;;  %v16760_v58 = vpop.f32.mrb[113].mxu1 }
 0xc69   :  { %v21664_v8 = vpop.permute.xlu1 %18487 }
 0xc6a   :  { %v21639_v41 = vadd.f32 %v10524_v57, %v22736_v28  ;;  %10600 = vmax.xlane.f32.xlu1 %v10599_v47  ;;  %v22741_v57 = vld [vmem:[#allocation44_spill] sm:$0xff] }
 0xc6c   :  { %v10602_v37 = vsel %vm938_vm2, %v21639_v41, -inf }
 0xc6d   :  { %10603 = vmax.xlane.f32.xlu0 %v10602_v37 }
 0xc89   :  { %v21657_v1 = vpop.permute.xlu0 %18492 }
 0xc8a   :  { %22737 = vst [vmem:[#allocation20_spill] sm:$0xff] %v21657_v1 }
 0xc8d   :  { %v21666_v42 = vpop.permute.xlu0 %18497 }
 0xc8f   :  { %v21670_v43 = vpop.permute.xlu1 %18507 }
 0xc90   :  { %22739 = vst [vmem:[#allocation18_spill] sm:$0xff] %v21670_v43 }
 0xc91   :  { %v21675_v61 = vpop.permute.xlu0 %18502 }
 0xc94   :  { %v21682_v28 = vpop.permute.xlu1 %18512 }
 0xcb4   :  { %v8765_v52 = vpop.f32.mrb[126].mxu0 }
 0xcb5   :  { %v10525_v10 = vmul.f32 0.25, %v8765_v52  ;;  %v16767_v6 = vpop.f32.mrb[127].mxu0 }
 0xcb6   :  { %v21686_v6 = vpop.permute.xlu0 %18522 }
 0xcb7   :  { %v21662_v0 = vadd.f32 %v10525_v10, %v22738_v20  ;;  %22742 = vst [vmem:[#allocation19_spill] sm:$0xff] %v21686_v6  ;;  %v22743_v20 = vld [vmem:[#allocation42_spill] sm:$0xff] }
 0xcb9   :  { %v10605_v22 = vsel %vm938_vm2, %v21662_v0, -inf }
 0xcba   :  { %v8841_v2 = vpop.f32.mrb[114].mxu1  ;;  %10606 = vmax.xlane.f32.xlu1 %v10605_v22 }
 0xcbb   :  { %v10526_v32 = vmul.f32 0.25, %v8841_v2  ;;  %v16774_v50 = vpop.f32.mrb[115].mxu1 }
 0xcbd   :  { %v21673_v39 = vadd.f32 %v10526_v32, %v22740_v59  ;;  %v21691_v59 = vpop.permute.xlu1 %18517 }
 0xcbe   :  { %v8917_v18 = vpop.f32.mrb[128].mxu0  ;;  %22744 = vst [vmem:[#allocation21_spill] sm:$0xff] %v21691_v59 }
 0xcbf   :  { %v10527_v15 = vmul.f32 0.25, %v8917_v18  ;;  %v16781_v9 = vpop.f32.mrb[129].mxu0  ;;  %v10608_v19 = vsel %vm938_vm2, %v21673_v39, -inf }
 0xcc0   :  { %10609 = vmax.xlane.f32.xlu0 %v10608_v19  ;;  %v21698_v19 = vpop.permute.xlu0 %18527 }
 0xcc1   :  { %v21680_v58 = vadd.f32 %v10527_v15, %v22741_v57  ;;  %v22745_v15 = vld [vmem:[#allocation49_spill] sm:$0xff] }
 0xcc3   :  { %v8993_v47 = vpop.f32.mrb[116].mxu1  ;;  %v10611_v37 = vsel %vm938_vm2, %v21680_v58, -inf }
 0xcc4   :  { %v10528_v52 = vmul.f32 0.25, %v8993_v47  ;;  %v16788_v10 = vpop.f32.mrb[117].mxu1  ;;  %10612 = vmax.xlane.f32.xlu1 %v10611_v37 }
 0xcc5   :  { %v21702_v10 = vpop.permute.xlu1 %18537 }
 0xcc6   :  { %v21689_v22 = vadd.f32 %v10528_v52, %v22743_v20  ;;  %v9069_v2 = vpop.f32.mrb[130].mxu0  ;;  %22746 = vst [vmem:[#allocation22_spill] sm:$0xff] %v21702_v10  ;;  %v22747_v20 = vld [vmem:[#allocation47_spill] sm:$0xff] }
 0xcc7   :  { %v10529_v32 = vmul.f32 0.25, %v9069_v2  ;;  %v16795_v50 = vpop.f32.mrb[131].mxu0 }
 0xcc8   :  { %v10614_v18 = vsel %vm938_vm2, %v21689_v22, -inf }
 0xcc9   :  { %v21696_v9 = vadd.f32 %v10529_v32, %v22745_v15  ;;  %10615 = vmax.xlane.f32.xlu0 %v10614_v18  ;;  %v21709_v18 = vpop.permute.xlu0 %18532  ;;  %v22749_v15 = vld [vmem:[#allocation52_spill] sm:$0xff] }
 0xcca   :  { %22748 = vst [vmem:[#allocation23_spill] sm:$0xff] %v21709_v18 }
 0xccb   :  { %v9145_v57 = vpop.f32.mrb[118].mxu1  ;;  %v10617_v47 = vsel %vm938_vm2, %v21696_v9, -inf }
 0xccc   :  { %v10530_v37 = vmul.f32 0.25, %v9145_v57  ;;  %v16802_v52 = vpop.f32.mrb[119].mxu1  ;;  %10618 = vmax.xlane.f32.xlu1 %v10617_v47 }
 0xccd   :  { %v21716_v52 = vpop.permute.xlu1 %18542  ;;  %v21721_v55 = vpop.permute.xlu0 %18552 }
 0xcce   :  { %v21705_v2 = vadd.f32 %v10530_v37, %v22747_v20  ;;  %v9221_v50 = vpop.f32.mrb[132].mxu0 }
 0xccf   :  { %v10531_v46 = vmul.f32 0.25, %v9221_v50  ;;  %v16809_v23 = vpop.f32.mrb[133].mxu0  ;;  %v22750_v50 = vld [vmem:[#allocation50_spill] sm:$0xff] }
 0xcd0   :  { %v10620_v32 = vsel %vm938_vm2, %v21705_v2, -inf }
 0xcd1   :  { %v21712_v27 = vadd.f32 %v10531_v46, %v22749_v15  ;;  %10621 = vmax.xlane.f32.xlu0 %v10620_v32  ;;  %v22751_v32 = vld [vmem:[#allocation55_spill] sm:$0xff]  ;;  %v21728_v5 = vpop.permute.xlu1 %18547 }
 0xcd2   :  { %22752 = vst [vmem:[#allocation24_spill] sm:$0xff] %v21728_v5 }
 0xcd3   :  { %v9297_v57 = vpop.f32.mrb[120].mxu1  ;;  %v10623_v47 = vsel %vm938_vm2, %v21712_v27, -inf }
 0xcd4   :  { %v10532_v37 = vmul.f32 0.25, %v9297_v57  ;;  %v16816_v20 = vpop.f32.mrb[121].mxu1  ;;  %10624 = vmax.xlane.f32.xlu1 %v10623_v47 }
 0xcd6   :  { %v21719_v23 = vadd.f32 %v10532_v37, %v22750_v50  ;;  %v9373_v17 = vpop.f32.mrb[134].mxu0  ;;  %v21732_v50 = vpop.permute.xlu0 %18557 }
 0xcd7   :  { %v10533_v3 = vmul.f32 0.25, %v9373_v17  ;;  %v16823_v60 = vpop.f32.mrb[135].mxu0  ;;  %22753 = vst [vmem:[#allocation25_spill] sm:$0xff] %v21732_v50  ;;  %v22754_v17 = vld [vmem:[#allocation54_spill] sm:$0xff] }
 0xcd8   :  { %v10626_v46 = vsel %vm938_vm2, %v21719_v23, -inf }
 0xcd9   :  { %v21726_v15 = vadd.f32 %v10533_v3, %v22751_v32  ;;  %10627 = vmax.xlane.f32.xlu0 %v10626_v46  ;;  %v21737_v3 = vpop.permute.xlu1 %18562  ;;  %v22755_v32 = vld [vmem:[#allocation59_spill] sm:$0xff] }
 0xcdb   :  { %v9449_v57 = vpop.f32.mrb[122].mxu1  ;;  %v10629_v47 = vsel %vm938_vm2, %v21726_v15, -inf }
 0xcdc   :  { %v10534_v37 = vmul.f32 0.25, %v9449_v57  ;;  %v16830_v20 = vpop.f32.mrb[123].mxu1  ;;  %10630 = vmax.xlane.f32.xlu1 %v10629_v47  ;;  %v21744_v57 = vpop.permute.xlu0 %18572 }
 0xcde   :  { %v21735_v60 = vadd.f32 %v10534_v37, %v22754_v17  ;;  %v9525_v62 = vpop.f32.mrb[136].mxu0 }
 0xcdf   :  { %v10535_v44 = vmul.f32 0.25, %v9525_v62  ;;  %v16837_v40 = vpop.f32.mrb[137].mxu0  ;;  %v21748_v62 = vpop.permute.xlu1 %18567 }
 0xce0   :  { %v10632_v46 = vsel %vm938_vm2, %v21735_v60, -inf  ;;  %22756 = vst [vmem:[#allocation27_spill] sm:$0xff] %v21748_v62  ;;  %v22757_v40 = vld [vmem:[#allocation57_spill] sm:$0xff] }
 0xce1   :  { %v21742_v56 = vadd.f32 %v10535_v44, %v22755_v32  ;;  %10633 = vmax.xlane.f32.xlu0 %v10632_v46 }
 0xce3   :  { %v9601_v47 = vpop.f32.mrb[124].mxu1  ;;  %v10635_v20 = vsel %vm938_vm2, %v21742_v56, -inf  ;;  %v10583_v7 = vpop.xlane.xlu0 %10582 }
 0xce4   :  { %v10536_v37 = vmul.f32 0.25, %v9601_v47  ;;  %v16844_v17 = vpop.f32.mrb[125].mxu1  ;;  %10636 = vmax.xlane.f32.xlu1 %v10635_v20  ;;  %v10677_v44 = vsub.f32 %v21606_v49, %v10583_v7  ;;  %v21756_v20 = vpop.permute.xlu1 %18577 }
 0xce5   :  { %22758 = vst [vmem:[#allocation29_spill] sm:$0xff] %v21756_v20 }
 0xce6   :  { %v21751_v25 = vadd.f32 %v10536_v37, %v22757_v40  ;;  %v9677_v45 = vpop.f32.mrb[138].mxu0  ;;  %v10709_v32 = vmul.f32 1.442695, %v10677_v44 }
 0xce7   :  { %v16851_v26 = vpop.f32.mrb[139].mxu0  ;;  %v10589_v10 = vpop.xlane.xlu0 %10588  ;;  %v10537_v7 = vmul.f32 0.25, %v9677_v45 }
 0xce8   :  { %v10638_v46 = vsel %vm938_vm2, %v21751_v25, -inf  ;;  %18765 = vpow2.f32 %v10709_v32  ;;  %v10679_v17 = vsub.f32 %v21609_v30, %v10589_v10  ;;  %v22759_v30 = vld [vmem:[#allocation62_spill] sm:$0xff] }
 0xce9   :  { %10639 = vmax.xlane.f32.xlu0 %v10638_v46  ;;  %v21764_v10 = vadd.f32 %v10537_v7, %v22759_v30 }
 0xcea   :  { %v10713_v6 = vmul.f32 1.442695, %v10679_v17 }
 0xceb   :  { %v9753_v21 = vpop.f32.mrb[126].mxu1  ;;  %v10592_v44 = vpop.xlane.xlu0 %10591  ;;  %v10641_v7 = vsel %vm938_vm2, %v21764_v10, -inf }
 0xcec   :  { %v16858_v47 = vpop.f32.mrb[127].mxu1  ;;  %18767 = vpow2.f32 %v10713_v6  ;;  %v10538_v30 = vmul.f32 0.25, %v9753_v21 }
 0xcee   :  { %v9829_v37 = vpop.f32.mrb[140].mxu0 }
 0xcef   :  { %v16865_v40 = vpop.f32.mrb[141].mxu0  ;;  %v10586_v43 = vpop.xlane.xlu1 %10585  ;;  %v10539_v17 = vmul.f32 0.25, %v9829_v37 }
 0xcf0   :  { %v10678_v26 = vsub.f32 %v21619_v11, %v10586_v43  ;;  %v10680_v11 = vsub.f32 %v21614_v51, %v10592_v44 }
 0xcf2   :  { %v10711_v1 = vmul.f32 1.442695, %v10678_v26  ;;  %v21760_v50 = vpop.eup %18765  ;;  %v10715_v37 = vmul.f32 1.442695, %v10680_v11 }
 0xcf3   :  { %v9905_v49 = vpop.f32.mrb[128].mxu1  ;;  %v10595_v46 = vpop.xlane.xlu1 %10594  ;;  %v10773_v45 = vsel %vm938_vm2, %v21760_v50, 0.0 }
 0xcf4   :  { %v16872_v62 = vpop.f32.mrb[129].mxu1  ;;  %18769 = vpow2.f32 %v10711_v1  ;;  %v10681_v32 = vsub.f32 %v21627_v31, %v10595_v46  ;;  %10774 = vadd.xlane.f32.xlu1 %v10773_v45  ;;  %v22760_v1 = vld [vmem:[#allocation63_spill] sm:$0xff] }
 0xcf5   :  { %v21771_v26 = vadd.f32 %v10539_v17, %v22760_v1 }
 0xcf6   :  { %v9981_v47 = vpop.f32.mrb[142].mxu0  ;;  %v10717_v43 = vmul.f32 1.442695, %v10681_v32  ;;  %v21775_v44 = vpop.eup %18767 }
 0xcf7   :  { %v16879_v40 = vpop.f32.mrb[143].mxu0  ;;  %v10601_v6 = vpop.xlane.xlu1 %10600 }
 0xcf8   :  { %18771 = vpow2.f32 %v10717_v43  ;;  %v10683_v62 = vsub.f32 %v21634_v12, %v10601_v6  ;;  %10642 = vmax.xlane.f32.xlu1 %v10641_v7  ;;  %v10598_v40 = vpop.xlane.xlu0 %10597  ;;  %v10647_v12 = vsel %vm938_vm2, %v21771_v26, -inf  ;;  %v22761_v43 = vld [vmem:[#allocation61_spill] sm:$0xff]  ;;  %v10540_v6 = vmul.f32 0.25, %v9905_v49 }
 0xcf9   :  { %18773 = vpow2.f32 %v10715_v37  ;;  %v10682_v17 = vsub.f32 %v21624_v16, %v10598_v40  ;;  %v21783_v11 = vadd.f32 %v10538_v30, %v22761_v43  ;;  %v10779_v7 = vsel %vm938_vm2, %v21775_v44, 0.0  ;;  %v22762_v16 = vld [vmem:[#allocation64_spill] sm:$0xff] }
 0xcfa   :  { %v10721_v20 = vmul.f32 1.442695, %v10683_v62  ;;  %v10541_v62 = vmul.f32 0.25, %v9981_v47  ;;  %v21792_v40 = vadd.f32 %v10540_v6, %v22762_v16 }
 0xcfb   :  { %v10057_v31 = vpop.f32.mrb[130].mxu1  ;;  %v10719_v37 = vmul.f32 1.442695, %v10682_v17  ;;  %v10644_v49 = vsel %vm938_vm2, %v21783_v11, -inf }
 0xcfc   :  { %v16886_v46 = vpop.f32.mrb[131].mxu1  ;;  %10648 = vmax.xlane.f32.xlu1 %v10647_v12  ;;  %18775 = vpow2.f32 %v10721_v20  ;;  %v10604_v30 = vpop.xlane.xlu0 %10603  ;;  %v22763_v12 = vld [vmem:[#allocation65_spill] sm:$0xff]  ;;  %v10650_v6 = vsel %vm938_vm2, %v21792_v40, -inf }
 0xcfd   :  { %v21797_v47 = vadd.f32 %v10541_v62, %v22763_v12  ;;  %18777 = vpow2.f32 %v10719_v37  ;;  %v10684_v17 = vsub.f32 %v21639_v41, %v10604_v30  ;;  %v22764_v37 = vld [vmem:[#allocation66_spill] sm:$0xff] }
 0xcfe   :  { %v10133_v51 = vpop.f32.mrb[144].mxu0  ;;  %v21779_v45 = vpop.eup %18769 }
 0xcff   :  { %v16893_v32 = vpop.f32.mrb[145].mxu0  ;;  %v10776_v21 = vsel %vm938_vm2, %v21779_v45, 0.0  ;;  %v10543_v16 = vmul.f32 0.25, %v10133_v51  ;;  %v10653_v62 = vsel %vm938_vm2, %v21797_v47, -inf }
 0xd00   :  { %10777 = vadd.xlane.f32.xlu0 %v10776_v21  ;;  %10780 = vadd.xlane.f32.xlu1 %v10779_v7  ;;  %v10542_v7 = vmul.f32 0.25, %v10057_v31 }
 0xd02   :  { %v21789_v46 = vpop.eup %18771  ;;  %v21811_v41 = vadd.f32 %v10542_v7, %v22764_v37 }
 0xd03   :  { %v10209_v1 = vpop.f32.mrb[132].mxu1  ;;  %v10785_v21 = vsel %vm938_vm2, %v21789_v46, 0.0 }
 0xd04   :  { %v16900_v32 = vpop.f32.mrb[133].mxu1  ;;  %10645 = vmax.xlane.f32.xlu0 %v10644_v49  ;;  %10786 = vadd.xlane.f32.xlu1 %v10785_v21  ;;  %v22765_v21 = vld [vmem:[#allocation67_spill] sm:$0xff] }
 0xd05   :  { %v21804_v32 = vpop.eup %18773 }
 0xd06   :  { %v10285_v20 = vpop.f32.mrb[146].mxu0  ;;  %v21808_v12 = vpop.eup %18775  ;;  %v10782_v31 = vsel %vm938_vm2, %v21804_v32, 0.0 }
 0xd07   :  { %v16907_v43 = vpop.f32.mrb[147].mxu0  ;;  %v10545_v51 = vmul.f32 0.25, %v10285_v20  ;;  %v10791_v59 = vsel %vm938_vm2, %v21808_v12, 0.0  ;;  %v21822_v7 = vpop.eup %18777 }
 0xd08   :  { %10651 = vmax.xlane.f32.xlu0 %v10650_v6  ;;  %v10723_v43 = vmul.f32 1.442695, %v10684_v17  ;;  %10654 = vmax.xlane.f32.xlu1 %v10653_v62  ;;  %v21816_v6 = vadd.f32 %v10543_v16, %v22765_v21  ;;  %v10656_v17 = vsel %vm938_vm2, %v21811_v41, -inf }
 0xd09   :  { %v21825_v62 = vadd.f32 %v10545_v51, %v20299_v29 }
 0xd0a   :  { %18779 = vpow2.f32 %v10723_v43 }
 0xd0b   :  { %v10361_v49 = vpop.f32.mrb[134].mxu1  ;;  %v10665_v29 = vsel %vm938_vm2, %v21825_v62, -inf }
 0xd0c   :  { %v16914_v5 = vpop.f32.mrb[135].mxu1  ;;  %10783 = vadd.xlane.f32.xlu0 %v10782_v31  ;;  %10792 = vadd.xlane.f32.xlu1 %v10791_v59  ;;  %v22766_v31 = vld [vmem:[#allocation68_spill] sm:$0xff]  ;;  %v10788_v59 = vsel %vm938_vm2, %v21822_v7, 0.0 }
 0xd0d   :  { %v10544_v5 = vmul.f32 0.25, %v10209_v1  ;;  %v22767_v1 = vld [vmem:[#allocation71_spill] sm:$0xff] }
 0xd0e   :  { %v10437_v30 = vpop.f32.mrb[148].mxu0 }
 0xd0f   :  { %v16921_v18 = vpop.f32.mrb[149].mxu0  ;;  %v10547_v37 = vmul.f32 0.25, %v10437_v30  ;;  %v21830_v43 = vadd.f32 %v10544_v5, %v22766_v31  ;;  %v10546_v30 = vmul.f32 0.25, %v10361_v49 }
 0xd10   :  { %10657 = vmax.xlane.f32.xlu0 %v10656_v17  ;;  %v10659_v18 = vsel %vm938_vm2, %v21816_v6, -inf }
 0xd11   :  { %10660 = vmax.xlane.f32.xlu1 %v10659_v18  ;;  %v21835_v21 = vadd.f32 %v10547_v37, %v22767_v1  ;;  %v10662_v51 = vsel %vm938_vm2, %v21830_v43, -inf  ;;  %v22768_v18 = vld [vmem:[#allocation69_spill] sm:$0xff] }
 0xd13   :  { %v10513_v16 = vpop.f32.mrb[136].mxu1  ;;  %v10671_v5 = vsel %vm938_vm2, %v21835_v21, -inf }
 0xd14   :  { %v16928_v20 = vpop.f32.mrb[137].mxu1  ;;  %10789 = vadd.xlane.f32.xlu0 %v10788_v59  ;;  %v21841_v17 = vpop.eup %18779  ;;  %v10548_v37 = vmul.f32 0.25, %v10513_v16  ;;  %v22769_v59 = vld [vmem:[#allocation70_spill] sm:$0xff] }
 0xd15   :  { %10666 = vmax.xlane.f32.xlu1 %v10665_v29  ;;  %v21846_v20 = vadd.f32 %v10546_v30, %v22768_v18  ;;  %v10794_v31 = vsel %vm938_vm2, %v21841_v17, 0.0 }
 0xd16   :  { %v21851_v49 = vadd.f32 %v10548_v37, %v22769_v59 }
 0xd17   :  { %v10668_v1 = vsel %vm938_vm2, %v21846_v20, -inf }
 0xd18   :  { %10663 = vmax.xlane.f32.xlu0 %v10662_v51  ;;  %v10674_v29 = vsel %vm938_vm2, %v21851_v49, -inf }
 0xd19   :  { %10672 = vmax.xlane.f32.xlu1 %v10671_v5 }
 0xd1c   :  { %10795 = vadd.xlane.f32.xlu0 %v10794_v31 }
 0xd20   :  { %10669 = vmax.xlane.f32.xlu0 %v10668_v1 }
 0xd24   :  { %10675 = vmax.xlane.f32.xlu0 %v10674_v29 }
 0xd2a   :  { %18587 = vrot.lane.b32.xlu1 %v21540_v38, %s19105_s22 }
 0xd3a   :  { %18582 = vrot.lane.b32.xlu0 %v21527_v53, %s19105_s22 }
 0xd47   :  { %v10607_v16 = vpop.xlane.xlu1 %10606 }
 0xd48   :  { %v10685_v30 = vsub.f32 %v21662_v0, %v10607_v16 }
 0xd4a   :  { %v10725_v51 = vmul.f32 1.442695, %v10685_v30 }
 0xd4c   :  { %18781 = vpow2.f32 %v10725_v51 }
 0xd4d   :  { %v10610_v5 = vpop.xlane.xlu0 %10609 }
 0xd4e   :  { %v10686_v18 = vsub.f32 %v21673_v39, %v10610_v5 }
 0xd50   :  { %v10727_v37 = vmul.f32 1.442695, %v10686_v18 }
 0xd51   :  { %v10613_v31 = vpop.xlane.xlu1 %10612 }
 0xd52   :  { %18783 = vpow2.f32 %v10727_v37  ;;  %v10687_v59 = vsub.f32 %v21680_v58, %v10613_v31 }
 0xd54   :  { %v10729_v1 = vmul.f32 1.442695, %v10687_v59 }
 0xd56   :  { %v21864_v29 = vpop.eup %18781  ;;  %18785 = vpow2.f32 %v10729_v1  ;;  %v10616_v38 = vpop.xlane.xlu0 %10615 }
 0xd57   :  { %v10688_v53 = vsub.f32 %v21689_v22, %v10616_v38  ;;  %v10797_v0 = vsel %vm938_vm2, %v21864_v29, 0.0 }
 0xd58   :  { %10798 = vadd.xlane.f32.xlu1 %v10797_v0 }
 0xd59   :  { %v10731_v16 = vmul.f32 1.442695, %v10688_v53  ;;  %v10619_v30 = vpop.xlane.xlu1 %10618 }
 0xd5a   :  { %v10689_v39 = vsub.f32 %v21696_v9, %v10619_v30 }
 0xd5b   :  { %18787 = vpow2.f32 %v10731_v16 }
 0xd5c   :  { %v21870_v51 = vpop.eup %18783  ;;  %v10733_v5 = vmul.f32 1.442695, %v10689_v39 }
 0xd5d   :  { %v10800_v58 = vsel %vm938_vm2, %v21870_v51, 0.0 }
 0xd5e   :  { %18789 = vpow2.f32 %v10733_v5  ;;  %v10622_v18 = vpop.xlane.xlu0 %10621  ;;  %10801 = vadd.xlane.f32.xlu0 %v10800_v58 }
 0xd5f   :  { %v10690_v22 = vsub.f32 %v21705_v2, %v10622_v18 }
 0xd60   :  { %v21875_v37 = vpop.eup %18785 }
 0xd61   :  { %v10735_v31 = vmul.f32 1.442695, %v10690_v22  ;;  %v10625_v59 = vpop.xlane.xlu1 %10624  ;;  %v10803_v1 = vsel %vm938_vm2, %v21875_v37, 0.0 }
 0xd62   :  { %v10691_v9 = vsub.f32 %v21712_v27, %v10625_v59  ;;  %10804 = vadd.xlane.f32.xlu1 %v10803_v1 }
 0xd63   :  { %18791 = vpow2.f32 %v10735_v31 }
 0xd64   :  { %v10737_v38 = vmul.f32 1.442695, %v10691_v9 }
 0xd65   :  { %v21880_v53 = vpop.eup %18787 }
 0xd66   :  { %18793 = vpow2.f32 %v10737_v38  ;;  %v10628_v0 = vpop.xlane.xlu0 %10627  ;;  %v10806_v16 = vsel %vm938_vm2, %v21880_v53, 0.0 }
 0xd67   :  { %v10692_v2 = vsub.f32 %v21719_v23, %v10628_v0  ;;  %10807 = vadd.xlane.f32.xlu0 %v10806_v16 }
 0xd68   :  { %v21885_v30 = vpop.eup %18789 }
 0xd69   :  { %v10739_v39 = vmul.f32 1.442695, %v10692_v2  ;;  %v10631_v5 = vpop.xlane.xlu1 %10630  ;;  %v10809_v27 = vsel %vm938_vm2, %v21885_v30, 0.0 }
 0xd6a   :  { %v10693_v58 = vsub.f32 %v21726_v15, %v10631_v5  ;;  %10810 = vadd.xlane.f32.xlu1 %v10809_v27 }
 0xd6b   :  { %18795 = vpow2.f32 %v10739_v39 }
 0xd6c   :  { %v10741_v18 = vmul.f32 1.442695, %v10693_v58 }
 0xd6d   :  { %v21890_v22 = vpop.eup %18791 }
 0xd6e   :  { %18797 = vpow2.f32 %v10741_v18  ;;  %v10634_v31 = vpop.xlane.xlu0 %10633  ;;  %v10812_v23 = vsel %vm938_vm2, %v21890_v22, 0.0 }
 0xd6f   :  { %v10694_v59 = vsub.f32 %v21735_v60, %v10634_v31  ;;  %10813 = vadd.xlane.f32.xlu0 %v10812_v23 }
 0xd70   :  { %v21895_v1 = vpop.eup %18793 }
 0xd71   :  { %v10743_v9 = vmul.f32 1.442695, %v10694_v59  ;;  %v10637_v38 = vpop.xlane.xlu1 %10636  ;;  %v10815_v15 = vsel %vm938_vm2, %v21895_v1, 0.0 }
 0xd72   :  { %v10695_v0 = vsub.f32 %v21742_v56, %v10637_v38  ;;  %10816 = vadd.xlane.f32.xlu1 %v10815_v15 }
 0xd73   :  { %18799 = vpow2.f32 %v10743_v9 }
 0xd74   :  { %v10745_v16 = vmul.f32 1.442695, %v10695_v0 }
 0xd75   :  { %v21900_v2 = vpop.eup %18795 }
 0xd76   :  { %18801 = vpow2.f32 %v10745_v16  ;;  %v10640_v39 = vpop.xlane.xlu0 %10639  ;;  %v10818_v60 = vsel %vm938_vm2, %v21900_v2, 0.0 }
 0xd77   :  { %v10696_v5 = vsub.f32 %v21751_v25, %v10640_v39  ;;  %10819 = vadd.xlane.f32.xlu0 %v10818_v60  ;;  %v18455_v60 = vunpack.i.h.bf16 %v21645_v54 }
 0xd78   :  { %v21905_v27 = vpop.eup %18797 }
 0xd79   :  { %v10747_v58 = vmul.f32 1.442695, %v10696_v5  ;;  %v10821_v18 = vsel %vm938_vm2, %v21905_v27, 0.0  ;;  %v18454_v5 = vunpack.i.l.bf16 %v21645_v54 }
 0xd7a   :  { %10822 = vadd.xlane.f32.xlu1 %v10821_v18 }
 0xd7b   :  { %18803 = vpow2.f32 %v10747_v58 }
 0xd7d   :  { %v21909_v56 = vpop.eup %18799 }
 0xd7e   :  { %v10824_v31 = vsel %vm938_vm2, %v21909_v56, 0.0 }
 0xd7f   :  { %10825 = vadd.xlane.f32.xlu0 %v10824_v31 }
 0xd80   :  { %v21913_v23 = vpop.eup %18801 }
 0xd81   :  { %v10827_v25 = vsel %vm938_vm2, %v21913_v23, 0.0  ;;  %v10775_v9 = vpop.xlane.xlu1 %10774 }
 0xd82   :  { %10828 = vadd.xlane.f32.xlu1 %v10827_v25  ;;  %18805 = vrcp.f32 %v10775_v9 }
 0xd85   :  { %v21917_v59 = vpop.eup %18803  ;;  %v10643_v15 = vpop.xlane.xlu1 %10642 }
 0xd86   :  { %22770 = vst [vmem:[#allocation33_spill] sm:$0xff] %v21917_v59  ;;  %v10830_v38 = vsel %vm938_vm2, %v21917_v59, 0.0  ;;  %v10697_v0 = vsub.f32 %v21764_v10, %v10643_v15 }
 0xd87   :  { %10831 = vadd.xlane.f32.xlu0 %v10830_v38  ;;  %v17833_v38 = vpack.c.bf16 %v18455_v60, %v18454_v5 }
 0xd88   :  { %v10749_v16 = vmul.f32 1.442695, %v10697_v0 }
 0xd89   :  { %v10649_v39 = vpop.xlane.xlu1 %10648 }
 0xd8a   :  { %18807 = vpow2.f32 %v10749_v16  ;;  %v10699_v58 = vsub.f32 %v21771_v26, %v10649_v39  ;;  %v18460_v16 = vunpack.i.h.bf16 %v21647_v35 }
 0xd8c   :  { %v18806_v31 = vpop.eup %18805  ;;  %v10753_v25 = vmul.f32 1.442695, %v10699_v58 }
 0xd8d   :  { %v10778_v18 = vpop.xlane.xlu0 %10777  ;;  %v10901_v9 = vmul.f32 %v18806_v31, %v21760_v50  ;;  %v10781_v59 = vpop.xlane.xlu1 %10780  ;;  %v18465_v31 = vunpack.i.h.bf16 %v21649_v33 }
 0xd8e   :  { %18809 = vrcp.f32 %v10778_v18 }
 0xd8f   :  { %18811 = vpow2.f32 %v10753_v25  ;;  %16934 = vmatmul.mubr.msk.f32.vlgmr.msra.gmra.mrb[150].mxu0 %vm938_vm2, %v10901_v9  ;;  %v18464_v25 = vunpack.i.l.bf16 %v21649_v33 }
 0xd90   :  { %18813 = vrcp.f32 %v10781_v59  ;;  %17834 = vmatpush3.bf16.msra.mxu0 %v17833_v38  ;;  %16947 = vmatprep.mubr.msk.f32.mxu0 %vm19100_vm1, %v22691_v13  ;;  %v18459_v59 = vunpack.i.l.bf16 %v21647_v35 }
 0xd91   :  { %v10646_v10 = vpop.xlane.xlu0 %10645  ;;  %v10787_v54 = vpop.xlane.xlu1 %10786  ;;  %17838 = vmatprep.subr.bf16.mxu0 %v22692_v63  ;;  %v17839_v33 = vpack.c.bf16 %v18465_v31, %v18464_v25  ;;  %v18469_v25 = vunpack.i.l.bf16 %v21651_v36 }
 0xd92   :  { %v10698_v15 = vsub.f32 %v21783_v11, %v10646_v10  ;;  %18815 = vrcp.f32 %v10787_v54  ;;  %v17836_v10 = vpack.c.bf16 %v18460_v16, %v18459_v59 }
 0xd94   :  { %v10751_v26 = vmul.f32 1.442695, %v10698_v15  ;;  %v21931_v50 = vpop.eup %18807 }
 0xd95   :  { %v10652_v0 = vpop.xlane.xlu0 %10651  ;;  %v10655_v11 = vpop.xlane.xlu1 %10654  ;;  %v10833_v60 = vsel %vm938_vm2, %v21931_v50, 0.0 }
 0xd96   :  { %18817 = vpow2.f32 %v10751_v26  ;;  %v10700_v39 = vsub.f32 %v21792_v40, %v10652_v0  ;;  %v10701_v18 = vsub.f32 %v21797_v47, %v10655_v11  ;;  %10834 = vadd.xlane.f32.xlu1 %v10833_v60  ;;  %v18474_v0 = vunpack.i.l.bf16 %v21653_v48 }
 0xd98   :  { %v18810_v5 = vpop.eup %18809  ;;  %v10755_v58 = vmul.f32 1.442695, %v10700_v39  ;;  %v10757_v40 = vmul.f32 1.442695, %v10701_v18 }
 0xd99   :  { %v10902_v9 = vmul.f32 %v18810_v5, %v21779_v45  ;;  %v10784_v38 = vpop.xlane.xlu0 %10783  ;;  %v21942_v35 = vpop.eup %18811  ;;  %v18475_v45 = vunpack.i.h.bf16 %v21653_v48 }
 0xd9a   :  { %18819 = vpow2.f32 %v10755_v58  ;;  %v18814_v15 = vpop.eup %18813  ;;  %v10793_v54 = vpop.xlane.xlu1 %10792  ;;  %v10839_v47 = vsel %vm938_vm2, %v21942_v35, 0.0 }
 0xd9b   :  { %18821 = vrcp.f32 %v10784_v38  ;;  %16941 = vmatmul.mubr.msk.f32.vlgmr.msra.gmra.mrb[138].mxu1 %vm938_vm2, %v10902_v9  ;;  %v10903_v26 = vmul.f32 %v18814_v15, %v21775_v44  ;;  %10840 = vadd.xlane.f32.xlu1 %v10839_v47  ;;  %v17845_v58 = vpack.c.bf16 %v18475_v45, %v18474_v0  ;;  %v18484_v15 = vunpack.i.l.bf16 %v21659_v14 }
 0xd9c   :  { %18823 = vpow2.f32 %v10757_v40  ;;  %17837 = vmatpush3.bf16.msra.mxu1 %v17836_v10  ;;  %16954 = vmatprep.mubr.msk.f32.mxu1 %vm19100_vm1, %v22691_v13  ;;  %v18816_v59 = vpop.eup %18815  ;;  %v18485_v40 = vunpack.i.h.bf16 %v21659_v14 }
 0xd9d   :  { %18825 = vrcp.f32 %v10793_v54  ;;  %v10658_v16 = vpop.xlane.xlu0 %10657  ;;  %17841 = vmatprep.subr.bf16.mxu1 %v22692_v63  ;;  %16948 = vmatmul.mubr.msk.f32.vlgmr.msra.gmra.mrb[152].mxu0 %vm938_vm2, %v10903_v26  ;;  %v10905_v44 = vmul.f32 %v18816_v59, %v21789_v46  ;;  %v18470_v46 = vunpack.i.h.bf16 %v21651_v36 }
 0xd9e   :  { %v10702_v39 = vsub.f32 %v21811_v41, %v10658_v16  ;;  %17840 = vmatpush3.bf16.msra.mxu0 %v17839_v33  ;;  %v10661_v11 = vpop.xlane.xlu1 %10660  ;;  %16961 = vmatprep.mubr.msk.f32.mxu0 %vm19100_vm1, %v22691_v13 }
 0xd9f   :  { %v10703_v5 = vsub.f32 %v21816_v6, %v10661_v11  ;;  %17844 = vmatprep.subr.bf16.mxu0 %v22692_v63  ;;  %v17842_v0 = vpack.c.bf16 %v18470_v46, %v18469_v25 }
 0xda0   :  { %v21958_v48 = vpop.eup %18817  ;;  %v10759_v60 = vmul.f32 1.442695, %v10702_v39 }
 0xda1   :  { %v10790_v18 = vpop.xlane.xlu0 %10789  ;;  %v10836_v41 = vsel %vm938_vm2, %v21958_v48, 0.0  ;;  %v10761_v31 = vmul.f32 1.442695, %v10703_v5  ;;  %16962 = vmatmul.mubr.msk.f32.vlgmr.msra.gmra.mrb[154].mxu0 %vm938_vm2, %v10905_v44 }
 0xda2   :  { %18827 = vpow2.f32 %v10759_v60  ;;  %10837 = vadd.xlane.f32.xlu0 %v10836_v41  ;;  %17846 = vmatpush3.bf16.msra.mxu0 %v17845_v58  ;;  %v10667_v9 = vpop.xlane.xlu1 %10666  ;;  %v18479_v60 = vunpack.i.l.bf16 %v21655_v4 }
 0xda3   :  { %18829 = vrcp.f32 %v10790_v18  ;;  %16975 = vmatprep.mubr.msk.f32.mxu0 %vm19100_vm1, %v22691_v13  ;;  %v10705_v38 = vsub.f32 %v21825_v62, %v10667_v9  ;;  %17850 = vmatprep.subr.bf16.mxu0 %v22692_v63 }
 0xda4   :  { %v21969_v6 = vpop.eup %18819  ;;  %18831 = vpow2.f32 %v10761_v31 }
 0xda5   :  { %v18822_v10 = vpop.eup %18821  ;;  %v10664_v54 = vpop.xlane.xlu0 %10663  ;;  %v10842_v36 = vsel %vm938_vm2, %v21969_v6, 0.0  ;;  %v10765_v33 = vmul.f32 1.442695, %v10705_v38 }
 0xda6   :  { %v21977_v47 = vpop.eup %18823  ;;  %v10904_v26 = vmul.f32 %v18822_v10, %v21804_v32  ;;  %v10704_v45 = vsub.f32 %v21830_v43, %v10664_v54  ;;  %10843 = vadd.xlane.f32.xlu0 %v10842_v36  ;;  %v10673_v16 = vpop.xlane.xlu1 %10672  ;;  %v17851_v32 = vpack.c.bf16 %v18485_v40, %v18484_v15  ;;  %v18499_v40 = vunpack.i.l.bf16 %v21666_v42 }
 0xda7   :  { %v18826_v62 = vpop.eup %18825  ;;  %v10845_v59 = vsel %vm938_vm2, %v21977_v47, 0.0  ;;  %18833 = vpow2.f32 %v10765_v33  ;;  %v10707_v44 = vsub.f32 %v21835_v21, %v10673_v16 }
 0xda8   :  { %v10907_v14 = vmul.f32 %v18826_v62, %v21808_v12  ;;  %v10763_v39 = vmul.f32 1.442695, %v10704_v45  ;;  %16955 = vmatmul.mubr.msk.f32.vlgmr.msra.gmra.mrb[140].mxu1 %vm938_vm2, %v10904_v26  ;;  %10846 = vadd.xlane.f32.xlu1 %v10845_v59  ;;  %v18480_v12 = vunpack.i.h.bf16 %v21655_v4 }
 0xda9   :  { %17843 = vmatpush3.bf16.msra.mxu1 %v17842_v0  ;;  %v10796_v11 = vpop.xlane.xlu0 %10795  ;;  %16968 = vmatprep.mubr.msk.f32.mxu1 %vm19100_vm1, %v22691_v13  ;;  %v10769_v43 = vmul.f32 1.442695, %v10707_v44 }
 0xdaa   :  { %18835 = vpow2.f32 %v10763_v39  ;;  %16976 = vmatmul.mubr.msk.f32.vlgmr.msra.gmra.mrb[156].mxu0 %vm938_vm2, %v10907_v14  ;;  %17847 = vmatprep.subr.bf16.mxu1 %v22692_v63  ;;  %v17848_v46 = vpack.c.bf16 %v18480_v12, %v18479_v60  ;;  %v22041_v14 = vpop.permute.xlu1 %18587 }
 0xdab   :  { %18837 = vrcp.f32 %v10796_v11  ;;  %17852 = vmatpush3.bf16.msra.mxu0 %v17851_v32  ;;  %16989 = vmatprep.mubr.msk.f32.mxu0 %vm19100_vm1, %v22691_v13  ;;  %v18515_v11 = vunpack.i.h.bf16 %v21682_v28 }
 0xdac   :  { %v21994_v21 = vpop.eup %18827  ;;  %18839 = vpow2.f32 %v10769_v43  ;;  %17856 = vmatprep.subr.bf16.mxu0 %v22692_v63  ;;  %v18514_v43 = vunpack.i.l.bf16 %v21682_v28 }
 0xdad   :  { %v18830_v5 = vpop.eup %18829  ;;  %v10670_v58 = vpop.xlane.xlu0 %10669  ;;  %v10848_v18 = vsel %vm938_vm2, %v21994_v21, 0.0 }
 0xdae   :  { %v21999_v41 = vpop.eup %18831  ;;  %v10906_v31 = vmul.f32 %v18830_v5, %v21822_v7  ;;  %v10706_v4 = vsub.f32 %v21846_v20, %v10670_v58  ;;  %10849 = vadd.xlane.f32.xlu0 %v10848_v18  ;;  %v18500_v20 = vunpack.i.h.bf16 %v21666_v42  ;;  %v17857_v5 = vpack.c.bf16 %v18515_v11, %v18514_v43 }
 0xdaf   :  { %v10851_v25 = vsel %vm938_vm2, %v21999_v41, 0.0  ;;  %v18529_v58 = vunpack.i.l.bf16 %v21698_v19 }
 0xdb0   :  { %v10767_v9 = vmul.f32 1.442695, %v10706_v4  ;;  %16969 = vmatmul.mubr.msk.f32.vlgmr.msra.gmra.mrb[142].mxu1 %vm938_vm2, %v10906_v31  ;;  %10852 = vadd.xlane.f32.xlu1 %v10851_v25  ;;  %v17854_v62 = vpack.c.bf16 %v18500_v20, %v18499_v40  ;;  %v18544_v25 = vunpack.i.l.bf16 %v21716_v52  ;;  %v18554_v20 = vunpack.i.l.bf16 %v21721_v55 }
 0xdb1   :  { %17849 = vmatpush3.bf16.msra.mxu1 %v17848_v46  ;;  %v10676_v38 = vpop.xlane.xlu0 %10675  ;;  %16982 = vmatprep.mubr.msk.f32.mxu1 %vm19100_vm1, %v22691_v13  ;;  %v22008_v10 = vpop.eup %18833  ;;  %v18545_v46 = vunpack.i.h.bf16 %v21716_v52 }
 0xdb2   :  { %18841 = vpow2.f32 %v10767_v9  ;;  %v10708_v7 = vsub.f32 %v21851_v49, %v10676_v38  ;;  %17853 = vmatprep.subr.bf16.mxu1 %v22692_v63  ;;  %v10857_v15 = vsel %vm938_vm2, %v22008_v10, 0.0 }
 0xdb3   :  { %v17863_v38 = vpack.c.bf16 %v18545_v46, %v18544_v25 }
 0xdb4   :  { %v22016_v54 = vpop.eup %18835  ;;  %v10771_v36 = vmul.f32 1.442695, %v10708_v7  ;;  %10858 = vadd.xlane.f32.xlu1 %v10857_v15  ;;  %v18555_v7 = vunpack.i.h.bf16 %v21721_v55  ;;  %v18564_v15 = vunpack.i.l.bf16 %v21737_v3 }
 0xdb5   :  { %v18838_v26 = vpop.eup %18837  ;;  %v10854_v33 = vsel %vm938_vm2, %v22016_v54, 0.0  ;;  %v22043_v44 = vpop.permute.xlu0 %18582 }
 0xdb6   :  { %v22020_v45 = vpop.eup %18839  ;;  %v10908_v49 = vmul.f32 %v18838_v26, %v21841_v17  ;;  %18843 = vpow2.f32 %v10771_v36  ;;  %10855 = vadd.xlane.f32.xlu0 %v10854_v33  ;;  %v17866_v26 = vpack.c.bf16 %v18555_v7, %v18554_v20 }
 0xdb7   :  { %v10863_v42 = vsel %vm938_vm2, %v22020_v45, 0.0 }
 0xdb8   :  { %16983 = vmatmul.mubr.msk.f32.vlgmr.msra.gmra.mrb[144].mxu1 %vm938_vm2, %v10908_v49  ;;  %10864 = vadd.xlane.f32.xlu1 %v10863_v42  ;;  %v18575_v42 = vunpack.i.h.bf16 %v21744_v57 }
 0xdb9   :  { %17855 = vmatpush3.bf16.msra.mxu1 %v17854_v62  ;;  %16996 = vmatprep.mubr.msk.f32.mxu1 %vm19100_vm1, %v22691_v13 }
 0xdba   :  { %17859 = vmatprep.subr.bf16.mxu1 %v22692_v63 }
 0xdbc   :  { %v22029_v0 = vpop.eup %18841 }
 0xdbd   :  { %v10860_v17 = vsel %vm938_vm2, %v22029_v0, 0.0 }
 0xdbe   :  { %10861 = vadd.xlane.f32.xlu0 %v10860_v17  ;;  %v18490_v17 = vunpack.i.h.bf16 %v21664_v8 }
 0xdc0   :  { %v22033_v16 = vpop.eup %18843 }
 0xdc1   :  { %v10866_v59 = vsel %vm938_vm2, %v22033_v16, 0.0 }
 0xdc2   :  { %10867 = vadd.xlane.f32.xlu0 %v10866_v59  ;;  %v18489_v59 = vunpack.i.l.bf16 %v21664_v8  ;;  %v18504_v8 = vunpack.i.l.bf16 %v21675_v61 }
 0xdc4   :  { %v17875_v43 = vpack.c.bf16 %v18490_v17, %v18489_v59  ;;  %v22777_v17 = vld [vmem:[#allocation20_spill] sm:$0xff] }
 0xdc5   :  { %v18495_v59 = vunpack.i.h.bf16 %v22777_v17 }
 0xdc9   :  { %18597 = vrot.lane.b32.xlu1 %v21567_v34, %s19105_s22 }
 0xdd8   :  { %18592 = vrot.lane.b32.xlu0 %v21553_v24, %s19105_s22  ;;  %v18530_v24 = vunpack.i.h.bf16 %v21698_v19 }
 0xde5   :  { %v10799_v39 = vpop.xlane.xlu1 %10798 }
 0xde6   :  { %18845 = vrcp.f32 %v10799_v39 }
 0xdeb   :  { %v10802_v32 = vpop.xlane.xlu0 %10801 }
 0xdec   :  { %18847 = vrcp.f32 %v10802_v32 }
 0xdef   :  { %v10805_v12 = vpop.xlane.xlu1 %10804 }
 0xdf0   :  { %v18846_v60 = vpop.eup %18845  ;;  %18849 = vrcp.f32 %v10805_v12 }
 0xdf1   :  { %v10909_v34 = vmul.f32 %v18846_v60, %v21864_v29  ;;  %v17860_v29 = vpack.c.bf16 %v18530_v24, %v18529_v58  ;;  %v18505_v60 = vunpack.i.h.bf16 %v21675_v61 }
 0xdf3   :  { %16990 = vmatmul.mubr.msk.f32.vlgmr.msra.gmra.mrb[158].mxu0 %vm938_vm2, %v10909_v34  ;;  %v22771_v34 = vld [vmem:[#allocation21_spill] sm:$0xff] }
 0xdf4   :  { %v10808_v18 = vpop.xlane.xlu0 %10807  ;;  %17858 = vmatpush3.bf16.msra.mxu0 %v17857_v5  ;;  %17003 = vmatprep.mubr.msk.f32.mxu0 %vm19100_vm1, %v22691_v13  ;;  %v18520_v5 = vunpack.i.h.bf16 %v22771_v34  ;;  %v18519_v24 = vunpack.i.l.bf16 %v22771_v34 }
 0xdf5   :  { %18851 = vrcp.f32 %v10808_v18  ;;  %17862 = vmatprep.subr.bf16.mxu0 %v22692_v63  ;;  %v17878_v18 = vpack.c.bf16 %v18505_v60, %v18504_v8  ;;  %v22778_v60 = vld [vmem:[#allocation29_spill] sm:$0xff] }
 0xdf6   :  { %v18848_v28 = vpop.eup %18847  ;;  %v18580_v8 = vunpack.i.h.bf16 %v22778_v60 }
 0xdf7   :  { %v10910_v31 = vmul.f32 %v18848_v28, %v21870_v51  ;;  %v10811_v4 = vpop.xlane.xlu1 %10810 }
 0xdf8   :  { %18853 = vrcp.f32 %v10811_v4 }
 0xdf9   :  { %16997 = vmatmul.mubr.msk.f32.vlgmr.msra.gmra.mrb[146].mxu1 %vm938_vm2, %v10910_v31  ;;  %v17881_v31 = vpack.c.bf16 %v18520_v5, %v18519_v24  ;;  %v22779_v5 = vld [vmem:[#allocation18_spill] sm:$0xff] }
 0xdfa   :  { %v18850_v19 = vpop.eup %18849  ;;  %17861 = vmatpush3.bf16.msra.mxu1 %v17860_v29  ;;  %17010 = vmatprep.mubr.msk.f32.mxu1 %vm19100_vm1, %v22691_v13  ;;  %v22772_v29 = vld [vmem:[#allocation23_spill] sm:$0xff]  ;;  %v18510_v24 = vunpack.i.h.bf16 %v22779_v5 }
 0xdfb   :  { %v10911_v9 = vmul.f32 %v18850_v19, %v21875_v37  ;;  %17865 = vmatprep.subr.bf16.mxu1 %v22692_v63  ;;  %v18565_v37 = vunpack.i.h.bf16 %v21737_v3  ;;  %v18574_v3 = vunpack.i.l.bf16 %v21744_v57  ;;  %v18535_v46 = vunpack.i.h.bf16 %v22772_v29 }
 0xdfc   :  { %v10814_v51 = vpop.xlane.xlu0 %10813  ;;  %v18534_v25 = vunpack.i.l.bf16 %v22772_v29 }
 0xdfd   :  { %18855 = vrcp.f32 %v10814_v51  ;;  %17004 = vmatmul.mubr.msk.f32.vlgmr.msra.gmra.mrb[160].mxu0 %vm938_vm2, %v10911_v9  ;;  %v17869_v49 = vpack.c.bf16 %v18565_v37, %v18564_v15  ;;  %v17872_v32 = vpack.c.bf16 %v18575_v42, %v18574_v3 }
 0xdfe   :  { %17864 = vmatpush3.bf16.msra.mxu0 %v17863_v38  ;;  %17017 = vmatprep.mubr.msk.f32.mxu0 %vm19100_vm1, %v22691_v13  ;;  %v17884_v51 = vpack.c.bf16 %v18535_v46, %v18534_v25 }
 0xdff   :  { %v18852_v52 = vpop.eup %18851  ;;  %v10817_v40 = vpop.xlane.xlu1 %10816  ;;  %17868 = vmatprep.subr.bf16.mxu0 %v22692_v63 }
 0xe00   :  { %v10912_v36 = vmul.f32 %v18852_v52, %v21880_v53  ;;  %18857 = vrcp.f32 %v10817_v40  ;;  %v22774_v40 = vld [vmem:[#allocation25_spill] sm:$0xff] }
 0xe01   :  { %v18560_v37 = vunpack.i.h.bf16 %v22774_v40  ;;  %v18559_v15 = vunpack.i.l.bf16 %v22774_v40 }
 0xe02   :  { %v18854_v55 = vpop.eup %18853  ;;  %17011 = vmatmul.mubr.msk.f32.vlgmr.msra.gmra.mrb[148].mxu1 %vm938_vm2, %v10912_v36 }
 0xe03   :  { %v10913_v33 = vmul.f32 %v18854_v55, %v21885_v30  ;;  %17867 = vmatpush3.bf16.msra.mxu1 %v17866_v26  ;;  %17024 = vmatprep.mubr.msk.f32.mxu1 %vm19100_vm1, %v22691_v13  ;;  %v17890_v26 = vpack.c.bf16 %v18560_v37, %v18559_v15 }
 0xe04   :  { %v10820_v62 = vpop.xlane.xlu0 %10819  ;;  %17871 = vmatprep.subr.bf16.mxu1 %v22692_v63 }
 0xe05   :  { %18859 = vrcp.f32 %v10820_v62  ;;  %17018 = vmatmul.mubr.msk.f32.vlgmr.msra.gmra.mrb[162].mxu0 %vm938_vm2, %v10913_v33 }
 0xe06   :  { %17870 = vmatpush3.bf16.msra.mxu0 %v17869_v49  ;;  %17031 = vmatprep.mubr.msk.f32.mxu0 %vm19100_vm1, %v22691_v13  ;;  %v22776_v49 = vld [vmem:[#allocation27_spill] sm:$0xff] }
 0xe07   :  { %v18856_v53 = vpop.eup %18855  ;;  %v10823_v30 = vpop.xlane.xlu1 %10822  ;;  %17874 = vmatprep.subr.bf16.mxu0 %v22692_v63  ;;  %v18570_v62 = vunpack.i.h.bf16 %v22776_v49  ;;  %v18569_v42 = vunpack.i.l.bf16 %v22776_v49 }
 0xe08   :  { %v10914_v39 = vmul.f32 %v18856_v53, %v21890_v22  ;;  %18861 = vrcp.f32 %v10823_v30 }
 0xe0a   :  { %v18858_v57 = vpop.eup %18857  ;;  %17025 = vmatmul.mubr.msk.f32.vlgmr.msra.gmra.mrb[150].mxu1 %vm938_vm2, %v10914_v39  ;;  %v18494_v39 = vunpack.i.l.bf16 %v22777_v17 }
 0xe0b   :  { %v10915_v11 = vmul.f32 %v18858_v57, %v21895_v1  ;;  %17873 = vmatpush3.bf16.msra.mxu1 %v17872_v32  ;;  %17038 = vmatprep.mubr.msk.f32.mxu1 %vm19100_vm1, %v22691_v13  ;;  %v17893_v32 = vpack.c.bf16 %v18570_v62, %v18569_v42  ;;  %v13463_v42 = vld [vmem:[#allocation4 + $0x48] sm:$0xff] }
 0xe0c   :  { %v10826_v12 = vpop.xlane.xlu0 %10825  ;;  %17877 = vmatprep.subr.bf16.mxu1 %v22692_v63 }
 0xe0d   :  { %18863 = vrcp.f32 %v10826_v12  ;;  %17032 = vmatmul.mubr.msk.f32.vlgmr.msra.gmra.mrb[164].mxu0 %vm938_vm2, %v10915_v11 }
 0xe0e   :  { %17876 = vmatpush3.bf16.msra.mxu0 %v17875_v43  ;;  %17045 = vmatprep.mubr.msk.f32.mxu0 %vm19100_vm1, %v22691_v13 }
 0xe0f   :  { %v18860_v22 = vpop.eup %18859  ;;  %v10829_v1 = vpop.xlane.xlu1 %10828  ;;  %17880 = vmatprep.subr.bf16.mxu0 %v22692_v63 }
 0xe10   :  { %v10916_v58 = vmul.f32 %v18860_v22, %v21900_v2  ;;  %18865 = vrcp.f32 %v10829_v1  ;;  %v18579_v22 = vunpack.i.l.bf16 %v22778_v60 }
 0xe12   :  { %v18862_v61 = vpop.eup %18861  ;;  %17039 = vmatmul.mubr.msk.f32.vlgmr.msra.gmra.mrb[152].mxu1 %vm938_vm2, %v10916_v58  ;;  %v18509_v58 = vunpack.i.l.bf16 %v22779_v5 }
 0xe13   :  { %v10917_v28 = vmul.f32 %v18862_v61, %v21905_v27  ;;  %17879 = vmatpush3.bf16.msra.mxu1 %v17878_v18  ;;  %17052 = vmatprep.mubr.msk.f32.mxu1 %vm19100_vm1, %v22691_v13  ;;  %v22773_v27 = vld [vmem:[#allocation24_spill] sm:$0xff]  ;;  %v17896_v18 = vpack.c.bf16 %v18580_v8, %v18579_v22 }
 0xe14   :  { %v10832_v4 = vpop.xlane.xlu0 %10831  ;;  %17883 = vmatprep.subr.bf16.mxu1 %v22692_v63  ;;  %v18550_v19 = vunpack.i.h.bf16 %v22773_v27  ;;  %v18549_v9 = vunpack.i.l.bf16 %v22773_v27  ;;  %v17902_v25 = vpack.c.bf16 %v18510_v24, %v18509_v58 }
 0xe15   :  { %18867 = vrcp.f32 %v10832_v4  ;;  %17046 = vmatmul.mubr.msk.f32.vlgmr.msra.gmra.mrb[166].mxu0 %vm938_vm2, %v10917_v28 }
 0xe16   :  { %17882 = vmatpush3.bf16.msra.mxu0 %v17881_v31  ;;  %17059 = vmatprep.mubr.msk.f32.mxu0 %vm19100_vm1, %v22691_v13  ;;  %v17887_v52 = vpack.c.bf16 %v18550_v19, %v18549_v9  ;;  %v22780_v31 = vld [vmem:[#allocation19_spill] sm:$0xff] }
 0xe17   :  { %v18864_v2 = vpop.eup %18863  ;;  %17886 = vmatprep.subr.bf16.mxu0 %v22692_v63  ;;  %v18525_v4 = vunpack.i.h.bf16 %v22780_v31  ;;  %v18524_v29 = vunpack.i.l.bf16 %v22780_v31 }
 0xe18   :  { %v10918_v38 = vmul.f32 %v18864_v2, %v21909_v56 }
 0xe19   :  { %v17905_v19 = vpack.c.bf16 %v18525_v4, %v18524_v29 }
 0xe1a   :  { %v18866_v7 = vpop.eup %18865  ;;  %17053 = vmatmul.mubr.msk.f32.vlgmr.msra.gmra.mrb[154].mxu1 %vm938_vm2, %v10918_v38 }
 0xe1b   :  { %v10919_v20 = vmul.f32 %v18866_v7, %v21913_v23  ;;  %17885 = vmatpush3.bf16.msra.mxu1 %v17884_v51  ;;  %17066 = vmatprep.mubr.msk.f32.mxu1 %vm19100_vm1, %v22691_v13  ;;  %v22775_v23 = vld [vmem:[#allocation33_spill] sm:$0xff]  ;;  %v18585_v7 = vunpack.i.h.bf16 %v22043_v44 }
 0xe1c   :  { %17889 = vmatprep.subr.bf16.mxu1 %v22692_v63 }
 0xe1d   :  { %17060 = vmatmul.mubr.msk.f32.vlgmr.msra.gmra.mrb[168].mxu0 %vm938_vm2, %v10919_v20  ;;  %v18584_v20 = vunpack.i.l.bf16 %v22043_v44 }
 0xe1e   :  { %17888 = vmatpush3.bf16.msra.mxu0 %v17887_v52  ;;  %17073 = vmatprep.mubr.msk.f32.mxu0 %vm19100_vm1, %v22691_v13 }
 0xe1f   :  { %v18868_v56 = vpop.eup %18867  ;;  %17892 = vmatprep.subr.bf16.mxu0 %v22692_v63 }
 0xe20   :  { %v10920_v36 = vmul.f32 %v18868_v56, %v22775_v23  ;;  %v17911_v23 = vpack.c.bf16 %v18585_v7, %v18584_v20 }
 0xe22   :  { %17067 = vmatmul.mubr.msk.f32.vlgmr.msra.gmra.mrb[156].mxu1 %vm938_vm2, %v10920_v36 }
 0xe23   :  { %17891 = vmatpush3.bf16.msra.mxu1 %v17890_v26  ;;  %17080 = vmatprep.mubr.msk.f32.mxu1 %vm19100_vm1, %v22691_v13  ;;  %v10835_v55 = vpop.xlane.xlu1 %10834  ;;  %v18589_v26 = vunpack.i.l.bf16 %v22041_v14 }
 0xe24   :  { %17895 = vmatprep.subr.bf16.mxu1 %v22692_v63  ;;  %18869 = vrcp.f32 %v10835_v55 }
 0xe28   :  { %v10841_v33 = vpop.xlane.xlu1 %10840 }
 0xe29   :  { %18871 = vrcp.f32 %v10841_v33 }
 0xe2e   :  { %v18870_v53 = vpop.eup %18869 }
 0xe2f   :  { %v10838_v3 = vpop.xlane.xlu0 %10837  ;;  %v10921_v30 = vmul.f32 %v18870_v53, %v21931_v50  ;;  %v17899_v50 = vpack.c.bf16 %v18495_v59, %v18494_v39  ;;  %v13464_v59 = vld [vmem:[#allocation4 + $0x50] sm:$0xff]  ;;  %v13465_v39 = vld [vmem:[#allocation4 + $0x58] sm:$0xff] }
 0xe30   :  { %18873 = vrcp.f32 %v10838_v3 }
 0xe31   :  { %17074 = vmatmul.mubr.msk.f32.vlgmr.msra.gmra.mrb[170].mxu0 %vm938_vm2, %v10921_v30 }
 0xe32   :  { %17894 = vmatpush3.bf16.msra.mxu0 %v17893_v32  ;;  %17087 = vmatprep.mubr.msk.f32.mxu0 %vm19100_vm1, %v22691_v13 }
 0xe33   :  { %v10844_v57 = vpop.xlane.xlu0 %10843  ;;  %v18872_v11 = vpop.eup %18871  ;;  %17898 = vmatprep.subr.bf16.mxu0 %v22692_v63 }
 0xe34   :  { %18875 = vrcp.f32 %v10844_v57  ;;  %v10923_v43 = vmul.f32 %v18872_v11, %v21942_v35 }
 0xe35   :  { %v10847_v12 = vpop.xlane.xlu1 %10846 }
 0xe36   :  { %18877 = vrcp.f32 %v10847_v12  ;;  %17088 = vmatmul.mubr.msk.f32.vlgmr.msra.gmra.mrb[172].mxu0 %vm938_vm2, %v10923_v43 }
 0xe37   :  { %17900 = vmatpush3.bf16.msra.mxu0 %v17899_v50  ;;  %17101 = vmatprep.mubr.msk.f32.mxu0 %vm19100_vm1, %v22691_v13  ;;  %v17926_v50 = vpack.c.bf16 %v13465_v39, %v13464_v59 }
 0xe38   :  { %17904 = vmatprep.subr.bf16.mxu0 %v22692_v63 }
 0xe3a   :  { %v18874_v1 = vpop.eup %18873 }
 0xe3b   :  { %v10922_v35 = vmul.f32 %v18874_v1, %v21958_v48  ;;  %v10850_v34 = vpop.xlane.xlu0 %10849 }
 0xe3c   :  { %18879 = vrcp.f32 %v10850_v34  ;;  %v13467_v34 = vld [vmem:[#allocation4 + $0x68] sm:$0xff] }
 0xe3d   :  { %17081 = vmatmul.mubr.msk.f32.vlgmr.msra.gmra.mrb[158].mxu1 %vm938_vm2, %v10922_v35  ;;  %v10853_v61 = vpop.xlane.xlu1 %10852 }
 0xe3e   :  { %v18876_v28 = vpop.eup %18875  ;;  %17897 = vmatpush3.bf16.msra.mxu1 %v17896_v18  ;;  %18881 = vrcp.f32 %v10853_v61  ;;  %17094 = vmatprep.mubr.msk.f32.mxu1 %vm19100_vm1, %v22691_v13 }
 0xe3f   :  { %v10924_v48 = vmul.f32 %v18876_v28, %v21969_v6  ;;  %17901 = vmatprep.subr.bf16.mxu1 %v22692_v63  ;;  %v22781_v6 = vld [vmem:[#allocation22_spill] sm:$0xff] }
 0xe40   :  { %v18878_v46 = vpop.eup %18877  ;;  %v18540_v38 = vunpack.i.h.bf16 %v22781_v6  ;;  %v18539_v51 = vunpack.i.l.bf16 %v22781_v6 }
 0xe41   :  { %v10925_v2 = vmul.f32 %v18878_v46, %v21977_v47  ;;  %17095 = vmatmul.mubr.msk.f32.vlgmr.msra.gmra.mrb[160].mxu1 %vm938_vm2, %v10924_v48  ;;  %v10859_v27 = vpop.xlane.xlu1 %10858 }
 0xe42   :  { %17903 = vmatpush3.bf16.msra.mxu1 %v17902_v25  ;;  %18883 = vrcp.f32 %v10859_v27  ;;  %17108 = vmatprep.mubr.msk.f32.mxu1 %vm19100_vm1, %v22691_v13  ;;  %v17908_v37 = vpack.c.bf16 %v18540_v38, %v18539_v51 }
 0xe43   :  { %v10856_v9 = vpop.xlane.xlu0 %10855  ;;  %17102 = vmatmul.mubr.msk.f32.vlgmr.msra.gmra.mrb[174].mxu0 %vm938_vm2, %v10925_v2  ;;  %17907 = vmatprep.subr.bf16.mxu1 %v22692_v63 }
 0xe44   :  { %18885 = vrcp.f32 %v10856_v9  ;;  %17906 = vmatpush3.bf16.msra.mxu0 %v17905_v19  ;;  %17115 = vmatprep.mubr.msk.f32.mxu0 %vm19100_vm1, %v22691_v13  ;;  %v13468_v19 = vld [vmem:[#allocation4 + $0x70] sm:$0xff]  ;;  %v13469_v9 = vld [vmem:[#allocation4 + $0x78] sm:$0xff] }
 0xe45   :  { %17910 = vmatprep.subr.bf16.mxu0 %v22692_v63  ;;  %v10865_v15 = vpop.xlane.xlu1 %10864  ;;  %v17934_v6 = vpack.c.bf16 %v13469_v9, %v13468_v19 }
 0xe46   :  { %v18880_v47 = vpop.eup %18879  ;;  %18887 = vrcp.f32 %v10865_v15 }
 0xe47   :  { %v10926_v52 = vmul.f32 %v18880_v47, %v21994_v21  ;;  %v18590_v21 = vunpack.i.h.bf16 %v22041_v14 }
 0xe48   :  { %v18882_v40 = vpop.eup %18881 }
 0xe49   :  { %v10927_v56 = vmul.f32 %v18882_v40, %v21999_v41  ;;  %17109 = vmatmul.mubr.msk.f32.vlgmr.msra.gmra.mrb[162].mxu1 %vm938_vm2, %v10926_v52  ;;  %v17914_v62 = vpack.c.bf16 %v18590_v21, %v18589_v26  ;;  %v18598_v14 = vpop.permute.xlu1 %18597 }
 0xe4a   :  { %17909 = vmatpush3.bf16.msra.mxu1 %v17908_v37  ;;  %17122 = vmatprep.mubr.msk.f32.mxu1 %vm19100_vm1, %v22691_v13  ;;  %v18599_v53 = vunpack.i.l.bf16 %v18598_v14 }
 0xe4b   :  { %v10862_v36 = vpop.xlane.xlu0 %10861  ;;  %17116 = vmatmul.mubr.msk.f32.vlgmr.msra.gmra.mrb[176].mxu0 %vm938_vm2, %v10927_v56  ;;  %17913 = vmatprep.subr.bf16.mxu1 %v22692_v63 }
 0xe4c   :  { %v18884_v44 = vpop.eup %18883  ;;  %18889 = vrcp.f32 %v10862_v36  ;;  %17912 = vmatpush3.bf16.msra.mxu0 %v17911_v23  ;;  %17129 = vmatprep.mubr.msk.f32.mxu0 %vm19100_vm1, %v22691_v13 }
 0xe4d   :  { %v10929_v41 = vmul.f32 %v18884_v44, %v22008_v10  ;;  %17916 = vmatprep.subr.bf16.mxu0 %v22692_v63  ;;  %v13462_v10 = vld [vmem:[#allocation4 + $0x40] sm:$0xff] }
 0xe4e   :  { %v18886_v55 = vpop.eup %18885  ;;  %v17922_v57 = vpack.c.bf16 %v13463_v42, %v13462_v10 }
 0xe4f   :  { %v10928_v33 = vmul.f32 %v18886_v55, %v22016_v54  ;;  %v10868_v49 = vpop.xlane.xlu0 %10867  ;;  %17130 = vmatmul.mubr.msk.f32.vlgmr.msra.gmra.mrb[178].mxu0 %vm938_vm2, %v10929_v41  ;;  %v18600_v54 = vunpack.i.h.bf16 %v18598_v14 }
 0xe50   :  { %18891 = vrcp.f32 %v10868_v49  ;;  %17143 = vmatprep.mubr.msk.f32.mxu0 %vm19100_vm1, %v22691_v13  ;;  %v18888_v32 = vpop.eup %18887 }
 0xe51   :  { %17123 = vmatmul.mubr.msk.f32.vlgmr.msra.gmra.mrb[164].mxu1 %vm938_vm2, %v10928_v33  ;;  %v17920_v60 = vpack.c.bf16 %v18600_v54, %v18599_v53  ;;  %v10931_v8 = vmul.f32 %v18888_v32, %v22020_v45  ;;  %v13466_v45 = vld [vmem:[#allocation4 + $0x60] sm:$0xff] }
 0xe52   :  { %17915 = vmatpush3.bf16.msra.mxu1 %v17914_v62  ;;  %17136 = vmatprep.mubr.msk.f32.mxu1 %vm19100_vm1, %v22691_v13  ;;  %v17930_v5 = vpack.c.bf16 %v13467_v34, %v13466_v45 }
 0xe53   :  { %v18593_v3 = vpop.permute.xlu0 %18592  ;;  %17919 = vmatprep.subr.bf16.mxu1 %v22692_v63 }
 0xe54   :  { %v18595_v30 = vunpack.i.h.bf16 %v18593_v3  ;;  %v18594_v17 = vunpack.i.l.bf16 %v18593_v3 }
 0xe56   :  { %v18890_v11 = vpop.eup %18889  ;;  %v17917_v43 = vpack.c.bf16 %v18595_v30, %v18594_v17 }
 0xe57   :  { %v10930_v12 = vmul.f32 %v18890_v11, %v22029_v0 }
 0xe58   :  { %17918 = vmatpush3.bf16.msra.mxu0 %v17917_v43 }
 0xe59   :  { %17137 = vmatmul.mubr.msk.f32.vlgmr.msra.gmra.mrb[166].mxu1 %vm938_vm2, %v10930_v12  ;;  %17923 = vmatprep.subr.bf16.mxu0 %v17922_v57 }
 0xe5a   :  { %v18892_v22 = vpop.eup %18891  ;;  %17921 = vmatpush3.bf16.msra.mxu1 %v17920_v60  ;;  %17150 = vmatprep.mubr.msk.f32.mxu1 %vm19100_vm1, %v22691_v13 }
 0xe5b   :  { %v10932_v1 = vmul.f32 %v18892_v22, %v22033_v16  ;;  %17144 = vmatmul.mubr.msk.f32.vlgmr.msra.gmra.mrb[180].mxu0 %vm938_vm2, %v10931_v8  ;;  %17927 = vmatprep.subr.bf16.mxu1 %v17926_v50 }
 0xe5c   :  { %17925 = vmatpush3.bf16.msra.mxu0 %v17922_v57 }
 0xe5d   :  { %17151 = vmatmul.mubr.msk.f32.vlgmr.msra.gmra.mrb[168].mxu1 %vm938_vm2, %v10932_v1  ;;  %17931 = vmatprep.subr.bf16.mxu0 %v17930_v5 }
 0xe5e   :  { %17929 = vmatpush3.bf16.msra.mxu1 %v17926_v50 }
 0xe5f   :  { %17935 = vmatprep.subr.bf16.mxu1 %v17934_v6 }
 0xe62   :  { %v11008_v0 = vpop.f32.mrb[150].mxu0 }
 0xe63   :  { %v16935_v35 = vpop.f32.mrb[151].mxu0  ;;  %17157 = vmatprep.mubr.msk.f32.mxu0 %vm938_vm2, %v11008_v0 }
 0xe6e   :  { %v11087_v24 = vpop.f32.mrb[138].mxu1 }
 0xe6f   :  { %v16942_v58 = vpop.f32.mrb[139].mxu1  ;;  %17158 = vmatmul.mubr.msk.f32.vlgmr.msra.gmra.mrb[182].mxu0 %vm938_vm2, %v11087_v24 }
 0xe70   :  { %17933 = vmatpush3.bf16.msra.mxu0 %v17930_v5  ;;  %v11166_v16 = vpop.f32.mrb[152].mxu0 }
 0xe71   :  { %v16949_v18 = vpop.f32.mrb[153].mxu0  ;;  %17160 = vmatprep.mubr.msk.f32.mxu0 %vm938_vm2, %v11166_v16 }
 0xe74   :  { %v11324_v61 = vpop.f32.mrb[154].mxu0 }
 0xe75   :  { %v16963_v28 = vpop.f32.mrb[155].mxu0 }
 0xe7b   :  { %v11245_v31 = vpop.f32.mrb[140].mxu1 }
 0xe7c   :  { %v16956_v4 = vpop.f32.mrb[141].mxu1  ;;  %17161 = vmatmul.mubr.msk.f32.gmra.mrb[184].mxu0 %vm938_vm2, %v11245_v31 }
 0xe7d   :  { %17163 = vmatprep.mubr.msk.f32.mxu0 %vm938_vm2, %v11324_v61  ;;  %v11482_v29 = vpop.f32.mrb[156].mxu0 }
 0xe7e   :  { %v16977_v48 = vpop.f32.mrb[157].mxu0 }
 0xe83   :  { %v11403_v46 = vpop.f32.mrb[142].mxu1 }
 0xe84   :  { %v16970_v25 = vpop.f32.mrb[143].mxu1  ;;  %17164 = vmatmul.mubr.msk.f32.gmra.mrb[186].mxu0 %vm938_vm2, %v11403_v46 }
 0xe85   :  { %17166 = vmatprep.mubr.msk.f32.mxu0 %vm938_vm2, %v11482_v29 }
 0xe8b   :  { %v11561_v2 = vpop.f32.mrb[144].mxu1 }
 0xe8c   :  { %v16984_v27 = vpop.f32.mrb[145].mxu1  ;;  %17167 = vmatmul.mubr.msk.f32.gmra.mrb[188].mxu0 %vm938_vm2, %v11561_v2 }
 0xec6   :  { %v11640_v38 = vpop.f32.mrb[158].mxu0 }
 0xec7   :  { %v16991_v51 = vpop.f32.mrb[159].mxu0  ;;  %17173 = vmatprep.mubr.msk.f32.mxu1 %vm938_vm2, %v11640_v38 }
 0xecc   :  { %v11719_v47 = vpop.f32.mrb[146].mxu1 }
 0xecd   :  { %v16998_v7 = vpop.f32.mrb[147].mxu1  ;;  %17174 = vmatmul.mubr.msk.f32.vlgmr.msra.gmra.mrb[170].mxu1 %vm938_vm2, %v11719_v47 }
 0xece   :  { %17937 = vmatpush3.bf16.msra.mxu1 %v17934_v6 }
 0xed0   :  { %v11798_v20 = vpop.f32.mrb[160].mxu0 }
 0xed1   :  { %v17005_v52 = vpop.f32.mrb[161].mxu0  ;;  %17176 = vmatprep.mubr.msk.f32.mxu1 %vm938_vm2, %v11798_v20 }
 0xed5   :  { %v11877_v40 = vpop.f32.mrb[148].mxu1 }
 0xed6   :  { %v17012_v37 = vpop.f32.mrb[149].mxu1  ;;  %17177 = vmatmul.mubr.msk.f32.gmra.mrb[172].mxu1 %vm938_vm2, %v11877_v40 }
 0xed8   :  { %v11956_v15 = vpop.f32.mrb[162].mxu0 }
 0xed9   :  { %v17019_v56 = vpop.f32.mrb[163].mxu0  ;;  %17179 = vmatprep.mubr.msk.f32.mxu1 %vm938_vm2, %v11956_v15 }
 0xedd   :  { %v12035_v23 = vpop.f32.mrb[150].mxu1 }
 0xede   :  { %v17026_v36 = vpop.f32.mrb[151].mxu1  ;;  %17180 = vmatmul.mubr.msk.f32.gmra.mrb[174].mxu1 %vm938_vm2, %v12035_v23 }
 0xee0   :  { %v12114_v44 = vpop.f32.mrb[164].mxu0 }
 0xee1   :  { %v17033_v21 = vpop.f32.mrb[165].mxu0  ;;  %17182 = vmatprep.mubr.msk.f32.mxu1 %vm938_vm2, %v12114_v44 }
 0xee5   :  { %v12193_v26 = vpop.f32.mrb[152].mxu1 }
 0xee6   :  { %v17040_v41 = vpop.f32.mrb[153].mxu1  ;;  %17183 = vmatmul.mubr.msk.f32.gmra.mrb[176].mxu1 %vm938_vm2, %v12193_v26 }
 0xee8   :  { %v12272_v55 = vpop.f32.mrb[166].mxu0 }
 0xee9   :  { %v17047_v33 = vpop.f32.mrb[167].mxu0  ;;  %17189 = vmatprep.mubr.msk.f32.mxu0 %vm938_vm2, %v12272_v55 }
 0xeed   :  { %v12351_v49 = vpop.f32.mrb[154].mxu1 }
 0xeee   :  { %v17054_v62 = vpop.f32.mrb[155].mxu1  ;;  %17190 = vmatmul.mubr.msk.f32.vlgmr.msra.gmra.mrb[190].mxu0 %vm938_vm2, %v12351_v49 }
 0xef0   :  { %v12430_v14 = vpop.f32.mrb[168].mxu0 }
 0xef1   :  { %v17061_v10 = vpop.f32.mrb[169].mxu0  ;;  %17192 = vmatprep.mubr.msk.f32.mxu0 %vm938_vm2, %v12430_v14 }
 0xef5   :  { %v12509_v42 = vpop.f32.mrb[156].mxu1 }
 0xef6   :  { %v17068_v3 = vpop.f32.mrb[157].mxu1  ;;  %17193 = vmatmul.mubr.msk.f32.gmra.mrb[192].mxu0 %vm938_vm2, %v12509_v42 }
 0xf04   :  { %v12588_v54 = vpop.f32.mrb[170].mxu0 }
 0xf05   :  { %v17075_v53 = vpop.f32.mrb[171].mxu0  ;;  %17195 = vmatprep.mubr.msk.f32.mxu0 %vm938_vm2, %v12588_v54 }
 0xf09   :  { %v12746_v30 = vpop.f32.mrb[172].mxu0 }
 0xf0a   :  { %v17089_v17 = vpop.f32.mrb[173].mxu0 }
 0xf10   :  { %v12667_v59 = vpop.f32.mrb[158].mxu1 }
 0xf11   :  { %v17082_v39 = vpop.f32.mrb[159].mxu1  ;;  %17196 = vmatmul.mubr.msk.f32.gmra.mrb[194].mxu0 %vm938_vm2, %v12667_v59 }
 0xf12   :  { %17198 = vmatprep.mubr.msk.f32.mxu0 %vm938_vm2, %v12746_v30 }
 0xf14   :  { %v12825_v32 = vpop.f32.mrb[160].mxu1 }
 0xf15   :  { %v17096_v57 = vpop.f32.mrb[161].mxu1  ;;  %17199 = vmatmul.mubr.msk.f32.gmra.mrb[196].mxu0 %vm938_vm2, %v12825_v32 }
 0xf16   :  { %v12904_v11 = vpop.f32.mrb[174].mxu0 }
 0xf17   :  { %v17103_v43 = vpop.f32.mrb[175].mxu0  ;;  %17205 = vmatprep.mubr.msk.f32.mxu1 %vm938_vm2, %v12904_v11 }
 0xf1c   :  { %v12983_v12 = vpop.f32.mrb[162].mxu1 }
 0xf1d   :  { %v17110_v50 = vpop.f32.mrb[163].mxu1  ;;  %17206 = vmatmul.mubr.msk.f32.vlgmr.msra.gmra.mrb[178].mxu1 %vm938_vm2, %v12983_v12 }
 0xf1e   :  { %v13062_v60 = vpop.f32.mrb[176].mxu0 }
 0xf1f   :  { %v17117_v8 = vpop.f32.mrb[177].mxu0  ;;  %17208 = vmatprep.mubr.msk.f32.mxu1 %vm938_vm2, %v13062_v60 }
 0xf22   :  { %v13220_v22 = vpop.f32.mrb[178].mxu0 }
 0xf23   :  { %v17131_v1 = vpop.f32.mrb[179].mxu0 }
 0xf24   :  { %v13141_v0 = vpop.f32.mrb[164].mxu1 }
 0xf25   :  { %v17124_v35 = vpop.f32.mrb[165].mxu1  ;;  %17209 = vmatmul.mubr.msk.f32.gmra.mrb[180].mxu1 %vm938_vm2, %v13141_v0 }
 0xf26   :  { %17211 = vmatprep.mubr.msk.f32.mxu1 %vm938_vm2, %v13220_v22 }
 0xf2c   :  { %v13299_v45 = vpop.f32.mrb[166].mxu1 }
 0xf2d   :  { %v17138_v34 = vpop.f32.mrb[167].mxu1  ;;  %17212 = vmatmul.mubr.msk.f32.gmra.mrb[182].mxu1 %vm938_vm2, %v13299_v45 }
 0xf2e   :  { %v13378_v5 = vpop.f32.mrb[180].mxu0 }
 0xf2f   :  { %v17145_v24 = vpop.f32.mrb[181].mxu0  ;;  %17214 = vmatprep.mubr.msk.f32.mxu1 %vm938_vm2, %v13378_v5 }
 0xf30   :  { %v13457_v58 = vpop.f32.mrb[168].mxu1 }
 0xf31   :  { %v17152_v16 = vpop.f32.mrb[169].mxu1  ;;  %17215 = vmatmul.mubr.msk.f32.gmra.mrb[184].mxu1 %vm938_vm2, %v13457_v58 }
 0xf42   :  { %v17159_v18 = vpop.f32.mrb[182].mxu0 }
 0xf43   :  { %v13560_v61 = vpop.f32.mrb[183].mxu0  ;;  %v13993_v2 = vsel %vm435_vm6, %v17159_v18, 0.0 }
 0xf44   :  { %v13986_v9 = vsel %vm435_vm6, %v13560_v61, 0.0 }
 0xf4f   :  { %v17162_v28 = vpop.f32.mrb[184].mxu0 }
 0xf50   :  { %v13570_v31 = vpop.f32.mrb[185].mxu0  ;;  %v14007_v7 = vsel %vm435_vm6, %v17162_v28, 0.0 }
 0xf51   :  { %v14000_v40 = vsel %vm435_vm6, %v13570_v31, 0.0  ;;  %v22253_v31 = vld [vmem:[#allocation7 + $0x10] sm:$0xff] }
 0xf57   :  { %v17165_v4 = vpop.f32.mrb[186].mxu0 }
 0xf58   :  { %v13580_v29 = vpop.f32.mrb[187].mxu0  ;;  %v14021_v36 = vsel %vm435_vm6, %v17165_v4, 0.0  ;;  %v22782_v4 = vld [vmem:[#allocation40_spill] sm:$0xff] }
 0xf59   :  { %v14014_v26 = vsel %vm435_vm6, %v13580_v29, 0.0  ;;  %v14045_v29 = vrot.slane %v22253_v31, %v22782_v4 }
 0xf5f   :  { %v17168_v48 = vpop.f32.mrb[188].mxu0 }
 0xf60   :  { %v13590_v46 = vpop.f32.mrb[189].mxu0  ;;  %v14035_v62 = vsel %vm435_vm6, %v17168_v48, 0.0 }
 0xf61   :  { %v14028_v42 = vsel %vm435_vm6, %v13590_v46, 0.0 }
 0xfa0   :  { %v17175_v25 = vpop.f32.mrb[170].mxu1 }
 0xfa1   :  { %v13994_v27 = vsel %vm435_vm6, %v17175_v25, 0.0  ;;  %v13689_v19 = vpop.f32.mrb[171].mxu1 }
 0xfa2   :  { %v13995_v6 = vadd.f32 %v13994_v27, %v13993_v2  ;;  %v13987_v38 = vsel %vm435_vm6, %v13689_v19, 0.0 }
 0xfa3   :  { %v13988_v51 = vadd.f32 %v13987_v38, %v13986_v9 }
 0xfa9   :  { %v17178_v47 = vpop.f32.mrb[172].mxu1 }
 0xfaa   :  { %v14008_v20 = vsel %vm435_vm6, %v17178_v47, 0.0  ;;  %v13699_v52 = vpop.f32.mrb[173].mxu1 }
 0xfab   :  { %v14009_v37 = vadd.f32 %v14008_v20, %v14007_v7  ;;  %v14001_v15 = vsel %vm435_vm6, %v13699_v52, 0.0 }
 0xfac   :  { %v14002_v56 = vadd.f32 %v14001_v15, %v14000_v40 }
 0xfb1   :  { %v17181_v23 = vpop.f32.mrb[174].mxu1 }
 0xfb2   :  { %v14022_v44 = vsel %vm435_vm6, %v17181_v23, 0.0  ;;  %v13709_v21 = vpop.f32.mrb[175].mxu1 }
 0xfb3   :  { %v14023_v41 = vadd.f32 %v14022_v44, %v14021_v36  ;;  %v14015_v55 = vsel %vm435_vm6, %v13709_v21, 0.0  ;;  %v22785_v21 = vld [vmem:[#allocation60_spill] sm:$0xff] }
 0xfb4   :  { %v14016_v33 = vadd.f32 %v14015_v55, %v14014_v26 }
 0xfb9   :  { %v17184_v49 = vpop.f32.mrb[176].mxu1 }
 0xfba   :  { %v14036_v14 = vsel %vm435_vm6, %v17184_v49, 0.0  ;;  %v13719_v10 = vpop.f32.mrb[177].mxu1 }
 0xfbb   :  { %v14037_v3 = vadd.f32 %v14036_v14, %v14035_v62  ;;  %v14029_v54 = vsel %vm435_vm6, %v13719_v10, 0.0  ;;  %v22786_v62 = vld [vmem:[#allocation58_spill] sm:$0xff] }
 0xfbc   :  { %v14030_v53 = vadd.f32 %v14029_v54, %v14028_v42 }
 0xfc1   :  { %v17191_v30 = vpop.f32.mrb[190].mxu0 }
 0xfc2   :  { %v13996_v17 = vsel %vm435_vm6, %v17191_v30, 0.0  ;;  %v13818_v59 = vpop.f32.mrb[191].mxu0 }
 0xfc3   :  { %v13997_v39 = vadd.f32 %v13996_v17, %v13995_v6  ;;  %v13989_v32 = vsel %vm435_vm6, %v13818_v59, 0.0  ;;  %v22783_v6 = vld [vmem:[#allocation53_spill] sm:$0xff] }
 0xfc4   :  { %v13990_v57 = vadd.f32 %v13989_v32, %v13988_v51  ;;  %v22784_v51 = vld [vmem:[#allocation56_spill] sm:$0xff] }
 0xfc9   :  { %v17194_v11 = vpop.f32.mrb[192].mxu0 }
 0xfca   :  { %v14010_v43 = vsel %vm435_vm6, %v17194_v11, 0.0  ;;  %v13828_v12 = vpop.f32.mrb[193].mxu0  ;;  %v22787_v11 = vld [vmem:[#allocation45_spill] sm:$0xff] }
 0xfcb   :  { %v14011_v50 = vadd.f32 %v14010_v43, %v14009_v37  ;;  %v14003_v60 = vsel %vm435_vm6, %v13828_v12, 0.0 }
 0xfcc   :  { %v14004_v8 = vadd.f32 %v14003_v60, %v14002_v56 }
 0xfe4   :  { %v17197_v22 = vpop.f32.mrb[194].mxu0 }
 0xfe5   :  { %v14024_v1 = vsel %vm435_vm6, %v17197_v22, 0.0  ;;  %v13838_v0 = vpop.f32.mrb[195].mxu0 }
 0xfe6   :  { %v14025_v35 = vadd.f32 %v14024_v1, %v14023_v41  ;;  %v14017_v45 = vsel %vm435_vm6, %v13838_v0, 0.0 }
 0xfe7   :  { %v14018_v34 = vadd.f32 %v14017_v45, %v14016_v33 }
 0xfe8   :  { %v17200_v5 = vpop.f32.mrb[196].mxu0 }
 0xfe9   :  { %v14038_v24 = vsel %vm435_vm6, %v17200_v5, 0.0  ;;  %v13848_v58 = vpop.f32.mrb[197].mxu0 }
 0xfea   :  { %v14039_v16 = vadd.f32 %v14038_v24, %v14037_v3  ;;  %v14031_v18 = vsel %vm435_vm6, %v13848_v58, 0.0 }
 0xfeb   :  { %v14032_v61 = vadd.f32 %v14031_v18, %v14030_v53 }
 0xff0   :  { %v17207_v28 = vpop.f32.mrb[178].mxu1 }
 0xff1   :  { %v13998_v48 = vsel %vm435_vm6, %v17207_v28, 0.0  ;;  %v13947_v46 = vpop.f32.mrb[179].mxu1 }
 0xff2   :  { %v13999_v25 = vadd.f32 %v13998_v48, %v13997_v39  ;;  %v13991_v2 = vsel %vm435_vm6, %v13947_v46, 0.0 }
 0xff3   :  { %v13992_v27 = vadd.f32 %v13991_v2, %v13990_v57 }
 0xff4   :  { %v14047_v19 = vadd.f32 %v14045_v29, %v13999_v25 }
 0xff5   :  { %v14046_v9 = vadd.f32 %v14045_v29, %v13992_v27 }
 0xff6   :  { %v14055_v38 = vadd.f32 %v14047_v19, %v22783_v6 }
 0xff7   :  { %v14054_v47 = vadd.f32 %v14046_v9, %v22784_v51 }
 0xff8   :  { %v17210_v7 = vpop.f32.mrb[180].mxu1  ;;  %v14065_v20 = vsel %vm435_vm6, %v14055_v38, 0.0 }
 0xff9   :  { %v14012_v52 = vsel %vm435_vm6, %v17210_v7, 0.0  ;;  %v13957_v40 = vpop.f32.mrb[181].mxu1  ;;  %14066 = vadd.xlane.f32.xlu1 %v14065_v20  ;;  %v14062_v37 = vsel %vm435_vm6, %v14054_v47, 0.0 }
 0xffa   :  { %v14013_v15 = vadd.f32 %v14012_v52, %v14011_v50  ;;  %v14005_v56 = vsel %vm435_vm6, %v13957_v40, 0.0  ;;  %14063 = vadd.xlane.f32.xlu0 %v14062_v37  ;;  %v22788_v50 = vld [vmem:[#allocation43_spill] sm:$0xff] }
 0xffb   :  { %v14006_v23 = vadd.f32 %v14005_v56, %v14004_v8 }
 0xffc   :  { %v14049_v36 = vadd.f32 %v14045_v29, %v14013_v15 }
 0xffd   :  { %v14048_v44 = vadd.f32 %v14045_v29, %v14006_v23 }
 0xffe   :  { %v14057_v14 = vadd.f32 %v14049_v36, %v22786_v62 }
 0xfff   :  { %v14056_v26 = vadd.f32 %v14048_v44, %v22785_v21 }
0x1000   :  { %v17213_v41 = vpop.f32.mrb[182].mxu1  ;;  %v14071_v39 = vsel %vm435_vm6, %v14057_v14, 0.0 }
0x1001   :  { %v14026_v55 = vsel %vm435_vm6, %v17213_v41, 0.0  ;;  %v13967_v33 = vpop.f32.mrb[183].mxu1  ;;  %v14068_v49 = vsel %vm435_vm6, %v14056_v26, 0.0 }
0x1002   :  { %v14027_v10 = vadd.f32 %v14026_v55, %v14025_v35  ;;  %v14019_v42 = vsel %vm435_vm6, %v13967_v33, 0.0  ;;  %14069 = vadd.xlane.f32.xlu0 %v14068_v49  ;;  %v22789_v35 = vld [vmem:[#allocation48_spill] sm:$0xff] }
0x1003   :  { %v14020_v3 = vadd.f32 %v14019_v42, %v14018_v34  ;;  %v22790_v34 = vld [vmem:[#allocation46_spill] sm:$0xff] }
0x1004   :  { %v14051_v54 = vadd.f32 %v14045_v29, %v14027_v10  ;;  %v17216_v53 = vpop.f32.mrb[184].mxu1 }
0x1005   :  { %v14050_v30 = vadd.f32 %v14045_v29, %v14020_v3  ;;  %v14040_v17 = vsel %vm435_vm6, %v17216_v53, 0.0  ;;  %v13977_v59 = vpop.f32.mrb[185].mxu1 }
0x1006   :  { %v14041_v32 = vadd.f32 %v14040_v17, %v14039_v16  ;;  %v14033_v57 = vsel %vm435_vm6, %v13977_v59, 0.0  ;;  %14072 = vadd.xlane.f32.xlu0 %v14071_v39  ;;  %v14059_v43 = vadd.f32 %v14051_v54, %v22787_v11  ;;  %v14191_v17 = vld [vmem:[#allocation6 + $0x40] sm:$0xff]  ;;  %v14192_v59 = vld [vmem:[#allocation6 + $0x48] sm:$0xff] }
0x1007   :  { %v14034_v12 = vadd.f32 %v14033_v57, %v14032_v61  ;;  %v14058_v60 = vadd.f32 %v14050_v30, %v22788_v50  ;;  %v17938_v39 = vpack.c.bf16 %v14192_v59, %v14191_v17  ;;  %v14194_v57 = vld [vmem:[#allocation6 + $0x58] sm:$0xff] }
0x1008   :  { %v14053_v8 = vadd.f32 %v14045_v29, %v14041_v32  ;;  %v14077_v22 = vsel %vm435_vm6, %v14059_v43, 0.0  ;;  %v14193_v32 = vld [vmem:[#allocation6 + $0x50] sm:$0xff] }
0x1009   :  { %v14052_v1 = vadd.f32 %v14045_v29, %v14034_v12  ;;  %v14074_v0 = vsel %vm435_vm6, %v14058_v60, 0.0  ;;  %17939 = vmatprep.subr.bf16.mxu0 %v17938_v39  ;;  %v17942_v11 = vpack.c.bf16 %v14194_v57, %v14193_v32  ;;  %v14196_v12 = vld [vmem:[#allocation6 + $0x68] sm:$0xff] }
0x100a   :  { %14078 = vadd.xlane.f32.xlu0 %v14077_v22  ;;  %14075 = vadd.xlane.f32.xlu1 %v14074_v0  ;;  %v14061_v45 = vadd.f32 %v14053_v8, %v22789_v35  ;;  %v14198_v8 = vld [vmem:[#allocation6 + $0x78] sm:$0xff]  ;;  %v15316_v0 = vld [vmem:[%s22534_s9 + $0x88] sm:$0xff]  ;;  %v15317_v35 = vld [vmem:[%s22534_s9 + $0x90] sm:$0xff] }
0x100b   :  { %v14060_v5 = vadd.f32 %v14052_v1, %v22790_v34  ;;  %17941 = vmatpush3.bf16.msra.mxu0 %v17938_v39  ;;  %v15315_v1 = vld [vmem:[%s22534_s9 + $0x80] sm:$0xff]  ;;  %v15318_v34 = vld [vmem:[%s22534_s9 + $0x98] sm:$0xff] }
0x100c   :  { %v14083_v24 = vsel %vm435_vm6, %v14061_v45, 0.0  ;;  %17943 = vmatprep.subr.bf16.mxu0 %v17942_v11 }
0x100d   :  { %v14080_v58 = vsel %vm435_vm6, %v14060_v5, 0.0 }
0x100e   :  { %14084 = vadd.xlane.f32.xlu0 %v14083_v24  ;;  %14081 = vadd.xlane.f32.xlu1 %v14080_v58  ;;  %v15319_v24 = vld [vmem:[%s22534_s9 + $0xa0] sm:$0xff]  ;;  %v15320_v58 = vld [vmem:[%s22534_s9 + $0xa8] sm:$0xff] }
0x100f   :  { %17945 = vmatpush3.bf16.msra.mxu0 %v17942_v11 }
0x1086   :  { %v14067_v16 = vpop.xlane.xlu1 %14066 }
0x1087   :  { %v14087_v18 = vmul.f32 0.015625, %v14067_v16  ;;  %v14064_v61 = vpop.xlane.xlu0 %14063  ;;  %v17962_v16 = vpack.c.bf16 %v15320_v58, %v15319_v24 }
0x1088   :  { %v14086_v28 = vmul.f32 0.015625, %v14064_v61  ;;  %v15322_v61 = vld [vmem:[%s22534_s9 + $0xb8] sm:$0xff] }
0x1089   :  { %v22281_v48 = vsub.f32 %v14055_v38, %v14087_v18  ;;  %v15321_v18 = vld [vmem:[%s22534_s9 + $0xb0] sm:$0xff] }
0x108a   :  { %v22283_v29 = vsub.f32 %v14054_v47, %v14086_v28  ;;  %v17966_v28 = vpack.c.bf16 %v15322_v61, %v15321_v18 }
0x108b   :  { %v14103_v46 = vmul.f32 %v22281_v48, %v22281_v48 }
0x108c   :  { %v14102_v25 = vmul.f32 %v22283_v29, %v22283_v29 }
0x108d   :  { %v14113_v2 = vsel %vm435_vm6, %v14103_v46, 0.0  ;;  %v15323_v46 = vld [vmem:[%s22534_s9 + $0xc0] sm:$0xff] }
0x108e   :  { %14114 = vadd.xlane.f32.xlu0 %v14113_v2  ;;  %v14110_v27 = vsel %vm435_vm6, %v14102_v25, 0.0  ;;  %v15324_v25 = vld [vmem:[%s22534_s9 + $0xc8] sm:$0xff] }
0x108f   :  { %v14070_v19 = vpop.xlane.xlu0 %14069  ;;  %14111 = vadd.xlane.f32.xlu1 %v14110_v27  ;;  %v17970_v2 = vpack.c.bf16 %v15324_v25, %v15323_v46  ;;  %v15325_v27 = vld [vmem:[%s22534_s9 + $0xd0] sm:$0xff] }
0x1090   :  { %v14088_v9 = vmul.f32 0.015625, %v14070_v19  ;;  %v15326_v19 = vld [vmem:[%s22534_s9 + $0xd8] sm:$0xff] }
0x1092   :  { %v22291_v6 = vsub.f32 %v14056_v26, %v14088_v9  ;;  %v17974_v9 = vpack.c.bf16 %v15326_v19, %v15325_v27 }
0x1093   :  { %v14073_v38 = vpop.xlane.xlu0 %14072 }
0x1094   :  { %v14089_v51 = vmul.f32 0.015625, %v14073_v38  ;;  %v14104_v47 = vmul.f32 %v22291_v6, %v22291_v6  ;;  %v15327_v38 = vld [vmem:[%s22534_s9 + $0xe0] sm:$0xff] }
0x1096   :  { %v22295_v7 = vsub.f32 %v14057_v14, %v14089_v51  ;;  %v14116_v20 = vsel %vm435_vm6, %v14104_v47, 0.0  ;;  %v15328_v51 = vld [vmem:[%s22534_s9 + $0xe8] sm:$0xff] }
0x1097   :  { %v14079_v52 = vpop.xlane.xlu0 %14078  ;;  %v14076_v40 = vpop.xlane.xlu1 %14075  ;;  %14117 = vadd.xlane.f32.xlu1 %v14116_v20  ;;  %v17978_v47 = vpack.c.bf16 %v15328_v51, %v15327_v38 }
0x1098   :  { %v14091_v37 = vmul.f32 0.015625, %v14079_v52  ;;  %v14090_v15 = vmul.f32 0.015625, %v14076_v40  ;;  %v14105_v56 = vmul.f32 %v22295_v7, %v22295_v7 }
0x109a   :  { %v22300_v23 = vsub.f32 %v14059_v43, %v14091_v37  ;;  %v22302_v36 = vsub.f32 %v14058_v60, %v14090_v15  ;;  %v14119_v44 = vsel %vm435_vm6, %v14105_v56, 0.0  ;;  %v14195_v43 = vld [vmem:[#allocation6 + $0x60] sm:$0xff]  ;;  %v14197_v60 = vld [vmem:[#allocation6 + $0x70] sm:$0xff] }
0x109b   :  { %14120 = vadd.xlane.f32.xlu0 %v14119_v44  ;;  %v14085_v21 = vpop.xlane.xlu0 %14084  ;;  %v14082_v26 = vpop.xlane.xlu1 %14081  ;;  %v17946_v50 = vpack.c.bf16 %v14196_v12, %v14195_v43  ;;  %v17950_v22 = vpack.c.bf16 %v14198_v8, %v14197_v60 }
0x109c   :  { %v14093_v41 = vmul.f32 0.015625, %v14085_v21  ;;  %v14092_v55 = vmul.f32 0.015625, %v14082_v26  ;;  %v14107_v33 = vmul.f32 %v22300_v23, %v22300_v23  ;;  %v14106_v49 = vmul.f32 %v22302_v36, %v22302_v36 }
0x109d   :  { %17947 = vmatprep.subr.bf16.mxu0 %v17946_v50 }
0x109e   :  { %v22309_v62 = vsub.f32 %v14061_v45, %v14093_v41  ;;  %v22311_v14 = vsub.f32 %v14060_v5, %v14092_v55  ;;  %v14125_v10 = vsel %vm435_vm6, %v14107_v33, 0.0  ;;  %v14122_v42 = vsel %vm435_vm6, %v14106_v49, 0.0  ;;  %17949 = vmatpush3.bf16.msra.mxu0 %v17946_v50  ;;  %v22791_v55 = vld [vmem:[#allocation39_spill] sm:$0xff] }
0x109f   :  { %14126 = vadd.xlane.f32.xlu0 %v14125_v10  ;;  %14123 = vadd.xlane.f32.xlu1 %v14122_v42  ;;  %v17954_v45 = vpack.c.bf16 %v15316_v0, %v15315_v1  ;;  %v17958_v5 = vpack.c.bf16 %v15318_v34, %v15317_v35  ;;  %v14169_v33 = vrot.slane %v22253_v31, %v22791_v55 }
0x10a0   :  { %v14109_v3 = vmul.f32 %v22309_v62, %v22309_v62  ;;  %v14108_v54 = vmul.f32 %v22311_v14, %v22311_v14  ;;  %17951 = vmatprep.subr.bf16.mxu0 %v17950_v22 }
0x10a1   :  { %17955 = vmatprep.subr.bf16.mxu1 %v17954_v45 }
0x10a2   :  { %v14131_v53 = vsel %vm435_vm6, %v14109_v3, 0.0  ;;  %v14128_v30 = vsel %vm435_vm6, %v14108_v54, 0.0  ;;  %17953 = vmatpush3.bf16.msra.mxu0 %v17950_v22  ;;  %17957 = vmatpush3.bf16.msra.mxu1 %v17954_v45 }
0x10a3   :  { %14132 = vadd.xlane.f32.xlu0 %v14131_v53  ;;  %14129 = vadd.xlane.f32.xlu1 %v14128_v30  ;;  %v22792_v53 = vld [vmem:[#allocation17_spill] sm:$0xff] }
0x10a4   :  { %17986 = vmatprep.subr.bf16.mxu0 %v22692_v63  ;;  %17959 = vmatprep.subr.bf16.mxu1 %v17958_v5  ;;  %v14181_v30 = vrot.slane %v22253_v31, %v22792_v53 }
0x10a6   :  { %17961 = vmatpush3.bf16.msra.mxu1 %v17958_v5 }
0x10a7   :  { %17963 = vmatprep.subr.bf16.mxu1 %v17962_v16 }
0x10aa   :  { %17965 = vmatpush3.bf16.msra.mxu1 %v17962_v16 }
0x10ab   :  { %17967 = vmatprep.subr.bf16.mxu1 %v17966_v28 }
0x10ae   :  { %17969 = vmatpush3.bf16.msra.mxu1 %v17966_v28 }
0x10af   :  { %17971 = vmatprep.subr.bf16.mxu1 %v17970_v2 }
0x10b2   :  { %17973 = vmatpush3.bf16.msra.mxu1 %v17970_v2 }
0x10b3   :  { %17975 = vmatprep.subr.bf16.mxu1 %v17974_v9 }
0x10b6   :  { %17977 = vmatpush3.bf16.msra.mxu1 %v17974_v9 }
0x10b7   :  { %17979 = vmatprep.subr.bf16.mxu1 %v17978_v47 }
0x10ba   :  { %17981 = vmatpush3.bf16.msra.mxu1 %v17978_v47 }
0x111b   :  { %v14115_v20 = vpop.xlane.xlu0 %14114 }
0x111c   :  { %v14135_v52 = vmul.f32 0.015625, %v14115_v20  ;;  %v14112_v40 = vpop.xlane.xlu1 %14111 }
0x111d   :  { %v14134_v37 = vmul.f32 0.015625, %v14112_v40 }
0x111e   :  { %v14143_v15 = vadd.f32 1e-05, %v14135_v52 }
0x111f   :  { %v14142_v56 = vadd.f32 1e-05, %v14134_v37  ;;  %v22793_v37 = vld [vmem:[#allocation51_spill] sm:$0xff] }
0x1120   :  { %18893 = vrsqrt.f32 %v14143_v15  ;;  %v14202_v15 = vrot.slane %v22253_v31, %v22793_v37 }
0x1121   :  { %18895 = vrsqrt.f32 %v14142_v56 }
0x1124   :  { %v14118_v44 = vpop.xlane.xlu1 %14117 }
0x1125   :  { %v14136_v21 = vmul.f32 0.015625, %v14118_v44 }
0x1127   :  { %v14144_v26 = vadd.f32 1e-05, %v14136_v21 }
0x1128   :  { %v14121_v41 = vpop.xlane.xlu0 %14120 }
0x1129   :  { %18897 = vrsqrt.f32 %v14144_v26  ;;  %v14137_v49 = vmul.f32 0.015625, %v14121_v41 }
0x112a   :  { %v18894_v10 = vpop.eup %18893 }
0x112b   :  { %v18896_v42 = vpop.eup %18895  ;;  %v14159_v3 = vmul.f32 %v18894_v10, %v22281_v48  ;;  %v14145_v54 = vadd.f32 1e-05, %v14137_v49 }
0x112c   :  { %v14127_v17 = vpop.xlane.xlu0 %14126  ;;  %v14124_v59 = vpop.xlane.xlu1 %14123  ;;  %v14158_v39 = vmul.f32 %v18896_v42, %v22283_v29 }
0x112d   :  { %v14171_v32 = vmul.f32 %v14169_v33, %v14159_v3  ;;  %18899 = vrsqrt.f32 %v14145_v54  ;;  %v14139_v57 = vmul.f32 0.015625, %v14127_v17  ;;  %v14138_v11 = vmul.f32 0.015625, %v14124_v59 }
0x112e   :  { %v14170_v43 = vmul.f32 %v14169_v33, %v14158_v39 }
0x112f   :  { %v14147_v12 = vadd.f32 1e-05, %v14139_v57  ;;  %v14146_v50 = vadd.f32 1e-05, %v14138_v11  ;;  %v22372_v48 = vadd.f32 %v14181_v30, %v14171_v32 }
0x1130   :  { %v14133_v60 = vpop.xlane.xlu0 %14132  ;;  %v14130_v8 = vpop.xlane.xlu1 %14129  ;;  %v22370_v22 = vadd.f32 %v14181_v30, %v14170_v43 }
0x1131   :  { %18901 = vrsqrt.f32 %v14147_v12  ;;  %v14141_v1 = vmul.f32 0.015625, %v14133_v60  ;;  %v14140_v0 = vmul.f32 0.015625, %v14130_v8 }
0x1132   :  { %18903 = vrsqrt.f32 %v14146_v50  ;;  %17233 = vmatprep.mubr.msk.f32.mxu0 %vm435_vm6, %v22370_v22 }
0x1133   :  { %v18898_v29 = vpop.eup %18897  ;;  %v14149_v35 = vadd.f32 1e-05, %v14141_v1  ;;  %v14148_v45 = vadd.f32 1e-05, %v14140_v0  ;;  %17234 = vmatmul.mubr.msk.f32.vlgmr.msra.gmra.mrb[198].mxu0 %vm435_vm6, %v22372_v48  ;;  %v22794_v1 = vld [vmem:[#allocation41_spill] sm:$0xff] }
0x1134   :  { %v14160_v34 = vmul.f32 %v18898_v29, %v22291_v6  ;;  %v14360_v0 = vrot.slane %v22253_v31, %v22794_v1 }
0x1135   :  { %18905 = vrsqrt.f32 %v14149_v35 }
0x1136   :  { %18907 = vrsqrt.f32 %v14148_v45  ;;  %v14172_v5 = vmul.f32 %v14169_v33, %v14160_v34 }
0x1137   :  { %v18900_v24 = vpop.eup %18899 }
0x1138   :  { %v22379_v58 = vadd.f32 %v14181_v30, %v14172_v5  ;;  %v14161_v16 = vmul.f32 %v18900_v24, %v22295_v7 }
0x113a   :  { %17236 = vmatprep.mubr.msk.f32.mxu0 %vm435_vm6, %v22379_v58  ;;  %v14173_v18 = vmul.f32 %v14169_v33, %v14161_v16 }
0x113b   :  { %v18902_v61 = vpop.eup %18901 }
0x113c   :  { %v18904_v28 = vpop.eup %18903  ;;  %v22384_v46 = vadd.f32 %v14181_v30, %v14173_v18  ;;  %v14163_v25 = vmul.f32 %v18902_v61, %v22300_v23 }
0x113d   :  { %v14162_v6 = vmul.f32 %v18904_v28, %v22302_v36 }
0x113e   :  { %17237 = vmatmul.mubr.msk.f32.gmra.mrb[200].mxu0 %vm435_vm6, %v22384_v46  ;;  %v14175_v2 = vmul.f32 %v14169_v33, %v14163_v25 }
0x113f   :  { %v18906_v27 = vpop.eup %18905  ;;  %v14174_v19 = vmul.f32 %v14169_v33, %v14162_v6 }
0x1140   :  { %v18908_v9 = vpop.eup %18907  ;;  %v22390_v7 = vadd.f32 %v14181_v30, %v14175_v2  ;;  %v14165_v38 = vmul.f32 %v18906_v27, %v22309_v62  ;;  %v15329_v62 = vld [vmem:[%s22534_s9 + $0xf0] sm:$0xff] }
0x1141   :  { %v22393_v51 = vadd.f32 %v14181_v30, %v14174_v19  ;;  %v14164_v47 = vmul.f32 %v18908_v9, %v22311_v14  ;;  %v15330_v14 = vld [vmem:[%s22534_s9 + $0xf8] sm:$0xff] }
0x1142   :  { %v14177_v20 = vmul.f32 %v14169_v33, %v14165_v38  ;;  %v17982_v40 = vpack.c.bf16 %v15330_v14, %v15329_v62 }
0x1143   :  { %17239 = vmatprep.mubr.msk.f32.mxu0 %vm435_vm6, %v22393_v51  ;;  %v14176_v23 = vmul.f32 %v14169_v33, %v14164_v47 }
0x1144   :  { %17240 = vmatmul.mubr.msk.f32.gmra.mrb[202].mxu0 %vm435_vm6, %v22390_v7  ;;  %v22400_v36 = vadd.f32 %v14181_v30, %v14177_v20  ;;  %17983 = vmatprep.subr.bf16.mxu1 %v17982_v40 }
0x1145   :  { %v22402_v52 = vadd.f32 %v14181_v30, %v14176_v23  ;;  %17985 = vmatpush3.bf16.msra.mxu1 %v17982_v40 }
0x1146   :  { %18010 = vmatprep.subr.bf16.mxu1 %v22692_v63 }
0x1147   :  { %17242 = vmatprep.mubr.msk.f32.mxu0 %vm435_vm6, %v22402_v52 }
0x1148   :  { %17243 = vmatmul.mubr.msk.f32.gmra.mrb[204].mxu0 %vm435_vm6, %v22400_v36 }
0x1149   :  { %17305 = vmatprep.mubr.msk.f32.mxu0 %vm19100_vm1, %v22691_v13 }
0x1206   :  { %v17235_v56 = vpop.f32.mrb[198].mxu0 }
0x1207   :  { %v14299_v44 = vadd.f32 %v17235_v56, %v14202_v15  ;;  %v14293_v21 = vpop.f32.mrb[199].mxu0 }
0x1208   :  { %v14294_v26 = vadd.f32 %v14293_v21, %v14202_v15 }
0x1209   :  { %v14333_v33 = vmax.f32 %v14299_v44, 0.0 }
0x120a   :  { %v14332_v41 = vmax.f32 %v14294_v26, 0.0 }
0x120c   :  { %17277 = vmatprep.mubr.f32.mxu1 %v14332_v41 }
0x120d   :  { %17278 = vmatmul.mubr.f32.vlgmr.msra.gmra.mrb[186].mxu1 %v14333_v33 }
0x1211   :  { %v17238_v49 = vpop.f32.mrb[200].mxu0 }
0x1212   :  { %v14309_v10 = vadd.f32 %v17238_v49, %v14202_v15  ;;  %v14303_v42 = vpop.f32.mrb[201].mxu0 }
0x1213   :  { %v14304_v3 = vadd.f32 %v14303_v42, %v14202_v15 }
0x1214   :  { %v14335_v53 = vmax.f32 %v14309_v10, 0.0 }
0x1215   :  { %v14334_v54 = vmax.f32 %v14304_v3, 0.0 }
0x1217   :  { %v17241_v30 = vpop.f32.mrb[202].mxu0  ;;  %17280 = vmatprep.mubr.f32.mxu1 %v14334_v54 }
0x1218   :  { %v14319_v17 = vadd.f32 %v17241_v30, %v14202_v15  ;;  %v14313_v59 = vpop.f32.mrb[203].mxu0  ;;  %17281 = vmatmul.mubr.f32.gmra.mrb[188].mxu1 %v14335_v53 }
0x1219   :  { %v14314_v39 = vadd.f32 %v14313_v59, %v14202_v15 }
0x121a   :  { %v14337_v11 = vmax.f32 %v14319_v17, 0.0 }
0x121b   :  { %v14336_v32 = vmax.f32 %v14314_v39, 0.0  ;;  %v17244_v57 = vpop.f32.mrb[204].mxu0 }
0x121c   :  { %v14329_v43 = vadd.f32 %v17244_v57, %v14202_v15  ;;  %v14323_v12 = vpop.f32.mrb[205].mxu0 }
0x121d   :  { %v14324_v50 = vadd.f32 %v14323_v12, %v14202_v15  ;;  %17283 = vmatprep.mubr.f32.mxu1 %v14336_v32 }
0x121e   :  { %17284 = vmatmul.mubr.f32.gmra.mrb[190].mxu1 %v14337_v11  ;;  %v14339_v8 = vmax.f32 %v14329_v43, 0.0 }
0x121f   :  { %v14338_v60 = vmax.f32 %v14324_v50, 0.0 }
0x1221   :  { %17286 = vmatprep.mubr.f32.mxu1 %v14338_v60 }
0x1222   :  { %17287 = vmatmul.mubr.f32.gmra.mrb[192].mxu1 %v14339_v8 }
0x1223   :  { %17343 = vmatprep.mubr.msk.f32.mxu1 %vm19100_vm1, %v22691_v13 }
0x12e0   :  { %v17279_v29 = vpop.f32.mrb[186].mxu1 }
0x12e1   :  { %v14433_v35 = vadd.f32 %v17279_v29, %v14360_v0  ;;  %v14427_v45 = vpop.f32.mrb[187].mxu1 }
0x12e2   :  { %v14428_v34 = vadd.f32 %v14427_v45, %v14360_v0 }
0x12e3   :  { %v14467_v5 = vadd.f32 %v14433_v35, %v22372_v48 }
0x12e4   :  { %v14466_v24 = vadd.f32 %v14428_v34, %v22370_v22 }
0x12e5   :  { %v14477_v16 = vsel %vm435_vm6, %v14467_v5, 0.0 }
0x12e6   :  { %14478 = vadd.xlane.f32.xlu0 %v14477_v16  ;;  %v14474_v18 = vsel %vm435_vm6, %v14466_v24, 0.0 }
0x12e7   :  { %14475 = vadd.xlane.f32.xlu1 %v14474_v18 }
0x12eb   :  { %v17282_v61 = vpop.f32.mrb[188].mxu1 }
0x12ec   :  { %v14443_v28 = vadd.f32 %v17282_v61, %v14360_v0  ;;  %v14437_v25 = vpop.f32.mrb[189].mxu1 }
0x12ed   :  { %v14438_v6 = vadd.f32 %v14437_v25, %v14360_v0 }
0x12ee   :  { %v14469_v2 = vadd.f32 %v14443_v28, %v22384_v46 }
0x12ef   :  { %v14468_v27 = vadd.f32 %v14438_v6, %v22379_v58 }
0x12f0   :  { %v14483_v19 = vsel %vm435_vm6, %v14469_v2, 0.0 }
0x12f1   :  { %v17285_v9 = vpop.f32.mrb[190].mxu1  ;;  %14484 = vadd.xlane.f32.xlu0 %v14483_v19  ;;  %v14480_v22 = vsel %vm435_vm6, %v14468_v27, 0.0 }
0x12f2   :  { %v14453_v48 = vadd.f32 %v17285_v9, %v14360_v0  ;;  %v14447_v38 = vpop.f32.mrb[191].mxu1  ;;  %14481 = vadd.xlane.f32.xlu1 %v14480_v22 }
0x12f3   :  { %v14448_v47 = vadd.f32 %v14447_v38, %v14360_v0 }
0x12f4   :  { %v14471_v20 = vadd.f32 %v14453_v48, %v22390_v7 }
0x12f5   :  { %v14470_v23 = vadd.f32 %v14448_v47, %v22393_v51  ;;  %v17288_v62 = vpop.f32.mrb[192].mxu1 }
0x12f6   :  { %v14463_v14 = vadd.f32 %v17288_v62, %v14360_v0  ;;  %v14457_v40 = vpop.f32.mrb[193].mxu1  ;;  %v14489_v46 = vsel %vm435_vm6, %v14471_v20, 0.0 }
0x12f7   :  { %v14458_v58 = vadd.f32 %v14457_v40, %v14360_v0  ;;  %14490 = vadd.xlane.f32.xlu0 %v14489_v46  ;;  %v14486_v15 = vsel %vm435_vm6, %v14470_v23, 0.0  ;;  %v7616_v46 = vld [vmem:[#allocation7 + $0x18] sm:$0xff] }
0x12f8   :  { %v14473_v56 = vadd.f32 %v14463_v14, %v22400_v36  ;;  %14487 = vadd.xlane.f32.xlu1 %v14486_v15  ;;  %v22795_v15 = vld [vmem:[#allocation16_spill] sm:$0xff] }
0x12f9   :  { %v14472_v44 = vadd.f32 %v14458_v58, %v22402_v52 }
0x12fa   :  { %v14495_v21 = vsel %vm435_vm6, %v14473_v56, 0.0 }
0x12fb   :  { %14496 = vadd.xlane.f32.xlu0 %v14495_v21  ;;  %v14492_v7 = vsel %vm435_vm6, %v14472_v44, 0.0 }
0x12fc   :  { %14493 = vadd.xlane.f32.xlu1 %v14492_v7 }
0x1373   :  { %v14479_v51 = vpop.xlane.xlu0 %14478 }
0x1374   :  { %v14499_v26 = vmul.f32 0.015625, %v14479_v51  ;;  %v14476_v41 = vpop.xlane.xlu1 %14475 }
0x1375   :  { %v14498_v33 = vmul.f32 0.015625, %v14476_v41  ;;  %v22797_v41 = vld [vmem:[#allocation28_spill] sm:$0xff] }
0x1376   :  { %v14507_v49 = vsub.f32 %v14467_v5, %v14499_v26 }
0x1377   :  { %v22439_v10 = vsub.f32 %v14466_v24, %v14498_v33  ;;  %v14593_v33 = vrot.slane %v7616_v46, %v22797_v41 }
0x1378   :  { %v14515_v42 = vmul.f32 %v14507_v49, %v14507_v49 }
0x1379   :  { %v14514_v36 = vmul.f32 %v22439_v10, %v22439_v10 }
0x137a   :  { %v14525_v3 = vsel %vm435_vm6, %v14515_v42, 0.0 }
0x137b   :  { %14526 = vadd.xlane.f32.xlu0 %v14525_v3  ;;  %v14522_v52 = vsel %vm435_vm6, %v14514_v36, 0.0 }
0x137c   :  { %14523 = vadd.xlane.f32.xlu1 %v14522_v52 }
0x137e   :  { %v14485_v54 = vpop.xlane.xlu0 %14484 }
0x137f   :  { %v14501_v53 = vmul.f32 0.015625, %v14485_v54  ;;  %v14482_v30 = vpop.xlane.xlu1 %14481 }
0x1380   :  { %v14500_v17 = vmul.f32 0.015625, %v14482_v30 }
0x1381   :  { %v22445_v59 = vsub.f32 %v14469_v2, %v14501_v53 }
0x1382   :  { %v22447_v39 = vsub.f32 %v14468_v27, %v14500_v17 }
0x1383   :  { %v14517_v32 = vmul.f32 %v22445_v59, %v22445_v59 }
0x1384   :  { %v14491_v57 = vpop.xlane.xlu0 %14490  ;;  %v14516_v11 = vmul.f32 %v22447_v39, %v22447_v39 }
0x1385   :  { %v14503_v43 = vmul.f32 0.015625, %v14491_v57  ;;  %v14488_v12 = vpop.xlane.xlu1 %14487  ;;  %v14531_v50 = vsel %vm435_vm6, %v14517_v32, 0.0 }
0x1386   :  { %v14502_v60 = vmul.f32 0.015625, %v14488_v12  ;;  %14532 = vadd.xlane.f32.xlu0 %v14531_v50  ;;  %v14528_v8 = vsel %vm435_vm6, %v14516_v11, 0.0 }
0x1387   :  { %v22455_v0 = vsub.f32 %v14471_v20, %v14503_v43  ;;  %14529 = vadd.xlane.f32.xlu1 %v14528_v8 }
0x1388   :  { %v22457_v29 = vsub.f32 %v14470_v23, %v14502_v60  ;;  %v14497_v35 = vpop.xlane.xlu0 %14496 }
0x1389   :  { %v14505_v45 = vmul.f32 0.015625, %v14497_v35  ;;  %v14494_v34 = vpop.xlane.xlu1 %14493  ;;  %v14519_v5 = vmul.f32 %v22455_v0, %v22455_v0 }
0x138a   :  { %v14504_v24 = vmul.f32 0.015625, %v14494_v34  ;;  %v14518_v16 = vmul.f32 %v22457_v29, %v22457_v29 }
0x138b   :  { %v22463_v18 = vsub.f32 %v14473_v56, %v14505_v45  ;;  %v14537_v61 = vsel %vm435_vm6, %v14519_v5, 0.0  ;;  %v22796_v56 = vsub.s32 7, %v22795_v15 }
0x138c   :  { %v22466_v28 = vsub.f32 %v14472_v44, %v14504_v24  ;;  %14538 = vadd.xlane.f32.xlu0 %v14537_v61  ;;  %v14534_v25 = vsel %vm435_vm6, %v14518_v16, 0.0 }
0x138d   :  { %14535 = vadd.xlane.f32.xlu1 %v14534_v25  ;;  %v14521_v6 = vmul.f32 %v22463_v18, %v22463_v18  ;;  %v14581_v44 = vrot.slane %v22253_v31, %v22796_v56 }
0x138e   :  { %v14520_v2 = vmul.f32 %v22466_v28, %v22466_v28 }
0x138f   :  { %v14543_v27 = vsel %vm435_vm6, %v14521_v6, 0.0 }
0x1390   :  { %14544 = vadd.xlane.f32.xlu0 %v14543_v27  ;;  %v14540_v19 = vsel %vm435_vm6, %v14520_v2, 0.0 }
0x1391   :  { %14541 = vadd.xlane.f32.xlu1 %v14540_v19 }
0x1408   :  { %v14527_v9 = vpop.xlane.xlu0 %14526 }
0x1409   :  { %v14547_v22 = vmul.f32 0.015625, %v14527_v9  ;;  %v14524_v48 = vpop.xlane.xlu1 %14523 }
0x140a   :  { %v14546_v38 = vmul.f32 0.015625, %v14524_v48 }
0x140b   :  { %v14555_v47 = vadd.f32 1e-05, %v14547_v22 }
0x140c   :  { %v14554_v20 = vadd.f32 1e-05, %v14546_v38 }
0x140d   :  { %18909 = vrsqrt.f32 %v14555_v47 }
0x140e   :  { %18911 = vrsqrt.f32 %v14554_v20 }
0x1413   :  { %v14533_v23 = vpop.xlane.xlu0 %14532 }
0x1414   :  { %v14549_v62 = vmul.f32 0.015625, %v14533_v23  ;;  %v14530_v14 = vpop.xlane.xlu1 %14529 }
0x1415   :  { %v14548_v40 = vmul.f32 0.015625, %v14530_v14 }
0x1416   :  { %v14557_v58 = vadd.f32 1e-05, %v14549_v62 }
0x1417   :  { %v18910_v21 = vpop.eup %18909  ;;  %v14556_v7 = vadd.f32 1e-05, %v14548_v40 }
0x1418   :  { %v18912_v51 = vpop.eup %18911  ;;  %v14571_v26 = vmul.f32 %v18910_v21, %v14507_v49  ;;  %18913 = vrsqrt.f32 %v14557_v58 }
0x1419   :  { %v14570_v42 = vmul.f32 %v18912_v51, %v22439_v10  ;;  %18915 = vrsqrt.f32 %v14556_v7  ;;  %v14539_v36 = vpop.xlane.xlu0 %14538 }
0x141a   :  { %v14551_v3 = vmul.f32 0.015625, %v14539_v36  ;;  %v14536_v52 = vpop.xlane.xlu1 %14535  ;;  %v14583_v54 = vmul.f32 %v14581_v44, %v14571_v26 }
0x141b   :  { %v14550_v53 = vmul.f32 0.015625, %v14536_v52  ;;  %v14582_v30 = vmul.f32 %v14581_v44, %v14570_v42  ;;  %v14707_v52 = vld [vmem:[#allocation9 + $0x8] sm:$0xff] }
0x141c   :  { %v14559_v17 = vadd.f32 1e-05, %v14551_v3  ;;  %v14595_v32 = vadd.f32 %v14593_v33, %v14583_v54  ;;  %v14706_v3 = vld [vmem:[#allocation9] sm:$0xff] }
0x141d   :  { %v14558_v57 = vadd.f32 1e-05, %v14550_v53  ;;  %v14545_v31 = vpop.xlane.xlu0 %14544  ;;  %v14594_v11 = vadd.f32 %v14593_v33, %v14582_v30  ;;  %v17999_v54 = vpack.c.bf16 %v14707_v52, %v14706_v3  ;;  %v14708_v53 = vld [vmem:[#allocation9 + $0x10] sm:$0xff]  ;;  %v14709_v30 = vld [vmem:[#allocation9 + $0x18] sm:$0xff] }
0x141e   :  { %18917 = vrsqrt.f32 %v14559_v17  ;;  %v14553_v43 = vmul.f32 0.015625, %v14545_v31  ;;  %v14542_v49 = vpop.xlane.xlu1 %14541  ;;  %v18002_v17 = vpack.c.bf16 %v14709_v30, %v14708_v53 }
0x141f   :  { %18919 = vrsqrt.f32 %v14558_v57  ;;  %v14552_v12 = vmul.f32 0.015625, %v14542_v49  ;;  %v17987_v50 = vpack.c.bf16 %v14595_v32, %v14594_v11  ;;  %v14710_v32 = vld [vmem:[#allocation9 + $0x20] sm:$0xff]  ;;  %v14711_v57 = vld [vmem:[#allocation9 + $0x28] sm:$0xff]  ;;  %v14712_v11 = vld [vmem:[#allocation9 + $0x30] sm:$0xff] }
0x1420   :  { %v14561_v60 = vadd.f32 1e-05, %v14553_v43  ;;  %v18005_v31 = vpack.c.bf16 %v14711_v57, %v14710_v32  ;;  %v14713_v43 = vld [vmem:[#allocation9 + $0x38] sm:$0xff] }
0x1421   :  { %v14560_v10 = vadd.f32 1e-05, %v14552_v12  ;;  %17988 = vmatpush3.bf16.msra.mxu0 %v17987_v50  ;;  %v18008_v49 = vpack.c.bf16 %v14713_v43, %v14712_v11 }
0x1422   :  { %v18914_v8 = vpop.eup %18913  ;;  %18921 = vrsqrt.f32 %v14561_v60  ;;  %17989 = vmatprep.subr.bf16.mxu0 %v22692_v63 }
0x1423   :  { %v18916_v35 = vpop.eup %18915  ;;  %v14573_v45 = vmul.f32 %v18914_v8, %v22445_v59  ;;  %18923 = vrsqrt.f32 %v14560_v10  ;;  %v18949_v10 = vld [vmem:[#allocation10] sm:$0xff] }
0x1424   :  { %v14572_v34 = vmul.f32 %v18916_v35, %v22447_v39  ;;  %v14699_v8 = vrot.slane %v18949_v10, %v22797_v41 }
0x1425   :  { %v14585_v5 = vmul.f32 %v14581_v44, %v14573_v45 }
0x1426   :  { %v14584_v24 = vmul.f32 %v14581_v44, %v14572_v34  ;;  %v22798_v34 = vld [vmem:[#allocation26_spill] sm:$0xff] }
0x1427   :  { %v14597_v16 = vadd.f32 %v14593_v33, %v14585_v5  ;;  %v14704_v5 = vrot.slane %v18949_v10, %v22798_v34 }
0x1428   :  { %v18918_v61 = vpop.eup %18917  ;;  %v14596_v25 = vadd.f32 %v14593_v33, %v14584_v24 }
0x1429   :  { %v18920_v6 = vpop.eup %18919  ;;  %v14575_v2 = vmul.f32 %v18918_v61, %v22455_v0  ;;  %v14717_v61 = vrot.slane %v18949_v10, %v22793_v37  ;;  %v14818_v37 = vld [vmem:[#allocation9 + $0x50] sm:$0xff] }
0x142a   :  { %v14574_v27 = vmul.f32 %v18920_v6, %v22457_v29  ;;  %v17990_v19 = vpack.c.bf16 %v14597_v16, %v14596_v25 }
0x142b   :  { %v14587_v9 = vmul.f32 %v14581_v44, %v14575_v2 }
0x142c   :  { %v18922_v22 = vpop.eup %18921  ;;  %17991 = vmatpush3.bf16.msra.mxu0 %v17990_v19  ;;  %v14586_v48 = vmul.f32 %v14581_v44, %v14574_v27 }
0x142d   :  { %v18924_v38 = vpop.eup %18923  ;;  %v14577_v59 = vmul.f32 %v18922_v22, %v22463_v18  ;;  %17992 = vmatprep.subr.bf16.mxu0 %v22692_v63  ;;  %v14599_v39 = vadd.f32 %v14593_v33, %v14587_v9  ;;  %v14602_v18 = vld [vmem:[%s22529_s4] sm:$0xff] }
0x142e   :  { %v14576_v47 = vmul.f32 %v18924_v38, %v22466_v28  ;;  %v14598_v20 = vadd.f32 %v14593_v33, %v14586_v48 }
0x142f   :  { %v14589_v23 = vmul.f32 %v14581_v44, %v14577_v59  ;;  %v14816_v59 = vld [vmem:[#allocation9 + $0x40] sm:$0xff] }
0x1430   :  { %v17993_v62 = vpack.c.bf16 %v14599_v39, %v14598_v20  ;;  %v14588_v14 = vmul.f32 %v14581_v44, %v14576_v47  ;;  %v14817_v39 = vld [vmem:[#allocation9 + $0x48] sm:$0xff]  ;;  %v14819_v20 = vld [vmem:[#allocation9 + $0x58] sm:$0xff] }
0x1431   :  { %v14601_v0 = vadd.f32 %v14593_v33, %v14589_v23  ;;  %v18011_v47 = vpack.c.bf16 %v14817_v39, %v14816_v59  ;;  %v18014_v23 = vpack.c.bf16 %v14819_v20, %v14818_v37 }
0x1432   :  { %17994 = vmatpush3.bf16.msra.mxu0 %v17993_v62  ;;  %v14600_v29 = vadd.f32 %v14593_v33, %v14588_v14  ;;  %v14820_v62 = vld [vmem:[#allocation9 + $0x60] sm:$0xff]  ;;  %v14821_v14 = vld [vmem:[#allocation9 + $0x68] sm:$0xff] }
0x1433   :  { %17995 = vmatprep.subr.bf16.mxu0 %v22692_v63  ;;  %18012 = vmatpush3.bf16.msra.mxu1 %v18011_v47 }
0x1434   :  { %v17996_v40 = vpack.c.bf16 %v14601_v0, %v14600_v29  ;;  %18013 = vmatprep.subr.bf16.mxu1 %v22692_v63  ;;  %v18017_v0 = vpack.c.bf16 %v14821_v14, %v14820_v62  ;;  %v14822_v29 = vld [vmem:[#allocation9 + $0x70] sm:$0xff] }
0x1436   :  { %17997 = vmatpush3.bf16.msra.mxu0 %v17996_v40  ;;  %v14823_v40 = vld [vmem:[#allocation9 + $0x78] sm:$0xff] }
0x1437   :  { %17998 = vmatprep.subr.bf16.mxu0 %v22692_v63  ;;  %18015 = vmatpush3.bf16.msra.mxu1 %v18014_v23 }
0x1438   :  { %18016 = vmatprep.subr.bf16.mxu1 %v22692_v63 }
0x1439   :  { %17306 = vmatmul.mubr.msk.f32.vlgmr.msra.gmra.mrb[206].mxu0 %vm435_vm6, %v14602_v18  ;;  %v18020_v18 = vpack.c.bf16 %v14823_v40, %v14822_v29 }
0x143a   :  { %17324 = vmatprep.mubr.msk.f32.mxu0 %vm19100_vm1, %v22691_v13  ;;  %18000 = vmatpush3.bf16.msra.mxu0 %v17999_v54 }
0x143b   :  { %18001 = vmatprep.subr.bf16.mxu0 %v22692_v63  ;;  %18018 = vmatpush3.bf16.msra.mxu1 %v18017_v0 }
0x143c   :  { %18019 = vmatprep.subr.bf16.mxu1 %v22692_v63 }
0x143e   :  { %18003 = vmatpush3.bf16.msra.mxu0 %v18002_v17 }
0x143f   :  { %18004 = vmatprep.subr.bf16.mxu0 %v22692_v63  ;;  %18021 = vmatpush3.bf16.msra.mxu1 %v18020_v18 }
0x1442   :  { %18006 = vmatpush3.bf16.msra.mxu0 %v18005_v31 }
0x1443   :  { %18007 = vmatprep.subr.bf16.mxu0 %v22692_v63  ;;  %v14827_v63 = vrot.slane %v18949_v10, %v22791_v55 }
0x1446   :  { %18009 = vmatpush3.bf16.msra.mxu0 %v18008_v49 }
0x150c   :  { %v14672_v28 = vpop.f32.mrb[206].mxu0 }
0x150d   :  { %v14676_v46 = vmul.f32 %v14672_v28, %v14672_v28  ;;  %v17307_v58 = vpop.f32.mrb[207].mxu0 }
0x150f   :  { %v14677_v15 = vsel %vm435_vm6, %v14676_v46, 0.0 }
0x1510   :  { %14678 = vadd.xlane.f32.xlu1 %v14677_v15  ;;  %v14808_v15 = vrot.slane %v18949_v10, %v22782_v4 }
0x159d   :  { %v14679_v56 = vpop.xlane.xlu1 %14678 }
0x159e   :  { %v14680_v44 = vmax.f32 %v14679_v56, 1e-24 }
0x15a0   :  { %18925 = vrsqrt.f32 %v14680_v44  ;;  %v14813_v44 = vrot.slane %v18949_v10, %v22794_v1 }
0x15aa   :  { %v18926_v21 = vpop.eup %18925 }
0x15ab   :  { %v22497_v7 = vmul.f32 %v18926_v21, %v14672_v28 }
0x15ad   :  { %v14683_v51 = vsel %vm435_vm6, %v22497_v7, 0.0 }
0x15ae   :  { %14684 = vadd.xlane.f32.xlu0 %v14683_v51 }
0x163b   :  { %v14685_v26 = vpop.xlane.xlu0 %14684 }
0x163c   :  { %v14686_v33 = vmul.f32 0.015625, %v14685_v26 }
0x163e   :  { %v14687_v13 = vsub.f32 %v22497_v7, %v14686_v33 }
0x1640   :  { %v14688_v42 = vmul.f32 %v14687_v13, %v14687_v13 }
0x1642   :  { %v14689_v36 = vsel %vm435_vm6, %v14688_v42, 0.0 }
0x1643   :  { %14690 = vadd.xlane.f32.xlu1 %v14689_v36 }
0x16d0   :  { %v14691_v12 = vpop.xlane.xlu1 %14690 }
0x16d1   :  { %v14692_v50 = vmul.f32 0.015625, %v14691_v12 }
0x16d3   :  { %v14693_v60 = vadd.f32 1e-05, %v14692_v50 }
0x16d5   :  { %18927 = vrsqrt.f32 %v14693_v60 }
0x16df   :  { %v18928_v35 = vpop.eup %18927 }
0x16e0   :  { %v14695_v45 = vmul.f32 %v18928_v35, %v14687_v13 }
0x16e2   :  { %v14700_v24 = vmul.f32 %v14699_v8, %v14695_v45 }
0x16e4   :  { %v14705_v16 = vadd.f32 %v14704_v5, %v14700_v24 }
0x16e6   :  { %17325 = vmatmul.mubr.msk.f32.vlgmr.msra.gmra.mrb[208].mxu0 %vm435_vm6, %v14705_v16 }
0x17b9   :  { %v14787_v25 = vpop.f32.mrb[208].mxu0 }
0x17ba   :  { %v14788_v6 = vadd.f32 %v14787_v25, %v14717_v61  ;;  %v17326_v2 = vpop.f32.mrb[209].mxu0 }
0x17bc   :  { %v14791_v27 = vmax.f32 %v14788_v6, 0.0 }
0x17be   :  { %v14792_v19 = vsel %vm435_vm6, %v14791_v27, 0.0 }
0x17bf   :  { %14793 = vadd.xlane.f32.xlu0 %v14792_v19 }
0x184c   :  { %v14794_v9 = vpop.xlane.xlu0 %14793 }
0x184d   :  { %v14795_v22 = vmul.f32 0.015625, %v14794_v9 }
0x184f   :  { %v14796_v41 = vsub.f32 %v14791_v27, %v14795_v22 }
0x1851   :  { %v14797_v48 = vmul.f32 %v14796_v41, %v14796_v41 }
0x1853   :  { %v14798_v38 = vsel %vm435_vm6, %v14797_v48, 0.0 }
0x1854   :  { %14799 = vadd.xlane.f32.xlu1 %v14798_v38 }
0x18e1   :  { %v14800_v28 = vpop.xlane.xlu1 %14799 }
0x18e2   :  { %v14801_v46 = vmul.f32 0.015625, %v14800_v28 }
0x18e4   :  { %v14802_v58 = vadd.f32 1e-05, %v14801_v46 }
0x18e6   :  { %18929 = vrsqrt.f32 %v14802_v58 }
0x18f0   :  { %v18930_v56 = vpop.eup %18929 }
0x18f1   :  { %v14804_v21 = vmul.f32 %v18930_v56, %v14796_v41 }
0x18f3   :  { %v14809_v51 = vmul.f32 %v14808_v15, %v14804_v21 }
0x18f5   :  { %v14814_v26 = vadd.f32 %v14813_v44, %v14809_v51 }
0x18f7   :  { %17344 = vmatmul.mubr.msk.f32.vlgmr.msra.gmra.mrb[194].mxu1 %vm435_vm6, %v14814_v26 }
0x19ca   :  { %v14897_v33 = vpop.f32.mrb[194].mxu1 }
0x19cb   :  { %v14898_v13 = vadd.f32 %v14897_v33, %v14827_v63  ;;  %v17345_v42 = vpop.f32.mrb[195].mxu1 }
0x19cd   :  { %14902 = vrot.lane.b32.xlu0 %v14898_v13, %s19105_s22 }
0x1a3f   :  { %v14903_v36 = vpop.permute.xlu0 %14902 }
0x1a40   :  { %v14905_v3 = vsel %vm435_vm6, %v22497_v7, %v14903_v36 }
0x1a41   :  { %14906 = vst [vmem:[%s22538_s13] sm:$0xff] %v14905_v3 }
0x1a42   :  { %14911 = vsyncpa [#allocation3], 1 }
0x1a43   :  { %14912 = vsyncpa [#allocation5], 1 }
0x1a44   :  { %14913 = vsyncpa [#allocation8], 1 }
0x1a45   :  { %14914 = vsyncpa [#allocation11], 1 }

</bundles_post_ra>
